<compile_context>
chip_gen: v6e
topology: v6e:2x2x1
jax: 0.10.0
libtpu: 0.0.40
codegen_flags: <defaults>
</compile_context>

<pallas_src>
import functools
import math

import jax
import jax.numpy as jnp
from jax import lax
from jax.experimental import pallas as pl
from jax.experimental.pallas import tpu as pltpu

EPS = 1e-5


def _round_up(v, m):
    return (v + m - 1) // m * m


def interp_matrix_align_corners(L, L2):
    """(L2, L) bilinear interpolation weights, align_corners=True (as nn.Upsample)."""
    o = jnp.arange(L2, dtype=jnp.float32)
    src = o * (L - 1) / (L2 - 1)
    i0 = jnp.clip(jnp.floor(src).astype(jnp.int32), 0, L - 1)
    i1 = jnp.minimum(i0 + 1, L - 1)
    frac = src - i0.astype(jnp.float32)
    rows = jnp.arange(L2)
    m = jnp.zeros((L2, L), jnp.float32)
    m = m.at[rows, i0].add(1.0 - frac)
    m = m.at[rows, i1].add(frac)
    return m


def _interp_taps(L, L2):
    """Static (i0, i1, frac) tuples for align_corners=True interpolation L -> L2."""
    i0s, i1s, fs = [], [], []
    for o in range(L2):
        src = o * (L - 1) / (L2 - 1) if L2 > 1 else 0.0
        i0 = min(max(int(math.floor(src)), 0), L - 1)
        i1 = min(i0 + 1, L - 1)
        i0s.append(i0)
        i1s.append(i1)
        fs.append(float(src - i0))
    return tuple(i0s), tuple(i1s), tuple(fs)


# ---------------------------------------------------------------------------
# Fused Pallas kernel: upsample + concat + ResU block
# ---------------------------------------------------------------------------
def _decoder_block_kernel(x_ref, skip_ref, uxT_ref, masks_ref,
                          w1_ref, b1_ref, w2_ref, b2_ref, wi_ref, bi_ref,
                          g1_ref, be1_ref, g2_ref, be2_ref,
                          out_ref, cat_ref,
                          *, H, W, cinp, cop, y_i0, y_i1, y_f):
    """Shapes (P = H2*W2, channels padded to multiples of 8):
       x_ref    (N, H*CinP, W) f32 (rows are h-major: h*CinP + c)
       skip_ref (N, CoP, P)    f32      uxT_ref (W, W2) bf16   masks_ref (8, P) f32
       w1 (9*CoP, CtP) bf16   w2 (9*CoP, CoP) bf16   wi (CoP, CtP) bf16
       b1/b2/bi (CoP,1) f32   g1/be1 (CtP,1) f32     g2/be2 (CoP,1) f32
       out_ref  (N, CoP, P)    f32      cat_ref (N, CtP, P) f32 scratch
    """
    N = skip_ref.shape[0]
    CinP, CoP = cinp, cop
    P = skip_ref.shape[2]
    H2, W2 = 2 * H, 2 * W

    # ---- 1) separable bilinear x2 upsample, written straight into the concat scratch ---
    cat_ref[:, CinP:, :] = skip_ref[...]            # skip -> upper channel band (aligned)
    uxT = uxT_ref[...]                                              # (W, W2) bf16
    for n in range(N):
        # x-direction: one MXU matmul, rows stay h-major.
        a = jnp.dot(x_ref[n].astype(jnp.bfloat16), uxT,
                    preferred_element_type=jnp.float32)             # (H*CinP, W2)
        # y-direction: 2-tap weighted row adds with trace-time constant weights; each
        # output row lands in its lane window of the concat scratch (the relayout).
        for y2 in range(H2):
            i0, i1, f = y_i0[y2], y_i1[y2], y_f[y2]
            r0 = a[i0 * CinP:(i0 + 1) * CinP, :]
            if f == 0.0 or i1 == i0:
                row = r0
            else:
                r1 = a[i1 * CinP:(i1 + 1) * CinP, :]
                row = (1.0 - f) * r0 + f * r1
            cat_ref[n, 0:CinP, y2 * W2:(y2 + 1) * W2] = row

    cat = cat_ref[...]                                              # (N, CtP, P) f32

    # Border masks for the 8 non-center conv taps, broadcast once (hoisted out of loops).
    masks_b = jnp.broadcast_to(masks_ref[...][:, None, :], (8, CoP, P))

    def bn_relu(v, g_ref, b_ref):
        # PyTorch training-mode BatchNorm2d: single-pass biased stats over (N, H, W).
        m = jnp.mean(jnp.mean(v, axis=2, keepdims=True), axis=0, keepdims=True)
        msq = jnp.mean(jnp.mean(v * v, axis=2, keepdims=True), axis=0, keepdims=True)
        var = msq - m * m
        scale = g_ref[...][None] * lax.rsqrt(var + EPS)             # (1, C, 1)
        shift = b_ref[...][None] - m * scale
        return jnp.maximum(v * scale + shift, 0.0)

    tap_shift = tuple((ky - 1) * W2 + (kx - 1) for ky in range(3) for kx in range(3))

    def conv3x3(t, w_ref, b_ref, init=None):
        # 'same' 3x3 conv: one tap-stacked bf16 MXU matmul per batch element; each tap's
        # (CoP, P) slab is lane-rotated to its output position (XLU) and accumulated under
        # its border mask.  No padded copies, no patch slab.
        outs = []
        b = b_ref[...]                                              # (CoP, 1)
        for n in range(N):
            y = jnp.dot(w_ref[...], t[n].astype(jnp.bfloat16),
                        preferred_element_type=jnp.float32)         # (9*CoP, P)
            acc = y[4 * CoP:5 * CoP, :]                             # center tap
            if init is not None:
                acc = acc + init[n]                                 # fused identity/residual
            mi = 0
            for tap in range(9):
                if tap == 4:
                    continue
                contrib = pltpu.roll(y[tap * CoP:(tap + 1) * CoP, :],
                                     shift=(-tap_shift[tap]) % P, axis=1)
                acc = acc + contrib * masks_b[mi]
                mi += 1
            outs.append(acc + b)
        return jnp.stack(outs, axis=0)                              # (N, CoP, P)

    # ---- 2) ResU block: BN+ReLU -> conv3x3 -> BN+ReLU -> conv3x3 (+ fused identity) ----
    t1 = bn_relu(cat, g1_ref, be1_ref)
    y1 = conv3x3(t1, w1_ref, b1_ref)
    t2 = bn_relu(y1, g2_ref, be2_ref)

    wi = wi_ref[...]
    bi = bi_ref[...]
    idn = [jnp.dot(wi, cat[n].astype(jnp.bfloat16),
                   preferred_element_type=jnp.float32) + bi for n in range(N)]

    out_ref[...] = conv3x3(t2, w2_ref, b2_ref, init=idn)


# ---------------------------------------------------------------------------
# Parameters (PyTorch layout) and packing into the padded kernel layout
# ---------------------------------------------------------------------------
def init_raw_params(key, in_channels, out_channels):
    Cin, Co = in_channels, out_channels
    Ct = Cin + Co
    ks = jax.random.split(key, 10)
    n = jax.random.normal
    return {
        "w1": 0.1 * n(ks[0], (Co, Ct, 3, 3), jnp.float32),
        "b1": 0.1 * n(ks[1], (Co,), jnp.float32),
        "w2": 0.1 * n(ks[2], (Co, Co, 3, 3), jnp.float32),
        "b2": 0.1 * n(ks[3], (Co,), jnp.float32),
        "wi": 0.1 * n(ks[4], (Co, Ct), jnp.float32),
        "bi": 0.1 * n(ks[5], (Co,), jnp.float32),
        "g1": 1.0 + 0.1 * n(ks[6], (Ct,), jnp.float32),
        "be1": 0.1 * n(ks[7], (Ct,), jnp.float32),
        "g2": 1.0 + 0.1 * n(ks[8], (Co,), jnp.float32),
        "be2": 0.1 * n(ks[9], (Co,), jnp.float32),
    }


def pack_params(raw, in_channels, out_channels, H, W):
    """Torch-layout params -> padded, tap-major, bf16 kernel layout (+ static tables)."""
    Cin, Co = in_channels, out_channels
    CinP, CoP = _round_up(Cin, 8), _round_up(Co, 8)
    CtP = CinP + CoP
    H2, W2 = 2 * H, 2 * W

    # slot of each real concat channel inside the padded concat layout
    idx_ct = jnp.concatenate([jnp.arange(Cin), CinP + jnp.arange(Co)])
    idx_co = jnp.arange(Co)

    def pack_conv3_tapmajor(w_t, cout_p, cin_p, idx_in):
        # torch (Cout, Cin, 3, 3) -> (9*cout_p, cin_p), row = (ky*3+kx)*cout_p + o
        cout = w_t.shape[0]
        w = jnp.zeros((9, cout_p, cin_p), jnp.float32)
        wt = jnp.transpose(w_t, (2, 3, 0, 1)).reshape(9, cout, -1)   # (9, cout, cin)
        w = w.at[:, :cout, idx_in].set(wt)
        return w.reshape(9 * cout_p, cin_p).astype(jnp.bfloat16)

    def pad_vec(v, c_p, idx, fill):
        out = jnp.full((c_p,), fill, jnp.float32)
        return out.at[idx].set(v).reshape(c_p, 1)

    # x-direction interpolation matrix (transposed), bf16 MXU operand  -- (W, W2), tiny.
    uxT = interp_matrix_align_corners(W, W2).T.astype(jnp.bfloat16)

    # border-validity masks for the 8 non-center 3x3 taps, flattened to P lanes.
    ys = jnp.repeat(jnp.arange(H2), W2)
    xs = jnp.tile(jnp.arange(W2), H2)
    rows = []
    for ky in range(3):
        for kx in range(3):
            if ky == 1 and kx == 1:
                continue
            dy, dx = ky - 1, kx - 1
            rows.append((ys + dy >= 0) & (ys + dy < H2) & (xs + dx >= 0) & (xs + dx < W2))
    masks = jnp.stack(rows).astype(jnp.float32)                       # (8, P)

    return {
        "w1": pack_conv3_tapmajor(raw["w1"], CoP, CtP, idx_ct),
        "b1": pad_vec(raw["b1"], CoP, idx_co, 0.0),
        "w2": pack_conv3_tapmajor(raw["w2"], CoP, CoP, idx_co),
        "b2": pad_vec(raw["b2"], CoP, idx_co, 0.0),
        "wi": jnp.zeros((CoP, CtP), jnp.float32).at[:Co, idx_ct].set(raw["wi"]).astype(jnp.bfloat16),
        "bi": pad_vec(raw["bi"], CoP, idx_co, 0.0),
        "g1": pad_vec(raw["g1"], CtP, idx_ct, 1.0),
        "be1": pad_vec(raw["be1"], CtP, idx_ct, 0.0),
        "g2": pad_vec(raw["g2"], CoP, idx_co, 1.0),
        "be2": pad_vec(raw["be2"], CoP, idx_co, 0.0),
        "uxT": uxT,
        "masks": masks,
    }


# ---------------------------------------------------------------------------
# Public forward: (N, Cin, H, W), (N, Co, 2H, 2W) -> (N, Co, 2H, 2W)
# ---------------------------------------------------------------------------
def decoder_block_forward(x_nchw, skip_nchw, kparams):
    N, Cin, H, W = x_nchw.shape
    Co = skip_nchw.shape[1]
    H2, W2 = 2 * H, 2 * W
    P = H2 * W2
    CinP, CoP = _round_up(Cin, 8), _round_up(Co, 8)
    CtP = CinP + CoP

    # Layout plumbing only (wrapper side): zero-pad channels to multiples of 8, put x rows
    # in h-major order for the upsample matmul, flatten spatial dims onto the lane axis.
    x_pad = jnp.pad(x_nchw.astype(jnp.float32),
                    ((0, 0), (0, CinP - Cin), (0, 0), (0, 0)))
    x_k = jnp.transpose(x_pad, (0, 2, 1, 3)).reshape(N, H * CinP, W)
    skip_k = jnp.pad(skip_nchw.astype(jnp.float32),
                     ((0, 0), (0, CoP - Co), (0, 0), (0, 0))).reshape(N, CoP, P)

    y_i0, y_i1, y_f = _interp_taps(H, H2)

    kernel = functools.partial(_decoder_block_kernel, H=H, W=W,
                               cinp=CinP, cop=CoP, y_i0=y_i0, y_i1=y_i1, y_f=y_f)
    out = pl.pallas_call(
        kernel,
        out_shape=jax.ShapeDtypeStruct((N, CoP, P), jnp.float32),
        scratch_shapes=[pltpu.VMEM((N, CtP, P), jnp.float32)],
        compiler_params=pltpu.CompilerParams(vmem_limit_bytes=32 * 1024 * 1024),
    )(x_k, skip_k, kparams["uxT"], kparams["masks"],
      kparams["w1"], kparams["b1"], kparams["w2"], kparams["b2"],
      kparams["wi"], kparams["bi"],
      kparams["g1"], kparams["be1"], kparams["g2"], kparams["be2"])

    return out[:, :Co, :].reshape(N, Co, H2, W2)


# ---------------------------------------------------------------------------
# Pure-JAX reference (for correctness checking only)
# ---------------------------------------------------------------------------
def reference_forward(x, skip, raw):
    N, Cin, H, W = x.shape
    Co = skip.shape[1]
    H2, W2 = 2 * H, 2 * W
    uy = interp_matrix_align_corners(H, H2)
    ux = interp_matrix_align_corners(W, W2)
    up = jnp.einsum("yh,xw,nchw->ncyx", uy, ux, x, precision=lax.Precision.HIGHEST)
    cat = jnp.concatenate([up, skip], axis=1)

    def bn_relu(v, g, b):
        m = jnp.mean(v, axis=(0, 2, 3), keepdims=True)
        var = jnp.mean((v - m) ** 2, axis=(0, 2, 3), keepdims=True)
        vn = (v - m) * lax.rsqrt(var + EPS)
        return jnp.maximum(vn * g.reshape(1, -1, 1, 1) + b.reshape(1, -1, 1, 1), 0.0)

    def conv(v, w, b, pad):
        y = lax.conv_general_dilated(v, w, (1, 1), [(pad, pad), (pad, pad)],
                                     dimension_numbers=("NCHW", "OIHW", "NCHW"),
                                     precision=lax.Precision.HIGHEST)
        return y + b.reshape(1, -1, 1, 1)

    t1 = bn_relu(cat, raw["g1"], raw["be1"])
    y1 = conv(t1, raw["w1"], raw["b1"], 1)
    t2 = bn_relu(y1, raw["g2"], raw["be2"])
    y2 = conv(t2, raw["w2"], raw["b2"], 1)
    s = conv(cat, raw["wi"][:, :, None, None], raw["bi"], 0)
    return y2 + s


if __name__ == "__main__":
    key = jax.random.PRNGKey(0)
    kx, ksk, kp = jax.random.split(key, 3)

    # Decoder_block(in_channels=8, out_channels=4), input spatial 16 -> output 32.
    N, Cin, Cout, H, W = 2, 8, 4, 16, 16
    x = jax.random.normal(kx, (N, Cin, H, W), jnp.float32)
    skip = jax.random.normal(ksk, (N, Cout, 2 * H, 2 * W), jnp.float32)

    raw = init_raw_params(kp, Cin, Cout)
    kparams = pack_params(raw, Cin, Cout, H, W)

    fwd = jax.jit(decoder_block_forward)
    out = fwd(x, skip, kparams)
    jax.block_until_ready(out)

    assert out.shape == (N, Cout, 2 * H, 2 * W)
    assert bool(jnp.all(jnp.isfinite(out)))

    # numerical check against the pure-JAX reference (bf16 matmul operands -> loose tol)
    ref = reference_forward(x, skip, raw)
    err = float(jnp.max(jnp.abs(out - ref)))
    tol = 0.05 * float(jnp.max(jnp.abs(ref))) + 0.05
    assert err < tol, f"max abs err {err} exceeds tol {tol}"

    print("KERNEL_OK")
</pallas_src>

<mosaic_0001>
module attributes {stable_mosaic.version = 11 : i64} {
  func.func @_decoder_block_kernel(%arg0: memref<2x128x16xf32, #tpu.memory_space<vmem>>, %arg1: memref<2x8x1024xf32, #tpu.memory_space<vmem>>, %arg2: memref<16x32xbf16, #tpu.memory_space<vmem>>, %arg3: memref<8x1024xf32, #tpu.memory_space<vmem>>, %arg4: memref<72x16xbf16, #tpu.memory_space<vmem>>, %arg5: memref<8x1xf32, #tpu.memory_space<vmem>>, %arg6: memref<72x8xbf16, #tpu.memory_space<vmem>>, %arg7: memref<8x1xf32, #tpu.memory_space<vmem>>, %arg8: memref<8x16xbf16, #tpu.memory_space<vmem>>, %arg9: memref<8x1xf32, #tpu.memory_space<vmem>>, %arg10: memref<16x1xf32, #tpu.memory_space<vmem>>, %arg11: memref<16x1xf32, #tpu.memory_space<vmem>>, %arg12: memref<8x1xf32, #tpu.memory_space<vmem>>, %arg13: memref<8x1xf32, #tpu.memory_space<vmem>>, %arg14: memref<2x8x1024xf32, #tpu.memory_space<vmem>>, %arg15: memref<2x16x1024xf32, #tpu.memory_space<vmem>>) attributes {dimension_semantics = [], scalar_prefetch = 0 : i64, scratch_operands = 1 : i64, tpu.core_type = #tpu.core_type<tc>} {
    %c0 = arith.constant 0 : index
    %c0_0 = arith.constant 0 : index
    %c0_1 = arith.constant 0 : index
    %0 = vector.load %arg1[%c0, %c0_0, %c0_1] : memref<2x8x1024xf32, #tpu.memory_space<vmem>>, vector<2x8x1024xf32>
    %c0_2 = arith.constant 0 : index
    %c8 = arith.constant 8 : index
    %c0_3 = arith.constant 0 : index
    %1 = vector.load %arg15[%c0_2, %c8, %c0_3] : memref<2x16x1024xf32, #tpu.memory_space<vmem>>, vector<2x8x1024xf32>
    tpu.vector_store %arg15[%c0_2, %c8, %c0_3], %0 {strides = array<i32>} : memref<2x16x1024xf32, #tpu.memory_space<vmem>>, vector<2x8x1024xf32>,
    %c0_4 = arith.constant 0 : index
    %c0_5 = arith.constant 0 : index
    %2 = vector.load %arg2[%c0_4, %c0_5] : memref<16x32xbf16, #tpu.memory_space<vmem>>, vector<16x32xbf16>
    %c0_6 = arith.constant 0 : index
    %c0_7 = arith.constant 0 : index
    %c0_8 = arith.constant 0 : index
    %3 = vector.load %arg0[%c0_6, %c0_7, %c0_8] : memref<2x128x16xf32, #tpu.memory_space<vmem>>, vector<1x128x16xf32>
    %4 = vector.shape_cast %3 : vector<1x128x16xf32> to vector<128x16xf32>
    %5 = arith.truncf %4 : vector<128x16xf32> to vector<128x16xbf16>
    %cst = arith.constant dense<0.000000e+00> : vector<128x32xf32>
    %6 = tpu.matmul %5, %2, %cst {dimension_numbers = #tpu.dot_dimension_numbers<[1], [0], [0], [1], [0, 0, 1, 1], [], []>} : vector<128x16xbf16>, vector<16x32xbf16>, vector<128x32xf32> -> vector<128x32xf32>
    %7 = vector.extract_strided_slice %6 {offsets = [0, 0], sizes = [8, 32], strides = [1, 1]} : vector<128x32xf32> to vector<8x32xf32>
    %c0_9 = arith.constant 0 : index
    %c0_10 = arith.constant 0 : index
    %c0_11 = arith.constant 0 : index
    %8 = vector.load %arg15[%c0_9, %c0_10, %c0_11] : memref<2x16x1024xf32, #tpu.memory_space<vmem>>, vector<1x8x32xf32>
    %9 = vector.shape_cast %8 : vector<1x8x32xf32> to vector<8x32xf32>
    %10 = vector.shape_cast %7 : vector<8x32xf32> to vector<1x8x32xf32>
    tpu.vector_store %arg15[%c0_9, %c0_10, %c0_11], %10 {strides = array<i32>} : memref<2x16x1024xf32, #tpu.memory_space<vmem>>, vector<1x8x32xf32>,
    %11 = vector.extract_strided_slice %6 {offsets = [0, 0], sizes = [8, 32], strides = [1, 1]} : vector<128x32xf32> to vector<8x32xf32>
    %12 = vector.extract_strided_slice %6 {offsets = [8, 0], sizes = [8, 32], strides = [1, 1]} : vector<128x32xf32> to vector<8x32xf32>
    %cst_12 = arith.constant 5.161290e-01 : f32
    %13 = vector.broadcast %cst_12 : f32 to vector<8x32xf32>
    %14 = arith.mulf %13, %11 : vector<8x32xf32>
    %cst_13 = arith.constant 0.483870953 : f32
    %15 = vector.broadcast %cst_13 : f32 to vector<8x32xf32>
    %16 = arith.mulf %15, %12 : vector<8x32xf32>
    %17 = arith.addf %14, %16 : vector<8x32xf32>
    %c0_14 = arith.constant 0 : index
    %c0_15 = arith.constant 0 : index
    %c32 = arith.constant 32 : index
    %18 = vector.load %arg15[%c0_14, %c0_15, %c32] : memref<2x16x1024xf32, #tpu.memory_space<vmem>>, vector<1x8x32xf32>
    %19 = vector.shape_cast %18 : vector<1x8x32xf32> to vector<8x32xf32>
    %20 = vector.shape_cast %17 : vector<8x32xf32> to vector<1x8x32xf32>
    tpu.vector_store %arg15[%c0_14, %c0_15, %c32], %20 {strides = array<i32>} : memref<2x16x1024xf32, #tpu.memory_space<vmem>>, vector<1x8x32xf32>,
    %21 = vector.extract_strided_slice %6 {offsets = [0, 0], sizes = [8, 32], strides = [1, 1]} : vector<128x32xf32> to vector<8x32xf32>
    %22 = vector.extract_strided_slice %6 {offsets = [8, 0], sizes = [8, 32], strides = [1, 1]} : vector<128x32xf32> to vector<8x32xf32>
    %cst_16 = arith.constant 0.0322580636 : f32
    %23 = vector.broadcast %cst_16 : f32 to vector<8x32xf32>
    %24 = arith.mulf %23, %21 : vector<8x32xf32>
    %cst_17 = arith.constant 0.967741906 : f32
    %25 = vector.broadcast %cst_17 : f32 to vector<8x32xf32>
    %26 = arith.mulf %25, %22 : vector<8x32xf32>
    %27 = arith.addf %24, %26 : vector<8x32xf32>
    %c0_18 = arith.constant 0 : index
    %c0_19 = arith.constant 0 : index
    %c64 = arith.constant 64 : index
    %28 = vector.load %arg15[%c0_18, %c0_19, %c64] : memref<2x16x1024xf32, #tpu.memory_space<vmem>>, vector<1x8x32xf32>
    %29 = vector.shape_cast %28 : vector<1x8x32xf32> to vector<8x32xf32>
    %30 = vector.shape_cast %27 : vector<8x32xf32> to vector<1x8x32xf32>
    tpu.vector_store %arg15[%c0_18, %c0_19, %c64], %30 {strides = array<i32>} : memref<2x16x1024xf32, #tpu.memory_space<vmem>>, vector<1x8x32xf32>,
    %31 = vector.extract_strided_slice %6 {offsets = [8, 0], sizes = [8, 32], strides = [1, 1]} : vector<128x32xf32> to vector<8x32xf32>
    %32 = vector.extract_strided_slice %6 {offsets = [16, 0], sizes = [8, 32], strides = [1, 1]} : vector<128x32xf32> to vector<8x32xf32>
    %cst_20 = arith.constant 0.54838711 : f32
    %33 = vector.broadcast %cst_20 : f32 to vector<8x32xf32>
    %34 = arith.mulf %33, %31 : vector<8x32xf32>
    %cst_21 = arith.constant 0.45161289 : f32
    %35 = vector.broadcast %cst_21 : f32 to vector<8x32xf32>
    %36 = arith.mulf %35, %32 : vector<8x32xf32>
    %37 = arith.addf %34, %36 : vector<8x32xf32>
    %c0_22 = arith.constant 0 : index
    %c0_23 = arith.constant 0 : index
    %c96 = arith.constant 96 : index
    %38 = vector.load %arg15[%c0_22, %c0_23, %c96] : memref<2x16x1024xf32, #tpu.memory_space<vmem>>, vector<1x8x32xf32>
    %39 = vector.shape_cast %38 : vector<1x8x32xf32> to vector<8x32xf32>
    %40 = vector.shape_cast %37 : vector<8x32xf32> to vector<1x8x32xf32>
    tpu.vector_store %arg15[%c0_22, %c0_23, %c96], %40 {strides = array<i32>} : memref<2x16x1024xf32, #tpu.memory_space<vmem>>, vector<1x8x32xf32>,
    %41 = vector.extract_strided_slice %6 {offsets = [8, 0], sizes = [8, 32], strides = [1, 1]} : vector<128x32xf32> to vector<8x32xf32>
    %42 = vector.extract_strided_slice %6 {offsets = [16, 0], sizes = [8, 32], strides = [1, 1]} : vector<128x32xf32> to vector<8x32xf32>
    %cst_24 = arith.constant 0.0645161271 : f32
    %43 = vector.broadcast %cst_24 : f32 to vector<8x32xf32>
    %44 = arith.mulf %43, %41 : vector<8x32xf32>
    %cst_25 = arith.constant 0.935483872 : f32
    %45 = vector.broadcast %cst_25 : f32 to vector<8x32xf32>
    %46 = arith.mulf %45, %42 : vector<8x32xf32>
    %47 = arith.addf %44, %46 : vector<8x32xf32>
    %c0_26 = arith.constant 0 : index
    %c0_27 = arith.constant 0 : index
    %c128 = arith.constant 128 : index
    %48 = vector.load %arg15[%c0_26, %c0_27, %c128] : memref<2x16x1024xf32, #tpu.memory_space<vmem>>, vector<1x8x32xf32>
    %49 = vector.shape_cast %48 : vector<1x8x32xf32> to vector<8x32xf32>
    %50 = vector.shape_cast %47 : vector<8x32xf32> to vector<1x8x32xf32>
    tpu.vector_store %arg15[%c0_26, %c0_27, %c128], %50 {strides = array<i32>} : memref<2x16x1024xf32, #tpu.memory_space<vmem>>, vector<1x8x32xf32>,
    %51 = vector.extract_strided_slice %6 {offsets = [16, 0], sizes = [8, 32], strides = [1, 1]} : vector<128x32xf32> to vector<8x32xf32>
    %52 = vector.extract_strided_slice %6 {offsets = [24, 0], sizes = [8, 32], strides = [1, 1]} : vector<128x32xf32> to vector<8x32xf32>
    %cst_28 = arith.constant 0.580645144 : f32
    %53 = vector.broadcast %cst_28 : f32 to vector<8x32xf32>
    %54 = arith.mulf %53, %51 : vector<8x32xf32>
    %cst_29 = arith.constant 0.419354826 : f32
    %55 = vector.broadcast %cst_29 : f32 to vector<8x32xf32>
    %56 = arith.mulf %55, %52 : vector<8x32xf32>
    %57 = arith.addf %54, %56 : vector<8x32xf32>
    %c0_30 = arith.constant 0 : index
    %c0_31 = arith.constant 0 : index
    %c160 = arith.constant 160 : index
    %58 = vector.load %arg15[%c0_30, %c0_31, %c160] : memref<2x16x1024xf32, #tpu.memory_space<vmem>>, vector<1x8x32xf32>
    %59 = vector.shape_cast %58 : vector<1x8x32xf32> to vector<8x32xf32>
    %60 = vector.shape_cast %57 : vector<8x32xf32> to vector<1x8x32xf32>
    tpu.vector_store %arg15[%c0_30, %c0_31, %c160], %60 {strides = array<i32>} : memref<2x16x1024xf32, #tpu.memory_space<vmem>>, vector<1x8x32xf32>,
    %61 = vector.extract_strided_slice %6 {offsets = [16, 0], sizes = [8, 32], strides = [1, 1]} : vector<128x32xf32> to vector<8x32xf32>
    %62 = vector.extract_strided_slice %6 {offsets = [24, 0], sizes = [8, 32], strides = [1, 1]} : vector<128x32xf32> to vector<8x32xf32>
    %cst_32 = arith.constant 0.0967741906 : f32
    %63 = vector.broadcast %cst_32 : f32 to vector<8x32xf32>
    %64 = arith.mulf %63, %61 : vector<8x32xf32>
    %cst_33 = arith.constant 0.903225779 : f32
    %65 = vector.broadcast %cst_33 : f32 to vector<8x32xf32>
    %66 = arith.mulf %65, %62 : vector<8x32xf32>
    %67 = arith.addf %64, %66 : vector<8x32xf32>
    %c0_34 = arith.constant 0 : index
    %c0_35 = arith.constant 0 : index
    %c192 = arith.constant 192 : index
    %68 = vector.load %arg15[%c0_34, %c0_35, %c192] : memref<2x16x1024xf32, #tpu.memory_space<vmem>>, vector<1x8x32xf32>
    %69 = vector.shape_cast %68 : vector<1x8x32xf32> to vector<8x32xf32>
    %70 = vector.shape_cast %67 : vector<8x32xf32> to vector<1x8x32xf32>
    tpu.vector_store %arg15[%c0_34, %c0_35, %c192], %70 {strides = array<i32>} : memref<2x16x1024xf32, #tpu.memory_space<vmem>>, vector<1x8x32xf32>,
    %71 = vector.extract_strided_slice %6 {offsets = [24, 0], sizes = [8, 32], strides = [1, 1]} : vector<128x32xf32> to vector<8x32xf32>
    %72 = vector.extract_strided_slice %6 {offsets = [32, 0], sizes = [8, 32], strides = [1, 1]} : vector<128x32xf32> to vector<8x32xf32>
    %cst_36 = arith.constant 0.612903237 : f32
    %73 = vector.broadcast %cst_36 : f32 to vector<8x32xf32>
    %74 = arith.mulf %73, %71 : vector<8x32xf32>
    %cst_37 = arith.constant 0.387096763 : f32
    %75 = vector.broadcast %cst_37 : f32 to vector<8x32xf32>
    %76 = arith.mulf %75, %72 : vector<8x32xf32>
    %77 = arith.addf %74, %76 : vector<8x32xf32>
    %c0_38 = arith.constant 0 : index
    %c0_39 = arith.constant 0 : index
    %c224 = arith.constant 224 : index
    %78 = vector.load %arg15[%c0_38, %c0_39, %c224] : memref<2x16x1024xf32, #tpu.memory_space<vmem>>, vector<1x8x32xf32>
    %79 = vector.shape_cast %78 : vector<1x8x32xf32> to vector<8x32xf32>
    %80 = vector.shape_cast %77 : vector<8x32xf32> to vector<1x8x32xf32>
    tpu.vector_store %arg15[%c0_38, %c0_39, %c224], %80 {strides = array<i32>} : memref<2x16x1024xf32, #tpu.memory_space<vmem>>, vector<1x8x32xf32>,
    %81 = vector.extract_strided_slice %6 {offsets = [24, 0], sizes = [8, 32], strides = [1, 1]} : vector<128x32xf32> to vector<8x32xf32>
    %82 = vector.extract_strided_slice %6 {offsets = [32, 0], sizes = [8, 32], strides = [1, 1]} : vector<128x32xf32> to vector<8x32xf32>
    %cst_40 = arith.constant 0.129032254 : f32
    %83 = vector.broadcast %cst_40 : f32 to vector<8x32xf32>
    %84 = arith.mulf %83, %81 : vector<8x32xf32>
    %cst_41 = arith.constant 0.870967745 : f32
    %85 = vector.broadcast %cst_41 : f32 to vector<8x32xf32>
    %86 = arith.mulf %85, %82 : vector<8x32xf32>
    %87 = arith.addf %84, %86 : vector<8x32xf32>
    %c0_42 = arith.constant 0 : index
    %c0_43 = arith.constant 0 : index
    %c256 = arith.constant 256 : index
    %88 = vector.load %arg15[%c0_42, %c0_43, %c256] : memref<2x16x1024xf32, #tpu.memory_space<vmem>>, vector<1x8x32xf32>
    %89 = vector.shape_cast %88 : vector<1x8x32xf32> to vector<8x32xf32>
    %90 = vector.shape_cast %87 : vector<8x32xf32> to vector<1x8x32xf32>
    tpu.vector_store %arg15[%c0_42, %c0_43, %c256], %90 {strides = array<i32>} : memref<2x16x1024xf32, #tpu.memory_space<vmem>>, vector<1x8x32xf32>,
    %91 = vector.extract_strided_slice %6 {offsets = [32, 0], sizes = [8, 32], strides = [1, 1]} : vector<128x32xf32> to vector<8x32xf32>
    %92 = vector.extract_strided_slice %6 {offsets = [40, 0], sizes = [8, 32], strides = [1, 1]} : vector<128x32xf32> to vector<8x32xf32>
    %cst_44 = arith.constant 0.645161271 : f32
    %93 = vector.broadcast %cst_44 : f32 to vector<8x32xf32>
    %94 = arith.mulf %93, %91 : vector<8x32xf32>
    %cst_45 = arith.constant 0.354838699 : f32
    %95 = vector.broadcast %cst_45 : f32 to vector<8x32xf32>
    %96 = arith.mulf %95, %92 : vector<8x32xf32>
    %97 = arith.addf %94, %96 : vector<8x32xf32>
    %c0_46 = arith.constant 0 : index
    %c0_47 = arith.constant 0 : index
    %c288 = arith.constant 288 : index
    %98 = vector.load %arg15[%c0_46, %c0_47, %c288] : memref<2x16x1024xf32, #tpu.memory_space<vmem>>, vector<1x8x32xf32>
    %99 = vector.shape_cast %98 : vector<1x8x32xf32> to vector<8x32xf32>
    %100 = vector.shape_cast %97 : vector<8x32xf32> to vector<1x8x32xf32>
    tpu.vector_store %arg15[%c0_46, %c0_47, %c288], %100 {strides = array<i32>} : memref<2x16x1024xf32, #tpu.memory_space<vmem>>, vector<1x8x32xf32>,
    %101 = vector.extract_strided_slice %6 {offsets = [32, 0], sizes = [8, 32], strides = [1, 1]} : vector<128x32xf32> to vector<8x32xf32>
    %102 = vector.extract_strided_slice %6 {offsets = [40, 0], sizes = [8, 32], strides = [1, 1]} : vector<128x32xf32> to vector<8x32xf32>
    %cst_48 = arith.constant 0.161290318 : f32
    %103 = vector.broadcast %cst_48 : f32 to vector<8x32xf32>
    %104 = arith.mulf %103, %101 : vector<8x32xf32>
    %cst_49 = arith.constant 0.838709652 : f32
    %105 = vector.broadcast %cst_49 : f32 to vector<8x32xf32>
    %106 = arith.mulf %105, %102 : vector<8x32xf32>
    %107 = arith.addf %104, %106 : vector<8x32xf32>
    %c0_50 = arith.constant 0 : index
    %c0_51 = arith.constant 0 : index
    %c320 = arith.constant 320 : index
    %108 = vector.load %arg15[%c0_50, %c0_51, %c320] : memref<2x16x1024xf32, #tpu.memory_space<vmem>>, vector<1x8x32xf32>
    %109 = vector.shape_cast %108 : vector<1x8x32xf32> to vector<8x32xf32>
    %110 = vector.shape_cast %107 : vector<8x32xf32> to vector<1x8x32xf32>
    tpu.vector_store %arg15[%c0_50, %c0_51, %c320], %110 {strides = array<i32>} : memref<2x16x1024xf32, #tpu.memory_space<vmem>>, vector<1x8x32xf32>,
    %111 = vector.extract_strided_slice %6 {offsets = [40, 0], sizes = [8, 32], strides = [1, 1]} : vector<128x32xf32> to vector<8x32xf32>
    %112 = vector.extract_strided_slice %6 {offsets = [48, 0], sizes = [8, 32], strides = [1, 1]} : vector<128x32xf32> to vector<8x32xf32>
    %cst_52 = arith.constant 0.677419364 : f32
    %113 = vector.broadcast %cst_52 : f32 to vector<8x32xf32>
    %114 = arith.mulf %113, %111 : vector<8x32xf32>
    %cst_53 = arith.constant 0.322580636 : f32
    %115 = vector.broadcast %cst_53 : f32 to vector<8x32xf32>
    %116 = arith.mulf %115, %112 : vector<8x32xf32>
    %117 = arith.addf %114, %116 : vector<8x32xf32>
    %c0_54 = arith.constant 0 : index
    %c0_55 = arith.constant 0 : index
    %c352 = arith.constant 352 : index
    %118 = vector.load %arg15[%c0_54, %c0_55, %c352] : memref<2x16x1024xf32, #tpu.memory_space<vmem>>, vector<1x8x32xf32>
    %119 = vector.shape_cast %118 : vector<1x8x32xf32> to vector<8x32xf32>
    %120 = vector.shape_cast %117 : vector<8x32xf32> to vector<1x8x32xf32>
    tpu.vector_store %arg15[%c0_54, %c0_55, %c352], %120 {strides = array<i32>} : memref<2x16x1024xf32, #tpu.memory_space<vmem>>, vector<1x8x32xf32>,
    %121 = vector.extract_strided_slice %6 {offsets = [40, 0], sizes = [8, 32], strides = [1, 1]} : vector<128x32xf32> to vector<8x32xf32>
    %122 = vector.extract_strided_slice %6 {offsets = [48, 0], sizes = [8, 32], strides = [1, 1]} : vector<128x32xf32> to vector<8x32xf32>
    %cst_56 = arith.constant 0.193548381 : f32
    %123 = vector.broadcast %cst_56 : f32 to vector<8x32xf32>
    %124 = arith.mulf %123, %121 : vector<8x32xf32>
    %cst_57 = arith.constant 0.806451618 : f32
    %125 = vector.broadcast %cst_57 : f32 to vector<8x32xf32>
    %126 = arith.mulf %125, %122 : vector<8x32xf32>
    %127 = arith.addf %124, %126 : vector<8x32xf32>
    %c0_58 = arith.constant 0 : index
    %c0_59 = arith.constant 0 : index
    %c384 = arith.constant 384 : index
    %128 = vector.load %arg15[%c0_58, %c0_59, %c384] : memref<2x16x1024xf32, #tpu.memory_space<vmem>>, vector<1x8x32xf32>
    %129 = vector.shape_cast %128 : vector<1x8x32xf32> to vector<8x32xf32>
    %130 = vector.shape_cast %127 : vector<8x32xf32> to vector<1x8x32xf32>
    tpu.vector_store %arg15[%c0_58, %c0_59, %c384], %130 {strides = array<i32>} : memref<2x16x1024xf32, #tpu.memory_space<vmem>>, vector<1x8x32xf32>,
    %131 = vector.extract_strided_slice %6 {offsets = [48, 0], sizes = [8, 32], strides = [1, 1]} : vector<128x32xf32> to vector<8x32xf32>
    %132 = vector.extract_strided_slice %6 {offsets = [56, 0], sizes = [8, 32], strides = [1, 1]} : vector<128x32xf32> to vector<8x32xf32>
    %cst_60 = arith.constant 0.709677398 : f32
    %133 = vector.broadcast %cst_60 : f32 to vector<8x32xf32>
    %134 = arith.mulf %133, %131 : vector<8x32xf32>
    %cst_61 = arith.constant 0.290322572 : f32
    %135 = vector.broadcast %cst_61 : f32 to vector<8x32xf32>
    %136 = arith.mulf %135, %132 : vector<8x32xf32>
    %137 = arith.addf %134, %136 : vector<8x32xf32>
    %c0_62 = arith.constant 0 : index
    %c0_63 = arith.constant 0 : index
    %c416 = arith.constant 416 : index
    %138 = vector.load %arg15[%c0_62, %c0_63, %c416] : memref<2x16x1024xf32, #tpu.memory_space<vmem>>, vector<1x8x32xf32>
    %139 = vector.shape_cast %138 : vector<1x8x32xf32> to vector<8x32xf32>
    %140 = vector.shape_cast %137 : vector<8x32xf32> to vector<1x8x32xf32>
    tpu.vector_store %arg15[%c0_62, %c0_63, %c416], %140 {strides = array<i32>} : memref<2x16x1024xf32, #tpu.memory_space<vmem>>, vector<1x8x32xf32>,
    %141 = vector.extract_strided_slice %6 {offsets = [48, 0], sizes = [8, 32], strides = [1, 1]} : vector<128x32xf32> to vector<8x32xf32>
    %142 = vector.extract_strided_slice %6 {offsets = [56, 0], sizes = [8, 32], strides = [1, 1]} : vector<128x32xf32> to vector<8x32xf32>
    %cst_64 = arith.constant 0.225806445 : f32
    %143 = vector.broadcast %cst_64 : f32 to vector<8x32xf32>
    %144 = arith.mulf %143, %141 : vector<8x32xf32>
    %cst_65 = arith.constant 0.774193525 : f32
    %145 = vector.broadcast %cst_65 : f32 to vector<8x32xf32>
    %146 = arith.mulf %145, %142 : vector<8x32xf32>
    %147 = arith.addf %144, %146 : vector<8x32xf32>
    %c0_66 = arith.constant 0 : index
    %c0_67 = arith.constant 0 : index
    %c448 = arith.constant 448 : index
    %148 = vector.load %arg15[%c0_66, %c0_67, %c448] : memref<2x16x1024xf32, #tpu.memory_space<vmem>>, vector<1x8x32xf32>
    %149 = vector.shape_cast %148 : vector<1x8x32xf32> to vector<8x32xf32>
    %150 = vector.shape_cast %147 : vector<8x32xf32> to vector<1x8x32xf32>
    tpu.vector_store %arg15[%c0_66, %c0_67, %c448], %150 {strides = array<i32>} : memref<2x16x1024xf32, #tpu.memory_space<vmem>>, vector<1x8x32xf32>,
    %151 = vector.extract_strided_slice %6 {offsets = [56, 0], sizes = [8, 32], strides = [1, 1]} : vector<128x32xf32> to vector<8x32xf32>
    %152 = vector.extract_strided_slice %6 {offsets = [64, 0], sizes = [8, 32], strides = [1, 1]} : vector<128x32xf32> to vector<8x32xf32>
    %cst_68 = arith.constant 0.741935492 : f32
    %153 = vector.broadcast %cst_68 : f32 to vector<8x32xf32>
    %154 = arith.mulf %153, %151 : vector<8x32xf32>
    %cst_69 = arith.constant 0.258064508 : f32
    %155 = vector.broadcast %cst_69 : f32 to vector<8x32xf32>
    %156 = arith.mulf %155, %152 : vector<8x32xf32>
    %157 = arith.addf %154, %156 : vector<8x32xf32>
    %c0_70 = arith.constant 0 : index
    %c0_71 = arith.constant 0 : index
    %c480 = arith.constant 480 : index
    %158 = vector.load %arg15[%c0_70, %c0_71, %c480] : memref<2x16x1024xf32, #tpu.memory_space<vmem>>, vector<1x8x32xf32>
    %159 = vector.shape_cast %158 : vector<1x8x32xf32> to vector<8x32xf32>
    %160 = vector.shape_cast %157 : vector<8x32xf32> to vector<1x8x32xf32>
    tpu.vector_store %arg15[%c0_70, %c0_71, %c480], %160 {strides = array<i32>} : memref<2x16x1024xf32, #tpu.memory_space<vmem>>, vector<1x8x32xf32>,
    %161 = vector.extract_strided_slice %6 {offsets = [56, 0], sizes = [8, 32], strides = [1, 1]} : vector<128x32xf32> to vector<8x32xf32>
    %162 = vector.extract_strided_slice %6 {offsets = [64, 0], sizes = [8, 32], strides = [1, 1]} : vector<128x32xf32> to vector<8x32xf32>
    %cst_72 = arith.constant 0.258064508 : f32
    %163 = vector.broadcast %cst_72 : f32 to vector<8x32xf32>
    %164 = arith.mulf %163, %161 : vector<8x32xf32>
    %cst_73 = arith.constant 0.741935492 : f32
    %165 = vector.broadcast %cst_73 : f32 to vector<8x32xf32>
    %166 = arith.mulf %165, %162 : vector<8x32xf32>
    %167 = arith.addf %164, %166 : vector<8x32xf32>
    %c0_74 = arith.constant 0 : index
    %c0_75 = arith.constant 0 : index
    %c512 = arith.constant 512 : index
    %168 = vector.load %arg15[%c0_74, %c0_75, %c512] : memref<2x16x1024xf32, #tpu.memory_space<vmem>>, vector<1x8x32xf32>
    %169 = vector.shape_cast %168 : vector<1x8x32xf32> to vector<8x32xf32>
    %170 = vector.shape_cast %167 : vector<8x32xf32> to vector<1x8x32xf32>
    tpu.vector_store %arg15[%c0_74, %c0_75, %c512], %170 {strides = array<i32>} : memref<2x16x1024xf32, #tpu.memory_space<vmem>>, vector<1x8x32xf32>,
    %171 = vector.extract_strided_slice %6 {offsets = [64, 0], sizes = [8, 32], strides = [1, 1]} : vector<128x32xf32> to vector<8x32xf32>
    %172 = vector.extract_strided_slice %6 {offsets = [72, 0], sizes = [8, 32], strides = [1, 1]} : vector<128x32xf32> to vector<8x32xf32>
    %cst_76 = arith.constant 0.774193525 : f32
    %173 = vector.broadcast %cst_76 : f32 to vector<8x32xf32>
    %174 = arith.mulf %173, %171 : vector<8x32xf32>
    %cst_77 = arith.constant 0.225806445 : f32
    %175 = vector.broadcast %cst_77 : f32 to vector<8x32xf32>
    %176 = arith.mulf %175, %172 : vector<8x32xf32>
    %177 = arith.addf %174, %176 : vector<8x32xf32>
    %c0_78 = arith.constant 0 : index
    %c0_79 = arith.constant 0 : index
    %c544 = arith.constant 544 : index
    %178 = vector.load %arg15[%c0_78, %c0_79, %c544] : memref<2x16x1024xf32, #tpu.memory_space<vmem>>, vector<1x8x32xf32>
    %179 = vector.shape_cast %178 : vector<1x8x32xf32> to vector<8x32xf32>
    %180 = vector.shape_cast %177 : vector<8x32xf32> to vector<1x8x32xf32>
    tpu.vector_store %arg15[%c0_78, %c0_79, %c544], %180 {strides = array<i32>} : memref<2x16x1024xf32, #tpu.memory_space<vmem>>, vector<1x8x32xf32>,
    %181 = vector.extract_strided_slice %6 {offsets = [64, 0], sizes = [8, 32], strides = [1, 1]} : vector<128x32xf32> to vector<8x32xf32>
    %182 = vector.extract_strided_slice %6 {offsets = [72, 0], sizes = [8, 32], strides = [1, 1]} : vector<128x32xf32> to vector<8x32xf32>
    %cst_80 = arith.constant 0.290322572 : f32
    %183 = vector.broadcast %cst_80 : f32 to vector<8x32xf32>
    %184 = arith.mulf %183, %181 : vector<8x32xf32>
    %cst_81 = arith.constant 0.709677398 : f32
    %185 = vector.broadcast %cst_81 : f32 to vector<8x32xf32>
    %186 = arith.mulf %185, %182 : vector<8x32xf32>
    %187 = arith.addf %184, %186 : vector<8x32xf32>
    %c0_82 = arith.constant 0 : index
    %c0_83 = arith.constant 0 : index
    %c576 = arith.constant 576 : index
    %188 = vector.load %arg15[%c0_82, %c0_83, %c576] : memref<2x16x1024xf32, #tpu.memory_space<vmem>>, vector<1x8x32xf32>
    %189 = vector.shape_cast %188 : vector<1x8x32xf32> to vector<8x32xf32>
    %190 = vector.shape_cast %187 : vector<8x32xf32> to vector<1x8x32xf32>
    tpu.vector_store %arg15[%c0_82, %c0_83, %c576], %190 {strides = array<i32>} : memref<2x16x1024xf32, #tpu.memory_space<vmem>>, vector<1x8x32xf32>,
    %191 = vector.extract_strided_slice %6 {offsets = [72, 0], sizes = [8, 32], strides = [1, 1]} : vector<128x32xf32> to vector<8x32xf32>
    %192 = vector.extract_strided_slice %6 {offsets = [80, 0], sizes = [8, 32], strides = [1, 1]} : vector<128x32xf32> to vector<8x32xf32>
    %cst_84 = arith.constant 0.806451618 : f32
    %193 = vector.broadcast %cst_84 : f32 to vector<8x32xf32>
    %194 = arith.mulf %193, %191 : vector<8x32xf32>
    %cst_85 = arith.constant 0.193548381 : f32
    %195 = vector.broadcast %cst_85 : f32 to vector<8x32xf32>
    %196 = arith.mulf %195, %192 : vector<8x32xf32>
    %197 = arith.addf %194, %196 : vector<8x32xf32>
    %c0_86 = arith.constant 0 : index
    %c0_87 = arith.constant 0 : index
    %c608 = arith.constant 608 : index
    %198 = vector.load %arg15[%c0_86, %c0_87, %c608] : memref<2x16x1024xf32, #tpu.memory_space<vmem>>, vector<1x8x32xf32>
    %199 = vector.shape_cast %198 : vector<1x8x32xf32> to vector<8x32xf32>
    %200 = vector.shape_cast %197 : vector<8x32xf32> to vector<1x8x32xf32>
    tpu.vector_store %arg15[%c0_86, %c0_87, %c608], %200 {strides = array<i32>} : memref<2x16x1024xf32, #tpu.memory_space<vmem>>, vector<1x8x32xf32>,
    %201 = vector.extract_strided_slice %6 {offsets = [72, 0], sizes = [8, 32], strides = [1, 1]} : vector<128x32xf32> to vector<8x32xf32>
    %202 = vector.extract_strided_slice %6 {offsets = [80, 0], sizes = [8, 32], strides = [1, 1]} : vector<128x32xf32> to vector<8x32xf32>
    %cst_88 = arith.constant 0.322580636 : f32
    %203 = vector.broadcast %cst_88 : f32 to vector<8x32xf32>
    %204 = arith.mulf %203, %201 : vector<8x32xf32>
    %cst_89 = arith.constant 0.677419364 : f32
    %205 = vector.broadcast %cst_89 : f32 to vector<8x32xf32>
    %206 = arith.mulf %205, %202 : vector<8x32xf32>
    %207 = arith.addf %204, %206 : vector<8x32xf32>
    %c0_90 = arith.constant 0 : index
    %c0_91 = arith.constant 0 : index
    %c640 = arith.constant 640 : index
    %208 = vector.load %arg15[%c0_90, %c0_91, %c640] : memref<2x16x1024xf32, #tpu.memory_space<vmem>>, vector<1x8x32xf32>
    %209 = vector.shape_cast %208 : vector<1x8x32xf32> to vector<8x32xf32>
    %210 = vector.shape_cast %207 : vector<8x32xf32> to vector<1x8x32xf32>
    tpu.vector_store %arg15[%c0_90, %c0_91, %c640], %210 {strides = array<i32>} : memref<2x16x1024xf32, #tpu.memory_space<vmem>>, vector<1x8x32xf32>,
    %211 = vector.extract_strided_slice %6 {offsets = [80, 0], sizes = [8, 32], strides = [1, 1]} : vector<128x32xf32> to vector<8x32xf32>
    %212 = vector.extract_strided_slice %6 {offsets = [88, 0], sizes = [8, 32], strides = [1, 1]} : vector<128x32xf32> to vector<8x32xf32>
    %cst_92 = arith.constant 0.838709652 : f32
    %213 = vector.broadcast %cst_92 : f32 to vector<8x32xf32>
    %214 = arith.mulf %213, %211 : vector<8x32xf32>
    %cst_93 = arith.constant 0.161290318 : f32
    %215 = vector.broadcast %cst_93 : f32 to vector<8x32xf32>
    %216 = arith.mulf %215, %212 : vector<8x32xf32>
    %217 = arith.addf %214, %216 : vector<8x32xf32>
    %c0_94 = arith.constant 0 : index
    %c0_95 = arith.constant 0 : index
    %c672 = arith.constant 672 : index
    %218 = vector.load %arg15[%c0_94, %c0_95, %c672] : memref<2x16x1024xf32, #tpu.memory_space<vmem>>, vector<1x8x32xf32>
    %219 = vector.shape_cast %218 : vector<1x8x32xf32> to vector<8x32xf32>
    %220 = vector.shape_cast %217 : vector<8x32xf32> to vector<1x8x32xf32>
    tpu.vector_store %arg15[%c0_94, %c0_95, %c672], %220 {strides = array<i32>} : memref<2x16x1024xf32, #tpu.memory_space<vmem>>, vector<1x8x32xf32>,
    %221 = vector.extract_strided_slice %6 {offsets = [80, 0], sizes = [8, 32], strides = [1, 1]} : vector<128x32xf32> to vector<8x32xf32>
    %222 = vector.extract_strided_slice %6 {offsets = [88, 0], sizes = [8, 32], strides = [1, 1]} : vector<128x32xf32> to vector<8x32xf32>
    %cst_96 = arith.constant 0.354838699 : f32
    %223 = vector.broadcast %cst_96 : f32 to vector<8x32xf32>
    %224 = arith.mulf %223, %221 : vector<8x32xf32>
    %cst_97 = arith.constant 0.645161271 : f32
    %225 = vector.broadcast %cst_97 : f32 to vector<8x32xf32>
    %226 = arith.mulf %225, %222 : vector<8x32xf32>
    %227 = arith.addf %224, %226 : vector<8x32xf32>
    %c0_98 = arith.constant 0 : index
    %c0_99 = arith.constant 0 : index
    %c704 = arith.constant 704 : index
    %228 = vector.load %arg15[%c0_98, %c0_99, %c704] : memref<2x16x1024xf32, #tpu.memory_space<vmem>>, vector<1x8x32xf32>
    %229 = vector.shape_cast %228 : vector<1x8x32xf32> to vector<8x32xf32>
    %230 = vector.shape_cast %227 : vector<8x32xf32> to vector<1x8x32xf32>
    tpu.vector_store %arg15[%c0_98, %c0_99, %c704], %230 {strides = array<i32>} : memref<2x16x1024xf32, #tpu.memory_space<vmem>>, vector<1x8x32xf32>,
    %231 = vector.extract_strided_slice %6 {offsets = [88, 0], sizes = [8, 32], strides = [1, 1]} : vector<128x32xf32> to vector<8x32xf32>
    %232 = vector.extract_strided_slice %6 {offsets = [96, 0], sizes = [8, 32], strides = [1, 1]} : vector<128x32xf32> to vector<8x32xf32>
    %cst_100 = arith.constant 0.870967745 : f32
    %233 = vector.broadcast %cst_100 : f32 to vector<8x32xf32>
    %234 = arith.mulf %233, %231 : vector<8x32xf32>
    %cst_101 = arith.constant 0.129032254 : f32
    %235 = vector.broadcast %cst_101 : f32 to vector<8x32xf32>
    %236 = arith.mulf %235, %232 : vector<8x32xf32>
    %237 = arith.addf %234, %236 : vector<8x32xf32>
    %c0_102 = arith.constant 0 : index
    %c0_103 = arith.constant 0 : index
    %c736 = arith.constant 736 : index
    %238 = vector.load %arg15[%c0_102, %c0_103, %c736] : memref<2x16x1024xf32, #tpu.memory_space<vmem>>, vector<1x8x32xf32>
    %239 = vector.shape_cast %238 : vector<1x8x32xf32> to vector<8x32xf32>
    %240 = vector.shape_cast %237 : vector<8x32xf32> to vector<1x8x32xf32>
    tpu.vector_store %arg15[%c0_102, %c0_103, %c736], %240 {strides = array<i32>} : memref<2x16x1024xf32, #tpu.memory_space<vmem>>, vector<1x8x32xf32>,
    %241 = vector.extract_strided_slice %6 {offsets = [88, 0], sizes = [8, 32], strides = [1, 1]} : vector<128x32xf32> to vector<8x32xf32>
    %242 = vector.extract_strided_slice %6 {offsets = [96, 0], sizes = [8, 32], strides = [1, 1]} : vector<128x32xf32> to vector<8x32xf32>
    %cst_104 = arith.constant 0.387096763 : f32
    %243 = vector.broadcast %cst_104 : f32 to vector<8x32xf32>
    %244 = arith.mulf %243, %241 : vector<8x32xf32>
    %cst_105 = arith.constant 0.612903237 : f32
    %245 = vector.broadcast %cst_105 : f32 to vector<8x32xf32>
    %246 = arith.mulf %245, %242 : vector<8x32xf32>
    %247 = arith.addf %244, %246 : vector<8x32xf32>
    %c0_106 = arith.constant 0 : index
    %c0_107 = arith.constant 0 : index
    %c768 = arith.constant 768 : index
    %248 = vector.load %arg15[%c0_106, %c0_107, %c768] : memref<2x16x1024xf32, #tpu.memory_space<vmem>>, vector<1x8x32xf32>
    %249 = vector.shape_cast %248 : vector<1x8x32xf32> to vector<8x32xf32>
    %250 = vector.shape_cast %247 : vector<8x32xf32> to vector<1x8x32xf32>
    tpu.vector_store %arg15[%c0_106, %c0_107, %c768], %250 {strides = array<i32>} : memref<2x16x1024xf32, #tpu.memory_space<vmem>>, vector<1x8x32xf32>,
    %251 = vector.extract_strided_slice %6 {offsets = [96, 0], sizes = [8, 32], strides = [1, 1]} : vector<128x32xf32> to vector<8x32xf32>
    %252 = vector.extract_strided_slice %6 {offsets = [104, 0], sizes = [8, 32], strides = [1, 1]} : vector<128x32xf32> to vector<8x32xf32>
    %cst_108 = arith.constant 0.903225779 : f32
    %253 = vector.broadcast %cst_108 : f32 to vector<8x32xf32>
    %254 = arith.mulf %253, %251 : vector<8x32xf32>
    %cst_109 = arith.constant 0.0967741906 : f32
    %255 = vector.broadcast %cst_109 : f32 to vector<8x32xf32>
    %256 = arith.mulf %255, %252 : vector<8x32xf32>
    %257 = arith.addf %254, %256 : vector<8x32xf32>
    %c0_110 = arith.constant 0 : index
    %c0_111 = arith.constant 0 : index
    %c800 = arith.constant 800 : index
    %258 = vector.load %arg15[%c0_110, %c0_111, %c800] : memref<2x16x1024xf32, #tpu.memory_space<vmem>>, vector<1x8x32xf32>
    %259 = vector.shape_cast %258 : vector<1x8x32xf32> to vector<8x32xf32>
    %260 = vector.shape_cast %257 : vector<8x32xf32> to vector<1x8x32xf32>
    tpu.vector_store %arg15[%c0_110, %c0_111, %c800], %260 {strides = array<i32>} : memref<2x16x1024xf32, #tpu.memory_space<vmem>>, vector<1x8x32xf32>,
    %261 = vector.extract_strided_slice %6 {offsets = [96, 0], sizes = [8, 32], strides = [1, 1]} : vector<128x32xf32> to vector<8x32xf32>
    %262 = vector.extract_strided_slice %6 {offsets = [104, 0], sizes = [8, 32], strides = [1, 1]} : vector<128x32xf32> to vector<8x32xf32>
    %cst_112 = arith.constant 0.419354826 : f32
    %263 = vector.broadcast %cst_112 : f32 to vector<8x32xf32>
    %264 = arith.mulf %263, %261 : vector<8x32xf32>
    %cst_113 = arith.constant 0.580645144 : f32
    %265 = vector.broadcast %cst_113 : f32 to vector<8x32xf32>
    %266 = arith.mulf %265, %262 : vector<8x32xf32>
    %267 = arith.addf %264, %266 : vector<8x32xf32>
    %c0_114 = arith.constant 0 : index
    %c0_115 = arith.constant 0 : index
    %c832 = arith.constant 832 : index
    %268 = vector.load %arg15[%c0_114, %c0_115, %c832] : memref<2x16x1024xf32, #tpu.memory_space<vmem>>, vector<1x8x32xf32>
    %269 = vector.shape_cast %268 : vector<1x8x32xf32> to vector<8x32xf32>
    %270 = vector.shape_cast %267 : vector<8x32xf32> to vector<1x8x32xf32>
    tpu.vector_store %arg15[%c0_114, %c0_115, %c832], %270 {strides = array<i32>} : memref<2x16x1024xf32, #tpu.memory_space<vmem>>, vector<1x8x32xf32>,
    %271 = vector.extract_strided_slice %6 {offsets = [104, 0], sizes = [8, 32], strides = [1, 1]} : vector<128x32xf32> to vector<8x32xf32>
    %272 = vector.extract_strided_slice %6 {offsets = [112, 0], sizes = [8, 32], strides = [1, 1]} : vector<128x32xf32> to vector<8x32xf32>
    %cst_116 = arith.constant 0.935483872 : f32
    %273 = vector.broadcast %cst_116 : f32 to vector<8x32xf32>
    %274 = arith.mulf %273, %271 : vector<8x32xf32>
    %cst_117 = arith.constant 0.0645161271 : f32
    %275 = vector.broadcast %cst_117 : f32 to vector<8x32xf32>
    %276 = arith.mulf %275, %272 : vector<8x32xf32>
    %277 = arith.addf %274, %276 : vector<8x32xf32>
    %c0_118 = arith.constant 0 : index
    %c0_119 = arith.constant 0 : index
    %c864 = arith.constant 864 : index
    %278 = vector.load %arg15[%c0_118, %c0_119, %c864] : memref<2x16x1024xf32, #tpu.memory_space<vmem>>, vector<1x8x32xf32>
    %279 = vector.shape_cast %278 : vector<1x8x32xf32> to vector<8x32xf32>
    %280 = vector.shape_cast %277 : vector<8x32xf32> to vector<1x8x32xf32>
    tpu.vector_store %arg15[%c0_118, %c0_119, %c864], %280 {strides = array<i32>} : memref<2x16x1024xf32, #tpu.memory_space<vmem>>, vector<1x8x32xf32>,
    %281 = vector.extract_strided_slice %6 {offsets = [104, 0], sizes = [8, 32], strides = [1, 1]} : vector<128x32xf32> to vector<8x32xf32>
    %282 = vector.extract_strided_slice %6 {offsets = [112, 0], sizes = [8, 32], strides = [1, 1]} : vector<128x32xf32> to vector<8x32xf32>
    %cst_120 = arith.constant 0.45161289 : f32
    %283 = vector.broadcast %cst_120 : f32 to vector<8x32xf32>
    %284 = arith.mulf %283, %281 : vector<8x32xf32>
    %cst_121 = arith.constant 0.54838711 : f32
    %285 = vector.broadcast %cst_121 : f32 to vector<8x32xf32>
    %286 = arith.mulf %285, %282 : vector<8x32xf32>
    %287 = arith.addf %284, %286 : vector<8x32xf32>
    %c0_122 = arith.constant 0 : index
    %c0_123 = arith.constant 0 : index
    %c896 = arith.constant 896 : index
    %288 = vector.load %arg15[%c0_122, %c0_123, %c896] : memref<2x16x1024xf32, #tpu.memory_space<vmem>>, vector<1x8x32xf32>
    %289 = vector.shape_cast %288 : vector<1x8x32xf32> to vector<8x32xf32>
    %290 = vector.shape_cast %287 : vector<8x32xf32> to vector<1x8x32xf32>
    tpu.vector_store %arg15[%c0_122, %c0_123, %c896], %290 {strides = array<i32>} : memref<2x16x1024xf32, #tpu.memory_space<vmem>>, vector<1x8x32xf32>,
    %291 = vector.extract_strided_slice %6 {offsets = [112, 0], sizes = [8, 32], strides = [1, 1]} : vector<128x32xf32> to vector<8x32xf32>
    %292 = vector.extract_strided_slice %6 {offsets = [120, 0], sizes = [8, 32], strides = [1, 1]} : vector<128x32xf32> to vector<8x32xf32>
    %cst_124 = arith.constant 0.967741906 : f32
    %293 = vector.broadcast %cst_124 : f32 to vector<8x32xf32>
    %294 = arith.mulf %293, %291 : vector<8x32xf32>
    %cst_125 = arith.constant 0.0322580636 : f32
    %295 = vector.broadcast %cst_125 : f32 to vector<8x32xf32>
    %296 = arith.mulf %295, %292 : vector<8x32xf32>
    %297 = arith.addf %294, %296 : vector<8x32xf32>
    %c0_126 = arith.constant 0 : index
    %c0_127 = arith.constant 0 : index
    %c928 = arith.constant 928 : index
    %298 = vector.load %arg15[%c0_126, %c0_127, %c928] : memref<2x16x1024xf32, #tpu.memory_space<vmem>>, vector<1x8x32xf32>
    %299 = vector.shape_cast %298 : vector<1x8x32xf32> to vector<8x32xf32>
    %300 = vector.shape_cast %297 : vector<8x32xf32> to vector<1x8x32xf32>
    tpu.vector_store %arg15[%c0_126, %c0_127, %c928], %300 {strides = array<i32>} : memref<2x16x1024xf32, #tpu.memory_space<vmem>>, vector<1x8x32xf32>,
    %301 = vector.extract_strided_slice %6 {offsets = [112, 0], sizes = [8, 32], strides = [1, 1]} : vector<128x32xf32> to vector<8x32xf32>
    %302 = vector.extract_strided_slice %6 {offsets = [120, 0], sizes = [8, 32], strides = [1, 1]} : vector<128x32xf32> to vector<8x32xf32>
    %cst_128 = arith.constant 0.483870953 : f32
    %303 = vector.broadcast %cst_128 : f32 to vector<8x32xf32>
    %304 = arith.mulf %303, %301 : vector<8x32xf32>
    %cst_129 = arith.constant 5.161290e-01 : f32
    %305 = vector.broadcast %cst_129 : f32 to vector<8x32xf32>
    %306 = arith.mulf %305, %302 : vector<8x32xf32>
    %307 = arith.addf %304, %306 : vector<8x32xf32>
    %c0_130 = arith.constant 0 : index
    %c0_131 = arith.constant 0 : index
    %c960 = arith.constant 960 : index
    %308 = vector.load %arg15[%c0_130, %c0_131, %c960] : memref<2x16x1024xf32, #tpu.memory_space<vmem>>, vector<1x8x32xf32>
    %309 = vector.shape_cast %308 : vector<1x8x32xf32> to vector<8x32xf32>
    %310 = vector.shape_cast %307 : vector<8x32xf32> to vector<1x8x32xf32>
    tpu.vector_store %arg15[%c0_130, %c0_131, %c960], %310 {strides = array<i32>} : memref<2x16x1024xf32, #tpu.memory_space<vmem>>, vector<1x8x32xf32>,
    %311 = vector.extract_strided_slice %6 {offsets = [120, 0], sizes = [8, 32], strides = [1, 1]} : vector<128x32xf32> to vector<8x32xf32>
    %c0_132 = arith.constant 0 : index
    %c0_133 = arith.constant 0 : index
    %c992 = arith.constant 992 : index
    %312 = vector.load %arg15[%c0_132, %c0_133, %c992] : memref<2x16x1024xf32, #tpu.memory_space<vmem>>, vector<1x8x32xf32>
    %313 = vector.shape_cast %312 : vector<1x8x32xf32> to vector<8x32xf32>
    %314 = vector.shape_cast %311 : vector<8x32xf32> to vector<1x8x32xf32>
    tpu.vector_store %arg15[%c0_132, %c0_133, %c992], %314 {strides = array<i32>} : memref<2x16x1024xf32, #tpu.memory_space<vmem>>, vector<1x8x32xf32>,
    %c1 = arith.constant 1 : index
    %c0_134 = arith.constant 0 : index
    %c0_135 = arith.constant 0 : index
    %315 = vector.load %arg0[%c1, %c0_134, %c0_135] : memref<2x128x16xf32, #tpu.memory_space<vmem>>, vector<1x128x16xf32>
    %316 = vector.shape_cast %315 : vector<1x128x16xf32> to vector<128x16xf32>
    %317 = arith.truncf %316 : vector<128x16xf32> to vector<128x16xbf16>
    %cst_136 = arith.constant dense<0.000000e+00> : vector<128x32xf32>
    %318 = tpu.matmul %317, %2, %cst_136 {dimension_numbers = #tpu.dot_dimension_numbers<[1], [0], [0], [1], [0, 0, 1, 1], [], []>} : vector<128x16xbf16>, vector<16x32xbf16>, vector<128x32xf32> -> vector<128x32xf32>
    %319 = vector.extract_strided_slice %318 {offsets = [0, 0], sizes = [8, 32], strides = [1, 1]} : vector<128x32xf32> to vector<8x32xf32>
    %c1_137 = arith.constant 1 : index
    %c0_138 = arith.constant 0 : index
    %c0_139 = arith.constant 0 : index
    %320 = vector.load %arg15[%c1_137, %c0_138, %c0_139] : memref<2x16x1024xf32, #tpu.memory_space<vmem>>, vector<1x8x32xf32>
    %321 = vector.shape_cast %320 : vector<1x8x32xf32> to vector<8x32xf32>
    %322 = vector.shape_cast %319 : vector<8x32xf32> to vector<1x8x32xf32>
    tpu.vector_store %arg15[%c1_137, %c0_138, %c0_139], %322 {strides = array<i32>} : memref<2x16x1024xf32, #tpu.memory_space<vmem>>, vector<1x8x32xf32>,
    %323 = vector.extract_strided_slice %318 {offsets = [0, 0], sizes = [8, 32], strides = [1, 1]} : vector<128x32xf32> to vector<8x32xf32>
    %324 = vector.extract_strided_slice %318 {offsets = [8, 0], sizes = [8, 32], strides = [1, 1]} : vector<128x32xf32> to vector<8x32xf32>
    %cst_140 = arith.constant 5.161290e-01 : f32
    %325 = vector.broadcast %cst_140 : f32 to vector<8x32xf32>
    %326 = arith.mulf %325, %323 : vector<8x32xf32>
    %cst_141 = arith.constant 0.483870953 : f32
    %327 = vector.broadcast %cst_141 : f32 to vector<8x32xf32>
    %328 = arith.mulf %327, %324 : vector<8x32xf32>
    %329 = arith.addf %326, %328 : vector<8x32xf32>
    %c1_142 = arith.constant 1 : index
    %c0_143 = arith.constant 0 : index
    %c32_144 = arith.constant 32 : index
    %330 = vector.load %arg15[%c1_142, %c0_143, %c32_144] : memref<2x16x1024xf32, #tpu.memory_space<vmem>>, vector<1x8x32xf32>
    %331 = vector.shape_cast %330 : vector<1x8x32xf32> to vector<8x32xf32>
    %332 = vector.shape_cast %329 : vector<8x32xf32> to vector<1x8x32xf32>
    tpu.vector_store %arg15[%c1_142, %c0_143, %c32_144], %332 {strides = array<i32>} : memref<2x16x1024xf32, #tpu.memory_space<vmem>>, vector<1x8x32xf32>,
    %333 = vector.extract_strided_slice %318 {offsets = [0, 0], sizes = [8, 32], strides = [1, 1]} : vector<128x32xf32> to vector<8x32xf32>
    %334 = vector.extract_strided_slice %318 {offsets = [8, 0], sizes = [8, 32], strides = [1, 1]} : vector<128x32xf32> to vector<8x32xf32>
    %cst_145 = arith.constant 0.0322580636 : f32
    %335 = vector.broadcast %cst_145 : f32 to vector<8x32xf32>
    %336 = arith.mulf %335, %333 : vector<8x32xf32>
    %cst_146 = arith.constant 0.967741906 : f32
    %337 = vector.broadcast %cst_146 : f32 to vector<8x32xf32>
    %338 = arith.mulf %337, %334 : vector<8x32xf32>
    %339 = arith.addf %336, %338 : vector<8x32xf32>
    %c1_147 = arith.constant 1 : index
    %c0_148 = arith.constant 0 : index
    %c64_149 = arith.constant 64 : index
    %340 = vector.load %arg15[%c1_147, %c0_148, %c64_149] : memref<2x16x1024xf32, #tpu.memory_space<vmem>>, vector<1x8x32xf32>
    %341 = vector.shape_cast %340 : vector<1x8x32xf32> to vector<8x32xf32>
    %342 = vector.shape_cast %339 : vector<8x32xf32> to vector<1x8x32xf32>
    tpu.vector_store %arg15[%c1_147, %c0_148, %c64_149], %342 {strides = array<i32>} : memref<2x16x1024xf32, #tpu.memory_space<vmem>>, vector<1x8x32xf32>,
    %343 = vector.extract_strided_slice %318 {offsets = [8, 0], sizes = [8, 32], strides = [1, 1]} : vector<128x32xf32> to vector<8x32xf32>
    %344 = vector.extract_strided_slice %318 {offsets = [16, 0], sizes = [8, 32], strides = [1, 1]} : vector<128x32xf32> to vector<8x32xf32>
    %cst_150 = arith.constant 0.54838711 : f32
    %345 = vector.broadcast %cst_150 : f32 to vector<8x32xf32>
    %346 = arith.mulf %345, %343 : vector<8x32xf32>
    %cst_151 = arith.constant 0.45161289 : f32
    %347 = vector.broadcast %cst_151 : f32 to vector<8x32xf32>
    %348 = arith.mulf %347, %344 : vector<8x32xf32>
    %349 = arith.addf %346, %348 : vector<8x32xf32>
    %c1_152 = arith.constant 1 : index
    %c0_153 = arith.constant 0 : index
    %c96_154 = arith.constant 96 : index
    %350 = vector.load %arg15[%c1_152, %c0_153, %c96_154] : memref<2x16x1024xf32, #tpu.memory_space<vmem>>, vector<1x8x32xf32>
    %351 = vector.shape_cast %350 : vector<1x8x32xf32> to vector<8x32xf32>
    %352 = vector.shape_cast %349 : vector<8x32xf32> to vector<1x8x32xf32>
    tpu.vector_store %arg15[%c1_152, %c0_153, %c96_154], %352 {strides = array<i32>} : memref<2x16x1024xf32, #tpu.memory_space<vmem>>, vector<1x8x32xf32>,
    %353 = vector.extract_strided_slice %318 {offsets = [8, 0], sizes = [8, 32], strides = [1, 1]} : vector<128x32xf32> to vector<8x32xf32>
    %354 = vector.extract_strided_slice %318 {offsets = [16, 0], sizes = [8, 32], strides = [1, 1]} : vector<128x32xf32> to vector<8x32xf32>
    %cst_155 = arith.constant 0.0645161271 : f32
    %355 = vector.broadcast %cst_155 : f32 to vector<8x32xf32>
    %356 = arith.mulf %355, %353 : vector<8x32xf32>
    %cst_156 = arith.constant 0.935483872 : f32
    %357 = vector.broadcast %cst_156 : f32 to vector<8x32xf32>
    %358 = arith.mulf %357, %354 : vector<8x32xf32>
    %359 = arith.addf %356, %358 : vector<8x32xf32>
    %c1_157 = arith.constant 1 : index
    %c0_158 = arith.constant 0 : index
    %c128_159 = arith.constant 128 : index
    %360 = vector.load %arg15[%c1_157, %c0_158, %c128_159] : memref<2x16x1024xf32, #tpu.memory_space<vmem>>, vector<1x8x32xf32>
    %361 = vector.shape_cast %360 : vector<1x8x32xf32> to vector<8x32xf32>
    %362 = vector.shape_cast %359 : vector<8x32xf32> to vector<1x8x32xf32>
    tpu.vector_store %arg15[%c1_157, %c0_158, %c128_159], %362 {strides = array<i32>} : memref<2x16x1024xf32, #tpu.memory_space<vmem>>, vector<1x8x32xf32>,
    %363 = vector.extract_strided_slice %318 {offsets = [16, 0], sizes = [8, 32], strides = [1, 1]} : vector<128x32xf32> to vector<8x32xf32>
    %364 = vector.extract_strided_slice %318 {offsets = [24, 0], sizes = [8, 32], strides = [1, 1]} : vector<128x32xf32> to vector<8x32xf32>
    %cst_160 = arith.constant 0.580645144 : f32
    %365 = vector.broadcast %cst_160 : f32 to vector<8x32xf32>
    %366 = arith.mulf %365, %363 : vector<8x32xf32>
    %cst_161 = arith.constant 0.419354826 : f32
    %367 = vector.broadcast %cst_161 : f32 to vector<8x32xf32>
    %368 = arith.mulf %367, %364 : vector<8x32xf32>
    %369 = arith.addf %366, %368 : vector<8x32xf32>
    %c1_162 = arith.constant 1 : index
    %c0_163 = arith.constant 0 : index
    %c160_164 = arith.constant 160 : index
    %370 = vector.load %arg15[%c1_162, %c0_163, %c160_164] : memref<2x16x1024xf32, #tpu.memory_space<vmem>>, vector<1x8x32xf32>
    %371 = vector.shape_cast %370 : vector<1x8x32xf32> to vector<8x32xf32>
    %372 = vector.shape_cast %369 : vector<8x32xf32> to vector<1x8x32xf32>
    tpu.vector_store %arg15[%c1_162, %c0_163, %c160_164], %372 {strides = array<i32>} : memref<2x16x1024xf32, #tpu.memory_space<vmem>>, vector<1x8x32xf32>,
    %373 = vector.extract_strided_slice %318 {offsets = [16, 0], sizes = [8, 32], strides = [1, 1]} : vector<128x32xf32> to vector<8x32xf32>
    %374 = vector.extract_strided_slice %318 {offsets = [24, 0], sizes = [8, 32], strides = [1, 1]} : vector<128x32xf32> to vector<8x32xf32>
    %cst_165 = arith.constant 0.0967741906 : f32
    %375 = vector.broadcast %cst_165 : f32 to vector<8x32xf32>
    %376 = arith.mulf %375, %373 : vector<8x32xf32>
    %cst_166 = arith.constant 0.903225779 : f32
    %377 = vector.broadcast %cst_166 : f32 to vector<8x32xf32>
    %378 = arith.mulf %377, %374 : vector<8x32xf32>
    %379 = arith.addf %376, %378 : vector<8x32xf32>
    %c1_167 = arith.constant 1 : index
    %c0_168 = arith.constant 0 : index
    %c192_169 = arith.constant 192 : index
    %380 = vector.load %arg15[%c1_167, %c0_168, %c192_169] : memref<2x16x1024xf32, #tpu.memory_space<vmem>>, vector<1x8x32xf32>
    %381 = vector.shape_cast %380 : vector<1x8x32xf32> to vector<8x32xf32>
    %382 = vector.shape_cast %379 : vector<8x32xf32> to vector<1x8x32xf32>
    tpu.vector_store %arg15[%c1_167, %c0_168, %c192_169], %382 {strides = array<i32>} : memref<2x16x1024xf32, #tpu.memory_space<vmem>>, vector<1x8x32xf32>,
    %383 = vector.extract_strided_slice %318 {offsets = [24, 0], sizes = [8, 32], strides = [1, 1]} : vector<128x32xf32> to vector<8x32xf32>
    %384 = vector.extract_strided_slice %318 {offsets = [32, 0], sizes = [8, 32], strides = [1, 1]} : vector<128x32xf32> to vector<8x32xf32>
    %cst_170 = arith.constant 0.612903237 : f32
    %385 = vector.broadcast %cst_170 : f32 to vector<8x32xf32>
    %386 = arith.mulf %385, %383 : vector<8x32xf32>
    %cst_171 = arith.constant 0.387096763 : f32
    %387 = vector.broadcast %cst_171 : f32 to vector<8x32xf32>
    %388 = arith.mulf %387, %384 : vector<8x32xf32>
    %389 = arith.addf %386, %388 : vector<8x32xf32>
    %c1_172 = arith.constant 1 : index
    %c0_173 = arith.constant 0 : index
    %c224_174 = arith.constant 224 : index
    %390 = vector.load %arg15[%c1_172, %c0_173, %c224_174] : memref<2x16x1024xf32, #tpu.memory_space<vmem>>, vector<1x8x32xf32>
    %391 = vector.shape_cast %390 : vector<1x8x32xf32> to vector<8x32xf32>
    %392 = vector.shape_cast %389 : vector<8x32xf32> to vector<1x8x32xf32>
    tpu.vector_store %arg15[%c1_172, %c0_173, %c224_174], %392 {strides = array<i32>} : memref<2x16x1024xf32, #tpu.memory_space<vmem>>, vector<1x8x32xf32>,
    %393 = vector.extract_strided_slice %318 {offsets = [24, 0], sizes = [8, 32], strides = [1, 1]} : vector<128x32xf32> to vector<8x32xf32>
    %394 = vector.extract_strided_slice %318 {offsets = [32, 0], sizes = [8, 32], strides = [1, 1]} : vector<128x32xf32> to vector<8x32xf32>
    %cst_175 = arith.constant 0.129032254 : f32
    %395 = vector.broadcast %cst_175 : f32 to vector<8x32xf32>
    %396 = arith.mulf %395, %393 : vector<8x32xf32>
    %cst_176 = arith.constant 0.870967745 : f32
    %397 = vector.broadcast %cst_176 : f32 to vector<8x32xf32>
    %398 = arith.mulf %397, %394 : vector<8x32xf32>
    %399 = arith.addf %396, %398 : vector<8x32xf32>
    %c1_177 = arith.constant 1 : index
    %c0_178 = arith.constant 0 : index
    %c256_179 = arith.constant 256 : index
    %400 = vector.load %arg15[%c1_177, %c0_178, %c256_179] : memref<2x16x1024xf32, #tpu.memory_space<vmem>>, vector<1x8x32xf32>
    %401 = vector.shape_cast %400 : vector<1x8x32xf32> to vector<8x32xf32>
    %402 = vector.shape_cast %399 : vector<8x32xf32> to vector<1x8x32xf32>
    tpu.vector_store %arg15[%c1_177, %c0_178, %c256_179], %402 {strides = array<i32>} : memref<2x16x1024xf32, #tpu.memory_space<vmem>>, vector<1x8x32xf32>,
    %403 = vector.extract_strided_slice %318 {offsets = [32, 0], sizes = [8, 32], strides = [1, 1]} : vector<128x32xf32> to vector<8x32xf32>
    %404 = vector.extract_strided_slice %318 {offsets = [40, 0], sizes = [8, 32], strides = [1, 1]} : vector<128x32xf32> to vector<8x32xf32>
    %cst_180 = arith.constant 0.645161271 : f32
    %405 = vector.broadcast %cst_180 : f32 to vector<8x32xf32>
    %406 = arith.mulf %405, %403 : vector<8x32xf32>
    %cst_181 = arith.constant 0.354838699 : f32
    %407 = vector.broadcast %cst_181 : f32 to vector<8x32xf32>
    %408 = arith.mulf %407, %404 : vector<8x32xf32>
    %409 = arith.addf %406, %408 : vector<8x32xf32>
    %c1_182 = arith.constant 1 : index
    %c0_183 = arith.constant 0 : index
    %c288_184 = arith.constant 288 : index
    %410 = vector.load %arg15[%c1_182, %c0_183, %c288_184] : memref<2x16x1024xf32, #tpu.memory_space<vmem>>, vector<1x8x32xf32>
    %411 = vector.shape_cast %410 : vector<1x8x32xf32> to vector<8x32xf32>
    %412 = vector.shape_cast %409 : vector<8x32xf32> to vector<1x8x32xf32>
    tpu.vector_store %arg15[%c1_182, %c0_183, %c288_184], %412 {strides = array<i32>} : memref<2x16x1024xf32, #tpu.memory_space<vmem>>, vector<1x8x32xf32>,
    %413 = vector.extract_strided_slice %318 {offsets = [32, 0], sizes = [8, 32], strides = [1, 1]} : vector<128x32xf32> to vector<8x32xf32>
    %414 = vector.extract_strided_slice %318 {offsets = [40, 0], sizes = [8, 32], strides = [1, 1]} : vector<128x32xf32> to vector<8x32xf32>
    %cst_185 = arith.constant 0.161290318 : f32
    %415 = vector.broadcast %cst_185 : f32 to vector<8x32xf32>
    %416 = arith.mulf %415, %413 : vector<8x32xf32>
    %cst_186 = arith.constant 0.838709652 : f32
    %417 = vector.broadcast %cst_186 : f32 to vector<8x32xf32>
    %418 = arith.mulf %417, %414 : vector<8x32xf32>
    %419 = arith.addf %416, %418 : vector<8x32xf32>
    %c1_187 = arith.constant 1 : index
    %c0_188 = arith.constant 0 : index
    %c320_189 = arith.constant 320 : index
    %420 = vector.load %arg15[%c1_187, %c0_188, %c320_189] : memref<2x16x1024xf32, #tpu.memory_space<vmem>>, vector<1x8x32xf32>
    %421 = vector.shape_cast %420 : vector<1x8x32xf32> to vector<8x32xf32>
    %422 = vector.shape_cast %419 : vector<8x32xf32> to vector<1x8x32xf32>
    tpu.vector_store %arg15[%c1_187, %c0_188, %c320_189], %422 {strides = array<i32>} : memref<2x16x1024xf32, #tpu.memory_space<vmem>>, vector<1x8x32xf32>,
    %423 = vector.extract_strided_slice %318 {offsets = [40, 0], sizes = [8, 32], strides = [1, 1]} : vector<128x32xf32> to vector<8x32xf32>
    %424 = vector.extract_strided_slice %318 {offsets = [48, 0], sizes = [8, 32], strides = [1, 1]} : vector<128x32xf32> to vector<8x32xf32>
    %cst_190 = arith.constant 0.677419364 : f32
    %425 = vector.broadcast %cst_190 : f32 to vector<8x32xf32>
    %426 = arith.mulf %425, %423 : vector<8x32xf32>
    %cst_191 = arith.constant 0.322580636 : f32
    %427 = vector.broadcast %cst_191 : f32 to vector<8x32xf32>
    %428 = arith.mulf %427, %424 : vector<8x32xf32>
    %429 = arith.addf %426, %428 : vector<8x32xf32>
    %c1_192 = arith.constant 1 : index
    %c0_193 = arith.constant 0 : index
    %c352_194 = arith.constant 352 : index
    %430 = vector.load %arg15[%c1_192, %c0_193, %c352_194] : memref<2x16x1024xf32, #tpu.memory_space<vmem>>, vector<1x8x32xf32>
    %431 = vector.shape_cast %430 : vector<1x8x32xf32> to vector<8x32xf32>
    %432 = vector.shape_cast %429 : vector<8x32xf32> to vector<1x8x32xf32>
    tpu.vector_store %arg15[%c1_192, %c0_193, %c352_194], %432 {strides = array<i32>} : memref<2x16x1024xf32, #tpu.memory_space<vmem>>, vector<1x8x32xf32>,
    %433 = vector.extract_strided_slice %318 {offsets = [40, 0], sizes = [8, 32], strides = [1, 1]} : vector<128x32xf32> to vector<8x32xf32>
    %434 = vector.extract_strided_slice %318 {offsets = [48, 0], sizes = [8, 32], strides = [1, 1]} : vector<128x32xf32> to vector<8x32xf32>
    %cst_195 = arith.constant 0.193548381 : f32
    %435 = vector.broadcast %cst_195 : f32 to vector<8x32xf32>
    %436 = arith.mulf %435, %433 : vector<8x32xf32>
    %cst_196 = arith.constant 0.806451618 : f32
    %437 = vector.broadcast %cst_196 : f32 to vector<8x32xf32>
    %438 = arith.mulf %437, %434 : vector<8x32xf32>
    %439 = arith.addf %436, %438 : vector<8x32xf32>
    %c1_197 = arith.constant 1 : index
    %c0_198 = arith.constant 0 : index
    %c384_199 = arith.constant 384 : index
    %440 = vector.load %arg15[%c1_197, %c0_198, %c384_199] : memref<2x16x1024xf32, #tpu.memory_space<vmem>>, vector<1x8x32xf32>
    %441 = vector.shape_cast %440 : vector<1x8x32xf32> to vector<8x32xf32>
    %442 = vector.shape_cast %439 : vector<8x32xf32> to vector<1x8x32xf32>
    tpu.vector_store %arg15[%c1_197, %c0_198, %c384_199], %442 {strides = array<i32>} : memref<2x16x1024xf32, #tpu.memory_space<vmem>>, vector<1x8x32xf32>,
    %443 = vector.extract_strided_slice %318 {offsets = [48, 0], sizes = [8, 32], strides = [1, 1]} : vector<128x32xf32> to vector<8x32xf32>
    %444 = vector.extract_strided_slice %318 {offsets = [56, 0], sizes = [8, 32], strides = [1, 1]} : vector<128x32xf32> to vector<8x32xf32>
    %cst_200 = arith.constant 0.709677398 : f32
    %445 = vector.broadcast %cst_200 : f32 to vector<8x32xf32>
    %446 = arith.mulf %445, %443 : vector<8x32xf32>
    %cst_201 = arith.constant 0.290322572 : f32
    %447 = vector.broadcast %cst_201 : f32 to vector<8x32xf32>
    %448 = arith.mulf %447, %444 : vector<8x32xf32>
    %449 = arith.addf %446, %448 : vector<8x32xf32>
    %c1_202 = arith.constant 1 : index
    %c0_203 = arith.constant 0 : index
    %c416_204 = arith.constant 416 : index
    %450 = vector.load %arg15[%c1_202, %c0_203, %c416_204] : memref<2x16x1024xf32, #tpu.memory_space<vmem>>, vector<1x8x32xf32>
    %451 = vector.shape_cast %450 : vector<1x8x32xf32> to vector<8x32xf32>
    %452 = vector.shape_cast %449 : vector<8x32xf32> to vector<1x8x32xf32>
    tpu.vector_store %arg15[%c1_202, %c0_203, %c416_204], %452 {strides = array<i32>} : memref<2x16x1024xf32, #tpu.memory_space<vmem>>, vector<1x8x32xf32>,
    %453 = vector.extract_strided_slice %318 {offsets = [48, 0], sizes = [8, 32], strides = [1, 1]} : vector<128x32xf32> to vector<8x32xf32>
    %454 = vector.extract_strided_slice %318 {offsets = [56, 0], sizes = [8, 32], strides = [1, 1]} : vector<128x32xf32> to vector<8x32xf32>
    %cst_205 = arith.constant 0.225806445 : f32
    %455 = vector.broadcast %cst_205 : f32 to vector<8x32xf32>
    %456 = arith.mulf %455, %453 : vector<8x32xf32>
    %cst_206 = arith.constant 0.774193525 : f32
    %457 = vector.broadcast %cst_206 : f32 to vector<8x32xf32>
    %458 = arith.mulf %457, %454 : vector<8x32xf32>
    %459 = arith.addf %456, %458 : vector<8x32xf32>
    %c1_207 = arith.constant 1 : index
    %c0_208 = arith.constant 0 : index
    %c448_209 = arith.constant 448 : index
    %460 = vector.load %arg15[%c1_207, %c0_208, %c448_209] : memref<2x16x1024xf32, #tpu.memory_space<vmem>>, vector<1x8x32xf32>
    %461 = vector.shape_cast %460 : vector<1x8x32xf32> to vector<8x32xf32>
    %462 = vector.shape_cast %459 : vector<8x32xf32> to vector<1x8x32xf32>
    tpu.vector_store %arg15[%c1_207, %c0_208, %c448_209], %462 {strides = array<i32>} : memref<2x16x1024xf32, #tpu.memory_space<vmem>>, vector<1x8x32xf32>,
    %463 = vector.extract_strided_slice %318 {offsets = [56, 0], sizes = [8, 32], strides = [1, 1]} : vector<128x32xf32> to vector<8x32xf32>
    %464 = vector.extract_strided_slice %318 {offsets = [64, 0], sizes = [8, 32], strides = [1, 1]} : vector<128x32xf32> to vector<8x32xf32>
    %cst_210 = arith.constant 0.741935492 : f32
    %465 = vector.broadcast %cst_210 : f32 to vector<8x32xf32>
    %466 = arith.mulf %465, %463 : vector<8x32xf32>
    %cst_211 = arith.constant 0.258064508 : f32
    %467 = vector.broadcast %cst_211 : f32 to vector<8x32xf32>
    %468 = arith.mulf %467, %464 : vector<8x32xf32>
    %469 = arith.addf %466, %468 : vector<8x32xf32>
    %c1_212 = arith.constant 1 : index
    %c0_213 = arith.constant 0 : index
    %c480_214 = arith.constant 480 : index
    %470 = vector.load %arg15[%c1_212, %c0_213, %c480_214] : memref<2x16x1024xf32, #tpu.memory_space<vmem>>, vector<1x8x32xf32>
    %471 = vector.shape_cast %470 : vector<1x8x32xf32> to vector<8x32xf32>
    %472 = vector.shape_cast %469 : vector<8x32xf32> to vector<1x8x32xf32>
    tpu.vector_store %arg15[%c1_212, %c0_213, %c480_214], %472 {strides = array<i32>} : memref<2x16x1024xf32, #tpu.memory_space<vmem>>, vector<1x8x32xf32>,
    %473 = vector.extract_strided_slice %318 {offsets = [56, 0], sizes = [8, 32], strides = [1, 1]} : vector<128x32xf32> to vector<8x32xf32>
    %474 = vector.extract_strided_slice %318 {offsets = [64, 0], sizes = [8, 32], strides = [1, 1]} : vector<128x32xf32> to vector<8x32xf32>
    %cst_215 = arith.constant 0.258064508 : f32
    %475 = vector.broadcast %cst_215 : f32 to vector<8x32xf32>
    %476 = arith.mulf %475, %473 : vector<8x32xf32>
    %cst_216 = arith.constant 0.741935492 : f32
    %477 = vector.broadcast %cst_216 : f32 to vector<8x32xf32>
    %478 = arith.mulf %477, %474 : vector<8x32xf32>
    %479 = arith.addf %476, %478 : vector<8x32xf32>
    %c1_217 = arith.constant 1 : index
    %c0_218 = arith.constant 0 : index
    %c512_219 = arith.constant 512 : index
    %480 = vector.load %arg15[%c1_217, %c0_218, %c512_219] : memref<2x16x1024xf32, #tpu.memory_space<vmem>>, vector<1x8x32xf32>
    %481 = vector.shape_cast %480 : vector<1x8x32xf32> to vector<8x32xf32>
    %482 = vector.shape_cast %479 : vector<8x32xf32> to vector<1x8x32xf32>
    tpu.vector_store %arg15[%c1_217, %c0_218, %c512_219], %482 {strides = array<i32>} : memref<2x16x1024xf32, #tpu.memory_space<vmem>>, vector<1x8x32xf32>,
    %483 = vector.extract_strided_slice %318 {offsets = [64, 0], sizes = [8, 32], strides = [1, 1]} : vector<128x32xf32> to vector<8x32xf32>
    %484 = vector.extract_strided_slice %318 {offsets = [72, 0], sizes = [8, 32], strides = [1, 1]} : vector<128x32xf32> to vector<8x32xf32>
    %cst_220 = arith.constant 0.774193525 : f32
    %485 = vector.broadcast %cst_220 : f32 to vector<8x32xf32>
    %486 = arith.mulf %485, %483 : vector<8x32xf32>
    %cst_221 = arith.constant 0.225806445 : f32
    %487 = vector.broadcast %cst_221 : f32 to vector<8x32xf32>
    %488 = arith.mulf %487, %484 : vector<8x32xf32>
    %489 = arith.addf %486, %488 : vector<8x32xf32>
    %c1_222 = arith.constant 1 : index
    %c0_223 = arith.constant 0 : index
    %c544_224 = arith.constant 544 : index
    %490 = vector.load %arg15[%c1_222, %c0_223, %c544_224] : memref<2x16x1024xf32, #tpu.memory_space<vmem>>, vector<1x8x32xf32>
    %491 = vector.shape_cast %490 : vector<1x8x32xf32> to vector<8x32xf32>
    %492 = vector.shape_cast %489 : vector<8x32xf32> to vector<1x8x32xf32>
    tpu.vector_store %arg15[%c1_222, %c0_223, %c544_224], %492 {strides = array<i32>} : memref<2x16x1024xf32, #tpu.memory_space<vmem>>, vector<1x8x32xf32>,
    %493 = vector.extract_strided_slice %318 {offsets = [64, 0], sizes = [8, 32], strides = [1, 1]} : vector<128x32xf32> to vector<8x32xf32>
    %494 = vector.extract_strided_slice %318 {offsets = [72, 0], sizes = [8, 32], strides = [1, 1]} : vector<128x32xf32> to vector<8x32xf32>
    %cst_225 = arith.constant 0.290322572 : f32
    %495 = vector.broadcast %cst_225 : f32 to vector<8x32xf32>
    %496 = arith.mulf %495, %493 : vector<8x32xf32>
    %cst_226 = arith.constant 0.709677398 : f32
    %497 = vector.broadcast %cst_226 : f32 to vector<8x32xf32>
    %498 = arith.mulf %497, %494 : vector<8x32xf32>
    %499 = arith.addf %496, %498 : vector<8x32xf32>
    %c1_227 = arith.constant 1 : index
    %c0_228 = arith.constant 0 : index
    %c576_229 = arith.constant 576 : index
    %500 = vector.load %arg15[%c1_227, %c0_228, %c576_229] : memref<2x16x1024xf32, #tpu.memory_space<vmem>>, vector<1x8x32xf32>
    %501 = vector.shape_cast %500 : vector<1x8x32xf32> to vector<8x32xf32>
    %502 = vector.shape_cast %499 : vector<8x32xf32> to vector<1x8x32xf32>
    tpu.vector_store %arg15[%c1_227, %c0_228, %c576_229], %502 {strides = array<i32>} : memref<2x16x1024xf32, #tpu.memory_space<vmem>>, vector<1x8x32xf32>,
    %503 = vector.extract_strided_slice %318 {offsets = [72, 0], sizes = [8, 32], strides = [1, 1]} : vector<128x32xf32> to vector<8x32xf32>
    %504 = vector.extract_strided_slice %318 {offsets = [80, 0], sizes = [8, 32], strides = [1, 1]} : vector<128x32xf32> to vector<8x32xf32>
    %cst_230 = arith.constant 0.806451618 : f32
    %505 = vector.broadcast %cst_230 : f32 to vector<8x32xf32>
    %506 = arith.mulf %505, %503 : vector<8x32xf32>
    %cst_231 = arith.constant 0.193548381 : f32
    %507 = vector.broadcast %cst_231 : f32 to vector<8x32xf32>
    %508 = arith.mulf %507, %504 : vector<8x32xf32>
    %509 = arith.addf %506, %508 : vector<8x32xf32>
    %c1_232 = arith.constant 1 : index
    %c0_233 = arith.constant 0 : index
    %c608_234 = arith.constant 608 : index
    %510 = vector.load %arg15[%c1_232, %c0_233, %c608_234] : memref<2x16x1024xf32, #tpu.memory_space<vmem>>, vector<1x8x32xf32>
    %511 = vector.shape_cast %510 : vector<1x8x32xf32> to vector<8x32xf32>
    %512 = vector.shape_cast %509 : vector<8x32xf32> to vector<1x8x32xf32>
    tpu.vector_store %arg15[%c1_232, %c0_233, %c608_234], %512 {strides = array<i32>} : memref<2x16x1024xf32, #tpu.memory_space<vmem>>, vector<1x8x32xf32>,
    %513 = vector.extract_strided_slice %318 {offsets = [72, 0], sizes = [8, 32], strides = [1, 1]} : vector<128x32xf32> to vector<8x32xf32>
    %514 = vector.extract_strided_slice %318 {offsets = [80, 0], sizes = [8, 32], strides = [1, 1]} : vector<128x32xf32> to vector<8x32xf32>
    %cst_235 = arith.constant 0.322580636 : f32
    %515 = vector.broadcast %cst_235 : f32 to vector<8x32xf32>
    %516 = arith.mulf %515, %513 : vector<8x32xf32>
    %cst_236 = arith.constant 0.677419364 : f32
    %517 = vector.broadcast %cst_236 : f32 to vector<8x32xf32>
    %518 = arith.mulf %517, %514 : vector<8x32xf32>
    %519 = arith.addf %516, %518 : vector<8x32xf32>
    %c1_237 = arith.constant 1 : index
    %c0_238 = arith.constant 0 : index
    %c640_239 = arith.constant 640 : index
    %520 = vector.load %arg15[%c1_237, %c0_238, %c640_239] : memref<2x16x1024xf32, #tpu.memory_space<vmem>>, vector<1x8x32xf32>
    %521 = vector.shape_cast %520 : vector<1x8x32xf32> to vector<8x32xf32>
    %522 = vector.shape_cast %519 : vector<8x32xf32> to vector<1x8x32xf32>
    tpu.vector_store %arg15[%c1_237, %c0_238, %c640_239], %522 {strides = array<i32>} : memref<2x16x1024xf32, #tpu.memory_space<vmem>>, vector<1x8x32xf32>,
    %523 = vector.extract_strided_slice %318 {offsets = [80, 0], sizes = [8, 32], strides = [1, 1]} : vector<128x32xf32> to vector<8x32xf32>
    %524 = vector.extract_strided_slice %318 {offsets = [88, 0], sizes = [8, 32], strides = [1, 1]} : vector<128x32xf32> to vector<8x32xf32>
    %cst_240 = arith.constant 0.838709652 : f32
    %525 = vector.broadcast %cst_240 : f32 to vector<8x32xf32>
    %526 = arith.mulf %525, %523 : vector<8x32xf32>
    %cst_241 = arith.constant 0.161290318 : f32
    %527 = vector.broadcast %cst_241 : f32 to vector<8x32xf32>
    %528 = arith.mulf %527, %524 : vector<8x32xf32>
    %529 = arith.addf %526, %528 : vector<8x32xf32>
    %c1_242 = arith.constant 1 : index
    %c0_243 = arith.constant 0 : index
    %c672_244 = arith.constant 672 : index
    %530 = vector.load %arg15[%c1_242, %c0_243, %c672_244] : memref<2x16x1024xf32, #tpu.memory_space<vmem>>, vector<1x8x32xf32>
    %531 = vector.shape_cast %530 : vector<1x8x32xf32> to vector<8x32xf32>
    %532 = vector.shape_cast %529 : vector<8x32xf32> to vector<1x8x32xf32>
    tpu.vector_store %arg15[%c1_242, %c0_243, %c672_244], %532 {strides = array<i32>} : memref<2x16x1024xf32, #tpu.memory_space<vmem>>, vector<1x8x32xf32>,
    %533 = vector.extract_strided_slice %318 {offsets = [80, 0], sizes = [8, 32], strides = [1, 1]} : vector<128x32xf32> to vector<8x32xf32>
    %534 = vector.extract_strided_slice %318 {offsets = [88, 0], sizes = [8, 32], strides = [1, 1]} : vector<128x32xf32> to vector<8x32xf32>
    %cst_245 = arith.constant 0.354838699 : f32
    %535 = vector.broadcast %cst_245 : f32 to vector<8x32xf32>
    %536 = arith.mulf %535, %533 : vector<8x32xf32>
    %cst_246 = arith.constant 0.645161271 : f32
    %537 = vector.broadcast %cst_246 : f32 to vector<8x32xf32>
    %538 = arith.mulf %537, %534 : vector<8x32xf32>
    %539 = arith.addf %536, %538 : vector<8x32xf32>
    %c1_247 = arith.constant 1 : index
    %c0_248 = arith.constant 0 : index
    %c704_249 = arith.constant 704 : index
    %540 = vector.load %arg15[%c1_247, %c0_248, %c704_249] : memref<2x16x1024xf32, #tpu.memory_space<vmem>>, vector<1x8x32xf32>
    %541 = vector.shape_cast %540 : vector<1x8x32xf32> to vector<8x32xf32>
    %542 = vector.shape_cast %539 : vector<8x32xf32> to vector<1x8x32xf32>
    tpu.vector_store %arg15[%c1_247, %c0_248, %c704_249], %542 {strides = array<i32>} : memref<2x16x1024xf32, #tpu.memory_space<vmem>>, vector<1x8x32xf32>,
    %543 = vector.extract_strided_slice %318 {offsets = [88, 0], sizes = [8, 32], strides = [1, 1]} : vector<128x32xf32> to vector<8x32xf32>
    %544 = vector.extract_strided_slice %318 {offsets = [96, 0], sizes = [8, 32], strides = [1, 1]} : vector<128x32xf32> to vector<8x32xf32>
    %cst_250 = arith.constant 0.870967745 : f32
    %545 = vector.broadcast %cst_250 : f32 to vector<8x32xf32>
    %546 = arith.mulf %545, %543 : vector<8x32xf32>
    %cst_251 = arith.constant 0.129032254 : f32
    %547 = vector.broadcast %cst_251 : f32 to vector<8x32xf32>
    %548 = arith.mulf %547, %544 : vector<8x32xf32>
    %549 = arith.addf %546, %548 : vector<8x32xf32>
    %c1_252 = arith.constant 1 : index
    %c0_253 = arith.constant 0 : index
    %c736_254 = arith.constant 736 : index
    %550 = vector.load %arg15[%c1_252, %c0_253, %c736_254] : memref<2x16x1024xf32, #tpu.memory_space<vmem>>, vector<1x8x32xf32>
    %551 = vector.shape_cast %550 : vector<1x8x32xf32> to vector<8x32xf32>
    %552 = vector.shape_cast %549 : vector<8x32xf32> to vector<1x8x32xf32>
    tpu.vector_store %arg15[%c1_252, %c0_253, %c736_254], %552 {strides = array<i32>} : memref<2x16x1024xf32, #tpu.memory_space<vmem>>, vector<1x8x32xf32>,
    %553 = vector.extract_strided_slice %318 {offsets = [88, 0], sizes = [8, 32], strides = [1, 1]} : vector<128x32xf32> to vector<8x32xf32>
    %554 = vector.extract_strided_slice %318 {offsets = [96, 0], sizes = [8, 32], strides = [1, 1]} : vector<128x32xf32> to vector<8x32xf32>
    %cst_255 = arith.constant 0.387096763 : f32
    %555 = vector.broadcast %cst_255 : f32 to vector<8x32xf32>
    %556 = arith.mulf %555, %553 : vector<8x32xf32>
    %cst_256 = arith.constant 0.612903237 : f32
    %557 = vector.broadcast %cst_256 : f32 to vector<8x32xf32>
    %558 = arith.mulf %557, %554 : vector<8x32xf32>
    %559 = arith.addf %556, %558 : vector<8x32xf32>
    %c1_257 = arith.constant 1 : index
    %c0_258 = arith.constant 0 : index
    %c768_259 = arith.constant 768 : index
    %560 = vector.load %arg15[%c1_257, %c0_258, %c768_259] : memref<2x16x1024xf32, #tpu.memory_space<vmem>>, vector<1x8x32xf32>
    %561 = vector.shape_cast %560 : vector<1x8x32xf32> to vector<8x32xf32>
    %562 = vector.shape_cast %559 : vector<8x32xf32> to vector<1x8x32xf32>
    tpu.vector_store %arg15[%c1_257, %c0_258, %c768_259], %562 {strides = array<i32>} : memref<2x16x1024xf32, #tpu.memory_space<vmem>>, vector<1x8x32xf32>,
    %563 = vector.extract_strided_slice %318 {offsets = [96, 0], sizes = [8, 32], strides = [1, 1]} : vector<128x32xf32> to vector<8x32xf32>
    %564 = vector.extract_strided_slice %318 {offsets = [104, 0], sizes = [8, 32], strides = [1, 1]} : vector<128x32xf32> to vector<8x32xf32>
    %cst_260 = arith.constant 0.903225779 : f32
    %565 = vector.broadcast %cst_260 : f32 to vector<8x32xf32>
    %566 = arith.mulf %565, %563 : vector<8x32xf32>
    %cst_261 = arith.constant 0.0967741906 : f32
    %567 = vector.broadcast %cst_261 : f32 to vector<8x32xf32>
    %568 = arith.mulf %567, %564 : vector<8x32xf32>
    %569 = arith.addf %566, %568 : vector<8x32xf32>
    %c1_262 = arith.constant 1 : index
    %c0_263 = arith.constant 0 : index
    %c800_264 = arith.constant 800 : index
    %570 = vector.load %arg15[%c1_262, %c0_263, %c800_264] : memref<2x16x1024xf32, #tpu.memory_space<vmem>>, vector<1x8x32xf32>
    %571 = vector.shape_cast %570 : vector<1x8x32xf32> to vector<8x32xf32>
    %572 = vector.shape_cast %569 : vector<8x32xf32> to vector<1x8x32xf32>
    tpu.vector_store %arg15[%c1_262, %c0_263, %c800_264], %572 {strides = array<i32>} : memref<2x16x1024xf32, #tpu.memory_space<vmem>>, vector<1x8x32xf32>,
    %573 = vector.extract_strided_slice %318 {offsets = [96, 0], sizes = [8, 32], strides = [1, 1]} : vector<128x32xf32> to vector<8x32xf32>
    %574 = vector.extract_strided_slice %318 {offsets = [104, 0], sizes = [8, 32], strides = [1, 1]} : vector<128x32xf32> to vector<8x32xf32>
    %cst_265 = arith.constant 0.419354826 : f32
    %575 = vector.broadcast %cst_265 : f32 to vector<8x32xf32>
    %576 = arith.mulf %575, %573 : vector<8x32xf32>
    %cst_266 = arith.constant 0.580645144 : f32
    %577 = vector.broadcast %cst_266 : f32 to vector<8x32xf32>
    %578 = arith.mulf %577, %574 : vector<8x32xf32>
    %579 = arith.addf %576, %578 : vector<8x32xf32>
    %c1_267 = arith.constant 1 : index
    %c0_268 = arith.constant 0 : index
    %c832_269 = arith.constant 832 : index
    %580 = vector.load %arg15[%c1_267, %c0_268, %c832_269] : memref<2x16x1024xf32, #tpu.memory_space<vmem>>, vector<1x8x32xf32>
    %581 = vector.shape_cast %580 : vector<1x8x32xf32> to vector<8x32xf32>
    %582 = vector.shape_cast %579 : vector<8x32xf32> to vector<1x8x32xf32>
    tpu.vector_store %arg15[%c1_267, %c0_268, %c832_269], %582 {strides = array<i32>} : memref<2x16x1024xf32, #tpu.memory_space<vmem>>, vector<1x8x32xf32>,
    %583 = vector.extract_strided_slice %318 {offsets = [104, 0], sizes = [8, 32], strides = [1, 1]} : vector<128x32xf32> to vector<8x32xf32>
    %584 = vector.extract_strided_slice %318 {offsets = [112, 0], sizes = [8, 32], strides = [1, 1]} : vector<128x32xf32> to vector<8x32xf32>
    %cst_270 = arith.constant 0.935483872 : f32
    %585 = vector.broadcast %cst_270 : f32 to vector<8x32xf32>
    %586 = arith.mulf %585, %583 : vector<8x32xf32>
    %cst_271 = arith.constant 0.0645161271 : f32
    %587 = vector.broadcast %cst_271 : f32 to vector<8x32xf32>
    %588 = arith.mulf %587, %584 : vector<8x32xf32>
    %589 = arith.addf %586, %588 : vector<8x32xf32>
    %c1_272 = arith.constant 1 : index
    %c0_273 = arith.constant 0 : index
    %c864_274 = arith.constant 864 : index
    %590 = vector.load %arg15[%c1_272, %c0_273, %c864_274] : memref<2x16x1024xf32, #tpu.memory_space<vmem>>, vector<1x8x32xf32>
    %591 = vector.shape_cast %590 : vector<1x8x32xf32> to vector<8x32xf32>
    %592 = vector.shape_cast %589 : vector<8x32xf32> to vector<1x8x32xf32>
    tpu.vector_store %arg15[%c1_272, %c0_273, %c864_274], %592 {strides = array<i32>} : memref<2x16x1024xf32, #tpu.memory_space<vmem>>, vector<1x8x32xf32>,
    %593 = vector.extract_strided_slice %318 {offsets = [104, 0], sizes = [8, 32], strides = [1, 1]} : vector<128x32xf32> to vector<8x32xf32>
    %594 = vector.extract_strided_slice %318 {offsets = [112, 0], sizes = [8, 32], strides = [1, 1]} : vector<128x32xf32> to vector<8x32xf32>
    %cst_275 = arith.constant 0.45161289 : f32
    %595 = vector.broadcast %cst_275 : f32 to vector<8x32xf32>
    %596 = arith.mulf %595, %593 : vector<8x32xf32>
    %cst_276 = arith.constant 0.54838711 : f32
    %597 = vector.broadcast %cst_276 : f32 to vector<8x32xf32>
    %598 = arith.mulf %597, %594 : vector<8x32xf32>
    %599 = arith.addf %596, %598 : vector<8x32xf32>
    %c1_277 = arith.constant 1 : index
    %c0_278 = arith.constant 0 : index
    %c896_279 = arith.constant 896 : index
    %600 = vector.load %arg15[%c1_277, %c0_278, %c896_279] : memref<2x16x1024xf32, #tpu.memory_space<vmem>>, vector<1x8x32xf32>
    %601 = vector.shape_cast %600 : vector<1x8x32xf32> to vector<8x32xf32>
    %602 = vector.shape_cast %599 : vector<8x32xf32> to vector<1x8x32xf32>
    tpu.vector_store %arg15[%c1_277, %c0_278, %c896_279], %602 {strides = array<i32>} : memref<2x16x1024xf32, #tpu.memory_space<vmem>>, vector<1x8x32xf32>,
    %603 = vector.extract_strided_slice %318 {offsets = [112, 0], sizes = [8, 32], strides = [1, 1]} : vector<128x32xf32> to vector<8x32xf32>
    %604 = vector.extract_strided_slice %318 {offsets = [120, 0], sizes = [8, 32], strides = [1, 1]} : vector<128x32xf32> to vector<8x32xf32>
    %cst_280 = arith.constant 0.967741906 : f32
    %605 = vector.broadcast %cst_280 : f32 to vector<8x32xf32>
    %606 = arith.mulf %605, %603 : vector<8x32xf32>
    %cst_281 = arith.constant 0.0322580636 : f32
    %607 = vector.broadcast %cst_281 : f32 to vector<8x32xf32>
    %608 = arith.mulf %607, %604 : vector<8x32xf32>
    %609 = arith.addf %606, %608 : vector<8x32xf32>
    %c1_282 = arith.constant 1 : index
    %c0_283 = arith.constant 0 : index
    %c928_284 = arith.constant 928 : index
    %610 = vector.load %arg15[%c1_282, %c0_283, %c928_284] : memref<2x16x1024xf32, #tpu.memory_space<vmem>>, vector<1x8x32xf32>
    %611 = vector.shape_cast %610 : vector<1x8x32xf32> to vector<8x32xf32>
    %612 = vector.shape_cast %609 : vector<8x32xf32> to vector<1x8x32xf32>
    tpu.vector_store %arg15[%c1_282, %c0_283, %c928_284], %612 {strides = array<i32>} : memref<2x16x1024xf32, #tpu.memory_space<vmem>>, vector<1x8x32xf32>,
    %613 = vector.extract_strided_slice %318 {offsets = [112, 0], sizes = [8, 32], strides = [1, 1]} : vector<128x32xf32> to vector<8x32xf32>
    %614 = vector.extract_strided_slice %318 {offsets = [120, 0], sizes = [8, 32], strides = [1, 1]} : vector<128x32xf32> to vector<8x32xf32>
    %cst_285 = arith.constant 0.483870953 : f32
    %615 = vector.broadcast %cst_285 : f32 to vector<8x32xf32>
    %616 = arith.mulf %615, %613 : vector<8x32xf32>
    %cst_286 = arith.constant 5.161290e-01 : f32
    %617 = vector.broadcast %cst_286 : f32 to vector<8x32xf32>
    %618 = arith.mulf %617, %614 : vector<8x32xf32>
    %619 = arith.addf %616, %618 : vector<8x32xf32>
    %c1_287 = arith.constant 1 : index
    %c0_288 = arith.constant 0 : index
    %c960_289 = arith.constant 960 : index
    %620 = vector.load %arg15[%c1_287, %c0_288, %c960_289] : memref<2x16x1024xf32, #tpu.memory_space<vmem>>, vector<1x8x32xf32>
    %621 = vector.shape_cast %620 : vector<1x8x32xf32> to vector<8x32xf32>
    %622 = vector.shape_cast %619 : vector<8x32xf32> to vector<1x8x32xf32>
    tpu.vector_store %arg15[%c1_287, %c0_288, %c960_289], %622 {strides = array<i32>} : memref<2x16x1024xf32, #tpu.memory_space<vmem>>, vector<1x8x32xf32>,
    %623 = vector.extract_strided_slice %318 {offsets = [120, 0], sizes = [8, 32], strides = [1, 1]} : vector<128x32xf32> to vector<8x32xf32>
    %c1_290 = arith.constant 1 : index
    %c0_291 = arith.constant 0 : index
    %c992_292 = arith.constant 992 : index
    %624 = vector.load %arg15[%c1_290, %c0_291, %c992_292] : memref<2x16x1024xf32, #tpu.memory_space<vmem>>, vector<1x8x32xf32>
    %625 = vector.shape_cast %624 : vector<1x8x32xf32> to vector<8x32xf32>
    %626 = vector.shape_cast %623 : vector<8x32xf32> to vector<1x8x32xf32>
    tpu.vector_store %arg15[%c1_290, %c0_291, %c992_292], %626 {strides = array<i32>} : memref<2x16x1024xf32, #tpu.memory_space<vmem>>, vector<1x8x32xf32>,
    %c0_293 = arith.constant 0 : index
    %c0_294 = arith.constant 0 : index
    %c0_295 = arith.constant 0 : index
    %627 = vector.load %arg15[%c0_293, %c0_294, %c0_295] : memref<2x16x1024xf32, #tpu.memory_space<vmem>>, vector<2x16x1024xf32>
    %c0_296 = arith.constant 0 : index
    %c0_297 = arith.constant 0 : index
    %628 = vector.load %arg3[%c0_296, %c0_297] : memref<8x1024xf32, #tpu.memory_space<vmem>>, vector<8x1024xf32>
    %629 = vector.shape_cast %628 : vector<8x1024xf32> to vector<8x1x1024xf32>
    %630 = vector.shape_cast %629 : vector<8x1x1024xf32> to vector<8x1x1024xf32>
    %631 = vector.broadcast %630 : vector<8x1x1024xf32> to vector<8x8x1024xf32>
    %cst_298 = arith.constant dense<0.000000e+00> : vector<2x16xf32>
    %632 = vector.multi_reduction <add>, %627, %cst_298 [2] : vector<2x16x1024xf32> to vector<2x16xf32>
    %633 = vector.shape_cast %632 : vector<2x16xf32> to vector<2x16x1xf32>
    %cst_299 = arith.constant 1.024000e+03 : f32
    %634 = vector.broadcast %cst_299 : f32 to vector<2x16x1xf32>
    %635 = arith.divf %633, %634 : vector<2x16x1xf32>
    %cst_300 = arith.constant dense<0.000000e+00> : vector<16x1xf32>
    %636 = vector.multi_reduction <add>, %635, %cst_300 [0] : vector<2x16x1xf32> to vector<16x1xf32>
    %637 = vector.shape_cast %636 : vector<16x1xf32> to vector<1x16x1xf32>
    %cst_301 = arith.constant 2.000000e+00 : f32
    %638 = vector.broadcast %cst_301 : f32 to vector<1x16x1xf32>
    %639 = arith.divf %637, %638 : vector<1x16x1xf32>
    %640 = arith.mulf %627, %627 : vector<2x16x1024xf32>
    %cst_302 = arith.constant dense<0.000000e+00> : vector<2x16xf32>
    %641 = vector.multi_reduction <add>, %640, %cst_302 [2] : vector<2x16x1024xf32> to vector<2x16xf32>
    %642 = vector.shape_cast %641 : vector<2x16xf32> to vector<2x16x1xf32>
    %cst_303 = arith.constant 1.024000e+03 : f32
    %643 = vector.broadcast %cst_303 : f32 to vector<2x16x1xf32>
    %644 = arith.divf %642, %643 : vector<2x16x1xf32>
    %cst_304 = arith.constant dense<0.000000e+00> : vector<16x1xf32>
    %645 = vector.multi_reduction <add>, %644, %cst_304 [0] : vector<2x16x1xf32> to vector<16x1xf32>
    %646 = vector.shape_cast %645 : vector<16x1xf32> to vector<1x16x1xf32>
    %cst_305 = arith.constant 2.000000e+00 : f32
    %647 = vector.broadcast %cst_305 : f32 to vector<1x16x1xf32>
    %648 = arith.divf %646, %647 : vector<1x16x1xf32>
    %649 = arith.mulf %639, %639 : vector<1x16x1xf32>
    %650 = arith.subf %648, %649 : vector<1x16x1xf32>
    %c0_306 = arith.constant 0 : index
    %c0_307 = arith.constant 0 : index
    %651 = vector.load %arg10[%c0_306, %c0_307] : memref<16x1xf32, #tpu.memory_space<vmem>>, vector<16x1xf32>
    %652 = vector.shape_cast %651 : vector<16x1xf32> to vector<1x16x1xf32>
    %cst_308 = arith.constant 9.99999974E-6 : f32
    %653 = vector.broadcast %cst_308 : f32 to vector<1x16x1xf32>
    %654 = arith.addf %650, %653 : vector<1x16x1xf32>
    %655 = math.rsqrt %654 : vector<1x16x1xf32>
    %656 = arith.mulf %652, %655 : vector<1x16x1xf32>
    %c0_309 = arith.constant 0 : index
    %c0_310 = arith.constant 0 : index
    %657 = vector.load %arg11[%c0_309, %c0_310] : memref<16x1xf32, #tpu.memory_space<vmem>>, vector<16x1xf32>
    %658 = vector.shape_cast %657 : vector<16x1xf32> to vector<1x16x1xf32>
    %659 = arith.mulf %639, %656 : vector<1x16x1xf32>
    %660 = arith.subf %658, %659 : vector<1x16x1xf32>
    %661 = vector.broadcast %656 : vector<1x16x1xf32> to vector<2x16x1024xf32>
    %662 = arith.mulf %627, %661 : vector<2x16x1024xf32>
    %663 = vector.broadcast %660 : vector<1x16x1xf32> to vector<2x16x1024xf32>
    %664 = arith.addf %662, %663 : vector<2x16x1024xf32>
    %cst_311 = arith.constant 0.000000e+00 : f32
    %665 = vector.broadcast %cst_311 : f32 to vector<2x16x1024xf32>
    %666 = arith.maximumf %664, %665 : vector<2x16x1024xf32>
    %c0_312 = arith.constant 0 : index
    %c0_313 = arith.constant 0 : index
    %667 = vector.load %arg5[%c0_312, %c0_313] : memref<8x1xf32, #tpu.memory_space<vmem>>, vector<8x1xf32>
    %c0_314 = arith.constant 0 : index
    %c0_315 = arith.constant 0 : index
    %668 = vector.load %arg4[%c0_314, %c0_315] : memref<72x16xbf16, #tpu.memory_space<vmem>>, vector<72x16xbf16>
    %669 = vector.extract_strided_slice %666 {offsets = [0, 0, 0], sizes = [1, 16, 1024], strides = [1, 1, 1]} : vector<2x16x1024xf32> to vector<1x16x1024xf32>
    %670 = vector.shape_cast %669 : vector<1x16x1024xf32> to vector<16x1024xf32>
    %671 = arith.truncf %670 : vector<16x1024xf32> to vector<16x1024xbf16>
    %cst_316 = arith.constant dense<0.000000e+00> : vector<72x1024xf32>
    %672 = tpu.matmul %668, %671, %cst_316 {dimension_numbers = #tpu.dot_dimension_numbers<[1], [0], [0], [1], [0, 0, 1, 1], [], []>} : vector<72x16xbf16>, vector<16x1024xbf16>, vector<72x1024xf32> -> vector<72x1024xf32>
    %673 = vector.extract_strided_slice %672 {offsets = [32, 0], sizes = [8, 1024], strides = [1, 1]} : vector<72x1024xf32> to vector<8x1024xf32>
    %674 = vector.extract_strided_slice %672 {offsets = [0, 0], sizes = [8, 1024], strides = [1, 1]} : vector<72x1024xf32> to vector<8x1024xf32>
    %c33_i32 = arith.constant 33 : i32
    %675 = tpu.dynamic_rotate %674 by %c33_i32 dim 1 : vector<8x1024xf32>, i32 -> vector<8x1024xf32>
    %676 = vector.extract_strided_slice %631 {offsets = [0, 0, 0], sizes = [1, 8, 1024], strides = [1, 1, 1]} : vector<8x8x1024xf32> to vector<1x8x1024xf32>
    %677 = vector.shape_cast %676 : vector<1x8x1024xf32> to vector<8x1024xf32>
    %678 = arith.mulf %675, %677 : vector<8x1024xf32>
    %679 = arith.addf %673, %678 : vector<8x1024xf32>
    %680 = vector.extract_strided_slice %672 {offsets = [8, 0], sizes = [8, 1024], strides = [1, 1]} : vector<72x1024xf32> to vector<8x1024xf32>
    %c32_i32 = arith.constant 32 : i32
    %681 = tpu.dynamic_rotate %680 by %c32_i32 dim 1 : vector<8x1024xf32>, i32 -> vector<8x1024xf32>
    %682 = vector.extract_strided_slice %631 {offsets = [1, 0, 0], sizes = [1, 8, 1024], strides = [1, 1, 1]} : vector<8x8x1024xf32> to vector<1x8x1024xf32>
    %683 = vector.shape_cast %682 : vector<1x8x1024xf32> to vector<8x1024xf32>
    %684 = arith.mulf %681, %683 : vector<8x1024xf32>
    %685 = arith.addf %679, %684 : vector<8x1024xf32>
    %686 = vector.extract_strided_slice %672 {offsets = [16, 0], sizes = [8, 1024], strides = [1, 1]} : vector<72x1024xf32> to vector<8x1024xf32>
    %c31_i32 = arith.constant 31 : i32
    %687 = tpu.dynamic_rotate %686 by %c31_i32 dim 1 : vector<8x1024xf32>, i32 -> vector<8x1024xf32>
    %688 = vector.extract_strided_slice %631 {offsets = [2, 0, 0], sizes = [1, 8, 1024], strides = [1, 1, 1]} : vector<8x8x1024xf32> to vector<1x8x1024xf32>
    %689 = vector.shape_cast %688 : vector<1x8x1024xf32> to vector<8x1024xf32>
    %690 = arith.mulf %687, %689 : vector<8x1024xf32>
    %691 = arith.addf %685, %690 : vector<8x1024xf32>
    %692 = vector.extract_strided_slice %672 {offsets = [24, 0], sizes = [8, 1024], strides = [1, 1]} : vector<72x1024xf32> to vector<8x1024xf32>
    %c1_i32 = arith.constant 1 : i32
    %693 = tpu.dynamic_rotate %692 by %c1_i32 dim 1 : vector<8x1024xf32>, i32 -> vector<8x1024xf32>
    %694 = vector.extract_strided_slice %631 {offsets = [3, 0, 0], sizes = [1, 8, 1024], strides = [1, 1, 1]} : vector<8x8x1024xf32> to vector<1x8x1024xf32>
    %695 = vector.shape_cast %694 : vector<1x8x1024xf32> to vector<8x1024xf32>
    %696 = arith.mulf %693, %695 : vector<8x1024xf32>
    %697 = arith.addf %691, %696 : vector<8x1024xf32>
    %698 = vector.extract_strided_slice %672 {offsets = [40, 0], sizes = [8, 1024], strides = [1, 1]} : vector<72x1024xf32> to vector<8x1024xf32>
    %c1023_i32 = arith.constant 1023 : i32
    %699 = tpu.dynamic_rotate %698 by %c1023_i32 dim 1 : vector<8x1024xf32>, i32 -> vector<8x1024xf32>
    %700 = vector.extract_strided_slice %631 {offsets = [4, 0, 0], sizes = [1, 8, 1024], strides = [1, 1, 1]} : vector<8x8x1024xf32> to vector<1x8x1024xf32>
    %701 = vector.shape_cast %700 : vector<1x8x1024xf32> to vector<8x1024xf32>
    %702 = arith.mulf %699, %701 : vector<8x1024xf32>
    %703 = arith.addf %697, %702 : vector<8x1024xf32>
    %704 = vector.extract_strided_slice %672 {offsets = [48, 0], sizes = [8, 1024], strides = [1, 1]} : vector<72x1024xf32> to vector<8x1024xf32>
    %c993_i32 = arith.constant 993 : i32
    %705 = tpu.dynamic_rotate %704 by %c993_i32 dim 1 : vector<8x1024xf32>, i32 -> vector<8x1024xf32>
    %706 = vector.extract_strided_slice %631 {offsets = [5, 0, 0], sizes = [1, 8, 1024], strides = [1, 1, 1]} : vector<8x8x1024xf32> to vector<1x8x1024xf32>
    %707 = vector.shape_cast %706 : vector<1x8x1024xf32> to vector<8x1024xf32>
    %708 = arith.mulf %705, %707 : vector<8x1024xf32>
    %709 = arith.addf %703, %708 : vector<8x1024xf32>
    %710 = vector.extract_strided_slice %672 {offsets = [56, 0], sizes = [8, 1024], strides = [1, 1]} : vector<72x1024xf32> to vector<8x1024xf32>
    %c992_i32 = arith.constant 992 : i32
    %711 = tpu.dynamic_rotate %710 by %c992_i32 dim 1 : vector<8x1024xf32>, i32 -> vector<8x1024xf32>
    %712 = vector.extract_strided_slice %631 {offsets = [6, 0, 0], sizes = [1, 8, 1024], strides = [1, 1, 1]} : vector<8x8x1024xf32> to vector<1x8x1024xf32>
    %713 = vector.shape_cast %712 : vector<1x8x1024xf32> to vector<8x1024xf32>
    %714 = arith.mulf %711, %713 : vector<8x1024xf32>
    %715 = arith.addf %709, %714 : vector<8x1024xf32>
    %716 = vector.extract_strided_slice %672 {offsets = [64, 0], sizes = [8, 1024], strides = [1, 1]} : vector<72x1024xf32> to vector<8x1024xf32>
    %c991_i32 = arith.constant 991 : i32
    %717 = tpu.dynamic_rotate %716 by %c991_i32 dim 1 : vector<8x1024xf32>, i32 -> vector<8x1024xf32>
    %718 = vector.extract_strided_slice %631 {offsets = [7, 0, 0], sizes = [1, 8, 1024], strides = [1, 1, 1]} : vector<8x8x1024xf32> to vector<1x8x1024xf32>
    %719 = vector.shape_cast %718 : vector<1x8x1024xf32> to vector<8x1024xf32>
    %720 = arith.mulf %717, %719 : vector<8x1024xf32>
    %721 = arith.addf %715, %720 : vector<8x1024xf32>
    %722 = vector.broadcast %667 : vector<8x1xf32> to vector<8x1024xf32>
    %723 = arith.addf %721, %722 : vector<8x1024xf32>
    %c0_317 = arith.constant 0 : index
    %c0_318 = arith.constant 0 : index
    %724 = vector.load %arg4[%c0_317, %c0_318] : memref<72x16xbf16, #tpu.memory_space<vmem>>, vector<72x16xbf16>
    %725 = vector.extract_strided_slice %666 {offsets = [1, 0, 0], sizes = [1, 16, 1024], strides = [1, 1, 1]} : vector<2x16x1024xf32> to vector<1x16x1024xf32>
    %726 = vector.shape_cast %725 : vector<1x16x1024xf32> to vector<16x1024xf32>
    %727 = arith.truncf %726 : vector<16x1024xf32> to vector<16x1024xbf16>
    %cst_319 = arith.constant dense<0.000000e+00> : vector<72x1024xf32>
    %728 = tpu.matmul %724, %727, %cst_319 {dimension_numbers = #tpu.dot_dimension_numbers<[1], [0], [0], [1], [0, 0, 1, 1], [], []>} : vector<72x16xbf16>, vector<16x1024xbf16>, vector<72x1024xf32> -> vector<72x1024xf32>
    %729 = vector.extract_strided_slice %728 {offsets = [32, 0], sizes = [8, 1024], strides = [1, 1]} : vector<72x1024xf32> to vector<8x1024xf32>
    %730 = vector.extract_strided_slice %728 {offsets = [0, 0], sizes = [8, 1024], strides = [1, 1]} : vector<72x1024xf32> to vector<8x1024xf32>
    %c33_i32_320 = arith.constant 33 : i32
    %731 = tpu.dynamic_rotate %730 by %c33_i32_320 dim 1 : vector<8x1024xf32>, i32 -> vector<8x1024xf32>
    %732 = vector.extract_strided_slice %631 {offsets = [0, 0, 0], sizes = [1, 8, 1024], strides = [1, 1, 1]} : vector<8x8x1024xf32> to vector<1x8x1024xf32>
    %733 = vector.shape_cast %732 : vector<1x8x1024xf32> to vector<8x1024xf32>
    %734 = arith.mulf %731, %733 : vector<8x1024xf32>
    %735 = arith.addf %729, %734 : vector<8x1024xf32>
    %736 = vector.extract_strided_slice %728 {offsets = [8, 0], sizes = [8, 1024], strides = [1, 1]} : vector<72x1024xf32> to vector<8x1024xf32>
    %c32_i32_321 = arith.constant 32 : i32
    %737 = tpu.dynamic_rotate %736 by %c32_i32_321 dim 1 : vector<8x1024xf32>, i32 -> vector<8x1024xf32>
    %738 = vector.extract_strided_slice %631 {offsets = [1, 0, 0], sizes = [1, 8, 1024], strides = [1, 1, 1]} : vector<8x8x1024xf32> to vector<1x8x1024xf32>
    %739 = vector.shape_cast %738 : vector<1x8x1024xf32> to vector<8x1024xf32>
    %740 = arith.mulf %737, %739 : vector<8x1024xf32>
    %741 = arith.addf %735, %740 : vector<8x1024xf32>
    %742 = vector.extract_strided_slice %728 {offsets = [16, 0], sizes = [8, 1024], strides = [1, 1]} : vector<72x1024xf32> to vector<8x1024xf32>
    %c31_i32_322 = arith.constant 31 : i32
    %743 = tpu.dynamic_rotate %742 by %c31_i32_322 dim 1 : vector<8x1024xf32>, i32 -> vector<8x1024xf32>
    %744 = vector.extract_strided_slice %631 {offsets = [2, 0, 0], sizes = [1, 8, 1024], strides = [1, 1, 1]} : vector<8x8x1024xf32> to vector<1x8x1024xf32>
    %745 = vector.shape_cast %744 : vector<1x8x1024xf32> to vector<8x1024xf32>
    %746 = arith.mulf %743, %745 : vector<8x1024xf32>
    %747 = arith.addf %741, %746 : vector<8x1024xf32>
    %748 = vector.extract_strided_slice %728 {offsets = [24, 0], sizes = [8, 1024], strides = [1, 1]} : vector<72x1024xf32> to vector<8x1024xf32>
    %c1_i32_323 = arith.constant 1 : i32
    %749 = tpu.dynamic_rotate %748 by %c1_i32_323 dim 1 : vector<8x1024xf32>, i32 -> vector<8x1024xf32>
    %750 = vector.extract_strided_slice %631 {offsets = [3, 0, 0], sizes = [1, 8, 1024], strides = [1, 1, 1]} : vector<8x8x1024xf32> to vector<1x8x1024xf32>
    %751 = vector.shape_cast %750 : vector<1x8x1024xf32> to vector<8x1024xf32>
    %752 = arith.mulf %749, %751 : vector<8x1024xf32>
    %753 = arith.addf %747, %752 : vector<8x1024xf32>
    %754 = vector.extract_strided_slice %728 {offsets = [40, 0], sizes = [8, 1024], strides = [1, 1]} : vector<72x1024xf32> to vector<8x1024xf32>
    %c1023_i32_324 = arith.constant 1023 : i32
    %755 = tpu.dynamic_rotate %754 by %c1023_i32_324 dim 1 : vector<8x1024xf32>, i32 -> vector<8x1024xf32>
    %756 = vector.extract_strided_slice %631 {offsets = [4, 0, 0], sizes = [1, 8, 1024], strides = [1, 1, 1]} : vector<8x8x1024xf32> to vector<1x8x1024xf32>
    %757 = vector.shape_cast %756 : vector<1x8x1024xf32> to vector<8x1024xf32>
    %758 = arith.mulf %755, %757 : vector<8x1024xf32>
    %759 = arith.addf %753, %758 : vector<8x1024xf32>
    %760 = vector.extract_strided_slice %728 {offsets = [48, 0], sizes = [8, 1024], strides = [1, 1]} : vector<72x1024xf32> to vector<8x1024xf32>
    %c993_i32_325 = arith.constant 993 : i32
    %761 = tpu.dynamic_rotate %760 by %c993_i32_325 dim 1 : vector<8x1024xf32>, i32 -> vector<8x1024xf32>
    %762 = vector.extract_strided_slice %631 {offsets = [5, 0, 0], sizes = [1, 8, 1024], strides = [1, 1, 1]} : vector<8x8x1024xf32> to vector<1x8x1024xf32>
    %763 = vector.shape_cast %762 : vector<1x8x1024xf32> to vector<8x1024xf32>
    %764 = arith.mulf %761, %763 : vector<8x1024xf32>
    %765 = arith.addf %759, %764 : vector<8x1024xf32>
    %766 = vector.extract_strided_slice %728 {offsets = [56, 0], sizes = [8, 1024], strides = [1, 1]} : vector<72x1024xf32> to vector<8x1024xf32>
    %c992_i32_326 = arith.constant 992 : i32
    %767 = tpu.dynamic_rotate %766 by %c992_i32_326 dim 1 : vector<8x1024xf32>, i32 -> vector<8x1024xf32>
    %768 = vector.extract_strided_slice %631 {offsets = [6, 0, 0], sizes = [1, 8, 1024], strides = [1, 1, 1]} : vector<8x8x1024xf32> to vector<1x8x1024xf32>
    %769 = vector.shape_cast %768 : vector<1x8x1024xf32> to vector<8x1024xf32>
    %770 = arith.mulf %767, %769 : vector<8x1024xf32>
    %771 = arith.addf %765, %770 : vector<8x1024xf32>
    %772 = vector.extract_strided_slice %728 {offsets = [64, 0], sizes = [8, 1024], strides = [1, 1]} : vector<72x1024xf32> to vector<8x1024xf32>
    %c991_i32_327 = arith.constant 991 : i32
    %773 = tpu.dynamic_rotate %772 by %c991_i32_327 dim 1 : vector<8x1024xf32>, i32 -> vector<8x1024xf32>
    %774 = vector.extract_strided_slice %631 {offsets = [7, 0, 0], sizes = [1, 8, 1024], strides = [1, 1, 1]} : vector<8x8x1024xf32> to vector<1x8x1024xf32>
    %775 = vector.shape_cast %774 : vector<1x8x1024xf32> to vector<8x1024xf32>
    %776 = arith.mulf %773, %775 : vector<8x1024xf32>
    %777 = arith.addf %771, %776 : vector<8x1024xf32>
    %778 = vector.broadcast %667 : vector<8x1xf32> to vector<8x1024xf32>
    %779 = arith.addf %777, %778 : vector<8x1024xf32>
    %780 = vector.shape_cast %723 : vector<8x1024xf32> to vector<1x8x1024xf32>
    %781 = vector.shape_cast %779 : vector<8x1024xf32> to vector<1x8x1024xf32>
    %782 = tpu.concatenate %780, %781 in 0 : vector<1x8x1024xf32>, vector<1x8x1024xf32> -> vector<2x8x1024xf32>
    %cst_328 = arith.constant dense<0.000000e+00> : vector<2x8xf32>
    %783 = vector.multi_reduction <add>, %782, %cst_328 [2] : vector<2x8x1024xf32> to vector<2x8xf32>
    %784 = vector.shape_cast %783 : vector<2x8xf32> to vector<2x8x1xf32>
    %cst_329 = arith.constant 1.024000e+03 : f32
    %785 = vector.broadcast %cst_329 : f32 to vector<2x8x1xf32>
    %786 = arith.divf %784, %785 : vector<2x8x1xf32>
    %cst_330 = arith.constant dense<0.000000e+00> : vector<8x1xf32>
    %787 = vector.multi_reduction <add>, %786, %cst_330 [0] : vector<2x8x1xf32> to vector<8x1xf32>
    %788 = vector.shape_cast %787 : vector<8x1xf32> to vector<1x8x1xf32>
    %cst_331 = arith.constant 2.000000e+00 : f32
    %789 = vector.broadcast %cst_331 : f32 to vector<1x8x1xf32>
    %790 = arith.divf %788, %789 : vector<1x8x1xf32>
    %791 = arith.mulf %782, %782 : vector<2x8x1024xf32>
    %cst_332 = arith.constant dense<0.000000e+00> : vector<2x8xf32>
    %792 = vector.multi_reduction <add>, %791, %cst_332 [2] : vector<2x8x1024xf32> to vector<2x8xf32>
    %793 = vector.shape_cast %792 : vector<2x8xf32> to vector<2x8x1xf32>
    %cst_333 = arith.constant 1.024000e+03 : f32
    %794 = vector.broadcast %cst_333 : f32 to vector<2x8x1xf32>
    %795 = arith.divf %793, %794 : vector<2x8x1xf32>
    %cst_334 = arith.constant dense<0.000000e+00> : vector<8x1xf32>
    %796 = vector.multi_reduction <add>, %795, %cst_334 [0] : vector<2x8x1xf32> to vector<8x1xf32>
    %797 = vector.shape_cast %796 : vector<8x1xf32> to vector<1x8x1xf32>
    %cst_335 = arith.constant 2.000000e+00 : f32
    %798 = vector.broadcast %cst_335 : f32 to vector<1x8x1xf32>
    %799 = arith.divf %797, %798 : vector<1x8x1xf32>
    %800 = arith.mulf %790, %790 : vector<1x8x1xf32>
    %801 = arith.subf %799, %800 : vector<1x8x1xf32>
    %c0_336 = arith.constant 0 : index
    %c0_337 = arith.constant 0 : index
    %802 = vector.load %arg12[%c0_336, %c0_337] : memref<8x1xf32, #tpu.memory_space<vmem>>, vector<8x1xf32>
    %803 = vector.shape_cast %802 : vector<8x1xf32> to vector<1x8x1xf32>
    %cst_338 = arith.constant 9.99999974E-6 : f32
    %804 = vector.broadcast %cst_338 : f32 to vector<1x8x1xf32>
    %805 = arith.addf %801, %804 : vector<1x8x1xf32>
    %806 = math.rsqrt %805 : vector<1x8x1xf32>
    %807 = arith.mulf %803, %806 : vector<1x8x1xf32>
    %c0_339 = arith.constant 0 : index
    %c0_340 = arith.constant 0 : index
    %808 = vector.load %arg13[%c0_339, %c0_340] : memref<8x1xf32, #tpu.memory_space<vmem>>, vector<8x1xf32>
    %809 = vector.shape_cast %808 : vector<8x1xf32> to vector<1x8x1xf32>
    %810 = arith.mulf %790, %807 : vector<1x8x1xf32>
    %811 = arith.subf %809, %810 : vector<1x8x1xf32>
    %812 = vector.broadcast %807 : vector<1x8x1xf32> to vector<2x8x1024xf32>
    %813 = arith.mulf %782, %812 : vector<2x8x1024xf32>
    %814 = vector.broadcast %811 : vector<1x8x1xf32> to vector<2x8x1024xf32>
    %815 = arith.addf %813, %814 : vector<2x8x1024xf32>
    %cst_341 = arith.constant 0.000000e+00 : f32
    %816 = vector.broadcast %cst_341 : f32 to vector<2x8x1024xf32>
    %817 = arith.maximumf %815, %816 : vector<2x8x1024xf32>
    %c0_342 = arith.constant 0 : index
    %c0_343 = arith.constant 0 : index
    %818 = vector.load %arg8[%c0_342, %c0_343] : memref<8x16xbf16, #tpu.memory_space<vmem>>, vector<8x16xbf16>
    %c0_344 = arith.constant 0 : index
    %c0_345 = arith.constant 0 : index
    %819 = vector.load %arg9[%c0_344, %c0_345] : memref<8x1xf32, #tpu.memory_space<vmem>>, vector<8x1xf32>
    %820 = vector.extract_strided_slice %627 {offsets = [0, 0, 0], sizes = [1, 16, 1024], strides = [1, 1, 1]} : vector<2x16x1024xf32> to vector<1x16x1024xf32>
    %821 = vector.shape_cast %820 : vector<1x16x1024xf32> to vector<16x1024xf32>
    %822 = arith.truncf %821 : vector<16x1024xf32> to vector<16x1024xbf16>
    %cst_346 = arith.constant dense<0.000000e+00> : vector<8x1024xf32>
    %823 = tpu.matmul %818, %822, %cst_346 {dimension_numbers = #tpu.dot_dimension_numbers<[1], [0], [0], [1], [0, 0, 1, 1], [], []>} : vector<8x16xbf16>, vector<16x1024xbf16>, vector<8x1024xf32> -> vector<8x1024xf32>
    %824 = vector.broadcast %819 : vector<8x1xf32> to vector<8x1024xf32>
    %825 = arith.addf %823, %824 : vector<8x1024xf32>
    %826 = vector.extract_strided_slice %627 {offsets = [1, 0, 0], sizes = [1, 16, 1024], strides = [1, 1, 1]} : vector<2x16x1024xf32> to vector<1x16x1024xf32>
    %827 = vector.shape_cast %826 : vector<1x16x1024xf32> to vector<16x1024xf32>
    %828 = arith.truncf %827 : vector<16x1024xf32> to vector<16x1024xbf16>
    %cst_347 = arith.constant dense<0.000000e+00> : vector<8x1024xf32>
    %829 = tpu.matmul %818, %828, %cst_347 {dimension_numbers = #tpu.dot_dimension_numbers<[1], [0], [0], [1], [0, 0, 1, 1], [], []>} : vector<8x16xbf16>, vector<16x1024xbf16>, vector<8x1024xf32> -> vector<8x1024xf32>
    %830 = vector.broadcast %819 : vector<8x1xf32> to vector<8x1024xf32>
    %831 = arith.addf %829, %830 : vector<8x1024xf32>
    %c0_348 = arith.constant 0 : index
    %c0_349 = arith.constant 0 : index
    %832 = vector.load %arg7[%c0_348, %c0_349] : memref<8x1xf32, #tpu.memory_space<vmem>>, vector<8x1xf32>
    %c0_350 = arith.constant 0 : index
    %c0_351 = arith.constant 0 : index
    %833 = vector.load %arg6[%c0_350, %c0_351] : memref<72x8xbf16, #tpu.memory_space<vmem>>, vector<72x8xbf16>
    %834 = vector.extract_strided_slice %817 {offsets = [0, 0, 0], sizes = [1, 8, 1024], strides = [1, 1, 1]} : vector<2x8x1024xf32> to vector<1x8x1024xf32>
    %835 = vector.shape_cast %834 : vector<1x8x1024xf32> to vector<8x1024xf32>
    %836 = arith.truncf %835 : vector<8x1024xf32> to vector<8x1024xbf16>
    %cst_352 = arith.constant dense<0.000000e+00> : vector<72x1024xf32>
    %837 = tpu.matmul %833, %836, %cst_352 {dimension_numbers = #tpu.dot_dimension_numbers<[1], [0], [0], [1], [0, 0, 1, 1], [], []>} : vector<72x8xbf16>, vector<8x1024xbf16>, vector<72x1024xf32> -> vector<72x1024xf32>
    %838 = vector.extract_strided_slice %837 {offsets = [32, 0], sizes = [8, 1024], strides = [1, 1]} : vector<72x1024xf32> to vector<8x1024xf32>
    %839 = arith.addf %838, %825 : vector<8x1024xf32>
    %840 = vector.extract_strided_slice %837 {offsets = [0, 0], sizes = [8, 1024], strides = [1, 1]} : vector<72x1024xf32> to vector<8x1024xf32>
    %c33_i32_353 = arith.constant 33 : i32
    %841 = tpu.dynamic_rotate %840 by %c33_i32_353 dim 1 : vector<8x1024xf32>, i32 -> vector<8x1024xf32>
    %842 = vector.extract_strided_slice %631 {offsets = [0, 0, 0], sizes = [1, 8, 1024], strides = [1, 1, 1]} : vector<8x8x1024xf32> to vector<1x8x1024xf32>
    %843 = vector.shape_cast %842 : vector<1x8x1024xf32> to vector<8x1024xf32>
    %844 = arith.mulf %841, %843 : vector<8x1024xf32>
    %845 = arith.addf %839, %844 : vector<8x1024xf32>
    %846 = vector.extract_strided_slice %837 {offsets = [8, 0], sizes = [8, 1024], strides = [1, 1]} : vector<72x1024xf32> to vector<8x1024xf32>
    %c32_i32_354 = arith.constant 32 : i32
    %847 = tpu.dynamic_rotate %846 by %c32_i32_354 dim 1 : vector<8x1024xf32>, i32 -> vector<8x1024xf32>
    %848 = vector.extract_strided_slice %631 {offsets = [1, 0, 0], sizes = [1, 8, 1024], strides = [1, 1, 1]} : vector<8x8x1024xf32> to vector<1x8x1024xf32>
    %849 = vector.shape_cast %848 : vector<1x8x1024xf32> to vector<8x1024xf32>
    %850 = arith.mulf %847, %849 : vector<8x1024xf32>
    %851 = arith.addf %845, %850 : vector<8x1024xf32>
    %852 = vector.extract_strided_slice %837 {offsets = [16, 0], sizes = [8, 1024], strides = [1, 1]} : vector<72x1024xf32> to vector<8x1024xf32>
    %c31_i32_355 = arith.constant 31 : i32
    %853 = tpu.dynamic_rotate %852 by %c31_i32_355 dim 1 : vector<8x1024xf32>, i32 -> vector<8x1024xf32>
    %854 = vector.extract_strided_slice %631 {offsets = [2, 0, 0], sizes = [1, 8, 1024], strides = [1, 1, 1]} : vector<8x8x1024xf32> to vector<1x8x1024xf32>
    %855 = vector.shape_cast %854 : vector<1x8x1024xf32> to vector<8x1024xf32>
    %856 = arith.mulf %853, %855 : vector<8x1024xf32>
    %857 = arith.addf %851, %856 : vector<8x1024xf32>
    %858 = vector.extract_strided_slice %837 {offsets = [24, 0], sizes = [8, 1024], strides = [1, 1]} : vector<72x1024xf32> to vector<8x1024xf32>
    %c1_i32_356 = arith.constant 1 : i32
    %859 = tpu.dynamic_rotate %858 by %c1_i32_356 dim 1 : vector<8x1024xf32>, i32 -> vector<8x1024xf32>
    %860 = vector.extract_strided_slice %631 {offsets = [3, 0, 0], sizes = [1, 8, 1024], strides = [1, 1, 1]} : vector<8x8x1024xf32> to vector<1x8x1024xf32>
    %861 = vector.shape_cast %860 : vector<1x8x1024xf32> to vector<8x1024xf32>
    %862 = arith.mulf %859, %861 : vector<8x1024xf32>
    %863 = arith.addf %857, %862 : vector<8x1024xf32>
    %864 = vector.extract_strided_slice %837 {offsets = [40, 0], sizes = [8, 1024], strides = [1, 1]} : vector<72x1024xf32> to vector<8x1024xf32>
    %c1023_i32_357 = arith.constant 1023 : i32
    %865 = tpu.dynamic_rotate %864 by %c1023_i32_357 dim 1 : vector<8x1024xf32>, i32 -> vector<8x1024xf32>
    %866 = vector.extract_strided_slice %631 {offsets = [4, 0, 0], sizes = [1, 8, 1024], strides = [1, 1, 1]} : vector<8x8x1024xf32> to vector<1x8x1024xf32>
    %867 = vector.shape_cast %866 : vector<1x8x1024xf32> to vector<8x1024xf32>
    %868 = arith.mulf %865, %867 : vector<8x1024xf32>
    %869 = arith.addf %863, %868 : vector<8x1024xf32>
    %870 = vector.extract_strided_slice %837 {offsets = [48, 0], sizes = [8, 1024], strides = [1, 1]} : vector<72x1024xf32> to vector<8x1024xf32>
    %c993_i32_358 = arith.constant 993 : i32
    %871 = tpu.dynamic_rotate %870 by %c993_i32_358 dim 1 : vector<8x1024xf32>, i32 -> vector<8x1024xf32>
    %872 = vector.extract_strided_slice %631 {offsets = [5, 0, 0], sizes = [1, 8, 1024], strides = [1, 1, 1]} : vector<8x8x1024xf32> to vector<1x8x1024xf32>
    %873 = vector.shape_cast %872 : vector<1x8x1024xf32> to vector<8x1024xf32>
    %874 = arith.mulf %871, %873 : vector<8x1024xf32>
    %875 = arith.addf %869, %874 : vector<8x1024xf32>
    %876 = vector.extract_strided_slice %837 {offsets = [56, 0], sizes = [8, 1024], strides = [1, 1]} : vector<72x1024xf32> to vector<8x1024xf32>
    %c992_i32_359 = arith.constant 992 : i32
    %877 = tpu.dynamic_rotate %876 by %c992_i32_359 dim 1 : vector<8x1024xf32>, i32 -> vector<8x1024xf32>
    %878 = vector.extract_strided_slice %631 {offsets = [6, 0, 0], sizes = [1, 8, 1024], strides = [1, 1, 1]} : vector<8x8x1024xf32> to vector<1x8x1024xf32>
    %879 = vector.shape_cast %878 : vector<1x8x1024xf32> to vector<8x1024xf32>
    %880 = arith.mulf %877, %879 : vector<8x1024xf32>
    %881 = arith.addf %875, %880 : vector<8x1024xf32>
    %882 = vector.extract_strided_slice %837 {offsets = [64, 0], sizes = [8, 1024], strides = [1, 1]} : vector<72x1024xf32> to vector<8x1024xf32>
    %c991_i32_360 = arith.constant 991 : i32
    %883 = tpu.dynamic_rotate %882 by %c991_i32_360 dim 1 : vector<8x1024xf32>, i32 -> vector<8x1024xf32>
    %884 = vector.extract_strided_slice %631 {offsets = [7, 0, 0], sizes = [1, 8, 1024], strides = [1, 1, 1]} : vector<8x8x1024xf32> to vector<1x8x1024xf32>
    %885 = vector.shape_cast %884 : vector<1x8x1024xf32> to vector<8x1024xf32>
    %886 = arith.mulf %883, %885 : vector<8x1024xf32>
    %887 = arith.addf %881, %886 : vector<8x1024xf32>
    %888 = vector.broadcast %832 : vector<8x1xf32> to vector<8x1024xf32>
    %889 = arith.addf %887, %888 : vector<8x1024xf32>
    %c0_361 = arith.constant 0 : index
    %c0_362 = arith.constant 0 : index
    %890 = vector.load %arg6[%c0_361, %c0_362] : memref<72x8xbf16, #tpu.memory_space<vmem>>, vector<72x8xbf16>
    %891 = vector.extract_strided_slice %817 {offsets = [1, 0, 0], sizes = [1, 8, 1024], strides = [1, 1, 1]} : vector<2x8x1024xf32> to vector<1x8x1024xf32>
    %892 = vector.shape_cast %891 : vector<1x8x1024xf32> to vector<8x1024xf32>
    %893 = arith.truncf %892 : vector<8x1024xf32> to vector<8x1024xbf16>
    %cst_363 = arith.constant dense<0.000000e+00> : vector<72x1024xf32>
    %894 = tpu.matmul %890, %893, %cst_363 {dimension_numbers = #tpu.dot_dimension_numbers<[1], [0], [0], [1], [0, 0, 1, 1], [], []>} : vector<72x8xbf16>, vector<8x1024xbf16>, vector<72x1024xf32> -> vector<72x1024xf32>
    %895 = vector.extract_strided_slice %894 {offsets = [32, 0], sizes = [8, 1024], strides = [1, 1]} : vector<72x1024xf32> to vector<8x1024xf32>
    %896 = arith.addf %895, %831 : vector<8x1024xf32>
    %897 = vector.extract_strided_slice %894 {offsets = [0, 0], sizes = [8, 1024], strides = [1, 1]} : vector<72x1024xf32> to vector<8x1024xf32>
    %c33_i32_364 = arith.constant 33 : i32
    %898 = tpu.dynamic_rotate %897 by %c33_i32_364 dim 1 : vector<8x1024xf32>, i32 -> vector<8x1024xf32>
    %899 = vector.extract_strided_slice %631 {offsets = [0, 0, 0], sizes = [1, 8, 1024], strides = [1, 1, 1]} : vector<8x8x1024xf32> to vector<1x8x1024xf32>
    %900 = vector.shape_cast %899 : vector<1x8x1024xf32> to vector<8x1024xf32>
    %901 = arith.mulf %898, %900 : vector<8x1024xf32>
    %902 = arith.addf %896, %901 : vector<8x1024xf32>
    %903 = vector.extract_strided_slice %894 {offsets = [8, 0], sizes = [8, 1024], strides = [1, 1]} : vector<72x1024xf32> to vector<8x1024xf32>
    %c32_i32_365 = arith.constant 32 : i32
    %904 = tpu.dynamic_rotate %903 by %c32_i32_365 dim 1 : vector<8x1024xf32>, i32 -> vector<8x1024xf32>
    %905 = vector.extract_strided_slice %631 {offsets = [1, 0, 0], sizes = [1, 8, 1024], strides = [1, 1, 1]} : vector<8x8x1024xf32> to vector<1x8x1024xf32>
    %906 = vector.shape_cast %905 : vector<1x8x1024xf32> to vector<8x1024xf32>
    %907 = arith.mulf %904, %906 : vector<8x1024xf32>
    %908 = arith.addf %902, %907 : vector<8x1024xf32>
    %909 = vector.extract_strided_slice %894 {offsets = [16, 0], sizes = [8, 1024], strides = [1, 1]} : vector<72x1024xf32> to vector<8x1024xf32>
    %c31_i32_366 = arith.constant 31 : i32
    %910 = tpu.dynamic_rotate %909 by %c31_i32_366 dim 1 : vector<8x1024xf32>, i32 -> vector<8x1024xf32>
    %911 = vector.extract_strided_slice %631 {offsets = [2, 0, 0], sizes = [1, 8, 1024], strides = [1, 1, 1]} : vector<8x8x1024xf32> to vector<1x8x1024xf32>
    %912 = vector.shape_cast %911 : vector<1x8x1024xf32> to vector<8x1024xf32>
    %913 = arith.mulf %910, %912 : vector<8x1024xf32>
    %914 = arith.addf %908, %913 : vector<8x1024xf32>
    %915 = vector.extract_strided_slice %894 {offsets = [24, 0], sizes = [8, 1024], strides = [1, 1]} : vector<72x1024xf32> to vector<8x1024xf32>
    %c1_i32_367 = arith.constant 1 : i32
    %916 = tpu.dynamic_rotate %915 by %c1_i32_367 dim 1 : vector<8x1024xf32>, i32 -> vector<8x1024xf32>
    %917 = vector.extract_strided_slice %631 {offsets = [3, 0, 0], sizes = [1, 8, 1024], strides = [1, 1, 1]} : vector<8x8x1024xf32> to vector<1x8x1024xf32>
    %918 = vector.shape_cast %917 : vector<1x8x1024xf32> to vector<8x1024xf32>
    %919 = arith.mulf %916, %918 : vector<8x1024xf32>
    %920 = arith.addf %914, %919 : vector<8x1024xf32>
    %921 = vector.extract_strided_slice %894 {offsets = [40, 0], sizes = [8, 1024], strides = [1, 1]} : vector<72x1024xf32> to vector<8x1024xf32>
    %c1023_i32_368 = arith.constant 1023 : i32
    %922 = tpu.dynamic_rotate %921 by %c1023_i32_368 dim 1 : vector<8x1024xf32>, i32 -> vector<8x1024xf32>
    %923 = vector.extract_strided_slice %631 {offsets = [4, 0, 0], sizes = [1, 8, 1024], strides = [1, 1, 1]} : vector<8x8x1024xf32> to vector<1x8x1024xf32>
    %924 = vector.shape_cast %923 : vector<1x8x1024xf32> to vector<8x1024xf32>
    %925 = arith.mulf %922, %924 : vector<8x1024xf32>
    %926 = arith.addf %920, %925 : vector<8x1024xf32>
    %927 = vector.extract_strided_slice %894 {offsets = [48, 0], sizes = [8, 1024], strides = [1, 1]} : vector<72x1024xf32> to vector<8x1024xf32>
    %c993_i32_369 = arith.constant 993 : i32
    %928 = tpu.dynamic_rotate %927 by %c993_i32_369 dim 1 : vector<8x1024xf32>, i32 -> vector<8x1024xf32>
    %929 = vector.extract_strided_slice %631 {offsets = [5, 0, 0], sizes = [1, 8, 1024], strides = [1, 1, 1]} : vector<8x8x1024xf32> to vector<1x8x1024xf32>
    %930 = vector.shape_cast %929 : vector<1x8x1024xf32> to vector<8x1024xf32>
    %931 = arith.mulf %928, %930 : vector<8x1024xf32>
    %932 = arith.addf %926, %931 : vector<8x1024xf32>
    %933 = vector.extract_strided_slice %894 {offsets = [56, 0], sizes = [8, 1024], strides = [1, 1]} : vector<72x1024xf32> to vector<8x1024xf32>
    %c992_i32_370 = arith.constant 992 : i32
    %934 = tpu.dynamic_rotate %933 by %c992_i32_370 dim 1 : vector<8x1024xf32>, i32 -> vector<8x1024xf32>
    %935 = vector.extract_strided_slice %631 {offsets = [6, 0, 0], sizes = [1, 8, 1024], strides = [1, 1, 1]} : vector<8x8x1024xf32> to vector<1x8x1024xf32>
    %936 = vector.shape_cast %935 : vector<1x8x1024xf32> to vector<8x1024xf32>
    %937 = arith.mulf %934, %936 : vector<8x1024xf32>
    %938 = arith.addf %932, %937 : vector<8x1024xf32>
    %939 = vector.extract_strided_slice %894 {offsets = [64, 0], sizes = [8, 1024], strides = [1, 1]} : vector<72x1024xf32> to vector<8x1024xf32>
    %c991_i32_371 = arith.constant 991 : i32
    %940 = tpu.dynamic_rotate %939 by %c991_i32_371 dim 1 : vector<8x1024xf32>, i32 -> vector<8x1024xf32>
    %941 = vector.extract_strided_slice %631 {offsets = [7, 0, 0], sizes = [1, 8, 1024], strides = [1, 1, 1]} : vector<8x8x1024xf32> to vector<1x8x1024xf32>
    %942 = vector.shape_cast %941 : vector<1x8x1024xf32> to vector<8x1024xf32>
    %943 = arith.mulf %940, %942 : vector<8x1024xf32>
    %944 = arith.addf %938, %943 : vector<8x1024xf32>
    %945 = vector.broadcast %832 : vector<8x1xf32> to vector<8x1024xf32>
    %946 = arith.addf %944, %945 : vector<8x1024xf32>
    %947 = vector.shape_cast %889 : vector<8x1024xf32> to vector<1x8x1024xf32>
    %948 = vector.shape_cast %946 : vector<8x1024xf32> to vector<1x8x1024xf32>
    %949 = tpu.concatenate %947, %948 in 0 : vector<1x8x1024xf32>, vector<1x8x1024xf32> -> vector<2x8x1024xf32>
    %c0_372 = arith.constant 0 : index
    %c0_373 = arith.constant 0 : index
    %c0_374 = arith.constant 0 : index
    %950 = vector.load %arg14[%c0_372, %c0_373, %c0_374] : memref<2x8x1024xf32, #tpu.memory_space<vmem>>, vector<2x8x1024xf32>
    tpu.vector_store %arg14[%c0_372, %c0_373, %c0_374], %949 {strides = array<i32>} : memref<2x8x1024xf32, #tpu.memory_space<vmem>>, vector<2x8x1024xf32>,
    return
  }
}

</mosaic_0001>

<bundles_post_ra>
// kernel: decoder_block_forward.1
= control target key start
LH: loop header
LB: loop body
LE: loop exit
PB: predicated region body
PF: predicated region fallthrough
CT: control target
= control target key end

     0   :  { %vm112_vm0 = vcmask 130048   ;;  %vm234_vm1 = vcmask 261120   ;;  %s4932_s27 = smov 64   ;;  %s4933_s28 = smov 96   ;;  %vm243_vm2 = vcmask 523520   ;;  %vm252_vm3 = vcmask 785920   ;;  %s9082_s2 = inlined_call_operand.vmem [shape: bf16[16,32], index: 2, kind: input, shape index: {}]   ;;  %s9083_s0 = inlined_call_operand.vmem [shape: f32[2,128,16], index: 0, kind: input, shape index: {}]   ;;  %s9084_s1 = inlined_call_operand.vmem [shape: f32[2,8,1024], index: 1, kind: input, shape index: {}]   ;;  %s9085_s10 = inlined_call_operand.vmem [shape: f32[16,1], index: 10, kind: input, shape index: {}]   ;;  %s9086_s11 = inlined_call_operand.vmem [shape: f32[16,1], index: 11, kind: input, shape index: {}]   ;;  %s9087_s5 = inlined_call_operand.vmem [shape: f32[8,1], index: 5, kind: input, shape index: {}]   ;;  %s9088_s4 = inlined_call_operand.vmem [shape: bf16[72,16], index: 4, kind: input, shape index: {}]   ;;  %s9089_s8 = inlined_call_operand.vmem [shape: bf16[8,16], index: 8, kind: input, shape index: {}]   ;;  %s9090_s3 = inlined_call_operand.vmem [shape: f32[8,1024], index: 3, kind: input, shape index: {}]   ;;  %s9091_s12 = inlined_call_operand.vmem [shape: f32[8,1], index: 12, kind: input, shape index: {}]   ;;  %s9092_s13 = inlined_call_operand.vmem [shape: f32[8,1], index: 13, kind: input, shape index: {}]   ;;  %s9093_s7 = inlined_call_operand.vmem [shape: f32[8,1], index: 7, kind: input, shape index: {}]   ;;  %s9094_s9 = inlined_call_operand.vmem [shape: f32[8,1], index: 9, kind: input, shape index: {}]   ;;  %s9095_s6 = inlined_call_operand.vmem [shape: bf16[72,8], index: 6, kind: input, shape index: {}]   ;;  %s9096_s14 = inlined_call_operand.vmem [shape: f32[2,8,1024], index: 14, kind: output, shape index: {}]  }
   0x1   :  { %v4901_v0 = vld [vmem:[%s9082_s2] sm:$0xff]   ;;  %v83_v2 = vld [vmem:[%s9083_s0 + $0x8] sm:$0xff]  ;;  %v84_v6 = vld [vmem:[%s9083_s0 + $0x10] sm:$0xff]  ;;  %vm261_vm4 = vcmask 1048320   ;;  %s4937_s15 = smov 1   ;;  %s4938_s16 = smov 127  }
   0x2   :  { %v82_v1 = vld [vmem:[%s9083_s0] sm:$0xff]  ;;  %4853 = vmatprep.subr.bf16.mxu0 %v4901_v0  ;;  %4871 = vmatprep.subr.bf16.mxu1 %v4901_v0  ;;  %v4706_v5 = vld [vmem:[%s9083_s0 + $0x88] sm:$0xff]  ;;  %v85_v7 = vld [vmem:[%s9083_s0 + $0x18] sm:$0xff]  ;;  %s4939_s17 = smov 97   ;;  %s4940_s18 = smov 95   ;;  %vm3294_vm13 = vcmask 1043456  }
   0x3   :  { %v4705_v3 = vld [vmem:[%s9083_s0 + $0x80] sm:$0xff]  ;;  %v98_v4 = vpack.c.bf16 %v83_v2, %v82_v1  ;;  %4854 = vmatpush3.bf16.msra.mxu0 %v4901_v0  ;;  %4872 = vmatpush3.bf16.msra.mxu1 %v4901_v0  ;;  %v99_v9 = vpack.c.bf16 %v85_v7, %v84_v6  ;;  %v4707_v10 = vld [vmem:[%s9083_s0 + $0x90] sm:$0xff]  ;;  %v4708_v11 = vld [vmem:[%s9083_s0 + $0x98] sm:$0xff]  ;;  %vm3278_vm14 = vcmask 64512  }
   0x4   :  { %v473_v8 = vpack.c.bf16 %v4706_v5, %v4705_v3  ;;  %v86_v12 = vld [vmem:[%s9083_s0 + $0x20] sm:$0xff]  ;;  %v474_v13 = vpack.c.bf16 %v4708_v11, %v4707_v10  ;;  %v87_v14 = vld [vmem:[%s9083_s0 + $0x28] sm:$0xff]  ;;  %v88_v19 = vld [vmem:[%s9083_s0 + $0x30] sm:$0xff] }
   0x5   :  { %4855 = vmatprep.mubr.msk.bf16.mxu0 %vm112_vm0, %v98_v4  ;;  %v4709_v15 = vld [vmem:[%s9083_s0 + $0xa0] sm:$0xff]  ;;  %v4710_v16 = vld [vmem:[%s9083_s0 + $0xa8] sm:$0xff]  ;;  %v100_v17 = vpack.c.bf16 %v87_v14, %v86_v12  ;;  %v89_v20 = vld [vmem:[%s9083_s0 + $0x38] sm:$0xff] }
   0x6   :  { %4873 = vmatprep.mubr.msk.bf16.mxu1 %vm112_vm0, %v473_v8  ;;  %v475_v18 = vpack.c.bf16 %v4710_v16, %v4709_v15  ;;  %4856 = vmatmul.mubr.msk.bf16.vlgmr.msra.gmra.mxu0 %vm112_vm0, %v99_v9  ;;  %v4711_v21 = vld [vmem:[%s9083_s0 + $0xb0] sm:$0xff]  ;;  %v4712_v22 = vld [vmem:[%s9083_s0 + $0xb8] sm:$0xff]  ;;  %v4713_v23 = vld [vmem:[%s9083_s0 + $0xc0] sm:$0xff]  ;;  %v101_v27 = vpack.c.bf16 %v89_v20, %v88_v19 }
   0x7   :  { %4874 = vmatmul.mubr.msk.bf16.vlgmr.msra.gmra.mxu1 %vm112_vm0, %v474_v13  ;;  %4859 = vmatprep.mubr.msk.bf16.mxu0 %vm112_vm0, %v100_v17  ;;  %v4714_v24 = vld [vmem:[%s9083_s0 + $0xc8] sm:$0xff]  ;;  %v90_v25 = vld [vmem:[%s9083_s0 + $0x40] sm:$0xff]  ;;  %v476_v28 = vpack.c.bf16 %v4712_v22, %v4711_v21  ;;  %v4715_v31 = vld [vmem:[%s9083_s0 + $0xd0] sm:$0xff] }
   0x8   :  { %4877 = vmatprep.mubr.msk.bf16.mxu1 %vm112_vm0, %v475_v18  ;;  %v91_v26 = vld [vmem:[%s9083_s0 + $0x48] sm:$0xff]  ;;  %v477_v29 = vpack.c.bf16 %v4714_v24, %v4713_v23  ;;  %v4716_v32 = vld [vmem:[%s9083_s0 + $0xd8] sm:$0xff]  ;;  %v92_v33 = vld [vmem:[%s9083_s0 + $0x50] sm:$0xff] }
   0x9   :  { %v102_v30 = vpack.c.bf16 %v91_v26, %v90_v25  ;;  %v93_v34 = vld [vmem:[%s9083_s0 + $0x58] sm:$0xff]  ;;  %v94_v35 = vld [vmem:[%s9083_s0 + $0x60] sm:$0xff]  ;;  %v95_v36 = vld [vmem:[%s9083_s0 + $0x68] sm:$0xff]  ;;  %v478_v39 = vpack.c.bf16 %v4716_v32, %v4715_v31 }
   0xa   :  { %v4717_v37 = vld [vmem:[%s9083_s0 + $0xe0] sm:$0xff]  ;;  %v4718_v38 = vld [vmem:[%s9083_s0 + $0xe8] sm:$0xff]  ;;  %v103_v40 = vpack.c.bf16 %v93_v34, %v92_v33  ;;  %v104_v41 = vpack.c.bf16 %v95_v36, %v94_v35  ;;  %v96_v43 = vld [vmem:[%s9083_s0 + $0x70] sm:$0xff] }
   0xb   :  { %v479_v42 = vpack.c.bf16 %v4718_v38, %v4717_v37  ;;  %v97_v44 = vld [vmem:[%s9083_s0 + $0x78] sm:$0xff]  ;;  %v4719_v45 = vld [vmem:[%s9083_s0 + $0xf0] sm:$0xff] }
   0xc   :  { %v4720_v46 = vld [vmem:[%s9083_s0 + $0xf8] sm:$0xff]  ;;  %v105_v47 = vpack.c.bf16 %v97_v44, %v96_v43  ;;  %s4931_s0 = smov 32  }
   0xd   :  { %v480_v48 = vpack.c.bf16 %v4720_v46, %v4719_v45 }
   0xe   :  { %4860 = vmatmul.mubr.msk.bf16.gmra.mxu0 %vm112_vm0, %v101_v27 }
   0xf   :  { %4878 = vmatmul.mubr.msk.bf16.gmra.mxu1 %vm112_vm0, %v476_v28  ;;  %4863 = vmatprep.mubr.msk.bf16.mxu0 %vm112_vm0, %v102_v30 }
  0x10   :  { %4881 = vmatprep.mubr.msk.bf16.mxu1 %vm112_vm0, %v477_v29 }
  0x16   :  { %4864 = vmatmul.mubr.msk.bf16.gmra.mxu0 %vm112_vm0, %v103_v40 }
  0x17   :  { %4882 = vmatmul.mubr.msk.bf16.gmra.mxu1 %vm112_vm0, %v478_v39  ;;  %4867 = vmatprep.mubr.msk.bf16.mxu0 %vm112_vm0, %v104_v41 }
  0x18   :  { %4885 = vmatprep.mubr.msk.bf16.mxu1 %vm112_vm0, %v479_v42 }
  0x1e   :  { %4868 = vmatmul.mubr.msk.bf16.gmra.mxu0 %vm112_vm0, %v105_v47 }
  0x1f   :  { %4886 = vmatmul.mubr.msk.bf16.gmra.mxu1 %vm112_vm0, %v480_v48 }
  0xc6   :  { %v5131_v49 = vpop.f32.mrf.mxu0 }
  0xc7   :  { %v5133_v50 = vpop.f32.mrf.mxu1  ;;  %v267_v62 = vmul.f32 0.58064514, %v5131_v49  ;;  %v275_v5 = vmul.f32 0.09677419, %v5131_v49  ;;  %v255_v35 = vmul.f32 0.4516129, %v5131_v49 }
  0xc8   :  { %v171_v51 = vpop.f32.mrf.mxu0  ;;  %v632_v55 = vmul.f32 0.58064514, %v5133_v50  ;;  %v640_v9 = vmul.f32 0.09677419, %v5133_v50  ;;  %v621_v33 = vmul.f32 0.4516129, %v5133_v50 }
  0xc9   :  { %v539_v52 = vpop.f32.mrf.mxu1  ;;  %235 = vst.msk [vmem:[#allocation2] sm:$0xff] %vm234_vm1, %v171_v51  ;;  %v236_v6 = vmul.f32 0.516129, %v171_v51  ;;  %v245_v16 = vmul.f32 0.032258064, %v171_v51 }
  0xca   :  { %603 = vst.msk [vmem:[#allocation2 + $0x80] sm:$0xff] %vm234_vm1, %v539_v52  ;;  %v5137_v53 = vpop.f32.mrf.mxu0  ;;  %v604_v23 = vmul.f32 0.516129, %v539_v52  ;;  %v612_v25 = vmul.f32 0.032258064, %v539_v52 }
  0xcb   :  { %v5139_v54 = vpop.f32.mrf.mxu1  ;;  %v268_v59 = vmul.f32 0.41935483, %v5137_v53  ;;  %v276_v63 = vmul.f32 0.9032258, %v5137_v53  ;;  %v291_v26 = vmul.f32 0.12903225, %v5137_v53 }
  0xcc   :  { %v5142_v56 = vpop.f32.mrf.mxu0  ;;  %v633_v58 = vmul.f32 0.41935483, %v5139_v54  ;;  %v641_v10 = vmul.f32 0.9032258, %v5139_v54  ;;  %v283_v42 = vmul.f32 0.61290324, %v5137_v53 }
  0xcd   :  { %v5144_v57 = vpop.f32.mrf.mxu1  ;;  %v269_v1 = vadd.f32 %v268_v59, %v267_v62  ;;  %v237_v4 = vmul.f32 0.48387095, %v5142_v56  ;;  %v277_v11 = vadd.f32 %v276_v63, %v275_v5  ;;  %v246_v13 = vmul.f32 0.9677419, %v5142_v56 }
  0xce   :  { %v5148_v60 = vpop.f32.mrf.mxu0  ;;  %v634_v0 = vadd.f32 %v633_v58, %v632_v55  ;;  %v642_v17 = vadd.f32 %v641_v10, %v640_v9  ;;  %v605_v18 = vmul.f32 0.48387095, %v5144_v57  ;;  %v613_v21 = vmul.f32 0.9677419, %v5144_v57 }
  0xcf   :  { %v5150_v61 = vpop.f32.mrf.mxu1  ;;  %271 = vrot.lane.b32.xlu0 %v269_v1, %s4931_s0  ;;  %v238_v12 = vadd.f32 %v237_v4, %v236_v6  ;;  %v247_v20 = vadd.f32 %v246_v13, %v245_v16  ;;  %v620_v30 = vmul.f32 0.5483871, %v5144_v57  ;;  %v254_v31 = vmul.f32 0.5483871, %v5142_v56 }
  0xd0   :  { %v5154_v2 = vpop.f32.mrf.mxu0  ;;  %636 = vrot.lane.b32.xlu1 %v634_v0, %s4931_s0  ;;  %v606_v27 = vadd.f32 %v605_v18, %v604_v23  ;;  %v614_v28 = vadd.f32 %v613_v21, %v612_v25  ;;  %v648_v43 = vmul.f32 0.61290324, %v5139_v54  ;;  %v323_v45 = vmul.f32 0.7096774, %v5148_v60 }
  0xd1   :  { %v5156_v3 = vpop.f32.mrf.mxu1  ;;  %v292_v19 = vmul.f32 0.87096775, %v5154_v2  ;;  %v284_v37 = vmul.f32 0.38709676, %v5154_v2  ;;  %v622_v38 = vadd.f32 %v621_v33, %v620_v30  ;;  %v256_v41 = vadd.f32 %v255_v35, %v254_v31 }
  0xd2   :  { %v5164_v8 = vpop.f32.mrf.mxu0  ;;  %v649_v40 = vmul.f32 0.38709676, %v5156_v3  ;;  %v331_v51 = vmul.f32 0.22580644, %v5148_v60  ;;  %v5215_v55 = vmul.f32 0.9354839, %v5131_v49 }
  0xd3   :  { %v5162_v7 = vpop.f32.mrf.mxu1  ;;  %240 = vrot.lane.b32.xlu0 %v238_v12, %s4931_s0  ;;  %v293_v32 = vadd.f32 %v292_v19, %v291_v26  ;;  %v324_v46 = vmul.f32 0.29032257, %v5164_v8  ;;  %v285_v47 = vadd.f32 %v284_v37, %v283_v42  ;;  %v332_v52 = vmul.f32 0.7741935, %v5164_v8 }
  0xd4   :  { %v5169_v14 = vpop.f32.mrf.mxu0  ;;  %279 = vrot.lane.b32.xlu1 %v277_v11, %s4932_s27  ;;  %v650_v53 = vadd.f32 %v649_v40, %v648_v43  ;;  %v629_v58 = vmul.f32 0.9354839, %v5133_v50  ;;  %v656_v59 = vmul.f32 0.12903225, %v5139_v54  ;;  %v312_v62 = vmul.f32 0.32258064, %v5148_v60 }
  0xd5   :  { %v5172_v15 = vpop.f32.mrf.mxu1  ;;  %294 = vst.msk [vmem:[#allocation2 + $0x10] sm:$0xff] %vm234_vm1, %v293_v32  ;;  %v5222_v63 = vmul.f32 0.8064516, %v5148_v60  ;;  %v5225_v0 = vmul.f32 0.32258064, %v5150_v61  ;;  %v325_v4 = vadd.f32 %v324_v46, %v323_v45  ;;  %v333_v9 = vadd.f32 %v332_v52, %v331_v51 }
  0xd6   :  { %v5178_v22 = vpop.f32.mrf.mxu0  ;;  %v685_v49 = vmul.f32 0.8064516, %v5150_v61  ;;  %v688_v50 = vmul.f32 0.7096774, %v5150_v61  ;;  %v689_v54 = vmul.f32 0.29032257, %v5162_v7 }
  0xd7   :  { %v5181_v24 = vpop.f32.mrf.mxu1  ;;  %249 = vrot.lane.b32.xlu0 %v247_v20, %s4932_s27  ;;  %v696_v6 = vmul.f32 0.22580644, %v5150_v61  ;;  %v295_v60 = vmul.f32 0.6451613, %v5154_v2  ;;  %v296_v10 = vmul.f32 0.3548387, %v5169_v14 }
  0xd8   :  { %644 = vrot.lane.b32.xlu1 %v642_v17, %s4932_s27  ;;  %v5185_v29 = vpop.f32.mrf.mxu0  ;;  %v303_v11 = vmul.f32 0.16129032, %v5154_v2  ;;  %v657_v12 = vmul.f32 0.87096775, %v5156_v3  ;;  %v697_v13 = vmul.f32 0.7741935, %v5162_v7  ;;  %v690_v20 = vadd.f32 %v689_v54, %v688_v50 }
  0xd9   :  { %v5191_v34 = vpop.f32.mrf.mxu1  ;;  %v660_v16 = vmul.f32 0.6451613, %v5156_v3  ;;  %v5244_v17 = vmul.f32 0.16129032, %v5156_v3  ;;  %v304_v61 = vmul.f32 0.83870965, %v5169_v14  ;;  %v297_v26 = vadd.f32 %v296_v10, %v295_v60 }
  0xda   :  { %v5195_v36 = vpop.f32.mrf.mxu0  ;;  %v712_v19 = vmul.f32 0.2580645, %v5162_v7  ;;  %v347_v2 = vmul.f32 0.2580645, %v5164_v8  ;;  %v661_v21 = vmul.f32 0.3548387, %v5172_v15  ;;  %v698_v33 = vadd.f32 %v697_v13, %v696_v6 }
  0xdb   :  { %616 = vrot.lane.b32.xlu0 %v614_v28, %s4932_s27  ;;  %v5199_v39 = vpop.f32.mrf.mxu1  ;;  %v741_v25 = vmul.f32 0.67741936, %v5181_v24  ;;  %v376_v3 = vmul.f32 0.67741936, %v5178_v22  ;;  %v713_v30 = vmul.f32 0.7419355, %v5191_v34  ;;  %v305_v37 = vadd.f32 %v304_v61, %v303_v11 }
  0xdc   :  { %608 = vrot.lane.b32.xlu1 %v606_v27, %s4931_s0  ;;  %v5206_v44 = vpop.f32.mrf.mxu0  ;;  %v311_v27 = vmul.f32 0.67741936, %v5169_v14  ;;  %v348_v31 = vmul.f32 0.7419355, %v5185_v29  ;;  %v403_v32 = vmul.f32 0.38709676, %v5195_v36  ;;  %v662_v42 = vadd.f32 %v661_v21, %v660_v16 }
  0xdd   :  { %v5210_v48 = vpop.f32.mrf.mxu1  ;;  %v768_v40 = vmul.f32 0.38709676, %v5199_v39  ;;  %v628_v46 = vmul.f32 0.06451613, %v5144_v57  ;;  %v669_v51 = vmul.f32 0.83870965, %v5172_v15 }
  0xde   :  { %v5228_v1 = vpop.f32.mrf.mxu0  ;;  %v676_v52 = vmul.f32 0.67741936, %v5172_v15  ;;  %v263_v50 = vmul.f32 0.06451613, %v5142_v56  ;;  %v319_v57 = vmul.f32 0.19354838, %v5169_v14 }
  0xdf   :  { %258 = vrot.lane.b32.xlu0 %v256_v41, %s4933_s28  ;;  %v5233_v5 = vpop.f32.mrf.mxu1  ;;  %v658_v41 = vadd.f32 %v657_v12, %v656_v59  ;;  %v375_v60 = vmul.f32 0.32258064, %v5206_v44  ;;  %v740_v56 = vmul.f32 0.32258064, %v5210_v48  ;;  %v714_v12 = vadd.f32 %v713_v30, %v712_v19 }
  0xe0   :  { %624 = vrot.lane.b32.xlu1 %v622_v38, %s4933_s28  ;;  %v5248_v18 = vpop.f32.mrf.mxu0  ;;  %v432_v38 = vmul.f32 0.5483871, %v5228_v1  ;;  %v797_v45 = vmul.f32 0.5483871, %v5233_v5  ;;  %v265_v6 = vadd.f32 %v5215_v55, %v263_v50  ;;  %v321_v10 = vadd.f32 %v5222_v63, %v319_v57 }
  0xe1   :  { %v5253_v23 = vpop.f32.mrf.mxu1  ;;  %v404_v43 = vmul.f32 0.61290324, %v5248_v18  ;;  %659 = vst.msk [vmem:[#allocation2 + $0x90] sm:$0xff] %vm234_vm1, %v658_v41  ;;  %v377_v14 = vadd.f32 %v376_v3, %v375_v60  ;;  %715 = vst.msk [vmem:[#allocation2 + $0xa0] sm:$0xff] %vm234_vm1, %v714_v12  ;;  %v379_v61 = vmul.f32 0.83870965, %v5178_v22 }
  0xe2   :  { %v5258_v28 = vpop.f32.mrf.mxu0  ;;  %v769_v59 = vmul.f32 0.61290324, %v5253_v23  ;;  %266 = vst.msk [vmem:[#allocation2 + $0x8] sm:$0xff] %vm234_vm1, %v265_v6  ;;  %322 = vst.msk [vmem:[#allocation2 + $0x18] sm:$0xff] %vm234_vm1, %v321_v10  ;;  %v380_v19 = vmul.f32 0.16129032, %v5195_v36 }
  0xe3   :  { %652 = vrot.lane.b32.xlu0 %v650_v53, %s4933_s28  ;;  %v5264_v35 = vpop.f32.mrf.mxu1  ;;  %v405_v13 = vadd.f32 %v404_v43, %v403_v32  ;;  %378 = vst.msk [vmem:[#allocation2 + $0x28] sm:$0xff] %vm234_vm1, %v377_v14  ;;  %v340_v21 = vmul.f32 0.2580645, %v5185_v29  ;;  %v744_v3 = vmul.f32 0.83870965, %v5181_v24  ;;  %v5338_v41 = vld [vmem:[%s9084_s1 + $0x48] sm:$0xff] }
  0xe4   :  { %287 = vrot.lane.b32.xlu1 %v285_v47, %s4933_s28  ;;  %v313_v47 = vadd.f32 %v312_v62, %v311_v27  ;;  %v5274_v53 = vpop.f32.mrf.mxu0  ;;  %v684_v62 = vmul.f32 0.19354838, %v5172_v15  ;;  %v742_v15 = vadd.f32 %v741_v25, %v740_v56  ;;  %v678_v25 = vadd.f32 %v5225_v0, %v676_v52  ;;  %v5320_v0 = vld [vmem:[%s9084_s1 + $0x40] sm:$0xff]  ;;  %73 = vst [vmem:[#allocation2 + $0xc8] sm:$0xff] %v5338_v41 }
  0xe5   :  { %v5280_v54 = vpop.f32.mrf.mxu1  ;;  %406 = vst.msk [vmem:[#allocation2 + $0x30] sm:$0xff] %vm234_vm1, %v405_v13  ;;  %v704_v27 = vmul.f32 0.7419355, %v5162_v7  ;;  %v705_v30 = vmul.f32 0.2580645, %v5191_v34  ;;  %72 = vst [vmem:[#allocation2 + $0xc0] sm:$0xff] %v5320_v0 }
  0xe6   :  { %v686_v11 = vadd.f32 %v685_v49, %v684_v62  ;;  %v796_v55 = vmul.f32 0.4516129, %v5280_v54  ;;  %v770_v49 = vadd.f32 %v769_v59, %v768_v40  ;;  %743 = vst.msk [vmem:[#allocation2 + $0xa8] sm:$0xff] %vm234_vm1, %v742_v15  ;;  %v752_v7 = vmul.f32 0.3548387, %v5181_v24 }
  0xe7   :  { %335 = vrot.lane.b32.xlu0 %v333_v9, %s4932_s27  ;;  %v349_v9 = vadd.f32 %v348_v31, %v347_v2  ;;  %v670_v2 = vadd.f32 %v669_v51, %v5244_v17  ;;  %v745_v17 = vmul.f32 0.16129032, %v5199_v39  ;;  %v5325_v31 = vld [vmem:[%s9084_s1] sm:$0xff]  ;;  %v753_v32 = vmul.f32 0.6451613, %v5199_v39 }
  0xe8   :  { %327 = vrot.lane.b32.xlu1 %v325_v4, %s4931_s0  ;;  %v630_v4 = vadd.f32 %v629_v58, %v628_v46  ;;  %v431_v58 = vmul.f32 0.4516129, %v5274_v53  ;;  %687 = vst.msk [vmem:[#allocation2 + $0x98] sm:$0xff] %vm234_vm1, %v686_v11  ;;  %v798_v16 = vadd.f32 %v797_v45, %v796_v55  ;;  %771 = vst.msk [vmem:[#allocation2 + $0xb0] sm:$0xff] %vm234_vm1, %v770_v49  ;;  %v351_v43 = vmul.f32 0.7741935, %v5185_v29 }
  0xe9   :  { %350 = vst.msk [vmem:[#allocation2 + $0x20] sm:$0xff] %vm234_vm1, %v349_v9  ;;  %64 = vst [vmem:[#allocation2 + $0x40] sm:$0xff] %v5325_v31  ;;  %v706_v40 = vadd.f32 %v705_v30, %v704_v27  ;;  %v754_v45 = vadd.f32 %v753_v32, %v752_v7  ;;  %v352_v46 = vmul.f32 0.22580644, %v5206_v44  ;;  %v360_v52 = vmul.f32 0.7096774, %v5206_v44 }
  0xea   :  { %631 = vst.msk [vmem:[#allocation2 + $0x88] sm:$0xff] %vm234_vm1, %v630_v4  ;;  %v433_v63 = vadd.f32 %v432_v38, %v431_v58  ;;  %799 = vst.msk [vmem:[#allocation2 + $0xb8] sm:$0xff] %vm234_vm1, %v798_v16  ;;  %v388_v38 = vmul.f32 0.6451613, %v5195_v36  ;;  %v716_v50 = vmul.f32 0.7741935, %v5191_v34 }
  0xeb   :  { %299 = vrot.lane.b32.xlu0 %v297_v26, %s4931_s0  ;;  %v381_v26 = vadd.f32 %v380_v19, %v379_v61  ;;  %v353_v59 = vadd.f32 %v352_v46, %v351_v43  ;;  %v717_v4 = vmul.f32 0.22580644, %v5210_v48  ;;  %v368_v57 = vmul.f32 0.19354838, %v5178_v22  ;;  %v5387_v49 = vld [vmem:[%s9084_s1 + $0x50] sm:$0xff]  ;;  %v5427_v43 = vld [vmem:[%s9084_s1 + $0x68] sm:$0xff] }
  0xec   :  { %692 = vrot.lane.b32.xlu1 %v690_v20, %s4931_s0  ;;  %434 = vst.msk [vmem:[#allocation2 + $0x38] sm:$0xff] %vm234_vm1, %v433_v63  ;;  %v339_v20 = vmul.f32 0.7419355, %v5164_v8  ;;  %v367_v6 = vmul.f32 0.8064516, %v5206_v44  ;;  %74 = vst [vmem:[#allocation2 + $0xd0] sm:$0xff] %v5387_v49 }
  0xed   :  { %v718_v60 = vadd.f32 %v717_v4, %v716_v50  ;;  %v725_v56 = vmul.f32 0.7096774, %v5210_v48  ;;  %v733_v9 = vmul.f32 0.19354838, %v5181_v24  ;;  %v732_v11 = vmul.f32 0.8064516, %v5210_v48 }
  0xee   :  { %v341_v8 = vadd.f32 %v340_v21, %v339_v20  ;;  %v369_v10 = vadd.f32 %v368_v57, %v367_v6  ;;  %v436_v44 = vmul.f32 0.032258064, %v5258_v28  ;;  %v395_v58 = vmul.f32 0.87096775, %v5195_v36  ;;  %v5374_v24 = vld [vmem:[%s9084_s1 + $0x10] sm:$0xff]  ;;  %v5398_v21 = vld [vmem:[%s9084_s1 + $0x18] sm:$0xff] }
  0xef   :  { %307 = vrot.lane.b32.xlu0 %v305_v37, %s4932_s27  ;;  %v387_v37 = vmul.f32 0.3548387, %v5178_v22  ;;  %v435_v22 = vmul.f32 0.9677419, %v5228_v1  ;;  %v734_v14 = vadd.f32 %v733_v9, %v732_v11  ;;  %66 = vst [vmem:[#allocation2 + $0x50] sm:$0xff] %v5374_v24  ;;  %77 = vst [vmem:[#allocation2 + $0xe8] sm:$0xff] %v5427_v43  ;;  %v918_v11 = vmul.f32 %v5398_v21, %v5398_v21 }
  0xf0   :  { %700 = vrot.lane.b32.xlu1 %v698_v33, %s4932_s27  ;;  %v746_v33 = vadd.f32 %v745_v17, %v744_v3  ;;  %v800_v48 = vmul.f32 0.9677419, %v5233_v5  ;;  %v801_v15 = vmul.f32 0.032258064, %v5264_v35  ;;  %v760_v36 = vmul.f32 0.87096775, %v5199_v39 }
  0xf1   :  { %v389_v51 = vadd.f32 %v388_v38, %v387_v37  ;;  %v437_v55 = vadd.f32 %v436_v44, %v435_v22  ;;  %v761_v13 = vmul.f32 0.12903225, %v5253_v23  ;;  %v808_v16 = vmul.f32 0.48387095, %v5233_v5  ;;  %v5451_v46 = vld [vmem:[%s9084_s1 + $0x28] sm:$0xff]  ;;  %v5459_v50 = vld [vmem:[%s9084_s1 + $0x30] sm:$0xff] }
  0xf2   :  { %v809_v61 = vmul.f32 0.516129, %v5264_v35  ;;  %v802_v19 = vadd.f32 %v801_v15, %v800_v48  ;;  %v443_v39 = vmul.f32 0.48387095, %v5228_v1  ;;  %v408_v17 = vmul.f32 0.09677419, %v5274_v53 }
  0xf3   :  { %315 = vrot.lane.b32.xlu0 %v313_v47, %s4933_s28  ;;  %v359_v47 = vmul.f32 0.29032257, %v5185_v29  ;;  %v724_v29 = vmul.f32 0.29032257, %v5191_v34  ;;  %v396_v34 = vmul.f32 0.12903225, %v5248_v18  ;;  %v762_v20 = vadd.f32 %v761_v13, %v760_v36 }
  0xf4   :  { %664 = vrot.lane.b32.xlu1 %v662_v42, %s4931_s0  ;;  %v5343_v42 = vld [vmem:[%s9084_s1 + $0x8] sm:$0xff]  ;;  %v810_v3 = vadd.f32 %v809_v61, %v808_v16  ;;  %v416_v30 = vmul.f32 0.58064514, %v5274_v53  ;;  %v772_v7 = vmul.f32 0.9032258, %v5253_v23  ;;  %70 = vst [vmem:[#allocation2 + $0x70] sm:$0xff] %v5459_v50  ;;  %v920_v15 = vmul.f32 %v5451_v46, %v5451_v46 }
  0xf5   :  { %65 = vst [vmem:[#allocation2 + $0x48] sm:$0xff] %v5343_v42  ;;  %v361_v62 = vadd.f32 %v360_v52, %v359_v47  ;;  %v726_v12 = vadd.f32 %v725_v56, %v724_v29  ;;  %v397_v63 = vadd.f32 %v396_v34, %v395_v58  ;;  %v423_v38 = vmul.f32 0.9354839, %v5274_v53  ;;  %v5446_v53 = vld [vmem:[%s9084_s1 + $0x20] sm:$0xff] }
  0xf6   :  { %v780_v47 = vmul.f32 0.41935483, %v5253_v23  ;;  %v781_v52 = vmul.f32 0.58064514, %v5280_v54  ;;  %68 = vst [vmem:[#allocation2 + $0x60] sm:$0xff] %v5446_v53  ;;  %v916_v29 = vmul.f32 %v5343_v42, %v5343_v42  ;;  %v870_v56 = vadd.f32 %v5343_v42, %v5325_v31 }
  0xf7   :  { %680 = vrot.lane.b32.xlu0 %v678_v25, %s4933_s28  ;;  %v407_v25 = vmul.f32 0.9032258, %v5248_v18  ;;  %v789_v4 = vmul.f32 0.06451613, %v5233_v5  ;;  %v788_v57 = vmul.f32 0.9354839, %v5280_v54  ;;  %v888_v5 = vadd.f32 %v5338_v41, %v5320_v0 }
  0xf8   :  { %672 = vrot.lane.b32.xlu1 %v670_v2, %s4932_s27  ;;  %v444_v2 = vmul.f32 0.516129, %v5258_v28  ;;  %v919_v58 = vmul.f32 %v5446_v53, %v5446_v53  ;;  %v921_v61 = vmul.f32 %v5459_v50, %v5459_v50 }
  0xf9   :  { %v409_v32 = vadd.f32 %v408_v17, %v407_v25  ;;  %v790_v6 = vadd.f32 %v789_v4, %v788_v57 }
  0xfa   :  { %v445_v27 = vadd.f32 %v444_v2, %v443_v39 }
  0xfb   :  { %343 = vrot.lane.b32.xlu0 %v341_v8, %s4933_s28  ;;  %v5409_v8 = vld [vmem:[%s9084_s1 + $0x58] sm:$0xff] }
  0xfc   :  { %383 = vrot.lane.b32.xlu1 %v381_v26, %s4931_s0  ;;  %v415_v26 = vmul.f32 0.41935483, %v5248_v18  ;;  %75 = vst [vmem:[#allocation2 + $0xd8] sm:$0xff] %v5409_v8  ;;  %v424_v18 = vmul.f32 0.06451613, %v5228_v1  ;;  %v5438_v1 = vld [vmem:[%s9084_s1 + $0x78] sm:$0xff] }
  0xfd   :  { %79 = vst [vmem:[#allocation2 + $0xf8] sm:$0xff] %v5438_v1 }
  0xfe   :  { %v417_v37 = vadd.f32 %v416_v30, %v415_v26  ;;  %v425_v23 = vadd.f32 %v424_v18, %v423_v38 }
  0xff   :  { %708 = vrot.lane.b32.xlu0 %v706_v40, %s4933_s28  ;;  %v5422_v40 = vld [vmem:[%s9084_s1 + $0x60] sm:$0xff] }
 0x100   :  { %748 = vrot.lane.b32.xlu1 %v746_v33, %s4931_s0  ;;  %v773_v33 = vmul.f32 0.09677419, %v5280_v54  ;;  %76 = vst [vmem:[#allocation2 + $0xe0] sm:$0xff] %v5422_v40  ;;  %v915_v54 = vmul.f32 %v5325_v31, %v5325_v31 }
 0x102   :  { %v948_v9 = vadd.f32 %v916_v29, %v915_v54 }
 0x103   :  { %391 = vrot.lane.b32.xlu0 %v389_v51, %s4932_s27  ;;  %v774_v51 = vadd.f32 %v773_v33, %v772_v7 }
 0x104   :  { %756 = vrot.lane.b32.xlu1 %v754_v45, %s4932_s27  ;;  %v5432_v45 = vld [vmem:[%s9084_s1 + $0x70] sm:$0xff] }
 0x105   :  { %78 = vst [vmem:[#allocation2 + $0xf0] sm:$0xff] %v5432_v45 }
 0x107   :  { %363 = vrot.lane.b32.xlu0 %v361_v62, %s4932_s27  ;;  %v782_v62 = vadd.f32 %v781_v52, %v780_v47 }
 0x108   :  { %355 = vrot.lane.b32.xlu1 %v353_v59, %s4931_s0  ;;  %v5464_v59 = vld [vmem:[%s9084_s1 + $0x38] sm:$0xff] }
 0x10b   :  { %371 = vrot.lane.b32.xlu0 %v369_v10, %s4933_s28  ;;  %v871_v10 = vadd.f32 %v870_v56, %v5374_v24 }
 0x10c   :  { %720 = vrot.lane.b32.xlu1 %v718_v60, %s4931_s0  ;;  %v889_v60 = vadd.f32 %v888_v5, %v5387_v49 }
 0x10f   :  { %736 = vrot.lane.b32.xlu0 %v734_v14, %s4933_s28 }
 0x110   :  { %728 = vrot.lane.b32.xlu1 %v726_v12, %s4932_s27  ;;  %v872_v12 = vadd.f32 %v871_v10, %v5398_v21 }
 0x112   :  { %v873_v48 = vadd.f32 %v872_v12, %v5446_v53 }
 0x113   :  { %399 = vrot.lane.b32.xlu0 %v397_v63, %s4933_s28 }
 0x114   :  { %439 = vrot.lane.b32.xlu1 %v437_v55, %s4931_s0  ;;  %v874_v16 = vadd.f32 %v873_v48, %v5451_v46 }
 0x116   :  { %v875_v25 = vadd.f32 %v874_v16, %v5459_v50  ;;  %v932_v16 = vmul.f32 %v5338_v41, %v5338_v41 }
 0x117   :  { %764 = vrot.lane.b32.xlu0 %v762_v20, %s4933_s28 }
 0x118   :  { %804 = vrot.lane.b32.xlu1 %v802_v19, %s4931_s0  ;;  %v876_v30 = vadd.f32 %v875_v25, %v5464_v59 }
 0x11b   :  { %447 = vrot.lane.b32.xlu0 %v445_v27, %s4932_s27 }
 0x11c   :  { %812 = vrot.lane.b32.xlu1 %v810_v3, %s4932_s27  ;;  %v922_v3 = vmul.f32 %v5464_v59, %v5464_v59 }
 0x11f   :  { %419 = vrot.lane.b32.xlu0 %v417_v37, %s4932_s27 }
 0x120   :  { %411 = vrot.lane.b32.xlu1 %v409_v32, %s4931_s0 }
 0x123   :  { %427 = vrot.lane.b32.xlu0 %v425_v23, %s4933_s28 }
 0x124   :  { %776 = vrot.lane.b32.xlu1 %v774_v51, %s4931_s0 }
 0x127   :  { %792 = vrot.lane.b32.xlu0 %v790_v6, %s4933_s28 }
 0x128   :  { %784 = vrot.lane.b32.xlu1 %v782_v62, %s4932_s27  ;;  %s4936_s27 = smov 31  }
 0x12b   :  { %452 = vrot.lane.b32.xlu0 %v5258_v28, %s4933_s28  ;;  %v890_v28 = vadd.f32 %v889_v60, %v5409_v8 }
 0x12c   :  { %817 = vrot.lane.b32.xlu1 %v5264_v35, %s4933_s28  ;;  %v917_v35 = vmul.f32 %v5374_v24, %v5374_v24 }
 0x12d   :  { %v891_v44 = vadd.f32 %v890_v28, %v5422_v40 }
 0x12e   :  { %v949_v22 = vadd.f32 %v948_v9, %v917_v35 }
 0x12f   :  { %v892_v14 = vadd.f32 %v891_v44, %v5427_v43 }
 0x130   :  { %v950_v34 = vadd.f32 %v949_v22, %v918_v11 }
 0x131   :  { %v893_v63 = vadd.f32 %v892_v14, %v5432_v45 }
 0x132   :  { %v951_v55 = vadd.f32 %v950_v34, %v919_v58 }
 0x133   :  { %v894_v20 = vadd.f32 %v893_v63, %v5438_v1  ;;  %v931_v63 = vmul.f32 %v5320_v0, %v5320_v0 }
 0x134   :  { %v952_v19 = vadd.f32 %v951_v55, %v920_v15 }
 0x136   :  { %v953_v17 = vadd.f32 %v952_v19, %v921_v61 }
 0x138   :  { %v954_v7 = vadd.f32 %v953_v17, %v922_v3 }
 0x141   :  { %v272_v13 = vpop.permute.xlu0 %271 }
 0x142   :  { %v637_v36 = vpop.permute.xlu1 %636  ;;  %274 = vst.msk [vmem:[#allocation2 + $0x8] sm:$0xff] %vm243_vm2, %v272_v13 }
 0x143   :  { %639 = vst.msk [vmem:[#allocation2 + $0x88] sm:$0xff] %vm243_vm2, %v637_v36 }
 0x145   :  { %v241_v2 = vpop.permute.xlu0 %240 }
 0x146   :  { %v280_v39 = vpop.permute.xlu1 %279  ;;  %244 = vst.msk [vmem:[#allocation2] sm:$0xff] %vm243_vm2, %v241_v2  ;;  %v966_v2 = vadd.f32 %v932_v16, %v931_v63  ;;  %v936_v63 = vmul.f32 %v5427_v43, %v5427_v43 }
 0x147   :  { %282 = vst.msk [vmem:[#allocation2 + $0x8] sm:$0xff] %vm252_vm3, %v280_v39  ;;  %v933_v39 = vmul.f32 %v5387_v49, %v5387_v49 }
 0x149   :  { %v250_v27 = vpop.permute.xlu0 %249 }
 0x14a   :  { %v645_v26 = vpop.permute.xlu1 %644  ;;  %253 = vst.msk [vmem:[#allocation2] sm:$0xff] %vm252_vm3, %v250_v27  ;;  %895 = vadd.xlane.f32.xlu0 %v894_v20 }
 0x14b   :  { %647 = vst.msk [vmem:[#allocation2 + $0x88] sm:$0xff] %vm252_vm3, %v645_v26 }
 0x14d   :  { %v617_v33 = vpop.permute.xlu0 %616 }
 0x14e   :  { %v609_v32 = vpop.permute.xlu1 %608  ;;  %955 = vadd.xlane.f32.xlu0 %v954_v7  ;;  %v967_v7 = vadd.f32 %v966_v2, %v933_v39 }
 0x14f   :  { %611 = vst.msk [vmem:[#allocation2 + $0x80] sm:$0xff] %vm243_vm2, %v609_v32 }
 0x150   :  { %619 = vst.msk [vmem:[#allocation2 + $0x80] sm:$0xff] %vm252_vm3, %v617_v33  ;;  %877 = vadd.xlane.f32.xlu1 %v876_v30  ;;  %v934_v30 = vmul.f32 %v5409_v8, %v5409_v8 }
 0x151   :  { %v259_v37 = vpop.permute.xlu0 %258 }
 0x152   :  { %v625_v18 = vpop.permute.xlu1 %624  ;;  %262 = vst.msk [vmem:[#allocation2] sm:$0xff] %vm261_vm4, %v259_v37 }
 0x153   :  { %627 = vst.msk [vmem:[#allocation2 + $0x80] sm:$0xff] %vm261_vm4, %v625_v18 }
 0x155   :  { %v653_v47 = vpop.permute.xlu0 %652 }
 0x156   :  { %v288_v38 = vpop.permute.xlu1 %287  ;;  %655 = vst.msk [vmem:[#allocation2 + $0x88] sm:$0xff] %vm261_vm4, %v653_v47 }
 0x157   :  { %290 = vst.msk [vmem:[#allocation2 + $0x8] sm:$0xff] %vm261_vm4, %v288_v38 }
 0x159   :  { %v336_v52 = vpop.permute.xlu0 %335  ;;  %v5564_v26 = vld [vmem:[#allocation2] sm:$0xff] }
 0x15a   :  { %v328_v51 = vpop.permute.xlu1 %327  ;;  %v5572_v18 = vld [vmem:[#allocation2 + $0x80] sm:$0xff] }
 0x15b   :  { %330 = vst.msk [vmem:[#allocation2 + $0x18] sm:$0xff] %vm243_vm2, %v328_v51 }
 0x15c   :  { %338 = vst.msk [vmem:[#allocation2 + $0x18] sm:$0xff] %vm252_vm3, %v336_v52 }
 0x15d   :  { %v300_v23 = vpop.permute.xlu0 %299  ;;  %v5562_v17 = vld [vmem:[#allocation2 + $0x88] sm:$0xff] }
 0x15e   :  { %v693_v4 = vpop.permute.xlu1 %692  ;;  %302 = vst.msk [vmem:[#allocation2 + $0x10] sm:$0xff] %vm243_vm2, %v300_v23  ;;  %v5559_v3 = vld [vmem:[#allocation2 + $0x8] sm:$0xff]  ;;  %v924_v51 = vmul.f32 %v5562_v17, %v5562_v17 }
 0x15f   :  { %695 = vst.msk [vmem:[#allocation2 + $0x98] sm:$0xff] %vm243_vm2, %v693_v4  ;;  %v908_v33 = vmul.f32 %v5559_v3, %v5559_v3  ;;  %v861_v52 = vadd.f32 %v5559_v3, %v5564_v26  ;;  %v907_v4 = vmul.f32 %v5564_v26, %v5564_v26 }
 0x161   :  { %v308_v62 = vpop.permute.xlu0 %307 }
 0x162   :  { %v701_v57 = vpop.permute.xlu1 %700  ;;  %310 = vst.msk [vmem:[#allocation2 + $0x10] sm:$0xff] %vm252_vm3, %v308_v62 }
 0x163   :  { %703 = vst.msk [vmem:[#allocation2 + $0x98] sm:$0xff] %vm252_vm3, %v701_v57 }
 0x165   :  { %v316_v5 = vpop.permute.xlu0 %315 }
 0x166   :  { %v665_v6 = vpop.permute.xlu1 %664  ;;  %318 = vst.msk [vmem:[#allocation2 + $0x10] sm:$0xff] %vm261_vm4, %v316_v5 }
 0x167   :  { %667 = vst.msk [vmem:[#allocation2 + $0x90] sm:$0xff] %vm243_vm2, %v665_v6  ;;  %v923_v6 = vmul.f32 %v5572_v18, %v5572_v18 }
 0x169   :  { %v681_v29 = vpop.permute.xlu0 %680 }
 0x16a   :  { %v673_v54 = vpop.permute.xlu1 %672 }
 0x16b   :  { %675 = vst.msk [vmem:[#allocation2 + $0x90] sm:$0xff] %vm252_vm3, %v673_v54  ;;  %v935_v54 = vmul.f32 %v5422_v40, %v5422_v40 }
 0x16c   :  { %683 = vst.msk [vmem:[#allocation2 + $0x90] sm:$0xff] %vm261_vm4, %v681_v29  ;;  %v968_v29 = vadd.f32 %v967_v7, %v934_v30 }
 0x16d   :  { %v344_v56 = vpop.permute.xlu0 %343  ;;  %v5566_v27 = vld [vmem:[#allocation2 + $0x10] sm:$0xff] }
 0x16e   :  { %v384_v60 = vpop.permute.xlu1 %383  ;;  %346 = vst.msk [vmem:[#allocation2 + $0x18] sm:$0xff] %vm261_vm4, %v344_v56  ;;  %v909_v23 = vmul.f32 %v5566_v27, %v5566_v27  ;;  %v862_v56 = vadd.f32 %v861_v52, %v5566_v27  ;;  %v969_v16 = vadd.f32 %v968_v29, %v935_v54  ;;  %v937_v52 = vmul.f32 %v5432_v45, %v5432_v45 }
 0x16f   :  { %386 = vst.msk [vmem:[#allocation2 + $0x28] sm:$0xff] %vm243_vm2, %v384_v60 }
 0x171   :  { %v709_v9 = vpop.permute.xlu0 %708 }
 0x172   :  { %v749_v35 = vpop.permute.xlu1 %748  ;;  %711 = vst.msk [vmem:[#allocation2 + $0x98] sm:$0xff] %vm261_vm4, %v709_v9  ;;  %v939_v9 = vadd.f32 %v908_v33, %v907_v4  ;;  %v970_v4 = vadd.f32 %v969_v16, %v936_v63  ;;  %v9097_v63 = vmov 0  }
 0x173   :  { %751 = vst.msk [vmem:[#allocation2 + $0xa8] sm:$0xff] %vm243_vm2, %v749_v35  ;;  %v5574_v37 = vld [vmem:[#allocation2 + $0x90] sm:$0xff]  ;;  %4900 = vset.pattern.permute.xlu1 %v9097_v63  ;;  %4899 = vset.pattern.permute.xlu0 %v9097_v63 }
 0x174   :  { %v925_v5 = vmul.f32 %v5574_v37, %v5574_v37  ;;  %1205 = vmatprep.mubr.bf16.mxu0 %v9097_v63  ;;  %1286 = vmatprep.mubr.bf16.mxu1 %v9097_v63 }
 0x175   :  { %v392_v10 = vpop.permute.xlu0 %391  ;;  %v5577_v47 = vld [vmem:[#allocation2 + $0x18] sm:$0xff] }
 0x176   :  { %v757_v28 = vpop.permute.xlu1 %756  ;;  %394 = vst.msk [vmem:[#allocation2 + $0x28] sm:$0xff] %vm252_vm3, %v392_v10  ;;  %v910_v35 = vmul.f32 %v5577_v47, %v5577_v47  ;;  %v879_v10 = vadd.f32 %v5562_v17, %v5572_v18 }
 0x177   :  { %759 = vst.msk [vmem:[#allocation2 + $0xa8] sm:$0xff] %vm252_vm3, %v757_v28 }
 0x179   :  { %v364_v22 = vpop.permute.xlu0 %363  ;;  %v5588_v57 = vld [vmem:[#allocation2 + $0x98] sm:$0xff] }
 0x17a   :  { %v356_v11 = vpop.permute.xlu1 %355 }
 0x17b   :  { %358 = vst.msk [vmem:[#allocation2 + $0x20] sm:$0xff] %vm243_vm2, %v356_v11 }
 0x17c   :  { %366 = vst.msk [vmem:[#allocation2 + $0x20] sm:$0xff] %vm252_vm3, %v364_v22 }
 0x17d   :  { %v372_v12 = vpop.permute.xlu0 %371 }
 0x17e   :  { %v721_v44 = vpop.permute.xlu1 %720  ;;  %374 = vst.msk [vmem:[#allocation2 + $0x20] sm:$0xff] %vm261_vm4, %v372_v12  ;;  %v957_v12 = vadd.f32 %v924_v51, %v923_v6 }
 0x17f   :  { %723 = vst.msk [vmem:[#allocation2 + $0xa0] sm:$0xff] %vm243_vm2, %v721_v44  ;;  %v926_v44 = vmul.f32 %v5588_v57, %v5588_v57 }
 0x181   :  { %v737_v34 = vpop.permute.xlu0 %736 }
 0x182   :  { %v729_v58 = vpop.permute.xlu1 %728 }
 0x183   :  { %731 = vst.msk [vmem:[#allocation2 + $0xa0] sm:$0xff] %vm252_vm3, %v729_v58  ;;  %v863_v58 = vadd.f32 %v862_v56, %v5577_v47 }
 0x184   :  { %739 = vst.msk [vmem:[#allocation2 + $0xa0] sm:$0xff] %vm261_vm4, %v737_v34 }
 0x185   :  { %v400_v48 = vpop.permute.xlu0 %399  ;;  %v5590_v62 = vld [vmem:[#allocation2 + $0x20] sm:$0xff] }
 0x186   :  { %v440_v14 = vpop.permute.xlu1 %439  ;;  %402 = vst.msk [vmem:[#allocation2 + $0x28] sm:$0xff] %vm261_vm4, %v400_v48  ;;  %v911_v34 = vmul.f32 %v5590_v62, %v5590_v62 }
 0x187   :  { %442 = vst.msk [vmem:[#allocation2 + $0x38] sm:$0xff] %vm243_vm2, %v440_v14  ;;  %v940_v14 = vadd.f32 %v939_v9, %v909_v23 }
 0x189   :  { %v765_v55 = vpop.permute.xlu0 %764  ;;  %v941_v39 = vadd.f32 %v940_v14, %v910_v35  ;;  %v971_v14 = vadd.f32 %v970_v4, %v937_v52 }
 0x18a   :  { %v805_v15 = vpop.permute.xlu1 %804  ;;  %767 = vst.msk [vmem:[#allocation2 + $0xa8] sm:$0xff] %vm261_vm4, %v765_v55 }
 0x18b   :  { %807 = vst.msk [vmem:[#allocation2 + $0xb8] sm:$0xff] %vm243_vm2, %v805_v15  ;;  %v5601_v28 = vld [vmem:[#allocation2 + $0xa0] sm:$0xff]  ;;  %v880_v15 = vadd.f32 %v879_v10, %v5574_v37  ;;  %v942_v33 = vadd.f32 %v941_v39, %v911_v34 }
 0x18d   :  { %v448_v13 = vpop.permute.xlu0 %447  ;;  %v5606_v22 = vld [vmem:[#allocation2 + $0x28] sm:$0xff]  ;;  %v881_v2 = vadd.f32 %v880_v15, %v5588_v57 }
 0x18e   :  { %v813_v36 = vpop.permute.xlu1 %812  ;;  %450 = vst.msk [vmem:[#allocation2 + $0x38] sm:$0xff] %vm252_vm3, %v448_v13  ;;  %v958_v13 = vadd.f32 %v957_v12, %v925_v5 }
 0x18f   :  { %815 = vst.msk [vmem:[#allocation2 + $0xb8] sm:$0xff] %vm252_vm3, %v813_v36  ;;  %v927_v36 = vmul.f32 %v5601_v28, %v5601_v28 }
 0x190   :  { %v959_v30 = vadd.f32 %v958_v13, %v926_v44  ;;  %v938_v44 = vmul.f32 %v5438_v1, %v5438_v1 }
 0x191   :  { %v420_v19 = vpop.permute.xlu0 %419  ;;  %v5614_v48 = vld [vmem:[#allocation2 + $0xa8] sm:$0xff] }
 0x192   :  { %v412_v61 = vpop.permute.xlu1 %411  ;;  %v960_v51 = vadd.f32 %v959_v30, %v927_v36  ;;  %v972_v13 = vadd.f32 %v971_v14, %v938_v44 }
 0x193   :  { %414 = vst.msk [vmem:[#allocation2 + $0x30] sm:$0xff] %vm243_vm2, %v412_v61  ;;  %v864_v61 = vadd.f32 %v863_v58, %v5590_v62 }
 0x194   :  { %422 = vst.msk [vmem:[#allocation2 + $0x30] sm:$0xff] %vm252_vm3, %v420_v19  ;;  %v912_v19 = vmul.f32 %v5606_v22, %v5606_v22 }
 0x195   :  { %v428_v25 = vpop.permute.xlu0 %427  ;;  %v865_v7 = vadd.f32 %v864_v61, %v5606_v22 }
 0x196   :  { %v777_v20 = vpop.permute.xlu1 %776  ;;  %430 = vst.msk [vmem:[#allocation2 + $0x30] sm:$0xff] %vm261_vm4, %v428_v25  ;;  %v928_v25 = vmul.f32 %v5614_v48, %v5614_v48  ;;  %v943_v6 = vadd.f32 %v942_v33, %v912_v19 }
 0x197   :  { %779 = vst.msk [vmem:[#allocation2 + $0xb0] sm:$0xff] %vm243_vm2, %v777_v20 }
 0x198   :  { %v961_v56 = vadd.f32 %v960_v51, %v928_v25 }
 0x199   :  { %v793_v38 = vpop.permute.xlu0 %792 }
 0x19a   :  { %v785_v32 = vpop.permute.xlu1 %784 }
 0x19b   :  { %787 = vst.msk [vmem:[#allocation2 + $0xb0] sm:$0xff] %vm252_vm3, %v785_v32 }
 0x19c   :  { %795 = vst.msk [vmem:[#allocation2 + $0xb0] sm:$0xff] %vm261_vm4, %v793_v38  ;;  %v882_v38 = vadd.f32 %v881_v2, %v5601_v28 }
 0x19d   :  { %v453_v11 = vpop.permute.xlu0 %452  ;;  %v5617_v55 = vld [vmem:[#allocation2 + $0x30] sm:$0xff] }
 0x19e   :  { %v818_v60 = vpop.permute.xlu1 %817  ;;  %455 = vst.msk [vmem:[#allocation2 + $0x38] sm:$0xff] %vm261_vm4, %v453_v11  ;;  %9293 = vst [vmem:[#allocation3_spill] sm:$0xff] %v5617_v55  ;;  %v913_v32 = vmul.f32 %v5617_v55, %v5617_v55  ;;  %v866_v23 = vadd.f32 %v865_v7, %v5617_v55  ;;  %v883_v5 = vadd.f32 %v882_v38, %v5614_v48 }
 0x19f   :  { %820 = vst.msk [vmem:[#allocation2 + $0xb8] sm:$0xff] %vm261_vm4, %v818_v60 }
 0x1a0   :  { %v944_v10 = vadd.f32 %v943_v6, %v913_v32 }
 0x1a3   :  { %v5627_v20 = vld [vmem:[#allocation2 + $0xb0] sm:$0xff] }
 0x1a4   :  { %v929_v54 = vmul.f32 %v5627_v20, %v5627_v20  ;;  %v884_v11 = vadd.f32 %v883_v5, %v5627_v20 }
 0x1a5   :  { %v5641_v29 = vld [vmem:[#allocation2 + $0x38] sm:$0xff] }
 0x1a6   :  { %v5643_v60 = vld [vmem:[#allocation2 + $0xb8] sm:$0xff]  ;;  %v867_v35 = vadd.f32 %v866_v23, %v5641_v29  ;;  %v914_v9 = vmul.f32 %v5641_v29, %v5641_v29  ;;  %v962_v34 = vadd.f32 %v961_v56, %v929_v54 }
 0x1a7   :  { %v930_v58 = vmul.f32 %v5643_v60, %v5643_v60  ;;  %v885_v15 = vadd.f32 %v884_v11, %v5643_v60 }
 0x1a8   :  { %868 = vadd.xlane.f32.xlu0 %v867_v35  ;;  %v945_v12 = vadd.f32 %v944_v10, %v914_v9 }
 0x1a9   :  { %v963_v36 = vadd.f32 %v962_v34, %v930_v58 }
 0x1aa   :  { %946 = vadd.xlane.f32.xlu1 %v945_v12 }
 0x1ac   :  { %886 = vadd.xlane.f32.xlu0 %v885_v15 }
 0x1ae   :  { %964 = vadd.xlane.f32.xlu1 %v963_v36 }
 0x1b0   :  { %973 = vadd.xlane.f32.xlu0 %v972_v13  ;;  %v987_v13 = vld [vmem:[%s9085_s10] sm:$0xff] }
 0x1d3   :  { %v896_v16 = vpop.xlane.xlu0 %895 }
 0x1d4   :  { %v901_v2 = vmul.f32 0.0009765625, %v896_v16 }
 0x1d7   :  { %v956_v61 = vpop.xlane.xlu0 %955 }
 0x1d8   :  { %v976_v6 = vmul.f32 0.0009765625, %v956_v61  ;;  %v988_v61 = vld [vmem:[%s9085_s10 + $0x8] sm:$0xff] }
 0x1d9   :  { %v878_v19 = vpop.xlane.xlu1 %877 }
 0x1da   :  { %v899_v25 = vmul.f32 0.0009765625, %v878_v19 }
 0x1dc   :  { %v903_v32 = vadd.f32 %v901_v2, %v899_v25  ;;  %v995_v2 = vld [vmem:[%s9086_s11] sm:$0xff] }
 0x1de   :  { %v906_v54 = vmul.f32 0.5, %v903_v32 }
 0x1e0   :  { %v984_v12 = vmul.f32 %v906_v54, %v906_v54 }
 0x231   :  { %v869_v39 = vpop.xlane.xlu0 %868 }
 0x232   :  { %v898_v33 = vmul.f32 0.0009765625, %v869_v39 }
 0x233   :  { %v947_v30 = vpop.xlane.xlu1 %946 }
 0x234   :  { %v975_v52 = vmul.f32 0.0009765625, %v947_v30 }
 0x235   :  { %v887_v7 = vpop.xlane.xlu0 %886 }
 0x236   :  { %v900_v38 = vmul.f32 0.0009765625, %v887_v7 }
 0x237   :  { %v965_v51 = vpop.xlane.xlu1 %964 }
 0x238   :  { %v902_v4 = vadd.f32 %v900_v38, %v898_v33  ;;  %v977_v23 = vmul.f32 0.0009765625, %v965_v51  ;;  %v1117_v33 = vld [vmem:[%s9087_s5] sm:$0xff]  ;;  %v996_v38 = vld [vmem:[%s9086_s11 + $0x8] sm:$0xff] }
 0x239   :  { %v974_v5 = vpop.xlane.xlu0 %973 }
 0x23a   :  { %v905_v56 = vmul.f32 0.5, %v902_v4  ;;  %v979_v35 = vadd.f32 %v977_v23, %v975_v52  ;;  %v978_v9 = vmul.f32 0.0009765625, %v974_v5 }
 0x23c   :  { %v983_v10 = vmul.f32 %v905_v56, %v905_v56  ;;  %v981_v11 = vmul.f32 0.5, %v979_v35  ;;  %v980_v44 = vadd.f32 %v978_v9, %v976_v6 }
 0x23e   :  { %v985_v58 = vsub.f32 %v981_v11, %v983_v10  ;;  %v982_v34 = vmul.f32 0.5, %v980_v44 }
 0x240   :  { %v989_v14 = vadd.f32 1e-05, %v985_v58  ;;  %v986_v15 = vsub.f32 %v982_v34, %v984_v12 }
 0x242   :  { %4912 = vrsqrt.f32 %v989_v14  ;;  %v990_v36 = vadd.f32 1e-05, %v986_v15 }
 0x244   :  { %4914 = vrsqrt.f32 %v990_v36 }
 0x24f   :  { %v4913_v16 = vpop.eup %4912 }
 0x250   :  { %v993_v19 = vmul.f32 %v4913_v16, %v987_v13 }
 0x251   :  { %v4915_v39 = vpop.eup %4914 }
 0x252   :  { %1003 = vperm.xlu1 %4900, %v993_v19   ;;  %v994_v25 = vmul.f32 %v4915_v39, %v988_v61  ;;  %v997_v30 = vmul.f32 %v993_v19, %v905_v56 }
 0x254   :  { %1008 = vperm.xlu0 %4899, %v994_v25   ;;  %v999_v7 = vsub.f32 %v995_v2, %v997_v30  ;;  %v998_v32 = vmul.f32 %v994_v25, %v906_v54 }
 0x256   :  { %1045 = vperm.xlu1 %4900, %v999_v7   ;;  %v1000_v51 = vsub.f32 %v996_v38, %v998_v32 }
 0x258   :  { %2085 = vperm.xlu0 %4899, %v1117_v33  }
 0x25a   :  { %1050 = vperm.xlu1 %4900, %v1000_v51  }
 0x2cd   :  { %v5673_v52 = vpop.permute.xlu1 %1003 }
 0x2ce   :  { %v1012_v23 = vmul.f32 %v5673_v52, %v5559_v3  ;;  %v1014_v6 = vmul.f32 %v5673_v52, %v5577_v47  ;;  %v1011_v5 = vmul.f32 %v5673_v52, %v5564_v26  ;;  %v1013_v54 = vmul.f32 %v5673_v52, %v5566_v27 }
 0x2cf   :  { %v5675_v4 = vpop.permute.xlu0 %1008  ;;  %v1016_v56 = vmul.f32 %v5673_v52, %v5606_v22  ;;  %v1018_v35 = vmul.f32 %v5673_v52, %v5641_v29  ;;  %v1015_v9 = vmul.f32 %v5673_v52, %v5590_v62  ;;  %v1017_v10 = vmul.f32 %v5673_v52, %v5617_v55 }
 0x2d0   :  { %v1020_v44 = vmul.f32 %v5675_v4, %v5343_v42  ;;  %v1022_v12 = vmul.f32 %v5675_v4, %v5398_v21  ;;  %v1019_v58 = vmul.f32 %v5675_v4, %v5325_v31  ;;  %v1021_v34 = vmul.f32 %v5675_v4, %v5374_v24 }
 0x2d1   :  { %v5693_v11 = vpop.permute.xlu1 %1045  ;;  %v1024_v42 = vmul.f32 %v5675_v4, %v5451_v46  ;;  %v1026_v16 = vmul.f32 %v5675_v4, %v5464_v59  ;;  %v1023_v31 = vmul.f32 %v5675_v4, %v5446_v53  ;;  %v1025_v24 = vmul.f32 %v5675_v4, %v5459_v50 }
 0x2d2   :  { %v1054_v14 = vadd.f32 %v5693_v11, %v1012_v23  ;;  %v1056_v15 = vadd.f32 %v5693_v11, %v1014_v6  ;;  %v1053_v36 = vadd.f32 %v5693_v11, %v1011_v5  ;;  %v1055_v13 = vadd.f32 %v5693_v11, %v1013_v54 }
 0x2d3   :  { %v1058_v61 = vadd.f32 %v5693_v11, %v1016_v56  ;;  %v1060_v19 = vadd.f32 %v5693_v11, %v1018_v35  ;;  %v1057_v39 = vadd.f32 %v5693_v11, %v1015_v9  ;;  %v1059_v2 = vadd.f32 %v5693_v11, %v1017_v10 }
 0x2d4   :  { %v1086_v30 = vmax.f32 %v1054_v14, 0.0  ;;  %v1088_v7 = vmax.f32 %v1056_v15, 0.0  ;;  %v1085_v32 = vmax.f32 %v1053_v36, 0.0  ;;  %v1087_v33 = vmax.f32 %v1055_v13, 0.0 }
 0x2d5   :  { %v5719_v25 = vpop.permute.xlu1 %1050  ;;  %v1090_v14 = vmax.f32 %v1058_v61, 0.0  ;;  %v1092_v15 = vmax.f32 %v1060_v19, 0.0  ;;  %v1036_v61 = vmul.f32 %v5675_v4, %v5338_v41  ;;  %v1030_v19 = vmul.f32 %v5673_v52, %v5588_v57 }
 0x2d6   :  { %v1062_v38 = vadd.f32 %v5719_v25, %v1020_v44  ;;  %v1064_v53 = vadd.f32 %v5719_v25, %v1022_v12  ;;  %v1061_v50 = vadd.f32 %v5719_v25, %v1019_v58  ;;  %v1063_v51 = vadd.f32 %v5719_v25, %v1021_v34 }
 0x2d7   :  { %v1066_v23 = vadd.f32 %v5719_v25, %v1024_v42  ;;  %v1068_v6 = vadd.f32 %v5719_v25, %v1026_v16  ;;  %v1065_v5 = vadd.f32 %v5719_v25, %v1023_v31  ;;  %v1067_v54 = vadd.f32 %v5719_v25, %v1025_v24  ;;  %v5732_v31 = vld [vmem:[%s9088_s4] sm:$0xff]  }
 0x2d8   :  { %v1094_v56 = vmax.f32 %v1062_v38, 0.0  ;;  %v1096_v35 = vmax.f32 %v1064_v53, 0.0  ;;  %v1093_v9 = vmax.f32 %v1061_v50, 0.0  ;;  %v1095_v10 = vmax.f32 %v1063_v51, 0.0 }
 0x2d9   :  { %v1098_v44 = vmax.f32 %v1066_v23, 0.0  ;;  %v1100_v12 = vmax.f32 %v1068_v6, 0.0  ;;  %v1097_v55 = vmax.f32 %v1065_v5, 0.0  ;;  %v1099_v16 = vmax.f32 %v1067_v54, 0.0  ;;  %v5755_v5 = vld [vmem:[%s9088_s4 + $0x8] sm:$0xff]   ;;  %v5766_v54 = vld [vmem:[%s9088_s4 + $0x10] sm:$0xff]  }
 0x2da   :  { %v1128_v36 = vpack.c.bf16 %v1094_v56, %v1086_v30  ;;  %v1130_v58 = vpack.c.bf16 %v1096_v35, %v1088_v7  ;;  %v1127_v13 = vpack.c.bf16 %v1093_v9, %v1085_v32  ;;  %v1129_v34 = vpack.c.bf16 %v1095_v10, %v1087_v33  ;;  %v5777_v56 = vld [vmem:[%s9088_s4 + $0x18] sm:$0xff]   ;;  %v5788_v35 = vld [vmem:[%s9088_s4 + $0x20] ss:$0 sps:$4 sm:$0xff]  }
 0x2db   :  { %v1132_v63 = vpack.c.bf16 %v1098_v44, %v1090_v14  ;;  %v1134_v42 = vpack.c.bf16 %v1100_v12, %v1092_v15  ;;  %v1028_v24 = vmul.f32 %v5673_v52, %v5562_v17  ;;  %v1089_v30 = vmax.f32 %v1057_v39, 0.0 }
 0x2dc   :  { %1187 = vmatprep.subr.bf16.mxu0 %v1128_v36  ;;  %1268 = vmatprep.subr.bf16.mxu1 %v1130_v58  ;;  %v1091_v7 = vmax.f32 %v1059_v2, 0.0  ;;  %v1038_v32 = vmul.f32 %v5675_v4, %v5409_v8  ;;  %v1078_v38 = vadd.f32 %v5719_v25, %v1036_v61  ;;  %v1072_v53 = vadd.f32 %v5693_v11, %v1030_v19 }
 0x2dd   :  { %1188 = vmatpush1.bf16.msra.mxu0 %v1127_v13  ;;  %1269 = vmatpush1.bf16.msra.mxu1 %v1129_v34  ;;  %v1070_v33 = vadd.f32 %v5693_v11, %v1028_v24  ;;  %v1131_v50 = vpack.c.bf16 %v1097_v55, %v1089_v30  ;;  %v9294_v6 = vmov 0   ;;  %v1035_v9 = vmul.f32 %v5675_v4, %v5320_v0 }
 0x2de   :  { %1349 = vmatprep.subr.bf16.mxu0 %v1132_v63  ;;  %1430 = vmatprep.subr.bf16.mxu1 %v1134_v42  ;;  %v1133_v41 = vpack.c.bf16 %v1099_v16, %v1091_v7  ;;  %v1080_v51 = vadd.f32 %v5719_v25, %v1038_v32  ;;  %v1110_v8 = vmax.f32 %v1078_v38, 0.0  ;;  %v1104_v63 = vmax.f32 %v1072_v53, 0.0 }
 0x2df   :  { %v1102_v39 = vmax.f32 %v1070_v33, 0.0  ;;  %v1037_v10 = vmul.f32 %v5675_v4, %v5387_v49  ;;  %v1027_v14 = vmul.f32 %v5673_v52, %v5572_v18  ;;  %v1040_v44 = vmul.f32 %v5675_v4, %v5427_v43 }
 0x2e0   :  { %4734 = vmatmul.mubr.msk.bf16.vlgmr.msra.gmra.mxu0 %vm112_vm0, %v5732_v31  ;;  %4739 = vmatmul.mubr.msk.bf16.vlgmr.msra.gmra.mxu1 %vm112_vm0, %v5732_v31  ;;  %v1112_v2 = vmax.f32 %v1080_v51, 0.0  ;;  %v1042_v15 = vmul.f32 %v5675_v4, %v5438_v1  ;;  %v1077_v12 = vadd.f32 %v5719_v25, %v1035_v9  ;;  %v1029_v36 = vmul.f32 %v5673_v52, %v5574_v37 }
 0x2e1   :  { %1350 = vmatpush1.bf16.msra.mxu0 %v1131_v50  ;;  %1431 = vmatpush1.bf16.msra.mxu1 %v1133_v41  ;;  %v2097_v23 = vpack.c.bf16 %v1110_v8, %v1102_v39  ;;  %v1079_v58 = vadd.f32 %v5719_v25, %v1037_v10  ;;  %v1032_v0 = vmul.f32 %v5673_v52, %v5614_v48 }
 0x2e2   :  { %1215 = vmatprep.mubr.bf16.mxu0 %v9294_v6  ;;  %1296 = vmatprep.mubr.bf16.mxu1 %v9294_v6  ;;  %v2099_v55 = vpack.c.bf16 %v1112_v2, %v1104_v63  ;;  %v1082_v49 = vadd.f32 %v5719_v25, %v1040_v44  ;;  %v1034_v43 = vmul.f32 %v5673_v52, %v5643_v60  ;;  %v1109_v24 = vmax.f32 %v1077_v12, 0.0  ;;  %v4918_v44 = vld [vmem:[#allocation2 + $0x48] sm:$0xff] }
 0x2e3   :  { %2118 = vmatprep.subr.bf16.mxu0 %v2097_v23  ;;  %v1084_v1 = vadd.f32 %v5719_v25, %v1042_v15  ;;  %v1069_v13 = vadd.f32 %v5693_v11, %v1027_v14  ;;  %v1071_v34 = vadd.f32 %v5693_v11, %v1029_v36  ;;  %v1074_v42 = vadd.f32 %v5693_v11, %v1032_v0  ;;  %v4926_v0 = vld [vmem:[#allocation2 + $0xd0] sm:$0xff] }
 0x2e4   :  { %2199 = vmatprep.subr.bf16.mxu1 %v2099_v55  ;;  %v1076_v16 = vadd.f32 %v5693_v11, %v1034_v43  ;;  %v1111_v61 = vmax.f32 %v1079_v58, 0.0  ;;  %v1114_v19 = vmax.f32 %v1082_v49, 0.0  ;;  %v1039_v39 = vmul.f32 %v5675_v4, %v5422_v40  ;;  %v4928_v43 = vld [vmem:[#allocation2 + $0xf8] sm:$0xff] }
 0x2e5   :  { %v1116_v30 = vmax.f32 %v1084_v1, 0.0  ;;  %v1101_v7 = vmax.f32 %v1069_v13, 0.0  ;;  %v1103_v32 = vmax.f32 %v1071_v34, 0.0  ;;  %v1106_v33 = vmax.f32 %v1074_v42, 0.0  ;;  %v4930_v13 = vld [vmem:[#allocation2 + $0xf0] sm:$0xff] }
 0x2e6   :  { %v1108_v38 = vmax.f32 %v1076_v16, 0.0  ;;  %v1041_v8 = vmul.f32 %v5675_v4, %v5432_v45  ;;  %v1031_v63 = vmul.f32 %v5673_v52, %v5601_v28  ;;  %v1081_v2 = vadd.f32 %v5719_v25, %v1039_v39 }
 0x2e7   :  { %v2096_v53 = vpack.c.bf16 %v1109_v24, %v1101_v7  ;;  %v2098_v50 = vpack.c.bf16 %v1111_v61, %v1103_v32  ;;  %v2101_v41 = vpack.c.bf16 %v1114_v19, %v1106_v33  ;;  %v1033_v23 = vmul.f32 %v5673_v52, %v5627_v20 }
 0x2e8   :  { %4735 = vmatmul.mubr.msk.bf16.gmra.mxu0 %vm112_vm0, %v5755_v5  ;;  %4740 = vmatmul.mubr.msk.bf16.gmra.mxu1 %vm112_vm0, %v5755_v5  ;;  %v2103_v51 = vpack.c.bf16 %v1116_v30, %v1108_v38  ;;  %v1083_v55 = vadd.f32 %v5719_v25, %v1041_v8  ;;  %v1073_v40 = vadd.f32 %v5693_v11, %v1031_v63  ;;  %v1113_v4 = vmax.f32 %v1081_v2, 0.0 }
 0x2e9   :  { %1225 = vmatprep.mubr.bf16.mxu0 %v9294_v6  ;;  %1306 = vmatprep.mubr.bf16.mxu1 %v9294_v6  ;;  %v1075_v45 = vadd.f32 %v5693_v11, %v1033_v23  ;;  %v2886_v15 = vpack.c.bf16 %v4918_v44, %v5559_v3  ;;  %v2888_v12 = vpack.c.bf16 %v5398_v21, %v5577_v47  ;;  %v4919_v21 = vld [vmem:[#allocation2 + $0x40] sm:$0xff]  ;;  %v4920_v47 = vld [vmem:[#allocation2 + $0x50] sm:$0xff] }
 0x2ea   :  { %v1115_v9 = vmax.f32 %v1083_v55, 0.0  ;;  %v1105_v10 = vmax.f32 %v1073_v40, 0.0  ;;  %v2885_v3 = vpack.c.bf16 %v4919_v21, %v5564_v26  ;;  %v2887_v11 = vpack.c.bf16 %v4920_v47, %v5566_v27  ;;  %v4922_v27 = vld [vmem:[#allocation2 + $0x70] sm:$0xff] }
 0x2eb   :  { %v1107_v52 = vmax.f32 %v1075_v45, 0.0  ;;  %v2890_v36 = vpack.c.bf16 %v5451_v46, %v5606_v22  ;;  %v2892_v58 = vpack.c.bf16 %v5464_v59, %v5641_v29  ;;  %v2883_v46 = vld [vmem:[%s9089_s8] sm:$0xf]  ;;  %v3067_v49 = vpack.c.bf16 %v4926_v0, %v5574_v37  ;;  %s4935_s8 = smov 33  }
 0x2ec   :  { %v2100_v14 = vpack.c.bf16 %v1113_v4, %v1105_v10  ;;  %v4921_v59 = vld [vmem:[#allocation2 + $0x60] sm:$0xff]  ;;  %v3072_v1 = vpack.c.bf16 %v4928_v43, %v5643_v60  ;;  %v3071_v34 = vpack.c.bf16 %v4930_v13, %v5627_v20 }
 0x2ed   :  { %v2102_v25 = vpack.c.bf16 %v1115_v9, %v1107_v52  ;;  %v2889_v26 = vpack.c.bf16 %v4921_v59, %v5590_v62  ;;  %v9295_v22 = vld [vmem:[#allocation3_spill] sm:$0xff] }
 0x2ee   :  { %v2891_v29 = vpack.c.bf16 %v4922_v27, %v9295_v22  ;;  %v4925_v62 = vld [vmem:[#allocation2 + $0xc0] sm:$0xff] }
 0x2f0   :  { %4736 = vmatmul.mubr.msk.bf16.gmra.mxu0 %vm112_vm0, %v5766_v54  ;;  %4741 = vmatmul.mubr.msk.bf16.gmra.mxu1 %vm112_vm0, %v5766_v54 }
 0x2f1   :  { %1235 = vmatprep.mubr.bf16.mxu0 %v9294_v6  ;;  %1316 = vmatprep.mubr.bf16.mxu1 %v9294_v6 }
 0x2f8   :  { %4737 = vmatmul.mubr.msk.bf16.gmra.mxu0 %vm112_vm0, %v5777_v56  ;;  %4742 = vmatmul.mubr.msk.bf16.gmra.mxu1 %vm112_vm0, %v5777_v56 }
 0x2f9   :  { %1245 = vmatprep.mubr.bf16.mxu0 %v9294_v6  ;;  %1326 = vmatprep.mubr.bf16.mxu1 %v9294_v6 }
 0x300   :  { %4738 = vmatmul.mubr.msk.bf16.gmra.mxu0 %vm112_vm0, %v5788_v35  ;;  %4743 = vmatmul.mubr.msk.bf16.gmra.mxu1 %vm112_vm0, %v5788_v35 }
 0x301   :  { %1367 = vmatprep.mubr.bf16.mxu0 %v9294_v6  ;;  %1448 = vmatprep.mubr.bf16.mxu1 %v9294_v6 }
 0x308   :  { %4744 = vmatmul.mubr.msk.bf16.vlgmr.msra.gmra.mxu0 %vm112_vm0, %v5732_v31  ;;  %4749 = vmatmul.mubr.msk.bf16.vlgmr.msra.gmra.mxu1 %vm112_vm0, %v5732_v31 }
 0x309   :  { %2119 = vmatpush1.bf16.msra.mxu0 %v2096_v53  ;;  %2200 = vmatpush1.bf16.msra.mxu1 %v2098_v50 }
 0x30a   :  { %2280 = vmatprep.subr.bf16.mxu0 %v2101_v41  ;;  %2361 = vmatprep.subr.bf16.mxu1 %v2103_v51 }
 0x30b   :  { %1377 = vmatprep.mubr.bf16.mxu0 %v9294_v6  ;;  %1458 = vmatprep.mubr.bf16.mxu1 %v9294_v6 }
 0x310   :  { %4745 = vmatmul.mubr.msk.bf16.gmra.mxu0 %vm112_vm0, %v5755_v5  ;;  %4750 = vmatmul.mubr.msk.bf16.gmra.mxu1 %vm112_vm0, %v5755_v5 }
 0x311   :  { %1387 = vmatprep.mubr.bf16.mxu0 %v9294_v6  ;;  %1468 = vmatprep.mubr.bf16.mxu1 %v9294_v6 }
 0x318   :  { %4746 = vmatmul.mubr.msk.bf16.gmra.mxu0 %vm112_vm0, %v5766_v54  ;;  %4751 = vmatmul.mubr.msk.bf16.gmra.mxu1 %vm112_vm0, %v5766_v54 }
 0x319   :  { %1397 = vmatprep.mubr.bf16.mxu0 %v9294_v6  ;;  %1478 = vmatprep.mubr.bf16.mxu1 %v9294_v6 }
 0x320   :  { %4747 = vmatmul.mubr.msk.bf16.gmra.mxu0 %vm112_vm0, %v5777_v56  ;;  %4752 = vmatmul.mubr.msk.bf16.gmra.mxu1 %vm112_vm0, %v5777_v56 }
 0x321   :  { %1407 = vmatprep.mubr.bf16.mxu0 %v9294_v6  ;;  %1488 = vmatprep.mubr.bf16.mxu1 %v9294_v6 }
 0x328   :  { %4748 = vmatmul.mubr.msk.bf16.gmra.mxu0 %vm112_vm0, %v5788_v35  ;;  %4753 = vmatmul.mubr.msk.bf16.gmra.mxu1 %vm112_vm0, %v5788_v35 }
 0x329   :  { %2136 = vmatprep.mubr.bf16.mxu0 %v9294_v6  ;;  %2217 = vmatprep.mubr.bf16.mxu1 %v9294_v6 }
 0x330   :  { %4754 = vmatmul.mubr.msk.bf16.vlgmr.msra.gmra.mxu0 %vm112_vm0, %v5732_v31  ;;  %4759 = vmatmul.mubr.msk.bf16.vlgmr.msra.gmra.mxu1 %vm112_vm0, %v5732_v31 }
 0x331   :  { %2281 = vmatpush1.bf16.msra.mxu0 %v2100_v14  ;;  %2362 = vmatpush1.bf16.msra.mxu1 %v2102_v25 }
 0x332   :  { %2915 = vmatprep.subr.bf16.mxu0 %v2886_v15  ;;  %2956 = vmatprep.subr.bf16.mxu1 %v2888_v12 }
 0x333   :  { %2146 = vmatprep.mubr.bf16.mxu0 %v9294_v6  ;;  %2227 = vmatprep.mubr.bf16.mxu1 %v9294_v6 }
 0x338   :  { %4755 = vmatmul.mubr.msk.bf16.gmra.mxu0 %vm112_vm0, %v5755_v5  ;;  %4760 = vmatmul.mubr.msk.bf16.gmra.mxu1 %vm112_vm0, %v5755_v5 }
 0x339   :  { %2156 = vmatprep.mubr.bf16.mxu0 %v9294_v6  ;;  %2237 = vmatprep.mubr.bf16.mxu1 %v9294_v6 }
 0x340   :  { %4756 = vmatmul.mubr.msk.bf16.gmra.mxu0 %vm112_vm0, %v5766_v54  ;;  %4761 = vmatmul.mubr.msk.bf16.gmra.mxu1 %vm112_vm0, %v5766_v54 }
 0x341   :  { %2166 = vmatprep.mubr.bf16.mxu0 %v9294_v6  ;;  %2247 = vmatprep.mubr.bf16.mxu1 %v9294_v6 }
 0x348   :  { %4757 = vmatmul.mubr.msk.bf16.gmra.mxu0 %vm112_vm0, %v5777_v56  ;;  %4762 = vmatmul.mubr.msk.bf16.gmra.mxu1 %vm112_vm0, %v5777_v56 }
 0x349   :  { %2176 = vmatprep.mubr.bf16.mxu0 %v9294_v6  ;;  %2257 = vmatprep.mubr.bf16.mxu1 %v9294_v6 }
 0x350   :  { %4758 = vmatmul.mubr.msk.bf16.gmra.mxu0 %vm112_vm0, %v5788_v35  ;;  %4763 = vmatmul.mubr.msk.bf16.gmra.mxu1 %vm112_vm0, %v5788_v35 }
 0x351   :  { %2298 = vmatprep.mubr.bf16.mxu0 %v9294_v6  ;;  %2379 = vmatprep.mubr.bf16.mxu1 %v9294_v6 }
 0x358   :  { %4764 = vmatmul.mubr.msk.bf16.vlgmr.msra.gmra.mxu0 %vm112_vm0, %v5732_v31  ;;  %4769 = vmatmul.mubr.msk.bf16.vlgmr.msra.gmra.mxu1 %vm112_vm0, %v5732_v31  ;;  %v4923_v31 = vld [vmem:[#allocation2 + $0xc8] sm:$0xff] }
 0x359   :  { %2916 = vmatpush1.bf16.msra.mxu0 %v2885_v3  ;;  %2957 = vmatpush1.bf16.msra.mxu1 %v2887_v11 }
 0x35a   :  { %2997 = vmatprep.subr.bf16.mxu0 %v2890_v36  ;;  %3038 = vmatprep.subr.bf16.mxu1 %v2892_v58 }
 0x35b   :  { %2308 = vmatprep.mubr.bf16.mxu0 %v9294_v6  ;;  %2389 = vmatprep.mubr.bf16.mxu1 %v9294_v6 }
 0x360   :  { %4765 = vmatmul.mubr.msk.bf16.gmra.mxu0 %vm112_vm0, %v5755_v5  ;;  %4770 = vmatmul.mubr.msk.bf16.gmra.mxu1 %vm112_vm0, %v5755_v5  ;;  %v3066_v5 = vpack.c.bf16 %v4923_v31, %v5562_v17  ;;  %v4927_v17 = vld [vmem:[#allocation2 + $0xe8] sm:$0xff] }
 0x361   :  { %2318 = vmatprep.mubr.bf16.mxu0 %v9294_v6  ;;  %2399 = vmatprep.mubr.bf16.mxu1 %v9294_v6 }
 0x368   :  { %4766 = vmatmul.mubr.msk.bf16.gmra.mxu0 %vm112_vm0, %v5766_v54  ;;  %4771 = vmatmul.mubr.msk.bf16.gmra.mxu1 %vm112_vm0, %v5766_v54  ;;  %v4924_v54 = vld [vmem:[#allocation2 + $0xd8] sm:$0xff] }
 0x369   :  { %2328 = vmatprep.mubr.bf16.mxu0 %v9294_v6  ;;  %2409 = vmatprep.mubr.bf16.mxu1 %v9294_v6 }
 0x370   :  { %4767 = vmatmul.mubr.msk.bf16.gmra.mxu0 %vm112_vm0, %v5777_v56  ;;  %4772 = vmatmul.mubr.msk.bf16.gmra.mxu1 %vm112_vm0, %v5777_v56  ;;  %v3068_v56 = vpack.c.bf16 %v4924_v54, %v5588_v57  ;;  %v3070_v57 = vpack.c.bf16 %v4927_v17, %v5614_v48 }
 0x371   :  { %2338 = vmatprep.mubr.bf16.mxu0 %v9294_v6  ;;  %2419 = vmatprep.mubr.bf16.mxu1 %v9294_v6 }
 0x378   :  { %4768 = vmatmul.mubr.msk.bf16.gmra.mxu0 %vm112_vm0, %v5788_v35  ;;  %4773 = vmatmul.mubr.msk.bf16.gmra.mxu1 %vm112_vm0, %v5788_v35  ;;  %v3065_v35 = vpack.c.bf16 %v4925_v62, %v5572_v18  ;;  %v4929_v18 = vld [vmem:[#allocation2 + $0xe0] sm:$0xff] }
 0x379   :  { %2933 = vmatprep.mubr.bf16.mxu0 %v9294_v6  ;;  %2974 = vmatprep.mubr.bf16.mxu1 %v9294_v6  ;;  %v3069_v37 = vpack.c.bf16 %v4929_v18, %v5601_v28 }
 0x380   :  { %4774 = vmatmul.mubr.msk.bf16.vlgmr.msra.gmra.mxu0 %vm112_vm0, %v2883_v46  ;;  %4775 = vmatmul.mubr.msk.bf16.vlgmr.msra.gmra.mxu1 %vm112_vm0, %v2883_v46 }
 0x381   :  { %2998 = vmatpush1.bf16.msra.mxu0 %v2889_v26  ;;  %3039 = vmatpush1.bf16.msra.mxu1 %v2891_v29 }
 0x382   :  { %3087 = vmatprep.subr.bf16.mxu0 %v3066_v5  ;;  %3128 = vmatprep.subr.bf16.mxu1 %v3068_v56 }
 0x383   :  { %3015 = vmatprep.mubr.bf16.mxu0 %v9294_v6  ;;  %3056 = vmatprep.mubr.bf16.mxu1 %v9294_v6 }
 0x388   :  { %4776 = vmatmul.mubr.msk.bf16.vlgmr.msra.gmra.mxu0 %vm112_vm0, %v2883_v46  ;;  %4777 = vmatmul.mubr.msk.bf16.vlgmr.msra.gmra.mxu1 %vm112_vm0, %v2883_v46 }
 0x389   :  { %3088 = vmatpush1.bf16.msra.mxu0 %v3065_v35  ;;  %3129 = vmatpush1.bf16.msra.mxu1 %v3067_v49 }
 0x38a   :  { %3169 = vmatprep.subr.bf16.mxu0 %v3070_v57  ;;  %3210 = vmatprep.subr.bf16.mxu1 %v3072_v1 }
 0x38b   :  { %3105 = vmatprep.mubr.bf16.mxu0 %v9294_v6  ;;  %3146 = vmatprep.mubr.bf16.mxu1 %v9294_v6 }
 0x390   :  { %4778 = vmatmul.mubr.msk.bf16.vlgmr.msra.gmra.mxu0 %vm112_vm0, %v2883_v46  ;;  %4779 = vmatmul.mubr.msk.bf16.vlgmr.msra.gmra.mxu1 %vm112_vm0, %v2883_v46 }
 0x391   :  { %3170 = vmatpush1.bf16.msra.mxu0 %v3069_v37  ;;  %3211 = vmatpush1.bf16.msra.mxu1 %v3071_v34 }
 0x392   :  { %3187 = vmatprep.mubr.bf16.mxu0 %v9294_v6  ;;  %3228 = vmatprep.mubr.bf16.mxu1 %v9294_v6 }
 0x398   :  { %4780 = vmatmul.mubr.msk.bf16.vlgmr.msra.gmra.mxu0 %vm112_vm0, %v2883_v46  ;;  %4781 = vmatmul.mubr.msk.bf16.vlgmr.msra.gmra.mxu1 %vm112_vm0, %v2883_v46 }
 0x399   :  { %3351 = vmatprep.mubr.bf16.mxu0 %v9294_v6  ;;  %3432 = vmatprep.mubr.bf16.mxu1 %v9294_v6 }
 0x3a0   :  { %v1207_v28 = vpop.f32.mrf.mxu0  ;;  %v1288_v48 = vpop.f32.mrf.mxu1 }
 0x3a1   :  { %1501 = vrot.lane.b32.xlu0 %v1288_v48, %s4935_s8  ;;  %1497 = vrot.lane.b32.xlu1 %v1207_v28, %s4935_s8 }
 0x3a2   :  { %v1209_v20 = vpop.f32.mrf.mxu0  ;;  %v1290_v60 = vpop.f32.mrf.mxu1 }
 0x3a4   :  { %v1211_v42 = vpop.f32.mrf.mxu0  ;;  %v1292_v16 = vpop.f32.mrf.mxu1 }
 0x3a5   :  { %1503 = vrot.lane.b32.xlu0 %v1290_v60, %s4935_s8  ;;  %1499 = vrot.lane.b32.xlu1 %v1209_v20, %s4935_s8 }
 0x3a6   :  { %v1213_v24 = vpop.f32.mrf.mxu0  ;;  %v1294_v61 = vpop.f32.mrf.mxu1 }
 0x3a8   :  { %v1217_v19 = vpop.f32.mrf.mxu0  ;;  %v1298_v30 = vpop.f32.mrf.mxu1 }
 0x3a9   :  { %1572 = vrot.lane.b32.xlu1 %v1211_v42, %s4931_s0  ;;  %1574 = vrot.lane.b32.xlu0 %v1213_v24, %s4931_s0 }
 0x3aa   :  { %v1219_v7 = vpop.f32.mrf.mxu0  ;;  %v1300_v32 = vpop.f32.mrf.mxu1 }
 0x3ac   :  { %v1221_v33 = vpop.f32.mrf.mxu0  ;;  %v1302_v38 = vpop.f32.mrf.mxu1 }
 0x3ad   :  { %1576 = vrot.lane.b32.xlu1 %v1292_v16, %s4931_s0  ;;  %1645 = vrot.lane.b32.xlu0 %v1217_v19, %s4936_s27 }
 0x3ae   :  { %v1223_v53 = vpop.f32.mrf.mxu0  ;;  %v1304_v50 = vpop.f32.mrf.mxu1 }
 0x3b0   :  { %v5968_v41 = vpop.f32.mrf.mxu0  ;;  %v5970_v51 = vpop.f32.mrf.mxu1 }
 0x3b1   :  { %9296 = vst [vmem:[#allocation3_spill] sm:$0xff] %v5968_v41  ;;  %9297 = vst [vmem:[#allocation4_spill] sm:$0xff] %v5970_v51  ;;  %1578 = vrot.lane.b32.xlu1 %v1294_v61, %s4931_s0  ;;  %1649 = vrot.lane.b32.xlu0 %v1298_v30, %s4936_s27 }
 0x3b2   :  { %v5974_v39 = vpop.f32.mrf.mxu0  ;;  %v5976_v8 = vpop.f32.mrf.mxu1 }
 0x3b3   :  { %9298 = vst [vmem:[#allocation5_spill] sm:$0xff] %v5974_v39  ;;  %9299 = vst [vmem:[#allocation6_spill] sm:$0xff] %v5976_v8 }
 0x3b4   :  { %v1231_v63 = vpop.f32.mrf.mxu0  ;;  %v1312_v2 = vpop.f32.mrf.mxu1 }
 0x3b5   :  { %1651 = vrot.lane.b32.xlu0 %v1300_v32, %s4936_s27  ;;  %1647 = vrot.lane.b32.xlu1 %v1219_v7, %s4936_s27 }
 0x3b6   :  { %v1233_v23 = vpop.f32.mrf.mxu0  ;;  %v1314_v55 = vpop.f32.mrf.mxu1 }
 0x3b8   :  { %v1237_v40 = vpop.f32.mrf.mxu0  ;;  %v1318_v45 = vpop.f32.mrf.mxu1 }
 0x3b9   :  { %1718 = vrot.lane.b32.xlu1 %v1221_v33, %s4937_s15  ;;  %1720 = vrot.lane.b32.xlu0 %v1223_v53, %s4937_s15 }
 0x3ba   :  { %v1239_v4 = vpop.f32.mrf.mxu0  ;;  %v1320_v9 = vpop.f32.mrf.mxu1 }
 0x3bc   :  { %v1241_v10 = vpop.f32.mrf.mxu0  ;;  %v1322_v52 = vpop.f32.mrf.mxu1 }
 0x3bd   :  { %1722 = vrot.lane.b32.xlu1 %v1302_v38, %s4937_s15  ;;  %1791 = vrot.lane.b32.xlu0 %v1231_v63, %s4938_s16 }
 0x3be   :  { %v1243_v14 = vpop.f32.mrf.mxu0  ;;  %v1324_v25 = vpop.f32.mrf.mxu1 }
 0x3c0   :  { %v1247_v44 = vpop.f32.mrf.mxu0  ;;  %v1328_v15 = vpop.f32.mrf.mxu1 }
 0x3c1   :  { %1724 = vrot.lane.b32.xlu1 %v1304_v50, %s4937_s15  ;;  %1795 = vrot.lane.b32.xlu0 %v1312_v2, %s4938_s16 }
 0x3c2   :  { %v1249_v12 = vpop.f32.mrf.mxu0  ;;  %v1330_v21 = vpop.f32.mrf.mxu1 }
 0x3c4   :  { %v1251_v3 = vpop.f32.mrf.mxu0  ;;  %v1332_v47 = vpop.f32.mrf.mxu1 }
 0x3c5   :  { %1797 = vrot.lane.b32.xlu0 %v1314_v55, %s4938_s16  ;;  %1793 = vrot.lane.b32.xlu1 %v1233_v23, %s4938_s16 }
 0x3c6   :  { %v1252_v11 = vpop.f32.mrf.mxu0  ;;  %v1333_v36 = vpop.f32.mrf.mxu1 }
 0x3c8   :  { %v1369_v58 = vpop.f32.mrf.mxu0  ;;  %v1450_v46 = vpop.f32.mrf.mxu1 }
 0x3c9   :  { %1864 = vrot.lane.b32.xlu1 %v1237_v40, %s4939_s17  ;;  %1866 = vrot.lane.b32.xlu0 %v1239_v4, %s4939_s17 }
 0x3ca   :  { %v1371_v59 = vpop.f32.mrf.mxu0  ;;  %v1452_v26 = vpop.f32.mrf.mxu1 }
 0x3cc   :  { %v1373_v27 = vpop.f32.mrf.mxu0  ;;  %v1454_v22 = vpop.f32.mrf.mxu1 }
 0x3cd   :  { %1868 = vrot.lane.b32.xlu1 %v1318_v45, %s4939_s17  ;;  %1870 = vrot.lane.b32.xlu0 %v1320_v9, %s4939_s17 }
 0x3ce   :  { %v1375_v29 = vpop.f32.mrf.mxu0  ;;  %v1456_v31 = vpop.f32.mrf.mxu1 }
 0x3d0   :  { %v1379_v5 = vpop.f32.mrf.mxu0  ;;  %v1460_v54 = vpop.f32.mrf.mxu1 }
 0x3d1   :  { %1937 = vrot.lane.b32.xlu1 %v1241_v10, %s4933_s28  ;;  %1939 = vrot.lane.b32.xlu0 %v1243_v14, %s4933_s28 }
 0x3d2   :  { %v1462_v56 = vpop.f32.mrf.mxu1  ;;  %v1381_v62 = vpop.f32.mrf.mxu0 }
 0x3d4   :  { %v1464_v35 = vpop.f32.mrf.mxu1  ;;  %v1383_v0 = vpop.f32.mrf.mxu0 }
 0x3d5   :  { %1941 = vrot.lane.b32.xlu1 %v1322_v52, %s4933_s28  ;;  %1943 = vrot.lane.b32.xlu0 %v1324_v25, %s4933_s28 }
 0x3d6   :  { %v1466_v49 = vpop.f32.mrf.mxu1  ;;  %v5996_v17 = vpop.f32.mrf.mxu0 }
 0x3d8   :  { %v5998_v57 = vpop.f32.mrf.mxu1  ;;  %v6000_v43 = vpop.f32.mrf.mxu0 }
 0x3d9   :  { %9300 = vst [vmem:[#allocation7_spill] sm:$0xff] %v5998_v57  ;;  %9301 = vst [vmem:[#allocation8_spill] sm:$0xff] %v6000_v43  ;;  %2010 = vrot.lane.b32.xlu1 %v1247_v44, %s4940_s18  ;;  %2012 = vrot.lane.b32.xlu0 %v1249_v12, %s4940_s18 }
 0x3da   :  { %v6004_v1 = vpop.f32.mrf.mxu1  ;;  %v6006_v18 = vpop.f32.mrf.mxu0 }
 0x3db   :  { %9302 = vst [vmem:[#allocation9_spill] sm:$0xff] %v6004_v1  ;;  %9303 = vst [vmem:[#allocation10_spill] sm:$0xff] %v6006_v18 }
 0x3dc   :  { %v1474_v37 = vpop.f32.mrf.mxu1  ;;  %v1393_v13 = vpop.f32.mrf.mxu0 }
 0x3dd   :  { %2014 = vrot.lane.b32.xlu1 %v1328_v15, %s4940_s18  ;;  %1505 = vrot.lane.b32.xlu0 %v1369_v58, %s4935_s8 }
 0x3de   :  { %v1395_v34 = vpop.f32.mrf.mxu0  ;;  %v1476_v28 = vpop.f32.mrf.mxu1 }
 0x3e0   :  { %v6010_v48 = vpop.f32.mrf.mxu0  ;;  %v1480_v20 = vpop.f32.mrf.mxu1 }
 0x3e1   :  { %2016 = vrot.lane.b32.xlu1 %v1330_v21, %s4940_s18  ;;  %1509 = vrot.lane.b32.xlu0 %v1450_v46, %s4935_s8 }
 0x3e2   :  { %v6014_v60 = vpop.f32.mrf.mxu0  ;;  %v6016_v42 = vpop.f32.mrf.mxu1 }
 0x3e4   :  { %v1403_v16 = vpop.f32.mrf.mxu0  ;;  %v1484_v24 = vpop.f32.mrf.mxu1 }
 0x3e5   :  { %1511 = vrot.lane.b32.xlu1 %v1452_v26, %s4935_s8  ;;  %1507 = vrot.lane.b32.xlu0 %v1371_v59, %s4935_s8 }
 0x3e6   :  { %v6020_v61 = vpop.f32.mrf.mxu0  ;;  %v6022_v19 = vpop.f32.mrf.mxu1 }
 0x3e8   :  { %v6024_v30 = vpop.f32.mrf.mxu0  ;;  %v6026_v7 = vpop.f32.mrf.mxu1 }
 0x3e9   :  { %1584 = vrot.lane.b32.xlu0 %v1454_v22, %s4931_s0  ;;  %1580 = vrot.lane.b32.xlu1 %v1373_v27, %s4931_s0 }
 0x3ea   :  { %v6030_v32 = vpop.f32.mrf.mxu1  ;;  %v6032_v33 = vpop.f32.mrf.mxu0 }
 0x3ec   :  { %v1494_v38 = vpop.f32.mrf.mxu1  ;;  %v1413_v53 = vpop.f32.mrf.mxu0 }
 0x3ed   :  { %1586 = vrot.lane.b32.xlu1 %v1456_v31, %s4931_s0  ;;  %1653 = vrot.lane.b32.xlu0 %v1379_v5, %s4936_s27 }
 0x3ee   :  { %v1495_v50 = vpop.f32.mrf.mxu1  ;;  %v1414_v63 = vpop.f32.mrf.mxu0 }
 0x3f0   :  { %v6036_v2 = vpop.f32.mrf.mxu1  ;;  %v6038_v23 = vpop.f32.mrf.mxu0 }
 0x3f1   :  { %1582 = vrot.lane.b32.xlu1 %v1375_v29, %s4931_s0  ;;  %1657 = vrot.lane.b32.xlu0 %v1460_v54, %s4936_s27 }
 0x3f2   :  { %v6042_v55 = vpop.f32.mrf.mxu1  ;;  %v6044_v40 = vpop.f32.mrf.mxu0 }
 0x3f4   :  { %v6046_v45 = vpop.f32.mrf.mxu1  ;;  %v6048_v4 = vpop.f32.mrf.mxu0 }
 0x3f5   :  { %1659 = vrot.lane.b32.xlu0 %v1462_v56, %s4936_s27  ;;  %1655 = vrot.lane.b32.xlu1 %v1381_v62, %s4936_s27 }
 0x3f6   :  { %v6052_v9 = vpop.f32.mrf.mxu0  ;;  %v6054_v10 = vpop.f32.mrf.mxu1 }
 0x3f8   :  { %v6056_v52 = vpop.f32.mrf.mxu1  ;;  %v6058_v14 = vpop.f32.mrf.mxu0 }
 0x3f9   :  { %1730 = vrot.lane.b32.xlu1 %v1464_v35, %s4937_s15  ;;  %1726 = vrot.lane.b32.xlu0 %v1383_v0, %s4937_s15  ;;  %v6118_v0 = vpop.permute.xlu0 %2085 }
 0x3fa   :  { %v6062_v25 = vpop.f32.mrf.mxu0  ;;  %v6064_v44 = vpop.f32.mrf.mxu1  ;;  %9308 = vst [vmem:[#allocation15_spill] sm:$0xff] %v6118_v0 }
 0x3fc   :  { %v6066_v15 = vpop.f32.mrf.mxu0  ;;  %v6068_v12 = vpop.f32.mrf.mxu1 }
 0x3fd   :  { %1732 = vrot.lane.b32.xlu1 %v1466_v49, %s4937_s15  ;;  %1803 = vrot.lane.b32.xlu0 %v1474_v37, %s4938_s16 }
 0x3fe   :  { %v6072_v21 = vpop.f32.mrf.mxu0  ;;  %v6074_v3 = vpop.f32.mrf.mxu1 }
 0x400   :  { %v6076_v47 = vpop.f32.mrf.mxu0  ;;  %v6078_v11 = vpop.f32.mrf.mxu1 }
 0x401   :  { %9304 = vst [vmem:[#allocation11_spill] sm:$0xff] %v6076_v47  ;;  %9305 = vst [vmem:[#allocation12_spill] sm:$0xff] %v6078_v11  ;;  %1728 = vrot.lane.b32.xlu1 %v5996_v17, %s4937_s15  ;;  %1801 = vrot.lane.b32.xlu0 %v1395_v34, %s4938_s16 }
 0x402   :  { %v6083_v36 = vpop.f32.mrf.mxu0  ;;  %v6085_v58 = vpop.f32.mrf.mxu1 }
 0x403   :  { %9306 = vst [vmem:[#allocation13_spill] sm:$0xff] %v6083_v36  ;;  %9307 = vst [vmem:[#allocation14_spill] sm:$0xff] %v6085_v58 }
 0x404   :  { %v6087_v46 = vpop.f32.mrf.mxu0  ;;  %v6089_v59 = vpop.f32.mrf.mxu1 }
 0x405   :  { %1799 = vrot.lane.b32.xlu1 %v1393_v13, %s4938_s16  ;;  %1876 = vrot.lane.b32.xlu0 %v1480_v20, %s4939_s17 }
 0x406   :  { %v6093_v26 = vpop.f32.mrf.mxu0  ;;  %v6095_v27 = vpop.f32.mrf.mxu1 }
 0x408   :  { %v6097_v22 = vpop.f32.mrf.mxu0  ;;  %v6099_v29 = vpop.f32.mrf.mxu1 }
 0x409   :  { %1805 = vrot.lane.b32.xlu1 %v1476_v28, %s4938_s16  ;;  %1945 = vrot.lane.b32.xlu0 %v1403_v16, %s4933_s28 }
 0x40a   :  { %v6103_v31 = vpop.f32.mrf.mxu0  ;;  %v6105_v5 = vpop.f32.mrf.mxu1 }
 0x40c   :  { %v6107_v54 = vpop.f32.mrf.mxu0  ;;  %v6109_v56 = vpop.f32.mrf.mxu1 }
 0x40d   :  { %1872 = vrot.lane.b32.xlu1 %v6010_v48, %s4939_s17  ;;  %1949 = vrot.lane.b32.xlu0 %v1484_v24, %s4933_s28 }
 0x40e   :  { %v6114_v62 = vpop.f32.mrf.mxu0  ;;  %v6116_v35 = vpop.f32.mrf.mxu1 }
 0x410   :  { %v6120_v49 = vpop.f32.mrf.mxu0  ;;  %v6122_v17 = vpop.f32.mrf.mxu1 }
 0x411   :  { %1874 = vrot.lane.b32.xlu1 %v6014_v60, %s4939_s17  ;;  %2018 = vrot.lane.b32.xlu0 %v6024_v30, %s4940_s18 }
 0x412   :  { %v6128_v37 = vpop.f32.mrf.mxu0  ;;  %v6130_v13 = vpop.f32.mrf.mxu1 }
 0x413   :  { %v6132_v34 = vpop.permute.xlu0 %1501  ;;  %v6134_v28 = vpop.permute.xlu1 %1497 }
 0x414   :  { %9309 = vst [vmem:[#allocation16_spill] sm:$0xff] %v6132_v34  ;;  %v2182_v48 = vpop.f32.mrf.mxu0  ;;  %v2263_v20 = vpop.f32.mrf.mxu1 }
 0x415   :  { %1878 = vrot.lane.b32.xlu1 %v6016_v42, %s4939_s17  ;;  %2022 = vrot.lane.b32.xlu0 %v6026_v7, %s4940_s18 }
 0x416   :  { %v2183_v60 = vpop.f32.mrf.mxu0  ;;  %v2264_v16 = vpop.f32.mrf.mxu1 }
 0x417   :  { %v6140_v24 = vpop.permute.xlu0 %1503  ;;  %v6142_v30 = vpop.permute.xlu1 %1499 }
 0x418   :  { %9310 = vst [vmem:[#allocation17_spill] sm:$0xff] %v6140_v24  ;;  %v6144_v38 = vpop.f32.mrf.mxu0  ;;  %v6146_v53 = vpop.f32.mrf.mxu1 }
 0x419   :  { %1947 = vrot.lane.b32.xlu1 %v6020_v61, %s4933_s28  ;;  %2432 = vrot.lane.b32.xlu0 %v6036_v2, %s4935_s8 }
 0x41a   :  { %v6152_v42 = vpop.f32.mrf.mxu0  ;;  %v6154_v50 = vpop.f32.mrf.mxu1 }
 0x41b   :  { %v6156_v7 = vpop.permute.xlu1 %1572  ;;  %v6158_v63 = vpop.permute.xlu0 %1574 }
 0x41c   :  { %v6160_v48 = vpop.f32.mrf.mxu0  ;;  %v6162_v20 = vpop.f32.mrf.mxu1 }
 0x41d   :  { %1951 = vrot.lane.b32.xlu1 %v6022_v19, %s4933_s28  ;;  %2472 = vrot.lane.b32.xlu0 %v6046_v45, %s4931_s0 }
 0x41e   :  { %v6168_v61 = vpop.f32.mrf.mxu0  ;;  %v6170_v2 = vpop.f32.mrf.mxu1 }
 0x41f   :  { %v6172_v60 = vpop.permute.xlu1 %1576  ;;  %v6174_v16 = vpop.permute.xlu0 %1645 }
 0x420   :  { %9311 = vst [vmem:[#allocation18_spill] sm:$0xff] %v6172_v60  ;;  %v6176_v6 = vpop.f32.mrf.mxu0  ;;  %v6178_v47 = vpop.f32.mrf.mxu1 }
 0x421   :  { %2020 = vrot.lane.b32.xlu1 %v6032_v33, %s4940_s18  ;;  %2470 = vrot.lane.b32.xlu0 %v6052_v9, %s4931_s0 }
 0x422   :  { %v6184_v19 = vpop.f32.mrf.mxu0  ;;  %v6186_v45 = vpop.f32.mrf.mxu1 }
 0x423   :  { %v6188_v58 = vpop.permute.xlu1 %1578  ;;  %v6190_v36 = vpop.permute.xlu0 %1649 }
 0x424   :  { %9312 = vst [vmem:[#allocation19_spill] sm:$0xff] %v6188_v58  ;;  %9313 = vst [vmem:[#allocation20_spill] sm:$0xff] %v6190_v36  ;;  %v6192_v11 = vpop.f32.mrf.mxu0  ;;  %v6194_v57 = vpop.f32.mrf.mxu1 }
 0x425   :  { %2428 = vrot.lane.b32.xlu1 %v6038_v23, %s4935_s8  ;;  %2512 = vrot.lane.b32.xlu0 %v6056_v52, %s4936_s27 }
 0x426   :  { %v6200_v33 = vpop.f32.mrf.mxu0  ;;  %v6202_v9 = vpop.f32.mrf.mxu1 }
 0x427   :  { %v6204_v18 = vpop.permute.xlu0 %1651  ;;  %v6206_v1 = vpop.permute.xlu1 %1647 }
 0x428   :  { %9314 = vst [vmem:[#allocation21_spill] sm:$0xff] %v6204_v18  ;;  %v6208_v43 = vpop.f32.mrf.mxu0  ;;  %v6210_v0 = vpop.f32.mrf.mxu1 }
 0x429   :  { %9315 = vst [vmem:[#allocation22_spill] sm:$0xff] %v6208_v43  ;;  %9316 = vst [vmem:[#allocation23_spill] sm:$0xff] %v6210_v0  ;;  %2430 = vrot.lane.b32.xlu1 %v6044_v40, %s4935_s8  ;;  %2510 = vrot.lane.b32.xlu0 %v6062_v25, %s4936_s27 }
 0x42a   :  { %v6216_v23 = vpop.f32.mrf.mxu0  ;;  %v6218_v52 = vpop.f32.mrf.mxu1 }
 0x42b   :  { %9317 = vst [vmem:[#allocation24_spill] sm:$0xff] %v6216_v23  ;;  %9318 = vst [vmem:[#allocation25_spill] sm:$0xff] %v6218_v52  ;;  %v6220_v8 = vpop.permute.xlu1 %1718  ;;  %v6222_v51 = vpop.permute.xlu0 %1720 }
 0x42c   :  { %9319 = vst [vmem:[#allocation26_spill] sm:$0xff] %v6220_v8  ;;  %9320 = vst [vmem:[#allocation27_spill] sm:$0xff] %v6222_v51  ;;  %v6224_v18 = vpop.f32.mrf.mxu0  ;;  %v6226_v41 = vpop.f32.mrf.mxu1 }
 0x42d   :  { %2434 = vrot.lane.b32.xlu1 %v6042_v55, %s4935_s8  ;;  %2552 = vrot.lane.b32.xlu0 %v6068_v12, %s4937_s15 }
 0x42e   :  { %v6232_v40 = vpop.f32.mrf.mxu0  ;;  %v6234_v25 = vpop.f32.mrf.mxu1 }
 0x42f   :  { %v6236_v0 = vpop.permute.xlu1 %1722  ;;  %v6238_v23 = vpop.permute.xlu0 %1791 }
 0x430   :  { %9321 = vst [vmem:[#allocation28_spill] sm:$0xff] %v6236_v0  ;;  %9322 = vst [vmem:[#allocation29_spill] sm:$0xff] %v6238_v23  ;;  %v6240_v52 = vpop.f32.mrf.mxu0  ;;  %v6242_v43 = vpop.f32.mrf.mxu1 }
 0x431   :  { %2468 = vrot.lane.b32.xlu1 %v6048_v4, %s4931_s0  ;;  %2550 = vrot.lane.b32.xlu0 %v6072_v21, %s4937_s15 }
 0x432   :  { %v6248_v55 = vpop.f32.mrf.mxu0  ;;  %v6250_v12 = vpop.f32.mrf.mxu1 }
 0x433   :  { %v6252_v58 = vpop.permute.xlu1 %1724  ;;  %v6254_v36 = vpop.permute.xlu0 %1795 }
 0x434   :  { %9323 = vst [vmem:[#allocation30_spill] sm:$0xff] %v6252_v58  ;;  %9324 = vst [vmem:[#allocation31_spill] sm:$0xff] %v6254_v36  ;;  %v6256_v0 = vpop.f32.mrf.mxu0  ;;  %v6258_v23 = vpop.f32.mrf.mxu1 }
 0x435   :  { %2474 = vrot.lane.b32.xlu1 %v6054_v10, %s4931_s0  ;;  %2590 = vrot.lane.b32.xlu0 %v6093_v26, %s4938_s16 }
 0x436   :  { %v6264_v4 = vpop.f32.mrf.mxu0  ;;  %v6266_v21 = vpop.f32.mrf.mxu1 }
 0x437   :  { %v6268_v60 = vpop.permute.xlu0 %1797  ;;  %v6270_v39 = vpop.permute.xlu1 %1793 }
 0x438   :  { %9325 = vst [vmem:[#allocation32_spill] sm:$0xff] %v6268_v60  ;;  %9326 = vst [vmem:[#allocation33_spill] sm:$0xff] %v6270_v39  ;;  %v6272_v58 = vpop.f32.mrf.mxu0  ;;  %v6274_v36 = vpop.f32.mrf.mxu1 }
 0x439   :  { %2508 = vrot.lane.b32.xlu1 %v6058_v14, %s4936_s27  ;;  %2594 = vrot.lane.b32.xlu0 %v6095_v27, %s4938_s16 }
 0x43a   :  { %v6280_v10 = vpop.f32.mrf.mxu0  ;;  %v6282_v26 = vpop.f32.mrf.mxu1 }
 0x43b   :  { %v6284_v8 = vpop.permute.xlu1 %1864  ;;  %v6286_v51 = vpop.permute.xlu0 %1866 }
 0x43c   :  { %v2344_v60 = vpop.f32.mrf.mxu0  ;;  %v2425_v39 = vpop.f32.mrf.mxu1 }
 0x43d   :  { %2514 = vrot.lane.b32.xlu1 %v6064_v44, %s4936_s27  ;;  %2630 = vrot.lane.b32.xlu0 %v6103_v31, %s4939_s17 }
 0x43e   :  { %v2345_v14 = vpop.f32.mrf.mxu0  ;;  %v2426_v24 = vpop.f32.mrf.mxu1 }
 0x43f   :  { %v6292_v34 = vpop.permute.xlu1 %1868  ;;  %v6294_v27 = vpop.permute.xlu0 %1870 }
 0x441   :  { %2548 = vrot.lane.b32.xlu1 %v6066_v15, %s4937_s15  ;;  %2634 = vrot.lane.b32.xlu0 %v6105_v5, %s4939_s17 }
 0x443   :  { %v6300_v60 = vpop.permute.xlu1 %1937  ;;  %v6302_v39 = vpop.permute.xlu0 %1939 }
 0x444   :  { %9327 = vst [vmem:[#allocation34_spill] sm:$0xff] %v6300_v60 }
 0x445   :  { %2554 = vrot.lane.b32.xlu1 %v6074_v3, %s4937_s15  ;;  %2670 = vrot.lane.b32.xlu0 %v6114_v62, %s4933_s28 }
 0x447   :  { %v6308_v44 = vpop.permute.xlu1 %1941  ;;  %v6310_v31 = vpop.permute.xlu0 %1943 }
 0x449   :  { %2588 = vrot.lane.b32.xlu1 %v6087_v46, %s4938_s16  ;;  %2708 = vrot.lane.b32.xlu0 %v6120_v49, %s4940_s18 }
 0x44b   :  { %v6316_v15 = vpop.permute.xlu1 %2010  ;;  %v6318_v5 = vpop.permute.xlu0 %2012 }
 0x44c   :  { %9328 = vst [vmem:[#allocation35_spill] sm:$0xff] %v6316_v15 }
 0x44d   :  { %2592 = vrot.lane.b32.xlu1 %v6089_v59, %s4938_s16  ;;  %2712 = vrot.lane.b32.xlu0 %v6122_v17, %s4940_s18 }
 0x44f   :  { %v6324_v3 = vpop.permute.xlu1 %2014  ;;  %v6326_v62 = vpop.permute.xlu0 %1505 }
 0x451   :  { %2628 = vrot.lane.b32.xlu1 %v6097_v22, %s4939_s17  ;;  %2714 = vrot.lane.b32.xlu0 %v6130_v13, %s4940_s18 }
 0x453   :  { %v6332_v46 = vpop.permute.xlu1 %2016  ;;  %v6334_v49 = vpop.permute.xlu0 %1509 }
 0x454   :  { %9329 = vst [vmem:[#allocation36_spill] sm:$0xff] %v6334_v49 }
 0x455   :  { %2632 = vrot.lane.b32.xlu1 %v6099_v29, %s4939_s17  ;;  %2436 = vrot.lane.b32.xlu0 %v6144_v38, %s4935_s8 }
 0x457   :  { %v6340_v59 = vpop.permute.xlu1 %1511  ;;  %v6342_v17 = vpop.permute.xlu0 %1507 }
 0x458   :  { %9330 = vst [vmem:[#allocation37_spill] sm:$0xff] %v6340_v59  ;;  %9331 = vst [vmem:[#allocation38_spill] sm:$0xff] %v6342_v17 }
 0x459   :  { %2668 = vrot.lane.b32.xlu1 %v6107_v54, %s4933_s28  ;;  %2440 = vrot.lane.b32.xlu0 %v6146_v53, %s4935_s8 }
 0x45b   :  { %v6348_v22 = vpop.permute.xlu0 %1584  ;;  %v6350_v13 = vpop.permute.xlu1 %1580 }
 0x45c   :  { %9332 = vst [vmem:[#allocation39_spill] sm:$0xff] %v6348_v22  ;;  %9333 = vst [vmem:[#allocation40_spill] sm:$0xff] %v6350_v13 }
 0x45d   :  { %2672 = vrot.lane.b32.xlu1 %v6109_v56, %s4933_s28  ;;  %2476 = vrot.lane.b32.xlu0 %v6160_v48, %s4931_s0 }
 0x45f   :  { %v6356_v29 = vpop.permute.xlu1 %1586  ;;  %v6358_v24 = vpop.permute.xlu0 %1653 }
 0x460   :  { %9334 = vst [vmem:[#allocation41_spill] sm:$0xff] %v6356_v29  ;;  %9335 = vst [vmem:[#allocation42_spill] sm:$0xff] %v6358_v24  ;;  %v6603_v24 = vld [vmem:[%s9090_s3 + $0x30] sm:$0xff] }
 0x461   :  { %2674 = vrot.lane.b32.xlu1 %v6116_v35, %s4933_s28  ;;  %2480 = vrot.lane.b32.xlu0 %v6162_v20, %s4931_s0 }
 0x463   :  { %v6364_v54 = vpop.permute.xlu1 %1582  ;;  %v6366_v38 = vpop.permute.xlu0 %1657 }
 0x464   :  { %9336 = vst [vmem:[#allocation43_spill] sm:$0xff] %v6364_v54  ;;  %9337 = vst [vmem:[#allocation44_spill] sm:$0xff] %v6366_v38  ;;  %v6593_v54 = vld [vmem:[%s9090_s3 + $0x38] sm:$0xff] }
 0x465   :  { %2710 = vrot.lane.b32.xlu1 %v6128_v37, %s4940_s18  ;;  %2516 = vrot.lane.b32.xlu0 %v6176_v6, %s4936_s27 }
 0x467   :  { %v6372_v56 = vpop.permute.xlu0 %1659  ;;  %v6374_v53 = vpop.permute.xlu1 %1655 }
 0x468   :  { %9338 = vst [vmem:[#allocation45_spill] sm:$0xff] %v6374_v53 }
 0x469   :  { %2442 = vrot.lane.b32.xlu1 %v6154_v50, %s4935_s8  ;;  %2556 = vrot.lane.b32.xlu0 %v6192_v11, %s4937_s15 }
 0x46b   :  { %v6380_v35 = vpop.permute.xlu1 %1730  ;;  %v6382_v48 = vpop.permute.xlu0 %1726 }
 0x46c   :  { %9339 = vst [vmem:[#allocation46_spill] sm:$0xff] %v6380_v35  ;;  %9340 = vst [vmem:[#allocation47_spill] sm:$0xff] %v6382_v48 }
 0x46d   :  { %2438 = vrot.lane.b32.xlu1 %v6152_v42, %s4935_s8  ;;  %2560 = vrot.lane.b32.xlu0 %v6194_v57, %s4937_s15 }
 0x46f   :  { %v6388_v6 = vpop.permute.xlu1 %1732  ;;  %v6390_v37 = vpop.permute.xlu0 %1803 }
 0x470   :  { %9341 = vst [vmem:[#allocation48_spill] sm:$0xff] %v6388_v6  ;;  %9342 = vst [vmem:[#allocation49_spill] sm:$0xff] %v6390_v37 }
 0x471   :  { %2482 = vrot.lane.b32.xlu1 %v6170_v2, %s4931_s0  ;;  %2558 = vrot.lane.b32.xlu0 %v6200_v33, %s4937_s15 }
 0x473   :  { %v6396_v11 = vpop.permute.xlu1 %1728  ;;  %v6398_v50 = vpop.permute.xlu0 %1801 }
 0x474   :  { %9343 = vst [vmem:[#allocation50_spill] sm:$0xff] %v6396_v11  ;;  %9344 = vst [vmem:[#allocation51_spill] sm:$0xff] %v6398_v50 }
 0x475   :  { %2478 = vrot.lane.b32.xlu1 %v6168_v61, %s4931_s0  ;;  %2636 = vrot.lane.b32.xlu0 %v6240_v52, %s4939_s17 }
 0x477   :  { %v6404_v57 = vpop.permute.xlu1 %1799  ;;  %v6406_v42 = vpop.permute.xlu0 %1876 }
 0x478   :  { %9345 = vst [vmem:[#allocation52_spill] sm:$0xff] %v6404_v57  ;;  %9346 = vst [vmem:[#allocation53_spill] sm:$0xff] %v6406_v42 }
 0x479   :  { %2520 = vrot.lane.b32.xlu1 %v6178_v47, %s4936_s27  ;;  %2640 = vrot.lane.b32.xlu0 %v6242_v43, %s4939_s17 }
 0x47b   :  { %v6412_v20 = vpop.permute.xlu1 %1805  ;;  %v6414_v2 = vpop.permute.xlu0 %1945 }
 0x47c   :  { %9347 = vst [vmem:[#allocation54_spill] sm:$0xff] %v6412_v20  ;;  %9348 = vst [vmem:[#allocation55_spill] sm:$0xff] %v6414_v2 }
 0x47d   :  { %2522 = vrot.lane.b32.xlu1 %v6186_v45, %s4936_s27  ;;  %2638 = vrot.lane.b32.xlu0 %v6248_v55, %s4939_s17 }
 0x47f   :  { %v6420_v61 = vpop.permute.xlu1 %1872  ;;  %v6422_v33 = vpop.permute.xlu0 %1949 }
 0x480   :  { %9349 = vst [vmem:[#allocation56_spill] sm:$0xff] %v6420_v61  ;;  %9350 = vst [vmem:[#allocation57_spill] sm:$0xff] %v6422_v33 }
 0x481   :  { %2518 = vrot.lane.b32.xlu1 %v6184_v19, %s4936_s27  ;;  %2642 = vrot.lane.b32.xlu0 %v6250_v12, %s4939_s17 }
 0x483   :  { %v6428_v43 = vpop.permute.xlu1 %1874  ;;  %v6430_v47 = vpop.permute.xlu0 %2018 }
 0x484   :  { %9351 = vst [vmem:[#allocation58_spill] sm:$0xff] %v6428_v43  ;;  %9352 = vst [vmem:[#allocation59_spill] sm:$0xff] %v6430_v47  ;;  %v6573_v47 = vld [vmem:[%s9090_s3 + $0x20] sm:$0xff] }
 0x485   :  { %2562 = vrot.lane.b32.xlu1 %v6202_v9, %s4937_s15  ;;  %2716 = vrot.lane.b32.xlu0 %v6272_v58, %s4940_s18  ;;  %9386 = vst [vmem:[#allocation93_spill] sm:$0xff] %v6573_v47 }
 0x487   :  { %v6436_v45 = vpop.permute.xlu1 %1878  ;;  %v6438_v52 = vpop.permute.xlu0 %2022 }
 0x488   :  { %9353 = vst [vmem:[#allocation60_spill] sm:$0xff] %v6436_v45  ;;  %9354 = vst [vmem:[#allocation61_spill] sm:$0xff] %v6438_v52 }
 0x489   :  { %2596 = vrot.lane.b32.xlu1 %v6224_v18, %s4938_s16  ;;  %2720 = vrot.lane.b32.xlu0 %v6274_v36, %s4940_s18 }
 0x48b   :  { %v6444_v19 = vpop.permute.xlu1 %1947  ;;  %v6446_v55 = vpop.permute.xlu0 %2432 }
 0x48c   :  { %9355 = vst [vmem:[#allocation62_spill] sm:$0xff] %v6444_v19  ;;  %9356 = vst [vmem:[#allocation63_spill] sm:$0xff] %v6446_v55 }
 0x48d   :  { %2600 = vrot.lane.b32.xlu1 %v6226_v41, %s4938_s16  ;;  %2718 = vrot.lane.b32.xlu0 %v6280_v10, %s4940_s18  ;;  %v1513_v10 = vlaneseq }
 0x48f   :  { %v6452_v58 = vpop.permute.xlu1 %1951  ;;  %v6454_v9 = vpop.permute.xlu0 %2472 }
 0x490   :  { %9357 = vst [vmem:[#allocation64_spill] sm:$0xff] %v6452_v58  ;;  %9358 = vst [vmem:[#allocation65_spill] sm:$0xff] %v6454_v9 }
 0x491   :  { %2598 = vrot.lane.b32.xlu1 %v6232_v40, %s4938_s16  ;;  %2722 = vrot.lane.b32.xlu0 %v6282_v26, %s4940_s18  ;;  %v1525_v26 = vshrl.u32 %v1513_v10, 7 }
 0x493   :  { %v6460_v18 = vpop.permute.xlu1 %2020  ;;  %v6462_v36 = vpop.permute.xlu0 %2470  ;;  %v1526_v52 = vsub.s32 0, %v1525_v26  ;;  %v6537_v55 = vsub.s32 7, %v1525_v26 }
 0x494   :  { %9359 = vst [vmem:[#allocation66_spill] sm:$0xff] %v6460_v18  ;;  %9360 = vst [vmem:[#allocation67_spill] sm:$0xff] %v6462_v36  ;;  %v6511_v36 = vsub.s32 4, %v1525_v26 }
 0x495   :  { %2602 = vrot.lane.b32.xlu1 %v6234_v25, %s4938_s16  ;;  %v6482_v25 = vand.u32 127, %v1513_v10  ;;  %v855_v10 = vld [vmem:[%s9090_s3 + $0x10] sm:$0xff]  ;;  %v6625_v60 = vrot.slane %v6573_v47, %v1526_v52 }
 0x496   :  { %v6517_v33 = vrot.slane %v855_v10, %v1526_v52 }
 0x497   :  { %v6466_v41 = vpop.permute.xlu1 %2428  ;;  %v6468_v12 = vpop.permute.xlu0 %2512  ;;  %vm1515_vm5 = vcmp.lt.s32.totalorder %v6482_v25, 33  ;;  %vm1588_vm6 = vcmp.lt.s32.totalorder %v6482_v25, 32  ;;  %vm1661_vm7 = vcmp.lt.s32.totalorder %v6482_v25, 31  ;;  %vm1734_vm8 = vcmp.lt.s32.totalorder %v6482_v25, 1  ;;  %9398 = vst [vmem:[#allocation105_spill] sm:$0xff] %v6625_v60 }
 0x498   :  { %9361 = vst [vmem:[#allocation68_spill] sm:$0xff] %v6466_v41  ;;  %9362 = vst [vmem:[#allocation69_spill] sm:$0xff] %v6468_v12  ;;  %v6505_v12 = vsub.s32 3, %v1525_v26  ;;  %vm1807_vm9 = vcmp.lt.s32.totalorder %v6482_v25, 127  ;;  %vm1880_vm10 = vcmp.lt.s32.totalorder %v6482_v25, 97  ;;  %vm1953_vm11 = vcmp.lt.s32.totalorder %v6482_v25, 96 }
 0x499   :  { %2676 = vrot.lane.b32.xlu1 %v6256_v0, %s4933_s28  ;;  %v6489_v0 = vld [vmem:[%s9090_s3 + $0x18] sm:$0xff]  ;;  %9371 = vst [vmem:[#allocation78_spill] sm:$0xff] %v6517_v33  ;;  %vm2026_vm12 = vcmp.lt.s32.totalorder %v6482_v25, 95 }
 0x49a   :  { %v6509_v41 = vrot.slane %v6489_v0, %v1526_v52 }
 0x49b   :  { %v6472_v14 = vpop.permute.xlu1 %2430  ;;  %v6474_v40 = vpop.permute.xlu0 %2510 }
 0x49c   :  { %9363 = vst [vmem:[#allocation70_spill] sm:$0xff] %v6472_v14  ;;  %9364 = vst [vmem:[#allocation71_spill] sm:$0xff] %v6474_v40  ;;  %v6491_v40 = vsub.s32 1, %v1525_v26  ;;  %v6535_v14 = vsub.s32 6, %v1525_v26 }
 0x49d   :  { %2680 = vrot.lane.b32.xlu1 %v6258_v23, %s4933_s28  ;;  %v854_v23 = vld [vmem:[%s9090_s3 + $0x8] sm:$0xff]  ;;  %9369 = vst [vmem:[#allocation76_spill] sm:$0xff] %v6509_v41 }
 0x49e   :  { %v6515_v9 = vrot.slane %v854_v23, %v1526_v52  ;;  %v6526_v19 = vrot.slane %v855_v10, %v6491_v40  ;;  %v6530_v45 = vrot.slane %v6489_v0, %v6491_v40  ;;  %9375 = vst [vmem:[#allocation82_spill] sm:$0xff] %v6535_v14  ;;  %v6555_v35 = vrot.slane %v854_v23, %v6505_v12 }
 0x49f   :  { %v6478_v58 = vpop.permute.xlu1 %2434  ;;  %v6480_v18 = vpop.permute.xlu0 %2552  ;;  %v6568_v11 = vrot.slane %v854_v23, %v6511_v36  ;;  %v6609_v13 = vrot.slane %v854_v23, %v6535_v14  ;;  %v6612_v17 = vrot.slane %v855_v10, %v6535_v14  ;;  %v6622_v15 = vrot.slane %v854_v23, %v6537_v55 }
 0x4a0   :  { %9365 = vst [vmem:[#allocation72_spill] sm:$0xff] %v6478_v58  ;;  %9366 = vst [vmem:[#allocation73_spill] sm:$0xff] %v6480_v18 }
 0x4a1   :  { %2678 = vrot.lane.b32.xlu1 %v6264_v4, %s4933_s28  ;;  %v6503_v4 = vsub.s32 2, %v1525_v26  ;;  %9370 = vst [vmem:[#allocation77_spill] sm:$0xff] %v6515_v9  ;;  %9373 = vst [vmem:[#allocation80_spill] sm:$0xff] %v6526_v19 }
 0x4a2   :  { %9374 = vst [vmem:[#allocation81_spill] sm:$0xff] %v6530_v45  ;;  %9381 = vst [vmem:[#allocation88_spill] sm:$0xff] %v6555_v35 }
 0x4a3   :  { %v6499_v58 = vpop.permute.xlu1 %2468  ;;  %v6501_v18 = vpop.permute.xlu0 %2550  ;;  %v6546_v20 = vrot.slane %v6489_v0, %v6503_v4  ;;  %v6549_v50 = vrot.slane %v854_v23, %v6503_v4  ;;  %v6552_v37 = vrot.slane %v855_v10, %v6503_v4  ;;  %9385 = vst [vmem:[#allocation92_spill] sm:$0xff] %v6568_v11  ;;  %9392 = vst [vmem:[#allocation99_spill] sm:$0xff] %v6609_v13 }
 0x4a4   :  { %9367 = vst [vmem:[#allocation74_spill] sm:$0xff] %v6499_v58  ;;  %9368 = vst [vmem:[#allocation75_spill] sm:$0xff] %v6501_v18  ;;  %v6521_v18 = vrot.slane %v854_v23, %v6491_v40  ;;  %v6523_v58 = vsub.s32 5, %v1525_v26  ;;  %v6558_v26 = vrot.slane %v855_v10, %v6505_v12 }
 0x4a5   :  { %2682 = vrot.lane.b32.xlu1 %v6266_v21, %s4933_s28  ;;  %v853_v21 = vld [vmem:[%s9090_s3] sm:$0xff]  ;;  %9378 = vst [vmem:[#allocation85_spill] sm:$0xff] %v6546_v20  ;;  %9379 = vst [vmem:[#allocation86_spill] sm:$0xff] %v6549_v50 }
 0x4a6   :  { %9372 = vst [vmem:[#allocation79_spill] sm:$0xff] %v6521_v18  ;;  %9380 = vst [vmem:[#allocation87_spill] sm:$0xff] %v6552_v37  ;;  %v6579_v48 = vrot.slane %v853_v21, %v6511_v36  ;;  %v6582_v53 = vrot.slane %v853_v21, %v6523_v58  ;;  %v6585_v2 = vrot.slane %v854_v23, %v6523_v58 }
 0x4a7   :  { %v6539_v42 = vpop.permute.xlu1 %2474  ;;  %v6541_v43 = vpop.permute.xlu0 %2590  ;;  %9382 = vst [vmem:[#allocation89_spill] sm:$0xff] %v6558_v26  ;;  %v6588_v38 = vrot.slane %v855_v10, %v6523_v58  ;;  %v6606_v22 = vrot.slane %v853_v21, %v6535_v14  ;;  %9393 = vst [vmem:[#allocation100_spill] sm:$0xff] %v6612_v17  ;;  %v6615_v61 = vrot.slane %v853_v21, %v6537_v55 }
 0x4a8   :  { %9376 = vst [vmem:[#allocation83_spill] sm:$0xff] %v6539_v42  ;;  %9377 = vst [vmem:[#allocation84_spill] sm:$0xff] %v6541_v43  ;;  %v6562_v42 = vrot.slane %v6489_v0, %v6505_v12  ;;  %v6565_v43 = vrot.slane %v855_v10, %v6511_v36  ;;  %v6644_v23 = vrot.slane %v6573_v47, %v6491_v40 }
 0x4a9   :  { %2024 = vrot.lane.b32.xlu1 %v6030_v32, %s4940_s18  ;;  %9387 = vst [vmem:[#allocation94_spill] sm:$0xff] %v6579_v48  ;;  %9388 = vst [vmem:[#allocation95_spill] sm:$0xff] %v6582_v53  ;;  %v6598_v32 = vld [vmem:[%s9090_s3 + $0x28] sm:$0xff]  ;;  %v6630_v53 = vrot.slane %v853_v21, %v1526_v52 }
 0x4aa   :  { %9383 = vst [vmem:[#allocation90_spill] sm:$0xff] %v6562_v42  ;;  %9384 = vst [vmem:[#allocation91_spill] sm:$0xff] %v6565_v43  ;;  %v6634_v42 = vrot.slane %v6593_v54, %v1526_v52 }
 0x4ab   :  { %9389 = vst [vmem:[#allocation96_spill] sm:$0xff] %v6585_v2  ;;  %9390 = vst [vmem:[#allocation97_spill] sm:$0xff] %v6588_v38  ;;  %v6617_v57 = vpop.permute.xlu1 %2508  ;;  %v6619_v49 = vpop.permute.xlu0 %2594 }
 0x4ac   :  { %9391 = vst [vmem:[#allocation98_spill] sm:$0xff] %v6606_v22  ;;  %9394 = vst [vmem:[#allocation101_spill] sm:$0xff] %v6615_v61  ;;  %v6628_v22 = vrot.slane %v855_v10, %v6537_v55  ;;  %v6647_v10 = vrot.slane %v853_v21, %v6491_v40  ;;  %v6651_v61 = vrot.slane %v6593_v54, %v6491_v40 }
 0x4ad   :  { %9395 = vst [vmem:[#allocation102_spill] sm:$0xff] %v6617_v57  ;;  %9396 = vst [vmem:[#allocation103_spill] sm:$0xff] %v6619_v49  ;;  %v6637_v57 = vrot.slane %v6598_v32, %v1526_v52  ;;  %v6640_v49 = vrot.slane %v6603_v24, %v1526_v52  ;;  %v1522_v52 = vsel %vm1515_vm5, %v6134_v28, %v6142_v30 }
 0x4ae   :  { %9397 = vst [vmem:[#allocation104_spill] sm:$0xff] %v6622_v15  ;;  %9399 = vst [vmem:[#allocation106_spill] sm:$0xff] %v6628_v22  ;;  %v6686_v22 = vrot.slane %v6603_v24, %v6503_v4 }
 0x4af   :  { %9400 = vst [vmem:[#allocation107_spill] sm:$0xff] %v6630_v53  ;;  %9401 = vst [vmem:[#allocation108_spill] sm:$0xff] %v6634_v42  ;;  %v6655_v42 = vrot.slane %v6573_v47, %v6503_v4  ;;  %v6678_v60 = vpop.permute.xlu0 %2630 }
 0x4b0   :  { %9402 = vst [vmem:[#allocation109_spill] sm:$0xff] %v6637_v57  ;;  %9403 = vst [vmem:[#allocation110_spill] sm:$0xff] %v6640_v49  ;;  %v6659_v57 = vrot.slane %v6598_v32, %v6491_v40  ;;  %v6670_v49 = vrot.slane %v853_v21, %v6503_v4 }
 0x4b1   :  { %9404 = vst [vmem:[#allocation111_spill] sm:$0xff] %v6644_v23  ;;  %9405 = vst [vmem:[#allocation112_spill] sm:$0xff] %v6647_v10  ;;  %v6667_v23 = vrot.slane %v6603_v24, %v6491_v40  ;;  %v6690_v40 = vrot.slane %v6573_v47, %v6505_v12 }
 0x4b2   :  { %9406 = vst [vmem:[#allocation113_spill] sm:$0xff] %v6651_v61  ;;  %9407 = vst [vmem:[#allocation114_spill] sm:$0xff] %v6655_v42  ;;  %v6674_v61 = vrot.slane %v6593_v54, %v6503_v4  ;;  %v6676_v42 = vpop.permute.xlu1 %2514 }
 0x4b3   :  { %9408 = vst [vmem:[#allocation115_spill] sm:$0xff] %v6659_v57  ;;  %9409 = vst [vmem:[#allocation116_spill] sm:$0xff] %v6667_v23  ;;  %v6682_v57 = vrot.slane %v6598_v32, %v6503_v4  ;;  %v6693_v23 = vrot.slane %v853_v21, %v6505_v12  ;;  %v6706_v4 = vrot.slane %v6598_v32, %v6505_v12 }
 0x4b4   :  { %9410 = vst [vmem:[#allocation117_spill] sm:$0xff] %v6670_v49  ;;  %9411 = vst [vmem:[#allocation118_spill] sm:$0xff] %v6674_v61  ;;  %v1557_v21 = vmul.f32 %v6515_v9, %v1522_v52  ;;  %v6732_v52 = vrot.slane %v6603_v24, %v6511_v36  ;;  %v6736_v9 = vrot.slane %v6593_v54, %v6511_v36 }
 0x4b5   :  { %9412 = vst [vmem:[#allocation119_spill] sm:$0xff] %v6676_v42  ;;  %9413 = vst [vmem:[#allocation120_spill] sm:$0xff] %v6678_v60  ;;  %v1595_v42 = vsel %vm1588_vm6, %v6156_v7, %v6158_v63  ;;  %v6702_v60 = vrot.slane %v6593_v54, %v6505_v12 }
 0x4b6   :  { %9414 = vst [vmem:[#allocation121_spill] sm:$0xff] %v6682_v57  ;;  %9415 = vst [vmem:[#allocation122_spill] sm:$0xff] %v6686_v22  ;;  %v6715_v22 = vrot.slane %v6598_v32, %v6511_v36  ;;  %v6719_v57 = vrot.slane %v6489_v0, %v6511_v36 }
 0x4b7   :  { %9416 = vst [vmem:[#allocation123_spill] sm:$0xff] %v6690_v40  ;;  %9417 = vst [vmem:[#allocation124_spill] sm:$0xff] %v6693_v23  ;;  %v6710_v40 = vrot.slane %v6603_v24, %v6505_v12  ;;  %v1668_v12 = vsel %vm1661_vm7, %v6174_v16, %v6206_v1 }
 0x4b8   :  { %9418 = vst [vmem:[#allocation125_spill] sm:$0xff] %v6702_v60  ;;  %9419 = vst [vmem:[#allocation126_spill] sm:$0xff] %v6706_v4  ;;  %v6723_v60 = vrot.slane %v6573_v47, %v6511_v36  ;;  %v9429_v4 = vld [vmem:[#allocation16_spill] sm:$0xff]  ;;  %v1523_v36 = vsel %vm1515_vm5, %v6340_v59, %v6134_v28  ;;  %v6774_v28 = vrot.slane %v6598_v32, %v6523_v58  ;;  %v9437_v59 = vld [vmem:[#allocation18_spill] sm:$0xff] }
 0x4b9   :  { %9420 = vst [vmem:[#allocation127_spill] sm:$0xff] %v6710_v40  ;;  %9421 = vst [vmem:[#allocation128_spill] sm:$0xff] %v6715_v22  ;;  %v6740_v22 = vrot.slane %v6489_v0, %v6535_v14  ;;  %v6744_v40 = vpop.permute.xlu0 %2634  ;;  %v1521_v61 = vsel %vm1515_vm5, %v6142_v30, %v9429_v4  ;;  %v1703_v14 = vmul.f32 %v6549_v50, %v1668_v12 }
 0x4ba   :  { %9422 = vst [vmem:[#allocation129_spill] sm:$0xff] %v6719_v57  ;;  %9423 = vst [vmem:[#allocation130_spill] sm:$0xff] %v6723_v60  ;;  %v6742_v60 = vpop.permute.xlu1 %2548  ;;  %v1630_v57 = vmul.f32 %v6521_v18, %v1595_v42  ;;  %v6770_v42 = vrot.slane %v6573_v47, %v6523_v58  ;;  %v9436_v18 = vld [vmem:[#allocation5_spill] sm:$0xff]  ;;  %v1556_v47 = vmul.f32 %v6630_v53, %v1523_v36 }
 0x4bb   :  { %9424 = vst [vmem:[#allocation131_spill] sm:$0xff] %v6732_v52  ;;  %9425 = vst [vmem:[#allocation132_spill] sm:$0xff] %v6736_v9  ;;  %v6757_v9 = vrot.slane %v6489_v0, %v6523_v58  ;;  %v9431_v52 = vld [vmem:[#allocation17_spill] sm:$0xff] }
 0x4bc   :  { %9426 = vst [vmem:[#allocation133_spill] sm:$0xff] %v6740_v22  ;;  %9427 = vst [vmem:[#allocation134_spill] sm:$0xff] %v6742_v60  ;;  %v9432_v60 = vld [vmem:[#allocation27_spill] sm:$0xff]  ;;  %v9433_v22 = vld [vmem:[#allocation26_spill] sm:$0xff] }
 0x4bd   :  { %9428 = vst [vmem:[#allocation135_spill] sm:$0xff] %v6744_v40  ;;  %9430 = vst [vmem:[#allocation16_spill] sm:$0xff] %v6757_v9  ;;  %v1520_v40 = vsel %vm1515_vm5, %v9429_v4, %v9431_v52  ;;  %v1741_v30 = vsel %vm1734_vm8, %v9433_v22, %v9432_v60  ;;  %v1565_v9 = vadd.f32 %v1557_v21, %v9436_v18  ;;  %v6798_v21 = vpop.permute.xlu0 %2670 }
 0x4be   :  { %9434 = vst [vmem:[#allocation27_spill] sm:$0xff] %v6770_v42  ;;  %9435 = vst [vmem:[#allocation26_spill] sm:$0xff] %v6774_v28  ;;  %v1594_v4 = vsel %vm1588_vm6, %v6158_v63, %v9437_v59  ;;  %v1596_v52 = vsel %vm1588_vm6, %v6356_v29, %v6156_v7  ;;  %v1558_v42 = vmul.f32 %v6517_v33, %v1521_v61  ;;  %v6796_v63 = vpop.permute.xlu1 %2554  ;;  %v9442_v7 = vld [vmem:[#allocation31_spill] sm:$0xff]  ;;  %v9443_v29 = vld [vmem:[#allocation33_spill] sm:$0xff] }
 0x4bf   :  { %v6790_v28 = vrot.slane %v6489_v0, %v6537_v55  ;;  %v6794_v18 = vrot.slane %v6603_v24, %v6523_v58  ;;  %9440 = vst [vmem:[#allocation136_spill] sm:$0xff] %v6796_v63  ;;  %9441 = vst [vmem:[#allocation137_spill] sm:$0xff] %v6798_v21  ;;  %v1638_v12 = vadd.f32 %v1630_v57, %v1565_v9  ;;  %v9444_v63 = vld [vmem:[#allocation20_spill] sm:$0xff] }
 0x4c0   :  { %v1776_v50 = vmul.f32 %v6555_v35, %v1741_v30  ;;  %v1813_v61 = vsel %vm1807_vm9, %v9443_v29, %v9442_v7  ;;  %v1669_v0 = vsel %vm1661_vm7, %v6372_v56, %v6174_v16  ;;  %v1559_v36 = vmul.f32 %v6509_v41, %v1520_v40  ;;  %v9445_v30 = vld [vmem:[#allocation19_spill] sm:$0xff] }
 0x4c1   :  { %9438 = vst [vmem:[#allocation5_spill] sm:$0xff] %v6790_v28  ;;  %9439 = vst [vmem:[#allocation18_spill] sm:$0xff] %v6794_v18  ;;  %v1631_v53 = vmul.f32 %v6526_v19, %v1594_v4  ;;  %v1667_v57 = vsel %vm1661_vm7, %v6206_v1, %v9444_v63  ;;  %v1629_v9 = vmul.f32 %v6647_v10, %v1596_v52  ;;  %v9446_v4 = vld [vmem:[#allocation28_spill] sm:$0xff]  ;;  %v9447_v10 = vld [vmem:[#allocation3_spill] sm:$0xff]  ;;  %v6837_v41 = vpop.permute.xlu0 %2708 }
 0x4c2   :  { %v1593_v21 = vsel %vm1588_vm6, %v9437_v59, %v9445_v30  ;;  %v1711_v35 = vadd.f32 %v1703_v14, %v1638_v12  ;;  %v1886_v16 = vsel %vm1880_vm10, %v6286_v51, %v6292_v34  ;;  %v1742_v40 = vsel %vm1734_vm8, %v6388_v6, %v9433_v22  ;;  %v6835_v12 = vpop.permute.xlu1 %2588  ;;  %9449 = vst [vmem:[#allocation33_spill] sm:$0xff] %v6837_v41  ;;  %v9450_v19 = vld [vmem:[#allocation4_spill] sm:$0xff] }
 0x4c3   :  { %v1740_v1 = vsel %vm1734_vm8, %v9432_v60, %v9446_v4  ;;  %v1849_v52 = vmul.f32 %v6568_v11, %v1813_v61  ;;  %v1564_v59 = vadd.f32 %v1556_v47, %v9447_v10  ;;  %v1702_v14 = vmul.f32 %v6670_v49, %v1669_v0  ;;  %9448 = vst [vmem:[#allocation31_spill] sm:$0xff] %v6835_v12  ;;  %v9451_v6 = vld [vmem:[#allocation32_spill] sm:$0xff] }
 0x4c4   :  { %v1566_v18 = vadd.f32 %v1558_v42, %v9450_v19  ;;  %v1704_v33 = vmul.f32 %v6552_v37, %v1667_v57  ;;  %v1784_v22 = vadd.f32 %v1776_v50, %v1711_v35  ;;  %v1959_v60 = vsel %vm1953_vm11, %v6302_v39, %v6308_v44 }
 0x4c5   :  { %v1812_v47 = vsel %vm1807_vm9, %v9442_v7, %v9451_v6  ;;  %v1922_v10 = vmul.f32 %v6585_v2, %v1886_v16  ;;  %v1637_v61 = vadd.f32 %v1629_v9, %v1564_v59  ;;  %v1775_v0 = vmul.f32 %v6693_v23, %v1742_v40 }
 0x4c6   :  { %v1639_v41 = vadd.f32 %v1631_v53, %v1566_v18  ;;  %v1632_v19 = vmul.f32 %v6530_v45, %v1593_v21  ;;  %v1777_v35 = vmul.f32 %v6558_v26, %v1740_v1  ;;  %v2032_v50 = vsel %vm2026_vm12, %v6318_v5, %v6324_v3  ;;  %v6862_v16 = vpop.permute.xlu1 %2592  ;;  %v6864_v53 = vpop.permute.xlu0 %2712  ;;  %v9453_v18 = vld [vmem:[#allocation21_spill] sm:$0xff] }
 0x4c7   :  { %v1857_v42 = vadd.f32 %v1849_v52, %v1784_v22  ;;  %v1885_v7 = vsel %vm1880_vm10, %v6292_v34, %v6294_v27  ;;  %v1995_v57 = vmul.f32 %v6609_v13, %v1959_v60  ;;  %v1710_v9 = vadd.f32 %v1702_v14, %v1637_v61  ;;  %9452 = vst [vmem:[#allocation20_spill] sm:$0xff] %v6864_v53  ;;  %v9454_v52 = vld [vmem:[#allocation29_spill] sm:$0xff]  ;;  %v9455_v61 = vld [vmem:[#allocation6_spill] sm:$0xff]  ;;  %v9500_v53 = vld [vmem:[#allocation111_spill] sm:$0xff] }
 0x4c8   :  { %v1666_v21 = vsel %vm1661_vm7, %v9444_v63, %v9453_v18  ;;  %v1712_v40 = vadd.f32 %v1704_v33, %v1639_v41  ;;  %v1850_v1 = vmul.f32 %v6565_v43, %v1812_v47  ;;  %v1814_v34 = vsel %vm1807_vm9, %v9454_v52, %v9443_v29  ;;  %v9497_v13 = vld [vmem:[#allocation110_spill] sm:$0xff]  ;;  %v9508_v45 = vld [vmem:[#allocation45_spill] sm:$0xff] }
 0x4c9   :  { %v1930_v59 = vadd.f32 %v1922_v10, %v1857_v42  ;;  %v1958_v14 = vsel %vm1953_vm11, %v6308_v44, %v6310_v31  ;;  %v2068_v22 = vmul.f32 %v6622_v15, %v2032_v50  ;;  %v1783_v60 = vadd.f32 %v1775_v0, %v1710_v9 }
 0x4ca   :  { %v1567_v23 = vadd.f32 %v1559_v36, %v9455_v61  ;;  %v1785_v63 = vadd.f32 %v1777_v35, %v1712_v40  ;;  %v1923_v33 = vmul.f32 %v6588_v38, %v1885_v7  ;;  %v6884_v41 = vrot.slane %v6593_v54, %v6523_v58  ;;  %v6892_v0 = vpop.permute.xlu1 %2628  ;;  %v6894_v36 = vpop.permute.xlu0 %2714  ;;  %v9459_v35 = vld [vmem:[#allocation30_spill] sm:$0xff] }
 0x4cb   :  { %v1705_v29 = vmul.f32 %v6546_v20, %v1666_v21  ;;  %v1848_v47 = vmul.f32 %v6579_v48, %v1814_v34  ;;  %v2003_v10 = vadd.f32 %v1995_v57, %v1930_v59  ;;  %v2031_v44 = vsel %vm2026_vm12, %v6324_v3, %v6332_v46  ;;  %9457 = vst [vmem:[#allocation28_spill] sm:$0xff] %v6892_v0  ;;  %v9460_v3 = vld [vmem:[#allocation17_spill] sm:$0xff]  ;;  %v9461_v59 = vld [vmem:[#allocation106_spill] sm:$0xff] }
 0x4cc   :  { %9456 = vst [vmem:[#allocation19_spill] sm:$0xff] %v6884_v41  ;;  %9458 = vst [vmem:[#allocation3_spill] sm:$0xff] %v6894_v36  ;;  %v1739_v58 = vsel %vm1734_vm8, %v9446_v4, %v9459_v35  ;;  %v1858_v50 = vadd.f32 %v1850_v1, %v1785_v63  ;;  %v1887_v42 = vsel %vm1880_vm10, %v6284_v8, %v6286_v51  ;;  %v9462_v4 = vld [vmem:[#allocation82_spill] sm:$0xff]  ;;  %v9463_v1 = vld [vmem:[#allocation93_spill] sm:$0xff] }
 0x4cd   :  { %v1996_v7 = vmul.f32 %v6612_v17, %v1958_v14  ;;  %v1640_v57 = vadd.f32 %v1632_v19, %v1567_v23  ;;  %v2076_v9 = vadd.f32 %v2068_v22, %v2003_v10  ;;  %v1519_v21 = vsel %vm1515_vm5, %v9460_v3, %v6326_v62  ;;  %v9466_v23 = vld [vmem:[#allocation90_spill] sm:$0xff]  ;;  %v9467_v22 = vld [vmem:[#allocation95_spill] sm:$0xff]  ;;  %v9475_v48 = vld [vmem:[#allocation37_spill] sm:$0xff] }
 0x4ce   :  { %v1856_v40 = vadd.f32 %v1848_v47, %v1783_v60  ;;  %v1931_v34 = vadd.f32 %v1923_v33, %v1858_v50  ;;  %v2069_v61 = vmul.f32 %v9461_v59, %v2031_v44  ;;  %v6912_v63 = vrot.slane %v9463_v1, %v9462_v4  ;;  %v6924_v60 = vpop.permute.xlu1 %2632  ;;  %v6926_v33 = vpop.permute.xlu0 %2436  ;;  %v9470_v47 = vld [vmem:[#allocation34_spill] sm:$0xff]  ;;  %v9476_v59 = vld [vmem:[#allocation36_spill] sm:$0xff]  ;;  %v9496_v20 = vld [vmem:[#allocation109_spill] sm:$0xff] }
 0x4cf   :  { %v6916_v51 = vrot.slane %v6598_v32, %v9462_v4  ;;  %v1713_v14 = vadd.f32 %v1705_v29, %v1640_v57  ;;  %v1778_v19 = vmul.f32 %v9466_v23, %v1739_v58  ;;  %v1921_v10 = vmul.f32 %v9467_v22, %v1887_v42  ;;  %9469 = vst [vmem:[#allocation29_spill] sm:$0xff] %v6926_v33  ;;  %v9471_v29 = vld [vmem:[#allocation35_spill] sm:$0xff]  ;;  %v9472_v42 = vld [vmem:[#allocation105_spill] sm:$0xff]  ;;  %v9477_v23 = vld [vmem:[#allocation52_spill] sm:$0xff] }
 0x4d0   :  { %9464 = vst [vmem:[#allocation4_spill] sm:$0xff] %v6912_v63  ;;  %v6922_v3 = vrot.slane %v6603_v24, %v9462_v4  ;;  %v1960_v44 = vsel %vm1953_vm11, %v9470_v47, %v6302_v39  ;;  %v2004_v50 = vadd.f32 %v1996_v7, %v1931_v34  ;;  %v2033_v58 = vsel %vm2026_vm12, %v9471_v29, %v6318_v5  ;;  %v9473_v22 = vld [vmem:[#allocation15_spill] sm:$0xff]  ;;  %v9499_v33 = vld [vmem:[#allocation9_spill] sm:$0xff]  ;;  %v9504_v36 = vld [vmem:[#allocation114_spill] sm:$0xff] }
 0x4d1   :  { %9465 = vst [vmem:[#allocation32_spill] sm:$0xff] %v6916_v51  ;;  %v1560_v57 = vmul.f32 %v9472_v42, %v1519_v21  ;;  %v6938_v0 = vadd.f32 %v9473_v22, %v2076_v9  ;;  %v1516_v12 = vsel %vm1515_vm5, %v9476_v59, %v9475_v48  ;;  %v1929_v15 = vadd.f32 %v1921_v10, %v1856_v40  ;;  %v9481_v40 = vld [vmem:[#allocation98_spill] sm:$0xff]  ;;  %v9482_v10 = vld [vmem:[#allocation101_spill] sm:$0xff]  ;;  %v9483_v42 = vld [vmem:[#allocation56_spill] sm:$0xff] }
 0x4d2   :  { %9468 = vst [vmem:[#allocation21_spill] sm:$0xff] %v6922_v3  ;;  %v1811_v39 = vsel %vm1807_vm9, %v9451_v6, %v9477_v23  ;;  %v2077_v7 = vadd.f32 %v2069_v61, %v2004_v50  ;;  %v6950_v5 = vrot.slane %v6593_v54, %v9462_v4  ;;  %v6954_v9 = vrot.slane %v9463_v1, %v6537_v55  ;;  %v6966_v61 = vpop.permute.xlu1 %2668  ;;  %v9485_v4 = vld [vmem:[#allocation108_spill] sm:$0xff]  ;;  %v9486_v1 = vld [vmem:[#allocation38_spill] sm:$0xff] }
 0x4d3   :  { %9474 = vst [vmem:[#allocation6_spill] sm:$0xff] %v6938_v0  ;;  %v6958_v21 = vrot.slane %v6598_v32, %v6537_v55  ;;  %v1786_v48 = vadd.f32 %v1778_v19, %v1713_v14  ;;  %v1994_v34 = vmul.f32 %v9481_v40, %v1960_v44  ;;  %v2067_v29 = vmul.f32 %v9482_v10, %v2033_v58  ;;  %v9487_v19 = vld [vmem:[#allocation129_spill] sm:$0xff]  ;;  %v6978_v58 = vpop.permute.xlu0 %2440  ;;  %v9489_v10 = vld [vmem:[#allocation8_spill] sm:$0xff]  ;;  %v9520_v38 = vld [vmem:[#allocation122_spill] sm:$0xff] }
 0x4d4   :  { %9478 = vst [vmem:[#allocation30_spill] sm:$0xff] %v6950_v5  ;;  %9479 = vst [vmem:[#allocation17_spill] sm:$0xff] %v6954_v9  ;;  %v1884_v6 = vsel %vm1880_vm10, %v6294_v27, %v9483_v42  ;;  %v1563_v50 = vmul.f32 %v9485_v4, %v1516_v12  ;;  %v1517_v32 = vsel %vm1515_vm5, %v9486_v1, %v9476_v59  ;;  %v9490_v4 = vld [vmem:[#allocation40_spill] sm:$0xff] }
 0x4d5   :  { %9480 = vst [vmem:[#allocation82_spill] sm:$0xff] %v6958_v21  ;;  %9484 = vst [vmem:[#allocation93_spill] sm:$0xff] %v6966_v61  ;;  %v1518_v14 = vsel %vm1515_vm5, %v6326_v62, %v9486_v1  ;;  %v1851_v44 = vmul.f32 %v9487_v19, %v1811_v39  ;;  %v6982_v27 = vmul.f32 %v6938_v0, %v6938_v0  ;;  %v9492_v62 = vld [vmem:[#allocation41_spill] sm:$0xff]  ;;  %v9493_v1 = vld [vmem:[#allocation39_spill] sm:$0xff] }
 0x4d6   :  { %9488 = vst [vmem:[#allocation34_spill] sm:$0xff] %v6978_v58  ;;  %v1568_v12 = vadd.f32 %v1560_v57, %v9489_v10  ;;  %v1592_v59 = vsel %vm1588_vm6, %v9445_v30, %v9490_v4  ;;  %v2002_v40 = vadd.f32 %v1994_v34, %v1929_v15  ;;  %v6990_v61 = vadd.f32 %v9473_v22, %v2077_v7  ;;  %v9494_v19 = vld [vmem:[#allocation42_spill] sm:$0xff]  ;;  %v9495_v57 = vld [vmem:[#allocation16_spill] sm:$0xff]  ;;  %v9498_v15 = vld [vmem:[#allocation43_spill] sm:$0xff] }
 0x4d7   :  { %v1589_v39 = vsel %vm1588_vm6, %v9493_v1, %v9492_v62  ;;  %v1665_v58 = vsel %vm1661_vm7, %v9453_v18, %v9494_v19  ;;  %v1924_v10 = vmul.f32 %v9495_v57, %v1884_v6  ;;  %v1561_v49 = vmul.f32 %v9496_v20, %v1518_v14  ;;  %v7011_v62 = vpop.permute.xlu1 %2672  ;;  %v9501_v14 = vld [vmem:[#allocation44_spill] sm:$0xff] }
 0x4d8   :  { %9491 = vst [vmem:[#allocation15_spill] sm:$0xff] %v6990_v61  ;;  %v1562_v30 = vmul.f32 %v9497_v13, %v1517_v32  ;;  %v1590_v7 = vsel %vm1588_vm6, %v9498_v15, %v9493_v1  ;;  %v1591_v34 = vsel %vm1588_vm6, %v9490_v4, %v9498_v15  ;;  %v1571_v18 = vadd.f32 %v1563_v50, %v9499_v33  ;;  %v7019_v13 = vpop.permute.xlu0 %2476  ;;  %v9503_v1 = vld [vmem:[#allocation113_spill] sm:$0xff]  ;;  %v9505_v4 = vld [vmem:[#allocation55_spill] sm:$0xff]  ;;  %v9507_v15 = vld [vmem:[#allocation116_spill] sm:$0xff] }
 0x4d9   :  { %v1633_v6 = vmul.f32 %v9500_v53, %v1592_v59  ;;  %v1662_v32 = vsel %vm1661_vm7, %v9501_v14, %v6372_v56  ;;  %v1859_v57 = vadd.f32 %v1851_v44, %v1786_v48  ;;  %9502 = vst [vmem:[#allocation37_spill] sm:$0xff] %v7019_v13  ;;  %v1636_v20 = vmul.f32 %v9503_v1, %v1589_v39  ;;  %v9506_v50 = vld [vmem:[#allocation115_spill] sm:$0xff]  ;;  %v9509_v44 = vld [vmem:[#allocation118_spill] sm:$0xff]  ;;  %v9517_v1 = vld [vmem:[#allocation121_spill] sm:$0xff] }
 0x4da   :  { %v1706_v2 = vmul.f32 %v9504_v36, %v1665_v58  ;;  %v2075_v17 = vadd.f32 %v2067_v29, %v2002_v40  ;;  %v1957_v33 = vsel %vm1953_vm11, %v6310_v31, %v9505_v4  ;;  %v1634_v59 = vmul.f32 %v9506_v50, %v1591_v34  ;;  %v9510_v40 = vld [vmem:[#allocation47_spill] sm:$0xff]  ;;  %v9519_v13 = vld [vmem:[#allocation50_spill] sm:$0xff] }
 0x4db   :  { %v1635_v53 = vmul.f32 %v9507_v15, %v1590_v7  ;;  %v1664_v56 = vsel %vm1661_vm7, %v9494_v19, %v9508_v45  ;;  %v1932_v48 = vadd.f32 %v1924_v10, %v1859_v57  ;;  %v1709_v39 = vmul.f32 %v9509_v44, %v1662_v32  ;;  %v9511_v58 = vld [vmem:[#allocation59_spill] sm:$0xff]  ;;  %v7046_v34 = vpop.permute.xlu1 %2674  ;;  %v9513_v19 = vld [vmem:[#allocation10_spill] sm:$0xff]  ;;  %v9515_v15 = vld [vmem:[#allocation133_spill] sm:$0xff] }
 0x4dc   :  { %v1663_v29 = vsel %vm1661_vm7, %v9508_v45, %v9501_v14  ;;  %v1738_v31 = vsel %vm1734_vm8, %v9459_v35, %v9510_v40  ;;  %v2030_v7 = vsel %vm2026_vm12, %v6332_v46, %v9511_v58  ;;  %9512 = vst [vmem:[#allocation36_spill] sm:$0xff] %v7046_v34  ;;  %v1569_v57 = vadd.f32 %v1561_v49, %v9513_v19  ;;  %v9514_v10 = vld [vmem:[#allocation7_spill] sm:$0xff]  ;;  %v7051_v45 = vpop.permute.xlu0 %2480 }
 0x4dd   :  { %v1570_v32 = vadd.f32 %v1562_v30, %v9514_v10  ;;  %v1641_v44 = vadd.f32 %v1633_v6, %v1568_v12  ;;  %v1997_v50 = vmul.f32 %v9515_v15, %v1957_v33  ;;  %9516 = vst [vmem:[#allocation52_spill] sm:$0xff] %v7051_v45  ;;  %v1644_v14 = vadd.f32 %v1636_v20, %v1571_v18  ;;  %v9521_v19 = vld [vmem:[#allocation123_spill] sm:$0xff]  ;;  %v9523_v15 = vld [vmem:[#allocation46_spill] sm:$0xff] }
 0x4de   :  { %v1707_v36 = vmul.f32 %v9517_v1, %v1664_v56  ;;  %v7055_v35 = vadd.f32 %v9473_v22, %v2075_v17  ;;  %v1737_v46 = vsel %vm1734_vm8, %v9510_v40, %v9519_v13  ;;  %v1708_v49 = vmul.f32 %v9520_v38, %v1663_v29  ;;  %v9522_v17 = vld [vmem:[#allocation48_spill] sm:$0xff]  ;;  %v9524_v40 = vld [vmem:[#allocation126_spill] sm:$0xff] }
 0x4df   :  { %v1779_v30 = vmul.f32 %v9521_v19, %v1738_v31  ;;  %v2005_v12 = vadd.f32 %v1997_v50, %v1932_v48  ;;  %v2070_v6 = vmul.f32 %v6790_v28, %v2030_v7  ;;  %v1714_v33 = vadd.f32 %v1706_v2, %v1641_v44  ;;  %v7064_v56 = vpop.permute.xlu1 %2710  ;;  %v9525_v48 = vld [vmem:[#allocation49_spill] sm:$0xff]  ;;  %v9526_v31 = vld [vmem:[#allocation51_spill] sm:$0xff]  ;;  %v9531_v28 = vld [vmem:[#allocation58_spill] sm:$0xff] }
 0x4e0   :  { %9518 = vst [vmem:[#allocation56_spill] sm:$0xff] %v7055_v35  ;;  %v1642_v10 = vadd.f32 %v1634_v59, %v1569_v57  ;;  %v1643_v20 = vadd.f32 %v1635_v53, %v1570_v32  ;;  %v1717_v18 = vadd.f32 %v1709_v39, %v1644_v14  ;;  %v1735_v1 = vsel %vm1734_vm8, %v9523_v15, %v9522_v17  ;;  %v7079_v53 = vpop.permute.xlu0 %2516  ;;  %v9527_v39 = vld [vmem:[#allocation54_spill] sm:$0xff]  ;;  %v9528_v14 = vld [vmem:[#allocation125_spill] sm:$0xff]  ;;  %v9530_v17 = vld [vmem:[#allocation128_spill] sm:$0xff] }
 0x4e1   :  { %v1736_v29 = vsel %vm1734_vm8, %v9519_v13, %v9523_v15  ;;  %v1780_v50 = vmul.f32 %v9524_v40, %v1737_v46  ;;  %v1809_v2 = vsel %vm1807_vm9, %v9526_v31, %v9525_v48  ;;  %v1810_v44 = vsel %vm1807_vm9, %v9477_v23, %v9526_v31  ;;  %v9544_v19 = vld [vmem:[#allocation18_spill] sm:$0xff] }
 0x4e2   :  { %v1715_v59 = vadd.f32 %v1707_v36, %v1642_v10  ;;  %v1808_v13 = vsel %vm1807_vm9, %v9525_v48, %v9527_v39  ;;  %v2778_v15 = vmul.f32 %v7055_v35, %v7055_v35  ;;  %v1716_v7 = vadd.f32 %v1708_v49, %v1643_v20  ;;  %v9529_v10 = vld [vmem:[#allocation127_spill] sm:$0xff] }
 0x4e3   :  { %v1787_v57 = vadd.f32 %v1779_v30, %v1714_v33  ;;  %v1815_v36 = vsel %vm1807_vm9, %v9527_v39, %v9454_v52  ;;  %v2078_v32 = vadd.f32 %v2070_v6, %v2005_v12  ;;  %v1782_v46 = vmul.f32 %v9528_v14, %v1735_v1  ;;  %v7102_v38 = vpop.permute.xlu1 %2442  ;;  %v9532_v30 = vld [vmem:[#allocation130_spill] sm:$0xff]  ;;  %v9533_v20 = vld [vmem:[#allocation131_spill] sm:$0xff]  ;;  %v9534_v52 = vld [vmem:[#allocation53_spill] sm:$0xff] }
 0x4e4   :  { %v1781_v23 = vmul.f32 %v9529_v10, %v1736_v29  ;;  %v1853_v31 = vmul.f32 %v9530_v17, %v1809_v2  ;;  %v1883_v48 = vsel %vm1880_vm10, %v9483_v42, %v9531_v28  ;;  %v1788_v49 = vadd.f32 %v1780_v50, %v1715_v59  ;;  %v7110_v12 = vpop.permute.xlu0 %2556  ;;  %v9535_v6 = vld [vmem:[#allocation132_spill] sm:$0xff]  ;;  %v9536_v2 = vld [vmem:[#allocation63_spill] sm:$0xff]  ;;  %v9537_v39 = vld [vmem:[#allocation70_spill] sm:$0xff] }
 0x4e5   :  { %v1852_v33 = vmul.f32 %v9532_v30, %v1810_v44  ;;  %v1854_v40 = vmul.f32 %v9533_v20, %v1808_v13  ;;  %v1882_v1 = vsel %vm1880_vm10, %v9531_v28, %v9534_v52  ;;  %v1855_v29 = vmul.f32 %v9535_v6, %v1815_v36  ;;  %v9538_v44 = vld [vmem:[#allocation27_spill] sm:$0xff]  ;;  %v9540_v28 = vld [vmem:[#allocation60_spill] sm:$0xff]  ;;  %v9542_v17 = vld [vmem:[#allocation62_spill] sm:$0xff] }
 0x4e6   :  { %v2449_v42 = vsel %vm1515_vm5, %v9537_v39, %v9536_v2  ;;  %v2756_v50 = vadd.f32 %v6938_v0, %v7055_v35  ;;  %v2794_v59 = vadd.f32 %v6982_v27, %v2778_v15  ;;  %v1925_v13 = vmul.f32 %v9538_v44, %v1883_v48  ;;  %v9541_v15 = vld [vmem:[#allocation26_spill] sm:$0xff] }
 0x4e7   :  { %v7122_v20 = vadd.f32 %v9473_v22, %v2078_v32  ;;  %v1881_v36 = vsel %vm1880_vm10, %v9534_v52, %v9540_v28  ;;  %v1888_v6 = vsel %vm1880_vm10, %v9540_v28, %v6284_v8  ;;  %v2780_v35 = vmul.f32 %v6990_v61, %v6990_v61  ;;  %v7135_v44 = vpop.permute.xlu1 %2438  ;;  %v9543_v30 = vld [vmem:[#allocation78_spill] sm:$0xff] }
 0x4e8   :  { %v1790_v0 = vadd.f32 %v1782_v46, %v1717_v18  ;;  %v1789_v27 = vadd.f32 %v1781_v23, %v1716_v7  ;;  %v1926_v48 = vmul.f32 %v9541_v15, %v1882_v1  ;;  %v1861_v32 = vadd.f32 %v1853_v31, %v1788_v49  ;;  %v7142_v45 = vpop.permute.xlu0 %2560  ;;  %v9547_v1 = vld [vmem:[#allocation67_spill] sm:$0xff] }
 0x4e9   :  { %9539 = vst [vmem:[#allocation38_spill] sm:$0xff] %v7122_v20  ;;  %v1860_v14 = vadd.f32 %v1852_v33, %v1787_v57  ;;  %v1956_v52 = vsel %vm1953_vm11, %v9505_v4, %v9542_v17  ;;  %v2454_v10 = vmul.f32 %v2449_v42, %v9543_v30  ;;  %v1927_v18 = vmul.f32 %v9544_v19, %v1881_v36  ;;  %v9545_v33 = vld [vmem:[#allocation57_spill] sm:$0xff]  ;;  %v9549_v42 = vld [vmem:[#allocation12_spill] sm:$0xff]  ;;  %v9556_v30 = vld [vmem:[#allocation74_spill] sm:$0xff] }
 0x4ea   :  { %v1862_v8 = vadd.f32 %v1854_v40, %v1789_v27  ;;  %v1863_v28 = vadd.f32 %v1855_v29, %v1790_v0  ;;  %v1928_v7 = vmul.f32 %v6884_v41, %v1888_v6  ;;  %v2781_v23 = vmul.f32 %v7122_v20, %v7122_v20  ;;  %v9546_v0 = vld [vmem:[#allocation65_spill] sm:$0xff]  ;;  %v9548_v29 = vld [vmem:[#allocation68_spill] sm:$0xff] }
 0x4eb   :  { %v1933_v46 = vadd.f32 %v1925_v13, %v1860_v14  ;;  %v2757_v57 = vadd.f32 %v2756_v50, %v6990_v61  ;;  %v2795_v31 = vadd.f32 %v2794_v59, %v2780_v35  ;;  %v1934_v49 = vadd.f32 %v1926_v48, %v1861_v32  ;;  %v7158_v14 = vpop.permute.xlu1 %2482  ;;  %v9552_v48 = vld [vmem:[#allocation69_spill] sm:$0xff]  ;;  %v9553_v32 = vld [vmem:[#allocation71_spill] sm:$0xff] }
 0x4ec   :  { %v1955_v4 = vsel %vm1953_vm11, %v9542_v17, %v9545_v33  ;;  %v1998_v40 = vmul.f32 %v6912_v63, %v1956_v52  ;;  %v2489_v6 = vsel %vm1588_vm6, %v9547_v1, %v9546_v0  ;;  %v2450_v35 = vsel %vm1515_vm5, %v9548_v29, %v9537_v39  ;;  %v7165_v59 = vpop.permute.xlu0 %2558 }
 0x4ed   :  { %v2462_v50 = vadd.f32 %v2454_v10, %v9549_v42  ;;  %v7169_v17 = vrot.slane %v6603_v24, %v6537_v55  ;;  %v7173_v13 = vrot.slane %v6593_v54, %v6537_v55  ;;  %v7175_v36 = vadd.f32 %v1927_v18, %v1862_v8  ;;  %v9555_v24 = vld [vmem:[#allocation80_spill] sm:$0xff]  ;;  %v9559_v18 = vld [vmem:[#allocation66_spill] sm:$0xff] }
 0x4ee   :  { %v7177_v27 = vadd.f32 %v1928_v7, %v1863_v28  ;;  %v2529_v39 = vsel %vm1661_vm7, %v9553_v32, %v9552_v48  ;;  %v7184_v10 = vadd.f32 %v2757_v57, %v7122_v20  ;;  %v1999_v52 = vmul.f32 %v6916_v51, %v1955_v4  ;;  %v9558_v28 = vld [vmem:[#allocation61_spill] sm:$0xff]  ;;  %v9570_v51 = vld [vmem:[#allocation103_spill] sm:$0xff] }
 0x4ef   :  { %9550 = vst [vmem:[#allocation8_spill] sm:$0xff] %v7169_v17  ;;  %9551 = vst [vmem:[#allocation40_spill] sm:$0xff] %v7173_v13  ;;  %v2494_v42 = vmul.f32 %v2489_v6, %v9555_v24  ;;  %v2490_v54 = vsel %vm1588_vm6, %v9556_v30, %v9547_v1  ;;  %v7192_v55 = vadd.f32 %v2795_v31, %v2781_v23  ;;  %v9560_v4 = vld [vmem:[#allocation77_spill] sm:$0xff]  ;;  %v7203_v24 = vpop.permute.xlu1 %2478  ;;  %v9562_v31 = vld [vmem:[#allocation75_spill] sm:$0xff] }
 0x4f0   :  { %9554 = vst [vmem:[#allocation41_spill] sm:$0xff] %v7184_v10  ;;  %v2006_v8 = vadd.f32 %v1998_v40, %v1933_v46  ;;  %v2028_v7 = vsel %vm2026_vm12, %v9559_v18, %v9558_v28  ;;  %v2029_v57 = vsel %vm2026_vm12, %v9511_v58, %v9559_v18  ;;  %v2453_v6 = vmul.f32 %v2450_v35, %v9560_v4  ;;  %v9561_v23 = vld [vmem:[#allocation73_spill] sm:$0xff]  ;;  %v9563_v40 = vld [vmem:[#allocation102_spill] sm:$0xff]  ;;  %v7233_v28 = vpop.permute.xlu0 %2636 }
 0x4f1   :  { %9557 = vst [vmem:[#allocation39_spill] sm:$0xff] %v7192_v55  ;;  %v2502_v61 = vadd.f32 %v2494_v42, %v2462_v50  ;;  %v2534_v1 = vmul.f32 %v2529_v39, %v6552_v37  ;;  %v2569_v46 = vsel %vm1734_vm8, %v9562_v31, %v9561_v23  ;;  %v2530_v20 = vsel %vm1661_vm7, %v9563_v40, %v9553_v32  ;;  %v9564_v55 = vld [vmem:[#allocation64_spill] sm:$0xff]  ;;  %v9566_v42 = vld [vmem:[#allocation79_spill] sm:$0xff]  ;;  %v9567_v10 = vld [vmem:[#allocation134_spill] sm:$0xff] }
 0x4f2   :  { %v1954_v58 = vsel %vm1953_vm11, %v9545_v33, %v9564_v55  ;;  %v1961_v35 = vsel %vm1953_vm11, %v9564_v55, %v9470_v47  ;;  %v9565_v50 = vld [vmem:[#allocation72_spill] sm:$0xff]  ;;  %v2493_v18 = vmul.f32 %v2490_v54, %v9566_v42  ;;  %v2007_v37 = vadd.f32 %v1999_v52, %v1934_v49  ;;  %v9568_v47 = vld [vmem:[#allocation13_spill] sm:$0xff]  ;;  %v9569_v17 = vld [vmem:[#allocation86_spill] sm:$0xff] }
 0x4f3   :  { %v2448_v39 = vsel %vm1515_vm5, %v9536_v2, %v9565_v50  ;;  %v2071_v32 = vmul.f32 %v6954_v9, %v2029_v57  ;;  %v2072_v4 = vmul.f32 %v6958_v21, %v2028_v7  ;;  %v2570_v33 = vsel %vm1734_vm8, %v9567_v10, %v9562_v31  ;;  %v7242_v52 = vpop.permute.xlu1 %2520  ;;  %v9571_v31 = vld [vmem:[#allocation76_spill] sm:$0xff] }
 0x4f4   :  { %v2461_v55 = vadd.f32 %v2453_v6, %v9568_v47  ;;  %v2574_v13 = vmul.f32 %v2569_v46, %v6558_v26  ;;  %v2533_v2 = vmul.f32 %v2530_v20, %v9569_v17  ;;  %v2608_v49 = vsel %vm1807_vm9, %v6862_v16, %v9570_v51  ;;  %v9572_v6 = vld [vmem:[#allocation88_spill] sm:$0xff]  ;;  %v9574_v26 = vld [vmem:[#allocation135_spill] sm:$0xff] }
 0x4f5   :  { %v2000_v54 = vmul.f32 %v6922_v3, %v1954_v58  ;;  %v2001_v7 = vmul.f32 %v6950_v5, %v1961_v35  ;;  %v2542_v57 = vadd.f32 %v2534_v1, %v2502_v61  ;;  %v2455_v42 = vmul.f32 %v2448_v39, %v9571_v31  ;;  %v9573_v46 = vld [vmem:[#allocation84_spill] sm:$0xff]  ;;  %v9575_v58 = vld [vmem:[#allocation83_spill] sm:$0xff] }
 0x4f6   :  { %v2501_v21 = vadd.f32 %v2493_v18, %v2461_v55  ;;  %v2573_v47 = vmul.f32 %v2570_v33, %v9572_v6  ;;  %v2609_v20 = vsel %vm1807_vm9, %v9573_v46, %v6862_v16  ;;  %v2648_v17 = vsel %vm1880_vm10, %v6924_v60, %v9574_v26  ;;  %v9582_v6 = vld [vmem:[#allocation137_spill] sm:$0xff]  ;;  %v9584_v5 = vld [vmem:[#allocation119_spill] sm:$0xff] }
 0x4f7   :  { %v2079_v63 = vadd.f32 %v2071_v32, %v2006_v8  ;;  %v2488_v61 = vsel %vm1588_vm6, %v9546_v0, %v9575_v58  ;;  %v2614_v1 = vmul.f32 %v2608_v49, %v6565_v43  ;;  %v2451_v35 = vsel %vm1515_vm5, %v7102_v38, %v9548_v29  ;;  %v7269_v32 = vpop.permute.xlu1 %2522  ;;  %v9576_v0 = vld [vmem:[#allocation120_spill] sm:$0xff]  ;;  %v9577_v49 = vld [vmem:[#allocation97_spill] sm:$0xff]  ;;  %v9579_v29 = vld [vmem:[#allocation14_spill] sm:$0xff] }
 0x4f8   :  { %v2080_v39 = vadd.f32 %v2072_v4, %v2007_v37  ;;  %v2582_v16 = vadd.f32 %v2574_v13, %v2542_v57  ;;  %v2541_v18 = vadd.f32 %v2533_v2, %v2501_v21  ;;  %v2688_v8 = vsel %vm1953_vm11, %v7011_v62, %v7046_v34  ;;  %v7281_v21 = vpop.permute.xlu0 %2640  ;;  %v9580_v4 = vld [vmem:[#allocation81_spill] sm:$0xff] }
 0x4f9   :  { %v2613_v33 = vmul.f32 %v2609_v20, %v6568_v11  ;;  %v2649_v55 = vsel %vm1880_vm10, %v9576_v0, %v6924_v60  ;;  %v2654_v31 = vmul.f32 %v2648_v17, %v9577_v49  ;;  %v2491_v37 = vsel %vm1588_vm6, %v7158_v14, %v9556_v30  ;;  %9578 = vst [vmem:[#allocation42_spill] sm:$0xff] %v7281_v21  ;;  %v9581_v20 = vld [vmem:[#allocation107_spill] sm:$0xff]  ;;  %v9583_v17 = vld [vmem:[#allocation100_spill] sm:$0xff] }
 0x4fa   :  { %v2463_v13 = vadd.f32 %v2455_v42, %v9579_v29  ;;  %v2495_v2 = vmul.f32 %v2488_v61, %v9580_v4  ;;  %v2581_v57 = vadd.f32 %v2573_v47, %v2541_v18  ;;  %v2452_v43 = vmul.f32 %v2451_v35, %v9581_v20  ;;  %v9585_v47 = vld [vmem:[#allocation136_spill] sm:$0xff]  ;;  %v9588_v29 = vld [vmem:[#allocation3_spill] sm:$0xff] }
 0x4fb   :  { %v2622_v11 = vadd.f32 %v2614_v1, %v2582_v16  ;;  %v2689_v60 = vsel %vm1953_vm11, %v9582_v6, %v7011_v62  ;;  %v2694_v49 = vmul.f32 %v2688_v8, %v9583_v17  ;;  %v2531_v30 = vsel %vm1661_vm7, %v7269_v32, %v9563_v40  ;;  %v9586_v1 = vld [vmem:[#allocation96_spill] sm:$0xff]  ;;  %v7305_v18 = vpop.permute.xlu1 %2518  ;;  %v9590_v17 = vld [vmem:[#allocation29_spill] sm:$0xff] }
 0x4fc   :  { %v2528_v42 = vsel %vm1661_vm7, %v9552_v48, %v9584_v5  ;;  %v2568_v61 = vsel %vm1734_vm8, %v9561_v23, %v9585_v47  ;;  %v2653_v35 = vmul.f32 %v2649_v55, %v9586_v1  ;;  %v9587_v62 = vld [vmem:[#allocation112_spill] sm:$0xff]  ;;  %v2621_v8 = vadd.f32 %v2613_v33, %v2581_v57  ;;  %v9591_v55 = vld [vmem:[#allocation99_spill] sm:$0xff]  ;;  %v9593_v57 = vld [vmem:[#allocation117_spill] sm:$0xff]  ;;  %v7326_v19 = vpop.permute.xlu0 %2638 }
 0x4fd   :  { %v2492_v16 = vmul.f32 %v2491_v37, %v9587_v62  ;;  %v9589_v4 = vld [vmem:[#allocation20_spill] sm:$0xff]  ;;  %v2662_v20 = vadd.f32 %v2654_v31, %v2622_v11  ;;  %v2447_v23 = vsel %vm1515_vm5, %v9565_v50, %v9590_v17  ;;  %v2693_v37 = vmul.f32 %v2689_v60, %v9591_v55  ;;  %v9592_v62 = vld [vmem:[#allocation11_spill] sm:$0xff]  ;;  %v9594_v31 = vld [vmem:[#allocation85_spill] sm:$0xff] }
 0x4fe   :  { %v2728_v40 = vsel %vm2026_vm12, %v9589_v4, %v9588_v29  ;;  %v2729_v48 = vsel %vm2026_vm12, %v7064_v56, %v9589_v4  ;;  %v2460_v33 = vadd.f32 %v2452_v43, %v9592_v62  ;;  %v2532_v1 = vmul.f32 %v2531_v30, %v9593_v57  ;;  %v9595_v4 = vld [vmem:[#allocation90_spill] sm:$0xff]  ;;  %v9596_v29 = vld [vmem:[#allocation104_spill] sm:$0xff]  ;;  %v9597_v43 = vld [vmem:[#allocation31_spill] sm:$0xff] }
 0x4ff   :  { %v7323_v3 = vadd.f32 %v9473_v22, %v2079_v63  ;;  %v2503_v11 = vadd.f32 %v2495_v2, %v2463_v13  ;;  %v2535_v9 = vmul.f32 %v2528_v42, %v9594_v31  ;;  %v2702_v41 = vadd.f32 %v2694_v49, %v2662_v20  ;;  %v7330_v60 = vpop.permute.xlu1 %2562  ;;  %v9598_v30 = vld [vmem:[#allocation106_spill] sm:$0xff]  ;;  %v9599_v2 = vld [vmem:[#allocation105_spill] sm:$0xff] }
 0x500   :  { %v2575_v15 = vmul.f32 %v2568_v61, %v9595_v4  ;;  %v2661_v34 = vadd.f32 %v2653_v35, %v2621_v8  ;;  %v2733_v50 = vmul.f32 %v2729_v48, %v9596_v29  ;;  %v2500_v21 = vadd.f32 %v2492_v16, %v2460_v33  ;;  %v9600_v61 = vld [vmem:[#allocation37_spill] sm:$0xff]  ;;  %v9601_v16 = vld [vmem:[#allocation124_spill] sm:$0xff] }
 0x501   :  { %v2610_v63 = vsel %vm1807_vm9, %v9597_v43, %v9573_v46  ;;  %v2734_v13 = vmul.f32 %v2728_v40, %v9598_v30  ;;  %v2456_v42 = vmul.f32 %v2447_v23, %v9599_v2  ;;  %v2571_v49 = vsel %vm1734_vm8, %v7330_v60, %v9567_v10  ;;  %v9613_v4 = vld [vmem:[#allocation101_spill] sm:$0xff] }
 0x502   :  { %v2701_v20 = vadd.f32 %v2693_v37, %v2661_v34  ;;  %v2487_v35 = vsel %vm1588_vm6, %v9575_v58, %v9600_v61  ;;  %v2540_v62 = vadd.f32 %v2532_v1, %v2500_v21  ;;  %v2572_v8 = vmul.f32 %v2571_v49, %v9601_v16  ;;  %v9603_v37 = vld [vmem:[#allocation111_spill] sm:$0xff] }
 0x503   :  { %v7348_v46 = vadd.f32 %v2000_v54, %v7175_v36  ;;  %v7351_v40 = vadd.f32 %v2001_v7, %v7177_v27  ;;  %v2543_v48 = vadd.f32 %v2535_v9, %v2503_v11  ;;  %v2742_v23 = vadd.f32 %v2734_v13, %v2702_v41  ;;  %v7360_v21 = vpop.permute.xlu1 %2596  ;;  %v9602_v36 = vld [vmem:[#allocation94_spill] sm:$0xff]  ;;  %v7364_v7 = vpop.permute.xlu0 %2642  ;;  %v9604_v9 = vld [vmem:[#allocation28_spill] sm:$0xff] }
 0x504   :  { %v7354_v33 = vadd.f32 %v9473_v22, %v2080_v39  ;;  %v2741_v34 = vadd.f32 %v2733_v50, %v2701_v20  ;;  %v2527_v10 = vsel %vm1661_vm7, %v9584_v5, %v7079_v53  ;;  %v2580_v58 = vadd.f32 %v2572_v8, %v2540_v62  ;;  %v9605_v5 = vld [vmem:[#allocation22_spill] sm:$0xff]  ;;  %v9606_v50 = vld [vmem:[#allocation93_spill] sm:$0xff] }
 0x505   :  { %v2583_v1 = vadd.f32 %v2575_v15, %v2543_v48  ;;  %v2612_v54 = vmul.f32 %v2610_v63, %v9602_v36  ;;  %v2496_v27 = vmul.f32 %v2487_v35, %v9603_v37  ;;  %v7368_v41 = vmul.f32 %v7323_v3, %v7323_v3  ;;  %v9607_v63 = vld [vmem:[#allocation34_spill] sm:$0xff]  ;;  %v9608_v20 = vld [vmem:[#allocation33_spill] sm:$0xff]  ;;  %v9612_v37 = vld [vmem:[#allocation108_spill] sm:$0xff] }
 0x506   :  { %v2650_v39 = vsel %vm1880_vm10, %v9604_v9, %v9576_v0  ;;  %v2464_v11 = vadd.f32 %v2456_v42, %v9605_v5  ;;  %v2690_v15 = vsel %vm1953_vm11, %v9606_v50, %v9582_v6  ;;  %v2444_v13 = vsel %vm1515_vm5, %v9607_v63, %v7102_v38  ;;  %v9609_v35 = vld [vmem:[#allocation114_spill] sm:$0xff]  ;;  %v9614_v36 = vld [vmem:[#allocation123_spill] sm:$0xff] }
 0x507   :  { %v7384_v49 = vadd.f32 %v2742_v23, %v9473_v22  ;;  %v2730_v0 = vsel %vm2026_vm12, %v9608_v20, %v7064_v56  ;;  %v2536_v42 = vmul.f32 %v2527_v10, %v9609_v35  ;;  %v2567_v6 = vsel %vm1734_vm8, %v9585_v47, %v7110_v12  ;;  %v2601_v48 = vpop.permute.xlu1 %2600  ;;  %v9610_v23 = vld [vmem:[#allocation95_spill] sm:$0xff]  ;;  %v9611_v5 = vld [vmem:[#allocation98_spill] sm:$0xff] }
 0x508   :  { %v7396_v62 = vadd.f32 %v2741_v34, %v9473_v22  ;;  %v2445_v38 = vsel %vm1515_vm5, %v7135_v44, %v9607_v63  ;;  %v2446_v56 = vsel %vm1515_vm5, %v9590_v17, %v7135_v44  ;;  %v2620_v8 = vadd.f32 %v2612_v54, %v2580_v58  ;;  %v9615_v63 = vld [vmem:[#allocation52_spill] sm:$0xff]  ;;  %v9616_v17 = vld [vmem:[#allocation109_spill] sm:$0xff]  ;;  %v9617_v54 = vld [vmem:[#allocation110_spill] sm:$0xff] }
 0x509   :  { %v2652_v10 = vmul.f32 %v2650_v39, %v9610_v23  ;;  %v2692_v35 = vmul.f32 %v2690_v15, %v9611_v5  ;;  %v2504_v47 = vadd.f32 %v2496_v27, %v2464_v11  ;;  %v2459_v34 = vmul.f32 %v2444_v13, %v9612_v37 }
 0x50a   :  { %v2732_v2 = vmul.f32 %v2730_v0, %v9613_v4  ;;  %v2576_v16 = vmul.f32 %v2567_v6, %v9614_v36  ;;  %v2484_v31 = vsel %vm1588_vm6, %v9615_v63, %v7158_v14  ;;  %v2607_v44 = vsel %vm1807_vm9, %v9570_v51, %v7360_v21  ;;  %v2717_v14 = vpop.permute.xlu0 %2716 }
 0x50b   :  { %v2457_v58 = vmul.f32 %v2446_v56, %v9616_v17  ;;  %v2458_v27 = vmul.f32 %v2445_v38, %v9617_v54  ;;  %v2485_v39 = vsel %vm1588_vm6, %v7203_v24, %v9615_v63  ;;  %v2486_v11 = vsel %vm1588_vm6, %v9600_v61, %v7203_v24  ;;  %v2599_v6 = vpop.permute.xlu1 %2598  ;;  %v9618_v38 = vld [vmem:[#allocation25_spill] sm:$0xff]  ;;  %v9628_v17 = vld [vmem:[#allocation16_spill] sm:$0xff] }
 0x50c   :  { %v7431_v15 = vmul.f32 %v7384_v49, %v7384_v49  ;;  %v7435_v51 = vmul.f32 %v7396_v62, %v7396_v62  ;;  %v2544_v13 = vadd.f32 %v2536_v42, %v2504_v47  ;;  %v2660_v0 = vadd.f32 %v2652_v10, %v2620_v8  ;;  %v9619_v63 = vld [vmem:[#allocation113_spill] sm:$0xff]  ;;  %v9621_v8 = vld [vmem:[#allocation115_spill] sm:$0xff] }
 0x50d   :  { %v2467_v56 = vadd.f32 %v2459_v34, %v9618_v38  ;;  %v2499_v36 = vmul.f32 %v2484_v31, %v9619_v63  ;;  %v2526_v24 = vsel %vm1661_vm7, %v7079_v53, %v7305_v18  ;;  %v9620_v61 = vld [vmem:[#allocation129_spill] sm:$0xff]  ;;  %v2565_v5 = vsel %vm1734_vm8, %v7165_v59, %v7142_v45  ;;  %v9622_v31 = vld [vmem:[#allocation116_spill] sm:$0xff]  ;;  %v9624_v53 = vld [vmem:[#allocation23_spill] sm:$0xff] }
 0x50e   :  { %v2615_v4 = vmul.f32 %v2607_v44, %v9620_v61  ;;  %v2566_v42 = vsel %vm1734_vm8, %v7110_v12, %v7165_v59  ;;  %v2497_v10 = vmul.f32 %v2486_v11, %v9621_v8  ;;  %v2498_v47 = vmul.f32 %v2485_v39, %v9622_v31  ;;  %v9623_v38 = vld [vmem:[#allocation24_spill] sm:$0xff]  ;;  %v9625_v59 = vld [vmem:[#allocation121_spill] sm:$0xff]  ;;  %v9626_v11 = vld [vmem:[#allocation126_spill] sm:$0xff]  ;;  %v2721_v31 = vpop.permute.xlu0 %2720 }
 0x50f   :  { %v2584_v34 = vadd.f32 %v2576_v16, %v2544_v13  ;;  %v2465_v63 = vadd.f32 %v2457_v58, %v9623_v38  ;;  %v2466_v37 = vadd.f32 %v2458_v27, %v9624_v53  ;;  %v2647_v44 = vsel %vm1880_vm10, %v9574_v26, %v7233_v28  ;;  %v2603_v39 = vpop.permute.xlu1 %2602  ;;  %v9627_v38 = vld [vmem:[#allocation127_spill] sm:$0xff] }
 0x510   :  { %v2524_v61 = vsel %vm1661_vm7, %v7242_v52, %v7269_v32  ;;  %v2525_v12 = vsel %vm1661_vm7, %v7305_v18, %v7242_v52  ;;  %v2537_v16 = vmul.f32 %v2526_v24, %v9625_v59  ;;  %v2700_v58 = vadd.f32 %v2692_v35, %v2660_v0  ;;  %v9629_v52 = vld [vmem:[#allocation118_spill] sm:$0xff] }
 0x511   :  { %v2507_v27 = vadd.f32 %v2499_v36, %v2467_v56  ;;  %v2577_v13 = vmul.f32 %v2566_v42, %v9626_v11  ;;  %v2578_v53 = vmul.f32 %v2565_v5, %v9627_v38  ;;  %v2623_v26 = vadd.f32 %v2615_v4, %v2583_v1  ;;  %v9630_v24 = vld [vmem:[#allocation42_spill] sm:$0xff] }
 0x512   :  { %v2505_v8 = vadd.f32 %v2497_v10, %v2465_v63  ;;  %v2506_v54 = vadd.f32 %v2498_v47, %v2466_v37  ;;  %v2655_v32 = vmul.f32 %v2647_v44, %v9628_v17  ;;  %v2606_v23 = vsel %vm1807_vm9, %v7360_v21, %v2599_v6  ;;  %v9631_v35 = vld [vmem:[#allocation122_spill] sm:$0xff]  ;;  %v9632_v63 = vld [vmem:[#allocation3_spill] sm:$0xff]  ;;  %v9634_v47 = vld [vmem:[#allocation36_spill] sm:$0xff] }
 0x513   :  { %v2539_v18 = vmul.f32 %v2524_v61, %v9629_v52  ;;  %v2645_v36 = vsel %vm1880_vm10, %v7326_v19, %v9630_v24  ;;  %v2538_v0 = vmul.f32 %v2525_v12, %v9631_v35  ;;  %v2605_v4 = vsel %vm1807_vm9, %v2599_v6, %v2601_v48  ;;  %v2677_v56 = vpop.permute.xlu1 %2676  ;;  %v9633_v42 = vld [vmem:[#allocation130_spill] sm:$0xff] }
 0x514   :  { %v2646_v1 = vsel %vm1880_vm10, %v7233_v28, %v7326_v19  ;;  %v2545_v37 = vadd.f32 %v2537_v16, %v2505_v8  ;;  %v2564_v21 = vsel %vm1734_vm8, %v7142_v45, %v7330_v60  ;;  %v2740_v5 = vadd.f32 %v2732_v2, %v2700_v58  ;;  %v9635_v19 = vld [vmem:[#allocation128_spill] sm:$0xff]  ;;  %v9636_v60 = vld [vmem:[#allocation133_spill] sm:$0xff]  ;;  %v9642_v17 = vld [vmem:[#allocation26_spill] sm:$0xff] }
 0x515   :  { %v2727_v61 = vsel %vm2026_vm12, %v9632_v63, %v2717_v14  ;;  %v2616_v10 = vmul.f32 %v2606_v23, %v9633_v42  ;;  %v2663_v6 = vadd.f32 %v2655_v32, %v2623_v26  ;;  %v2687_v44 = vsel %vm1953_vm11, %v9634_v47, %v2677_v56  ;;  %v9637_v58 = vld [vmem:[#allocation125_spill] sm:$0xff]  ;;  %v2719_v32 = vpop.permute.xlu0 %2718 }
 0x516   :  { %v2617_v28 = vmul.f32 %v2605_v4, %v9635_v19  ;;  %v2604_v8 = vsel %vm1807_vm9, %v2601_v48, %v2603_v39  ;;  %v2611_v45 = vsel %vm1807_vm9, %v2603_v39, %v9597_v43  ;;  %v2695_v2 = vmul.f32 %v2687_v44, %v9636_v60  ;;  %v9641_v44 = vld [vmem:[#allocation27_spill] sm:$0xff] }
 0x517   :  { %v2547_v12 = vadd.f32 %v2539_v18, %v2507_v27  ;;  %v2546_v16 = vadd.f32 %v2538_v0, %v2506_v54  ;;  %v2644_v23 = vsel %vm1880_vm10, %v9630_v24, %v7364_v7  ;;  %v2579_v26 = vmul.f32 %v2564_v21, %v9637_v58  ;;  %v2681_v27 = vpop.permute.xlu1 %2680  ;;  %v9638_v54 = vld [vmem:[#allocation5_spill] sm:$0xff]  ;;  %v9639_v24 = vld [vmem:[#allocation131_spill] sm:$0xff]  ;;  %v9640_v21 = vld [vmem:[#allocation132_spill] sm:$0xff] }
 0x518   :  { %v2651_v48 = vsel %vm1880_vm10, %v7364_v7, %v9604_v9  ;;  %v7515_v4 = vadd.f32 %v2740_v5, %v9473_v22  ;;  %v2585_v43 = vadd.f32 %v2577_v13, %v2545_v37  ;;  %v2703_v39 = vadd.f32 %v2695_v2, %v2663_v6  ;;  %v9643_v5 = vld [vmem:[#allocation18_spill] sm:$0xff]  ;;  %v9644_v2 = vld [vmem:[#allocation19_spill] sm:$0xff] }
 0x519   :  { %v2735_v18 = vmul.f32 %v2727_v61, %v9638_v54  ;;  %v2726_v0 = vsel %vm2026_vm12, %v2717_v14, %v2719_v32  ;;  %v2618_v63 = vmul.f32 %v2604_v8, %v9639_v24  ;;  %v2619_v47 = vmul.f32 %v2611_v45, %v9640_v21  ;;  %v9645_v54 = vld [vmem:[#allocation17_spill] sm:$0xff]  ;;  %v2723_v45 = vpop.permute.xlu0 %2722 }
 0x51a   :  { %v2656_v60 = vmul.f32 %v2646_v1, %v9641_v44  ;;  %v2657_v19 = vmul.f32 %v2645_v36, %v9642_v17  ;;  %v2624_v7 = vadd.f32 %v2616_v10, %v2584_v34  ;;  %v2625_v9 = vadd.f32 %v2617_v28, %v2585_v43 }
 0x51b   :  { %v2658_v42 = vmul.f32 %v2644_v23, %v9643_v5  ;;  %v2587_v13 = vadd.f32 %v2579_v26, %v2547_v12  ;;  %v2586_v37 = vadd.f32 %v2578_v53, %v2546_v16  ;;  %v2743_v6 = vadd.f32 %v2735_v18, %v2703_v39  ;;  %v2679_v24 = vpop.permute.xlu1 %2678  ;;  %v9646_v16 = vld [vmem:[#allocation4_spill] sm:$0xff] }
 0x51c   :  { %v2659_v61 = vmul.f32 %v2651_v48, %v9644_v2  ;;  %v2725_v14 = vsel %vm2026_vm12, %v2719_v32, %v2721_v31  ;;  %v2736_v8 = vmul.f32 %v2726_v0, %v9645_v54  ;;  %v2786_v1 = vmul.f32 %v7515_v4, %v7515_v4  ;;  %v9647_v26 = vld [vmem:[#allocation32_spill] sm:$0xff]  ;;  %v9648_v48 = vld [vmem:[#allocation82_spill] sm:$0xff] }
 0x51d   :  { %v2626_v36 = vadd.f32 %v2618_v63, %v2586_v37  ;;  %v2627_v34 = vadd.f32 %v2619_v47, %v2587_v13  ;;  %v2685_v10 = vsel %vm1953_vm11, %v2679_v24, %v2681_v27  ;;  %v2686_v53 = vsel %vm1953_vm11, %v2677_v56, %v2679_v24 }
 0x51e   :  { %v2664_v28 = vadd.f32 %v2656_v60, %v2624_v7  ;;  %v2665_v12 = vadd.f32 %v2657_v19, %v2625_v9  ;;  %v2696_v23 = vmul.f32 %v2686_v53, %v9646_v16  ;;  %v2697_v32 = vmul.f32 %v2685_v10, %v9647_v26  ;;  %v9650_v10 = vld [vmem:[#allocation30_spill] sm:$0xff] }
 0x51f   :  { %v2737_v43 = vmul.f32 %v2725_v14, %v9648_v48  ;;  %v2724_v39 = vsel %vm2026_vm12, %v2721_v31, %v2723_v45  ;;  %v7541_v18 = vadd.f32 %v2743_v6, %v9473_v22  ;;  %v2765_v0 = vadd.f32 %v7396_v62, %v7515_v4  ;;  %v2683_v24 = vpop.permute.xlu1 %2682  ;;  %v9649_v6 = vld [vmem:[#allocation21_spill] sm:$0xff] }
 0x520   :  { %v2731_v56 = vsel %vm2026_vm12, %v2723_v45, %v9608_v20  ;;  %v2704_v19 = vadd.f32 %v2696_v23, %v2664_v28  ;;  %v2705_v60 = vadd.f32 %v2697_v32, %v2665_v12  ;;  %v2803_v63 = vadd.f32 %v7435_v51, %v2786_v1  ;;  %v9651_v45 = vld [vmem:[#allocation8_spill] sm:$0xff]  ;;  %v9654_v32 = vld [vmem:[#allocation35_spill] sm:$0xff] }
 0x521   :  { %v2666_v47 = vadd.f32 %v2658_v42, %v2626_v36  ;;  %v2667_v7 = vadd.f32 %v2659_v61, %v2627_v34  ;;  %v2684_v31 = vsel %vm1953_vm11, %v2681_v27, %v2683_v24  ;;  %v2691_v9 = vsel %vm1953_vm11, %v2683_v24, %v9606_v50  ;;  %v9652_v28 = vld [vmem:[#allocation40_spill] sm:$0xff]  ;;  %v9653_v34 = vld [vmem:[#allocation61_spill] sm:$0xff] }
 0x522   :  { %v2744_v13 = vadd.f32 %v2736_v8, %v2704_v19  ;;  %v2745_v37 = vadd.f32 %v2737_v43, %v2705_v60  ;;  %v2698_v14 = vmul.f32 %v2684_v31, %v9649_v6  ;;  %v2699_v20 = vmul.f32 %v2691_v9, %v9650_v10 }
 0x523   :  { %v2738_v53 = vmul.f32 %v2724_v39, %v9651_v45  ;;  %v2739_v12 = vmul.f32 %v2731_v56, %v9652_v28  ;;  %v2766_v51 = vadd.f32 %v2765_v0, %v7384_v49  ;;  %v2789_v42 = vmul.f32 %v7541_v18, %v7541_v18  ;;  %v2025_v8 = vpop.permute.xlu1 %2024 }
 0x524   :  { %v7562_v27 = vadd.f32 %v2744_v13, %v9473_v22  ;;  %v2706_v61 = vadd.f32 %v2698_v14, %v2666_v47  ;;  %v2707_v50 = vadd.f32 %v2699_v20, %v2667_v7  ;;  %v2804_v1 = vadd.f32 %v2803_v63, %v7431_v15  ;;  %v9655_v15 = vld [vmem:[#allocation41_spill] sm:$0xff] }
 0x525   :  { %v7566_v36 = vadd.f32 %v2745_v37, %v9473_v22  ;;  %v2027_v23 = vsel %vm2026_vm12, %v9653_v34, %v2025_v8  ;;  %v2034_v43 = vsel %vm2026_vm12, %v2025_v8, %v9654_v32  ;;  %v2767_v39 = vadd.f32 %v2766_v51, %v7541_v18  ;;  %v9656_v37 = vld [vmem:[#allocation39_spill] sm:$0xff] }
 0x526   :  { %v2746_v0 = vadd.f32 %v2738_v53, %v2706_v61  ;;  %v2073_v56 = vmul.f32 %v9651_v45, %v2027_v23  ;;  %v2074_v19 = vmul.f32 %v9652_v28, %v2034_v43  ;;  %v2759_v60 = vadd.f32 %v9655_v15, %v7323_v3 }
 0x527   :  { %v2747_v24 = vadd.f32 %v2739_v12, %v2707_v50  ;;  %v2768_v63 = vadd.f32 %v2767_v39, %v7562_v27  ;;  %v2790_v47 = vmul.f32 %v7562_v27, %v7562_v27  ;;  %v2805_v7 = vadd.f32 %v2804_v1, %v2789_v42 }
 0x528   :  { %v2081_v31 = vadd.f32 %v2073_v56, %v7348_v46  ;;  %v2082_v9 = vadd.f32 %v2074_v19, %v7351_v40  ;;  %v7585_v13 = vadd.f32 %v2746_v0, %v9473_v22  ;;  %v2797_v14 = vadd.f32 %v9656_v37, %v7368_v41 }
 0x529   :  { %v2769_v20 = vadd.f32 %v2768_v63, %v7566_v36  ;;  %v2783_v53 = vmul.f32 %v7354_v33, %v7354_v33  ;;  %v2791_v12 = vmul.f32 %v7566_v36, %v7566_v36  ;;  %v2806_v51 = vadd.f32 %v2805_v7, %v2790_v47 }
 0x52a   :  { %v7595_v42 = vadd.f32 %v9473_v22, %v2081_v31  ;;  %v7598_v46 = vadd.f32 %v9473_v22, %v2082_v9  ;;  %v2760_v40 = vadd.f32 %v2759_v60, %v7354_v33  ;;  %v2792_v41 = vmul.f32 %v7585_v13, %v7585_v13  ;;  %v7616_v60 = vpop.f32.mrf.mxu0 }
 0x52b   :  { %v7604_v61 = vadd.f32 %v2747_v24, %v9473_v22  ;;  %v2770_v50 = vadd.f32 %v2769_v20, %v7585_v13  ;;  %v2807_v8 = vadd.f32 %v2806_v51, %v2791_v12  ;;  %v2798_v23 = vadd.f32 %v2797_v14, %v2783_v53  ;;  %v7618_v24 = vpop.f32.mrf.mxu1 }
 0x52c   :  { %v2761_v1 = vadd.f32 %v2760_v40, %v7595_v42  ;;  %v2784_v34 = vmul.f32 %v7595_v42, %v7595_v42  ;;  %v2785_v39 = vmul.f32 %v7598_v46, %v7598_v46  ;;  %v7620_v63 = vpop.f32.mrf.mxu0 }
 0x52d   :  { %v2771_v32 = vadd.f32 %v2770_v50, %v7604_v61  ;;  %v2808_v56 = vadd.f32 %v2807_v8, %v2792_v41  ;;  %v2793_v19 = vmul.f32 %v7604_v61, %v7604_v61  ;;  %v7622_v47 = vpop.f32.mrf.mxu1 }
 0x52e   :  { %v2762_v43 = vadd.f32 %v2761_v1, %v7598_v46  ;;  %v2799_v0 = vadd.f32 %v2798_v23, %v2784_v34  ;;  %9657 = vst [vmem:[#allocation43_spill] sm:$0xff] %v7622_v47  ;;  %v2939_v7 = vpop.f32.mrf.mxu0 }
 0x52f   :  { %2772 = vadd.xlane.f32.xlu0 %v2771_v32  ;;  %v2809_v15 = vadd.f32 %v2808_v56, %v2793_v19  ;;  %v2980_v31 = vpop.f32.mrf.mxu1 }
 0x530   :  { %2763 = vadd.xlane.f32.xlu1 %v2762_v43  ;;  %v2800_v22 = vadd.f32 %v2799_v0, %v2785_v39  ;;  %v2940_v9 = vpop.f32.mrf.mxu0 }
 0x531   :  { %v2981_v37 = vpop.f32.mrf.mxu1 }
 0x532   :  { %v7624_v14 = vpop.f32.mrf.mxu0 }
 0x533   :  { %2801 = vadd.xlane.f32.xlu0 %v2800_v22  ;;  %9658 = vst [vmem:[#allocation9_spill] sm:$0xff] %v7624_v14  ;;  %v7626_v20 = vpop.f32.mrf.mxu1 }
 0x534   :  { %2810 = vadd.xlane.f32.xlu1 %v2809_v15  ;;  %9659 = vst [vmem:[#allocation44_spill] sm:$0xff] %v7626_v20  ;;  %v7628_v53 = vpop.f32.mrf.mxu0 }
 0x535   :  { %9660 = vst [vmem:[#allocation55_spill] sm:$0xff] %v7628_v53  ;;  %v7630_v12 = vpop.f32.mrf.mxu1 }
 0x536   :  { %9661 = vst [vmem:[#allocation45_spill] sm:$0xff] %v7630_v12  ;;  %v3021_v51 = vpop.f32.mrf.mxu0 }
 0x537   :  { %v3062_v40 = vpop.f32.mrf.mxu1 }
 0x538   :  { %v3022_v41 = vpop.f32.mrf.mxu0 }
 0x539   :  { %v3063_v50 = vpop.f32.mrf.mxu1 }
 0x53a   :  { %v7636_v50 = vpop.f32.mrf.mxu0 }
 0x53b   :  { %v7632_v8 = vpop.f32.mrf.mxu1  ;;  %9664 = vst [vmem:[#allocation10_spill] sm:$0xff] %v7636_v50 }
 0x53c   :  { %9662 = vst [vmem:[#allocation47_spill] sm:$0xff] %v7632_v8 }
 0x53d   :  { %v7634_v1 = vpop.f32.mrf.mxu1 }
 0x53e   :  { %9663 = vst [vmem:[#allocation59_spill] sm:$0xff] %v7634_v1 }
 0x53f   :  { %v3152_v34 = vpop.f32.mrf.mxu1 }
 0x540   :  { %v2818_v34 = vld [vmem:[%s9091_s12] sm:$0xff] }
 0x541   :  { %v3153_v23 = vpop.f32.mrf.mxu1 }
 0x542   :  { %v7641_v23 = vpop.f32.mrf.mxu0 }
 0x543   :  { %9665 = vst [vmem:[#allocation7_spill] sm:$0xff] %v7641_v23 }
 0x5b8   :  { %v2773_v32 = vpop.xlane.xlu0 %2772 }
 0x5b9   :  { %v2764_v43 = vpop.xlane.xlu1 %2763  ;;  %v2775_v39 = vmul.f32 0.0009765625, %v2773_v32 }
 0x5ba   :  { %v2774_v0 = vmul.f32 0.0009765625, %v2764_v43  ;;  %v3111_v43 = vpop.f32.mrf.mxu0 }
 0x5bc   :  { %v2776_v56 = vadd.f32 %v2775_v39, %v2774_v0  ;;  %v2802_v22 = vpop.xlane.xlu0 %2801  ;;  %v2822_v0 = vld [vmem:[%s9092_s13] sm:$0xff] }
 0x5bd   :  { %v2811_v19 = vpop.xlane.xlu1 %2810  ;;  %v2812_v7 = vmul.f32 0.0009765625, %v2802_v22  ;;  %v7646_v22 = vpop.f32.mrf.mxu1 }
 0x5be   :  { %v2777_v15 = vmul.f32 0.5, %v2776_v56  ;;  %v2813_v31 = vmul.f32 0.0009765625, %v2811_v19  ;;  %v3112_v56 = vpop.f32.mrf.mxu0  ;;  %9666 = vst [vmem:[#allocation50_spill] sm:$0xff] %v7646_v22 }
 0x5c0   :  { %v2814_v9 = vadd.f32 %v2813_v31, %v2812_v7  ;;  %v2816_v37 = vmul.f32 %v2777_v15, %v2777_v15  ;;  %v3237_v7 = vld [vmem:[%s9093_s7] sm:$0xff]  ;;  %v7651_v31 = vpop.f32.mrf.mxu0 }
 0x5c1   :  { %9667 = vst [vmem:[#allocation48_spill] sm:$0xff] %v7651_v31 }
 0x5c2   :  { %v2815_v51 = vmul.f32 0.5, %v2814_v9  ;;  %v7653_v9 = vpop.f32.mrf.mxu1 }
 0x5c3   :  { %9668 = vst [vmem:[#allocation46_spill] sm:$0xff] %v7653_v9 }
 0x5c4   :  { %v2817_v40 = vsub.f32 %v2815_v51, %v2816_v37  ;;  %v7655_v51 = vpop.f32.mrf.mxu0 }
 0x5c5   :  { %9669 = vst [vmem:[#allocation49_spill] sm:$0xff] %v7655_v51 }
 0x5c6   :  { %v2819_v41 = vadd.f32 1e-05, %v2817_v40  ;;  %v3234_v40 = vpop.f32.mrf.mxu1 }
 0x5c7   :  { %v9672_v40 = vld [vmem:[#allocation56_spill] sm:$0xff] }
 0x5c8   :  { %4916 = vrsqrt.f32 %v2819_v41  ;;  %v2884_v41 = vld [vmem:[%s9094_s9] sm:$0xff] }
 0x5d5   :  { %v4917_v32 = vpop.eup %4916 }
 0x5d6   :  { %v2821_v39 = vmul.f32 %v4917_v32, %v2818_v34  ;;  %v3193_v34 = vpop.f32.mrf.mxu0 }
 0x5d8   :  { %2827 = vperm.xlu0 %4899, %v2821_v39   ;;  %v2823_v19 = vmul.f32 %v2821_v39, %v2777_v15  ;;  %v3235_v15 = vpop.f32.mrf.mxu1  ;;  %v3194_v32 = vpop.f32.mrf.mxu0  ;;  %v9670_v39 = vld [vmem:[#allocation6_spill] sm:$0xff] }
 0x5da   :  { %v2824_v37 = vsub.f32 %v2822_v0, %v2823_v19  ;;  %v9671_v0 = vld [vmem:[#allocation38_spill] sm:$0xff] }
 0x5dc   :  { %3973 = vperm.xlu0 %4899, %v3237_v7   ;;  %2848 = vperm.xlu1 %4900, %v2824_v37   ;;  %v9673_v37 = vld [vmem:[#allocation15_spill] sm:$0xff] }
 0x5e0   :  { %2895 = vperm.xlu1 %4900, %v2884_v41  }
 0x653   :  { %v7660_v43 = vpop.permute.xlu0 %2827 }
 0x654   :  { %v2831_v56 = vmul.f32 %v7660_v43, %v9670_v39  ;;  %v2833_v19 = vmul.f32 %v7660_v43, %v9671_v0  ;;  %v2830_v7 = vmul.f32 %v7660_v43, %v9672_v40  ;;  %v2832_v9 = vmul.f32 %v7660_v43, %v9673_v37 }
 0x655   :  { %v2835_v34 = vmul.f32 %v7660_v43, %v7354_v33  ;;  %v2837_v41 = vmul.f32 %v7660_v43, %v7598_v46  ;;  %v2834_v32 = vmul.f32 %v7660_v43, %v7323_v3  ;;  %v2836_v39 = vmul.f32 %v7660_v43, %v7595_v42 }
 0x656   :  { %v2839_v0 = vmul.f32 %v7660_v43, %v7396_v62 }
 0x657   :  { %v7672_v15 = vpop.permute.xlu1 %2848 }
 0x658   :  { %v2852_v40 = vadd.f32 %v7672_v15, %v2831_v56  ;;  %v2854_v37 = vadd.f32 %v7672_v15, %v2833_v19  ;;  %v2851_v33 = vadd.f32 %v7672_v15, %v2830_v7  ;;  %v2853_v51 = vadd.f32 %v7672_v15, %v2832_v9 }
 0x659   :  { %v2856_v22 = vadd.f32 %v7672_v15, %v2835_v34  ;;  %v2858_v46 = vadd.f32 %v7672_v15, %v2837_v41  ;;  %v2855_v3 = vadd.f32 %v7672_v15, %v2834_v32  ;;  %v2857_v50 = vadd.f32 %v7672_v15, %v2836_v39 }
 0x65a   :  { %v2868_v42 = vmax.f32 %v2852_v40, 0.0  ;;  %v2870_v31 = vmax.f32 %v2854_v37, 0.0  ;;  %v2867_v23 = vmax.f32 %v2851_v33, 0.0  ;;  %v2869_v62 = vmax.f32 %v2853_v51, 0.0  ;;  %v7718_v33 = vld [vmem:[%s9095_s6 + $0x8] sm:$0xff]  }
 0x65b   :  { %v2872_v8 = vmax.f32 %v2856_v22, 0.0  ;;  %v2874_v56 = vmax.f32 %v2858_v46, 0.0  ;;  %v2871_v1 = vmax.f32 %v2855_v3, 0.0  ;;  %v2873_v19 = vmax.f32 %v2857_v50, 0.0  ;;  %v7698_v22 = vld [vmem:[%s9095_s6] sm:$0xff]   ;;  %v7729_v46 = vld [vmem:[%s9095_s6 + $0x10] sm:$0xff]   ;;  %v8033_v35 = vpop.permute.xlu1 %2895 }
 0x65c   :  { %v3248_v28 = vpack.c.bf16 %v2868_v42, %v2868_v42  ;;  %v3250_v7 = vpack.c.bf16 %v2870_v31, %v2870_v31  ;;  %v3247_v45 = vpack.c.bf16 %v2867_v23, %v2867_v23  ;;  %v2841_v9 = vmul.f32 %v7660_v43, %v7541_v18  ;;  %v7740_v3 = vld [vmem:[%s9095_s6 + $0x18] sm:$0xff]  }
 0x65d   :  { %v3249_v34 = vpack.c.bf16 %v2869_v62, %v2869_v62  ;;  %v3252_v41 = vpack.c.bf16 %v2872_v8, %v2872_v8  ;;  %v3251_v50 = vpack.c.bf16 %v2871_v1, %v2871_v1  ;;  %v2860_v31 = vadd.f32 %v7672_v15, %v2839_v0 }
 0x65e   :  { %4787 = vmatprep.subr.msk.bf16.mxu0 %vm3294_vm13, %v3248_v28  ;;  %4793 = vmatprep.subr.msk.bf16.mxu1 %vm3294_vm13, %v3250_v7  ;;  %v3296_v32 = vsel %vm3294_vm13, %v3247_v45, 0  ;;  %v2862_v23 = vadd.f32 %v7672_v15, %v2841_v9  ;;  %v3254_v8 = vpack.c.bf16 %v2874_v56, %v2874_v56  ;;  %v3253_v28 = vpack.c.bf16 %v2873_v19, %v2873_v19  ;;  %v7755_v56 = vld [vmem:[%s9095_s6 + $0x20] ss:$0 sps:$4 sm:$0xff]  }
 0x65f   :  { %3334 = vmatpush1.bf16.msra.mxu0 %v3296_v32  ;;  %v3302_v18 = vsel %vm3294_vm13, %v3249_v34, 0  ;;  %v2876_v45 = vmax.f32 %v2860_v31, 0.0  ;;  %v3308_v1 = vsel %vm3294_vm13, %v3251_v50, 0  ;;  %v9674_v37 = vmov 0  }
 0x660   :  { %3415 = vmatpush1.bf16.msra.mxu1 %v3302_v18  ;;  %4799 = vmatprep.subr.msk.bf16.mxu0 %vm3294_vm13, %v3252_v41  ;;  %v2878_v51 = vmax.f32 %v2862_v23, 0.0  ;;  %v3314_v0 = vsel %vm3294_vm13, %v3253_v28, 0  ;;  %v2838_v42 = vmul.f32 %v7660_v43, %v7515_v4  ;;  %v2840_v62 = vmul.f32 %v7660_v43, %v7384_v49 }
 0x661   :  { %4805 = vmatprep.subr.msk.bf16.mxu1 %vm3294_vm13, %v3254_v8  ;;  %v3985_v39 = vpack.c.bf16 %v2876_v45, %v2876_v45  ;;  %v2843_v9 = vmul.f32 %v7660_v43, %v7566_v36  ;;  %v2845_v34 = vmul.f32 %v7660_v43, %v7604_v61  ;;  %v2842_v45 = vmul.f32 %v7660_v43, %v7562_v27 }
 0x662   :  { %4788 = vmatmul.mubr.msk.bf16.vlgmr.msra.gmra.mxu0 %vm3278_vm14, %v7698_v22  ;;  %v3987_v40 = vpack.c.bf16 %v2878_v51, %v2878_v51  ;;  %v2859_v19 = vadd.f32 %v7672_v15, %v2838_v42  ;;  %v2861_v7 = vadd.f32 %v7672_v15, %v2840_v62  ;;  %v2844_v51 = vmul.f32 %v7660_v43, %v7585_v13 }
 0x663   :  { %4794 = vmatmul.mubr.msk.bf16.vlgmr.msra.gmra.mxu1 %vm3278_vm14, %v7698_v22  ;;  %3496 = vmatpush1.bf16.msra.mxu0 %v3308_v1  ;;  %v2864_v49 = vadd.f32 %v7672_v15, %v2843_v9  ;;  %v2866_v32 = vadd.f32 %v7672_v15, %v2845_v34  ;;  %v2863_v1 = vadd.f32 %v7672_v15, %v2842_v45 }
 0x664   :  { %3577 = vmatpush1.bf16.msra.mxu1 %v3314_v0  ;;  %4811 = vmatprep.subr.msk.bf16.mxu0 %vm3294_vm13, %v3985_v39  ;;  %v2875_v4 = vmax.f32 %v2859_v19, 0.0  ;;  %v2877_v41 = vmax.f32 %v2861_v7, 0.0  ;;  %v2865_v39 = vadd.f32 %v7672_v15, %v2844_v51 }
 0x665   :  { %4817 = vmatprep.subr.msk.bf16.mxu1 %vm3294_vm13, %v3987_v40  ;;  %3361 = vmatprep.mubr.bf16.mxu0 %v9674_v37  ;;  %v2880_v50 = vmax.f32 %v2864_v49, 0.0  ;;  %v2882_v61 = vmax.f32 %v2866_v32, 0.0  ;;  %v2879_v0 = vmax.f32 %v2863_v1, 0.0 }
 0x666   :  { %3442 = vmatprep.mubr.bf16.mxu1 %v9674_v37  ;;  %v3984_v36 = vpack.c.bf16 %v2875_v4, %v2875_v4  ;;  %v3986_v31 = vpack.c.bf16 %v2877_v41, %v2877_v41  ;;  %v2881_v40 = vmax.f32 %v2865_v39, 0.0 }
 0x667   :  { %v3989_v18 = vpack.c.bf16 %v2880_v50, %v2880_v50  ;;  %v3991_v28 = vpack.c.bf16 %v2882_v61, %v2882_v61  ;;  %v3988_v27 = vpack.c.bf16 %v2879_v0, %v2879_v0 }
 0x668   :  { %v3993_v23 = vsel %vm3294_vm13, %v3984_v36, 0  ;;  %v3999_v8 = vsel %vm3294_vm13, %v3986_v31, 0  ;;  %v3990_v42 = vpack.c.bf16 %v2881_v40, %v2881_v40 }
 0x669   :  { %v4005_v13 = vsel %vm3294_vm13, %v3988_v27, 0 }
 0x66a   :  { %4789 = vmatmul.mubr.msk.bf16.gmra.mxu0 %vm3278_vm14, %v7718_v33  ;;  %v4011_v43 = vsel %vm3294_vm13, %v3990_v42, 0 }
 0x66b   :  { %4795 = vmatmul.mubr.msk.bf16.gmra.mxu1 %vm3278_vm14, %v7718_v33  ;;  %3371 = vmatprep.mubr.bf16.mxu0 %v9674_v37 }
 0x66c   :  { %3452 = vmatprep.mubr.bf16.mxu1 %v9674_v37 }
 0x672   :  { %4790 = vmatmul.mubr.msk.bf16.gmra.mxu0 %vm3278_vm14, %v7729_v46 }
 0x673   :  { %4796 = vmatmul.mubr.msk.bf16.gmra.mxu1 %vm3278_vm14, %v7729_v46  ;;  %3381 = vmatprep.mubr.bf16.mxu0 %v9674_v37 }
 0x674   :  { %3462 = vmatprep.mubr.bf16.mxu1 %v9674_v37 }
 0x67a   :  { %4791 = vmatmul.mubr.msk.bf16.gmra.mxu0 %vm3278_vm14, %v7740_v3 }
 0x67b   :  { %4797 = vmatmul.mubr.msk.bf16.gmra.mxu1 %vm3278_vm14, %v7740_v3  ;;  %3391 = vmatprep.mubr.bf16.mxu0 %v9674_v37 }
 0x67c   :  { %3472 = vmatprep.mubr.bf16.mxu1 %v9674_v37 }
 0x682   :  { %4792 = vmatmul.mubr.msk.bf16.gmra.mxu0 %vm3278_vm14, %v7755_v56 }
 0x683   :  { %4798 = vmatmul.mubr.msk.bf16.gmra.mxu1 %vm3278_vm14, %v7755_v56  ;;  %3513 = vmatprep.mubr.bf16.mxu0 %v9674_v37 }
 0x684   :  { %3594 = vmatprep.mubr.bf16.mxu1 %v9674_v37 }
 0x68a   :  { %4800 = vmatmul.mubr.msk.bf16.vlgmr.msra.gmra.mxu0 %vm3278_vm14, %v7698_v22 }
 0x68b   :  { %4806 = vmatmul.mubr.msk.bf16.vlgmr.msra.gmra.mxu1 %vm3278_vm14, %v7698_v22  ;;  %4031 = vmatpush1.bf16.msra.mxu0 %v3993_v23 }
 0x68c   :  { %4112 = vmatpush1.bf16.msra.mxu1 %v3999_v8  ;;  %4823 = vmatprep.subr.msk.bf16.mxu0 %vm3294_vm13, %v3989_v18 }
 0x68d   :  { %4829 = vmatprep.subr.msk.bf16.mxu1 %vm3294_vm13, %v3991_v28  ;;  %3523 = vmatprep.mubr.bf16.mxu0 %v9674_v37 }
 0x68e   :  { %3604 = vmatprep.mubr.bf16.mxu1 %v9674_v37 }
 0x692   :  { %4801 = vmatmul.mubr.msk.bf16.gmra.mxu0 %vm3278_vm14, %v7718_v33 }
 0x693   :  { %4807 = vmatmul.mubr.msk.bf16.gmra.mxu1 %vm3278_vm14, %v7718_v33  ;;  %3533 = vmatprep.mubr.bf16.mxu0 %v9674_v37 }
 0x694   :  { %3614 = vmatprep.mubr.bf16.mxu1 %v9674_v37 }
 0x69a   :  { %4802 = vmatmul.mubr.msk.bf16.gmra.mxu0 %vm3278_vm14, %v7729_v46 }
 0x69b   :  { %4808 = vmatmul.mubr.msk.bf16.gmra.mxu1 %vm3278_vm14, %v7729_v46  ;;  %3543 = vmatprep.mubr.bf16.mxu0 %v9674_v37 }
 0x69c   :  { %3624 = vmatprep.mubr.bf16.mxu1 %v9674_v37 }
 0x6a2   :  { %4803 = vmatmul.mubr.msk.bf16.gmra.mxu0 %vm3278_vm14, %v7740_v3 }
 0x6a3   :  { %4809 = vmatmul.mubr.msk.bf16.gmra.mxu1 %vm3278_vm14, %v7740_v3  ;;  %3553 = vmatprep.mubr.bf16.mxu0 %v9674_v37 }
 0x6a4   :  { %3634 = vmatprep.mubr.bf16.mxu1 %v9674_v37 }
 0x6aa   :  { %4804 = vmatmul.mubr.msk.bf16.gmra.mxu0 %vm3278_vm14, %v7755_v56 }
 0x6ab   :  { %4810 = vmatmul.mubr.msk.bf16.gmra.mxu1 %vm3278_vm14, %v7755_v56  ;;  %4048 = vmatprep.mubr.bf16.mxu0 %v9674_v37 }
 0x6ac   :  { %4129 = vmatprep.mubr.bf16.mxu1 %v9674_v37 }
 0x6b2   :  { %4812 = vmatmul.mubr.msk.bf16.vlgmr.msra.gmra.mxu0 %vm3278_vm14, %v7698_v22 }
 0x6b3   :  { %4818 = vmatmul.mubr.msk.bf16.vlgmr.msra.gmra.mxu1 %vm3278_vm14, %v7698_v22  ;;  %4193 = vmatpush1.bf16.msra.mxu0 %v4005_v13 }
 0x6b4   :  { %4274 = vmatpush1.bf16.msra.mxu1 %v4011_v43  ;;  %4058 = vmatprep.mubr.bf16.mxu0 %v9674_v37 }
 0x6b5   :  { %4139 = vmatprep.mubr.bf16.mxu1 %v9674_v37 }
 0x6ba   :  { %4813 = vmatmul.mubr.msk.bf16.gmra.mxu0 %vm3278_vm14, %v7718_v33 }
 0x6bb   :  { %4819 = vmatmul.mubr.msk.bf16.gmra.mxu1 %vm3278_vm14, %v7718_v33  ;;  %4068 = vmatprep.mubr.bf16.mxu0 %v9674_v37 }
 0x6bc   :  { %4149 = vmatprep.mubr.bf16.mxu1 %v9674_v37 }
 0x6c2   :  { %4814 = vmatmul.mubr.msk.bf16.gmra.mxu0 %vm3278_vm14, %v7729_v46 }
 0x6c3   :  { %4820 = vmatmul.mubr.msk.bf16.gmra.mxu1 %vm3278_vm14, %v7729_v46  ;;  %4078 = vmatprep.mubr.bf16.mxu0 %v9674_v37 }
 0x6c4   :  { %4159 = vmatprep.mubr.bf16.mxu1 %v9674_v37 }
 0x6ca   :  { %4815 = vmatmul.mubr.msk.bf16.gmra.mxu0 %vm3278_vm14, %v7740_v3 }
 0x6cb   :  { %4821 = vmatmul.mubr.msk.bf16.gmra.mxu1 %vm3278_vm14, %v7740_v3  ;;  %4088 = vmatprep.mubr.bf16.mxu0 %v9674_v37 }
 0x6cc   :  { %4169 = vmatprep.mubr.bf16.mxu1 %v9674_v37 }
 0x6d2   :  { %4816 = vmatmul.mubr.msk.bf16.gmra.mxu0 %vm3278_vm14, %v7755_v56 }
 0x6d3   :  { %4822 = vmatmul.mubr.msk.bf16.gmra.mxu1 %vm3278_vm14, %v7755_v56  ;;  %4210 = vmatprep.mubr.bf16.mxu0 %v9674_v37 }
 0x6d4   :  { %4291 = vmatprep.mubr.bf16.mxu1 %v9674_v37 }
 0x6da   :  { %4824 = vmatmul.mubr.msk.bf16.vlgmr.msra.gmra.mxu0 %vm3278_vm14, %v7698_v22 }
 0x6db   :  { %4830 = vmatmul.mubr.msk.bf16.vlgmr.msra.gmra.mxu1 %vm3278_vm14, %v7698_v22  ;;  %4220 = vmatprep.mubr.bf16.mxu0 %v9674_v37 }
 0x6dc   :  { %4301 = vmatprep.mubr.bf16.mxu1 %v9674_v37 }
 0x6e2   :  { %4825 = vmatmul.mubr.msk.bf16.gmra.mxu0 %vm3278_vm14, %v7718_v33 }
 0x6e3   :  { %4831 = vmatmul.mubr.msk.bf16.gmra.mxu1 %vm3278_vm14, %v7718_v33  ;;  %4230 = vmatprep.mubr.bf16.mxu0 %v9674_v37 }
 0x6e4   :  { %4311 = vmatprep.mubr.bf16.mxu1 %v9674_v37 }
 0x6ea   :  { %4826 = vmatmul.mubr.msk.bf16.gmra.mxu0 %vm3278_vm14, %v7729_v46 }
 0x6eb   :  { %4832 = vmatmul.mubr.msk.bf16.gmra.mxu1 %vm3278_vm14, %v7729_v46  ;;  %4240 = vmatprep.mubr.bf16.mxu0 %v9674_v37 }
 0x6ec   :  { %4321 = vmatprep.mubr.bf16.mxu1 %v9674_v37 }
 0x6f2   :  { %4827 = vmatmul.mubr.msk.bf16.gmra.mxu0 %vm3278_vm14, %v7740_v3 }
 0x6f3   :  { %4833 = vmatmul.mubr.msk.bf16.gmra.mxu1 %vm3278_vm14, %v7740_v3  ;;  %4250 = vmatprep.mubr.bf16.mxu0 %v9674_v37 }
 0x6f4   :  { %4331 = vmatprep.mubr.bf16.mxu1 %v9674_v37 }
 0x6fa   :  { %4828 = vmatmul.mubr.msk.bf16.gmra.mxu0 %vm3278_vm14, %v7755_v56 }
 0x6fb   :  { %4834 = vmatmul.mubr.msk.bf16.gmra.mxu1 %vm3278_vm14, %v7755_v56 }
 0x722   :  { %v3353_v15 = vpop.f32.mrf.mxu0 }
 0x723   :  { %v3434_v22 = vpop.f32.mrf.mxu1  ;;  %3651 = vrot.lane.b32.xlu0 %v3353_v15, %s4935_s8 }
 0x724   :  { %v3355_v33 = vpop.f32.mrf.mxu0 }
 0x725   :  { %v3436_v46 = vpop.f32.mrf.mxu1  ;;  %3653 = vrot.lane.b32.xlu1 %v3355_v33, %s4935_s8 }
 0x726   :  { %v3357_v62 = vpop.f32.mrf.mxu0 }
 0x727   :  { %v3438_v3 = vpop.f32.mrf.mxu1  ;;  %3655 = vrot.lane.b32.xlu0 %v3434_v22, %s4935_s8 }
 0x728   :  { %v3359_v19 = vpop.f32.mrf.mxu0 }
 0x729   :  { %v3440_v37 = vpop.f32.mrf.mxu1  ;;  %3657 = vrot.lane.b32.xlu1 %v3436_v46, %s4935_s8 }
 0x72a   :  { %v3363_v7 = vpop.f32.mrf.mxu0 }
 0x72b   :  { %v3444_v9 = vpop.f32.mrf.mxu1  ;;  %3691 = vrot.lane.b32.xlu0 %v3357_v62, %s4931_s0 }
 0x72c   :  { %v3365_v56 = vpop.f32.mrf.mxu0 }
 0x72d   :  { %v3446_v34 = vpop.f32.mrf.mxu1  ;;  %3693 = vrot.lane.b32.xlu1 %v3359_v19, %s4931_s0 }
 0x72e   :  { %v3367_v4 = vpop.f32.mrf.mxu0 }
 0x72f   :  { %v3448_v49 = vpop.f32.mrf.mxu1  ;;  %3695 = vrot.lane.b32.xlu0 %v3438_v3, %s4931_s0 }
 0x730   :  { %v3369_v41 = vpop.f32.mrf.mxu0 }
 0x731   :  { %v3450_v32 = vpop.f32.mrf.mxu1  ;;  %3697 = vrot.lane.b32.xlu1 %v3440_v37, %s4931_s0 }
 0x732   :  { %v7879_v36 = vpop.f32.mrf.mxu0 }
 0x733   :  { %9675 = vst [vmem:[#allocation51_spill] sm:$0xff] %v7879_v36  ;;  %v7881_v50 = vpop.f32.mrf.mxu1  ;;  %3731 = vrot.lane.b32.xlu0 %v3363_v7, %s4936_s27 }
 0x734   :  { %v7884_v31 = vpop.f32.mrf.mxu0 }
 0x735   :  { %v7886_v61 = vpop.f32.mrf.mxu1  ;;  %3733 = vrot.lane.b32.xlu1 %v3365_v56, %s4936_s27 }
 0x736   :  { %9676 = vst [vmem:[#allocation54_spill] sm:$0xff] %v7886_v61  ;;  %v3377_v23 = vpop.f32.mrf.mxu0 }
 0x737   :  { %v3458_v18 = vpop.f32.mrf.mxu1  ;;  %3735 = vrot.lane.b32.xlu0 %v3444_v9, %s4936_s27 }
 0x738   :  { %v3379_v8 = vpop.f32.mrf.mxu0 }
 0x739   :  { %v3460_v28 = vpop.f32.mrf.mxu1  ;;  %3737 = vrot.lane.b32.xlu1 %v3446_v34, %s4936_s27 }
 0x73a   :  { %v3383_v45 = vpop.f32.mrf.mxu0 }
 0x73b   :  { %v3464_v51 = vpop.f32.mrf.mxu1  ;;  %3771 = vrot.lane.b32.xlu0 %v3367_v4, %s4937_s15 }
 0x73c   :  { %v3385_v1 = vpop.f32.mrf.mxu0 }
 0x73d   :  { %v3466_v39 = vpop.f32.mrf.mxu1  ;;  %3773 = vrot.lane.b32.xlu1 %v3369_v41, %s4937_s15 }
 0x73e   :  { %v3387_v0 = vpop.f32.mrf.mxu0 }
 0x73f   :  { %v3468_v40 = vpop.f32.mrf.mxu1  ;;  %3775 = vrot.lane.b32.xlu0 %v3448_v49, %s4937_s15 }
 0x740   :  { %v3389_v27 = vpop.f32.mrf.mxu0 }
 0x741   :  { %v3470_v42 = vpop.f32.mrf.mxu1  ;;  %3777 = vrot.lane.b32.xlu1 %v3450_v32, %s4937_s15 }
 0x742   :  { %v3393_v13 = vpop.f32.mrf.mxu0 }
 0x743   :  { %v3474_v43 = vpop.f32.mrf.mxu1  ;;  %3811 = vrot.lane.b32.xlu0 %v3377_v23, %s4938_s16 }
 0x744   :  { %v3395_v15 = vpop.f32.mrf.mxu0 }
 0x745   :  { %v3476_v22 = vpop.f32.mrf.mxu1  ;;  %3813 = vrot.lane.b32.xlu1 %v3379_v8, %s4938_s16 }
 0x746   :  { %v3397_v33 = vpop.f32.mrf.mxu0 }
 0x747   :  { %v3478_v46 = vpop.f32.mrf.mxu1  ;;  %3815 = vrot.lane.b32.xlu0 %v3458_v18, %s4938_s16 }
 0x748   :  { %v3398_v62 = vpop.f32.mrf.mxu0 }
 0x749   :  { %v3479_v3 = vpop.f32.mrf.mxu1  ;;  %3817 = vrot.lane.b32.xlu1 %v3460_v28, %s4938_s16 }
 0x74a   :  { %v3515_v19 = vpop.f32.mrf.mxu0 }
 0x74b   :  { %v3596_v37 = vpop.f32.mrf.mxu1  ;;  %3851 = vrot.lane.b32.xlu0 %v3383_v45, %s4939_s17 }
 0x74c   :  { %v3517_v7 = vpop.f32.mrf.mxu0 }
 0x74d   :  { %v3598_v9 = vpop.f32.mrf.mxu1  ;;  %3853 = vrot.lane.b32.xlu1 %v3385_v1, %s4939_s17 }
 0x74e   :  { %v3519_v56 = vpop.f32.mrf.mxu0 }
 0x74f   :  { %v3600_v34 = vpop.f32.mrf.mxu1  ;;  %3855 = vrot.lane.b32.xlu0 %v3464_v51, %s4939_s17 }
 0x750   :  { %v3521_v4 = vpop.f32.mrf.mxu0 }
 0x751   :  { %v3602_v49 = vpop.f32.mrf.mxu1  ;;  %3857 = vrot.lane.b32.xlu1 %v3466_v39, %s4939_s17 }
 0x752   :  { %v3525_v41 = vpop.f32.mrf.mxu0 }
 0x753   :  { %v3606_v32 = vpop.f32.mrf.mxu1  ;;  %3891 = vrot.lane.b32.xlu0 %v3387_v0, %s4933_s28 }
 0x754   :  { %v3527_v23 = vpop.f32.mrf.mxu0 }
 0x755   :  { %v3608_v18 = vpop.f32.mrf.mxu1  ;;  %3893 = vrot.lane.b32.xlu1 %v3389_v27, %s4933_s28 }
 0x756   :  { %v3529_v8 = vpop.f32.mrf.mxu0 }
 0x757   :  { %v3610_v28 = vpop.f32.mrf.mxu1  ;;  %3895 = vrot.lane.b32.xlu0 %v3468_v40, %s4933_s28 }
 0x758   :  { %v3531_v45 = vpop.f32.mrf.mxu0 }
 0x759   :  { %v3612_v1 = vpop.f32.mrf.mxu1  ;;  %3897 = vrot.lane.b32.xlu1 %v3470_v42, %s4933_s28 }
 0x75a   :  { %v7907_v51 = vpop.f32.mrf.mxu0 }
 0x75b   :  { %9677 = vst [vmem:[#allocation58_spill] sm:$0xff] %v7907_v51  ;;  %v7909_v33 = vpop.f32.mrf.mxu1  ;;  %3931 = vrot.lane.b32.xlu0 %v3393_v13, %s4940_s18 }
 0x75c   :  { %9678 = vst [vmem:[#allocation53_spill] sm:$0xff] %v7909_v33  ;;  %v7912_v39 = vpop.f32.mrf.mxu0 }
 0x75d   :  { %9679 = vst [vmem:[#allocation63_spill] sm:$0xff] %v7912_v39  ;;  %v7914_v0 = vpop.f32.mrf.mxu1  ;;  %3933 = vrot.lane.b32.xlu1 %v3395_v15, %s4940_s18 }
 0x75e   :  { %9680 = vst [vmem:[#allocation70_spill] sm:$0xff] %v7914_v0  ;;  %v3539_v27 = vpop.f32.mrf.mxu0 }
 0x75f   :  { %v3620_v46 = vpop.f32.mrf.mxu1  ;;  %3935 = vrot.lane.b32.xlu0 %v3474_v43, %s4940_s18 }
 0x760   :  { %v3541_v40 = vpop.f32.mrf.mxu0 }
 0x761   :  { %v3622_v62 = vpop.f32.mrf.mxu1  ;;  %3937 = vrot.lane.b32.xlu1 %v3476_v22, %s4940_s18 }
 0x762   :  { %v3545_v42 = vpop.f32.mrf.mxu0 }
 0x763   :  { %v7919_v3 = vpop.f32.mrf.mxu1  ;;  %3659 = vrot.lane.b32.xlu0 %v3515_v19, %s4935_s8 }
 0x764   :  { %v3547_v13 = vpop.f32.mrf.mxu0 }
 0x765   :  { %v7922_v48 = vpop.f32.mrf.mxu1  ;;  %3661 = vrot.lane.b32.xlu1 %v3517_v7, %s4935_s8 }
 0x766   :  { %v7925_v54 = vpop.f32.mrf.mxu0 }
 0x767   :  { %v7927_v15 = vpop.f32.mrf.mxu1  ;;  %3663 = vrot.lane.b32.xlu0 %v3596_v37, %s4935_s8 }
 0x768   :  { %v7930_v43 = vpop.f32.mrf.mxu0 }
 0x769   :  { %v7932_v10 = vpop.f32.mrf.mxu1  ;;  %3665 = vrot.lane.b32.xlu1 %v3598_v9, %s4935_s8 }
 0x76a   :  { %v7935_v22 = vpop.f32.mrf.mxu0 }
 0x76b   :  { %v7937_v19 = vpop.f32.mrf.mxu1  ;;  %3699 = vrot.lane.b32.xlu0 %v3519_v56, %s4931_s0 }
 0x76c   :  { %v7940_v6 = vpop.f32.mrf.mxu0 }
 0x76d   :  { %v7942_v7 = vpop.f32.mrf.mxu1  ;;  %3701 = vrot.lane.b32.xlu1 %v3521_v4, %s4931_s0 }
 0x76e   :  { %v3559_v26 = vpop.f32.mrf.mxu0 }
 0x76f   :  { %v3640_v37 = vpop.f32.mrf.mxu1  ;;  %3703 = vrot.lane.b32.xlu0 %v3600_v34, %s4931_s0 }
 0x770   :  { %v3560_v2 = vpop.f32.mrf.mxu0 }
 0x771   :  { %v3641_v5 = vpop.f32.mrf.mxu1  ;;  %3705 = vrot.lane.b32.xlu1 %v3602_v49, %s4931_s0 }
 0x772   :  { %v7947_v9 = vpop.f32.mrf.mxu0 }
 0x773   :  { %v7949_v16 = vpop.f32.mrf.mxu1  ;;  %3739 = vrot.lane.b32.xlu0 %v3525_v41, %s4936_s27 }
 0x774   :  { %v7952_v56 = vpop.f32.mrf.mxu0 }
 0x775   :  { %v7954_v17 = vpop.f32.mrf.mxu1  ;;  %3741 = vrot.lane.b32.xlu1 %v3527_v23, %s4936_s27 }
 0x776   :  { %v7957_v26 = vpop.f32.mrf.mxu0 }
 0x777   :  { %v7959_v4 = vpop.f32.mrf.mxu1  ;;  %3743 = vrot.lane.b32.xlu0 %v3606_v32, %s4936_s27 }
 0x778   :  { %v7962_v5 = vpop.f32.mrf.mxu0 }
 0x779   :  { %v7964_v2 = vpop.f32.mrf.mxu1  ;;  %3745 = vrot.lane.b32.xlu1 %v3608_v18, %s4936_s27 }
 0x77a   :  { %v7967_v34 = vpop.f32.mrf.mxu0 }
 0x77b   :  { %v7969_v49 = vpop.f32.mrf.mxu1  ;;  %3779 = vrot.lane.b32.xlu0 %v3529_v8, %s4937_s15 }
 0x77c   :  { %v7972_v41 = vpop.f32.mrf.mxu0 }
 0x77d   :  { %v7974_v23 = vpop.f32.mrf.mxu1  ;;  %3781 = vrot.lane.b32.xlu1 %v3531_v45, %s4937_s15 }
 0x77e   :  { %v7977_v37 = vpop.f32.mrf.mxu0 }
 0x77f   :  { %v7979_v32 = vpop.f32.mrf.mxu1  ;;  %3783 = vrot.lane.b32.xlu0 %v3610_v28, %s4937_s15 }
 0x780   :  { %v7982_v21 = vpop.f32.mrf.mxu0 }
 0x781   :  { %v7984_v18 = vpop.f32.mrf.mxu1  ;;  %3785 = vrot.lane.b32.xlu1 %v3612_v1, %s4937_s15 }
 0x782   :  { %v7987_v44 = vpop.f32.mrf.mxu0 }
 0x783   :  { %9681 = vst [vmem:[#allocation60_spill] sm:$0xff] %v7987_v44  ;;  %v7989_v8 = vpop.f32.mrf.mxu1  ;;  %3819 = vrot.lane.b32.xlu0 %v3539_v27, %s4938_s16 }
 0x784   :  { %9682 = vst [vmem:[#allocation62_spill] sm:$0xff] %v7989_v8  ;;  %v7992_v58 = vpop.f32.mrf.mxu0 }
 0x785   :  { %9683 = vst [vmem:[#allocation57_spill] sm:$0xff] %v7992_v58  ;;  %v7994_v45 = vpop.f32.mrf.mxu1  ;;  %3821 = vrot.lane.b32.xlu1 %v3541_v40, %s4938_s16 }
 0x786   :  { %9684 = vst [vmem:[#allocation65_spill] sm:$0xff] %v7994_v45  ;;  %v7997_v38 = vpop.f32.mrf.mxu0  ;;  %v8025_v45 = vpop.permute.xlu0 %3973 }
 0x787   :  { %v7999_v28 = vpop.f32.mrf.mxu1  ;;  %3823 = vrot.lane.b32.xlu0 %v3620_v46, %s4938_s16 }
 0x788   :  { %v8002_v11 = vpop.f32.mrf.mxu0 }
 0x789   :  { %v8004_v1 = vpop.f32.mrf.mxu1  ;;  %3825 = vrot.lane.b32.xlu1 %v3622_v62, %s4938_s16 }
 0x78a   :  { %v8007_v44 = vpop.f32.mrf.mxu0 }
 0x78b   :  { %v8009_v27 = vpop.f32.mrf.mxu1  ;;  %3859 = vrot.lane.b32.xlu0 %v3545_v42, %s4939_s17 }
 0x78c   :  { %v8012_v58 = vpop.f32.mrf.mxu0 }
 0x78d   :  { %v8014_v40 = vpop.f32.mrf.mxu1  ;;  %3861 = vrot.lane.b32.xlu1 %v3547_v13, %s4939_s17 }
 0x78e   :  { %v8017_v8 = vpop.f32.mrf.mxu0 }
 0x78f   :  { %v8019_v46 = vpop.f32.mrf.mxu1  ;;  %3863 = vrot.lane.b32.xlu0 %v7919_v3, %s4939_s17 }
 0x790   :  { %v8023_v62 = vpop.f32.mrf.mxu0 }
 0x791   :  { %v8027_v52 = vpop.f32.mrf.mxu1  ;;  %3865 = vrot.lane.b32.xlu1 %v7922_v48, %s4939_s17 }
 0x792   :  { %v8031_v42 = vpop.f32.mrf.mxu0 }
 0x793   :  { %v8035_v13 = vpop.f32.mrf.mxu1  ;;  %3899 = vrot.lane.b32.xlu0 %v7925_v54, %s4933_s28 }
 0x794   :  { %v8039_v59 = vpop.f32.mrf.mxu0 }
 0x795   :  { %v8041_v3 = vpop.f32.mrf.mxu1  ;;  %v8043_v0 = vpop.permute.xlu0 %3651  ;;  %3901 = vrot.lane.b32.xlu1 %v7930_v43, %s4933_s28 }
 0x796   :  { %v4094_v39 = vpop.f32.mrf.mxu0 }
 0x797   :  { %v4175_v48 = vpop.f32.mrf.mxu1  ;;  %v8047_v12 = vpop.permute.xlu1 %3653  ;;  %3903 = vrot.lane.b32.xlu0 %v7927_v15, %s4933_s28 }
 0x798   :  { %v4095_v33 = vpop.f32.mrf.mxu0 }
 0x799   :  { %v4176_v51 = vpop.f32.mrf.mxu1  ;;  %v8051_v53 = vpop.permute.xlu0 %3655  ;;  %3905 = vrot.lane.b32.xlu1 %v7932_v10, %s4933_s28 }
 0x79a   :  { %v8055_v54 = vpop.f32.mrf.mxu0 }
 0x79b   :  { %v8057_v61 = vpop.f32.mrf.mxu1  ;;  %v8059_v57 = vpop.permute.xlu1 %3657  ;;  %3939 = vrot.lane.b32.xlu0 %v7935_v22, %s4940_s18 }
 0x79c   :  { %v8063_v39 = vpop.f32.mrf.mxu0 }
 0x79d   :  { %v8065_v43 = vpop.f32.mrf.mxu1  ;;  %v8067_v33 = vpop.permute.xlu0 %3691  ;;  %3941 = vrot.lane.b32.xlu1 %v7940_v6, %s4940_s18 }
 0x79e   :  { %v8071_v51 = vpop.f32.mrf.mxu0 }
 0x79f   :  { %v8073_v10 = vpop.f32.mrf.mxu1  ;;  %v8075_v15 = vpop.permute.xlu1 %3693  ;;  %3943 = vrot.lane.b32.xlu0 %v7937_v19, %s4940_s18 }
 0x7a0   :  { %9685 = vst [vmem:[#allocation67_spill] sm:$0xff] %v8073_v10  ;;  %v8079_v48 = vpop.f32.mrf.mxu0 }
 0x7a1   :  { %v8081_v22 = vpop.f32.mrf.mxu1  ;;  %v8083_v20 = vpop.permute.xlu0 %3695  ;;  %3945 = vrot.lane.b32.xlu1 %v7942_v7, %s4940_s18 }
 0x7a2   :  { %9686 = vst [vmem:[#allocation68_spill] sm:$0xff] %v8081_v22  ;;  %v8087_v14 = vpop.f32.mrf.mxu0 }
 0x7a3   :  { %9687 = vst [vmem:[#allocation12_spill] sm:$0xff] %v8087_v14  ;;  %v8089_v6 = vpop.f32.mrf.mxu1  ;;  %v8091_v47 = vpop.permute.xlu1 %3697  ;;  %4350 = vrot.lane.b32.xlu0 %v7952_v56, %s4935_s8 }
 0x7a4   :  { %9688 = vst [vmem:[#allocation69_spill] sm:$0xff] %v8089_v6  ;;  %v8095_v10 = vpop.f32.mrf.mxu0 }
 0x7a5   :  { %9689 = vst [vmem:[#allocation71_spill] sm:$0xff] %v8095_v10  ;;  %v8097_v19 = vpop.f32.mrf.mxu1  ;;  %v8099_v36 = vpop.permute.xlu0 %3731  ;;  %4348 = vrot.lane.b32.xlu1 %v7947_v9, %s4935_s8 }
 0x7a6   :  { %9690 = vst [vmem:[#allocation74_spill] sm:$0xff] %v8097_v19  ;;  %v8103_v22 = vpop.f32.mrf.mxu0 }
 0x7a7   :  { %9691 = vst [vmem:[#allocation66_spill] sm:$0xff] %v8103_v22  ;;  %v8105_v7 = vpop.f32.mrf.mxu1  ;;  %v8107_v14 = vpop.permute.xlu1 %3733  ;;  %4354 = vrot.lane.b32.xlu0 %v7954_v17, %s4935_s8 }
 0x7a8   :  { %9692 = vst [vmem:[#allocation73_spill] sm:$0xff] %v8105_v7  ;;  %v8111_v6 = vpop.f32.mrf.mxu0 }
 0x7a9   :  { %9693 = vst [vmem:[#allocation75_spill] sm:$0xff] %v8111_v6  ;;  %v8113_v56 = vpop.f32.mrf.mxu1  ;;  %v8115_v10 = vpop.permute.xlu0 %3735  ;;  %4352 = vrot.lane.b32.xlu1 %v7949_v16, %s4935_s8 }
 0x7aa   :  { %9694 = vst [vmem:[#allocation102_spill] sm:$0xff] %v8113_v56  ;;  %v8119_v19 = vpop.f32.mrf.mxu0 }
 0x7ab   :  { %9695 = vst [vmem:[#allocation64_spill] sm:$0xff] %v8119_v19  ;;  %v8121_v9 = vpop.f32.mrf.mxu1  ;;  %v8123_v22 = vpop.permute.xlu1 %3737  ;;  %4390 = vrot.lane.b32.xlu0 %v7962_v5, %s4931_s0 }
 0x7ac   :  { %9696 = vst [vmem:[#allocation72_spill] sm:$0xff] %v8121_v9  ;;  %v8127_v7 = vpop.f32.mrf.mxu0 }
 0x7ad   :  { %9697 = vst [vmem:[#allocation134_spill] sm:$0xff] %v8127_v7  ;;  %v8129_v17 = vpop.f32.mrf.mxu1  ;;  %v8131_v6 = vpop.permute.xlu0 %3771  ;;  %4388 = vrot.lane.b32.xlu1 %v7957_v26, %s4931_s0 }
 0x7ae   :  { %9698 = vst [vmem:[#allocation13_spill] sm:$0xff] %v8129_v17  ;;  %v8135_v56 = vpop.f32.mrf.mxu0 }
 0x7af   :  { %9699 = vst [vmem:[#allocation103_spill] sm:$0xff] %v8135_v56  ;;  %v8137_v16 = vpop.permute.xlu1 %3773  ;;  %4394 = vrot.lane.b32.xlu0 %v7964_v2, %s4931_s0  ;;  %v8141_v9 = vpop.f32.mrf.mxu1 }
 0x7b0   :  { %9700 = vst [vmem:[#allocation84_spill] sm:$0xff] %v8141_v9  ;;  %v8143_v19 = vpop.f32.mrf.mxu0 }
 0x7b1   :  { %9701 = vst [vmem:[#allocation135_spill] sm:$0xff] %v8143_v19  ;;  %v8145_v5 = vpop.permute.xlu0 %3775  ;;  %4392 = vrot.lane.b32.xlu1 %v7959_v4, %s4931_s0  ;;  %v8149_v17 = vpop.f32.mrf.mxu1 }
 0x7b2   :  { %9702 = vst [vmem:[#allocation83_spill] sm:$0xff] %v8145_v5  ;;  %9703 = vst [vmem:[#allocation120_spill] sm:$0xff] %v8149_v17  ;;  %v8151_v7 = vpop.f32.mrf.mxu0 }
 0x7b3   :  { %9704 = vst [vmem:[#allocation14_spill] sm:$0xff] %v8151_v7  ;;  %v8153_v26 = vpop.permute.xlu1 %3777  ;;  %4430 = vrot.lane.b32.xlu0 %v7972_v41, %s4936_s27  ;;  %v8157_v56 = vpop.f32.mrf.mxu1 }
 0x7b4   :  { %9705 = vst [vmem:[#allocation137_spill] sm:$0xff] %v8153_v26  ;;  %9706 = vst [vmem:[#allocation119_spill] sm:$0xff] %v8157_v56  ;;  %v8159_v2 = vpop.f32.mrf.mxu0 }
 0x7b5   :  { %9707 = vst [vmem:[#allocation136_spill] sm:$0xff] %v8159_v2  ;;  %v8161_v9 = vpop.permute.xlu0 %3811  ;;  %4428 = vrot.lane.b32.xlu1 %v7967_v34, %s4936_s27  ;;  %v8165_v19 = vpop.f32.mrf.mxu1 }
 0x7b6   :  { %9708 = vst [vmem:[#allocation20_spill] sm:$0xff] %v8161_v9  ;;  %9709 = vst [vmem:[#allocation29_spill] sm:$0xff] %v8165_v19  ;;  %v8167_v4 = vpop.f32.mrf.mxu0 }
 0x7b7   :  { %9710 = vst [vmem:[#allocation11_spill] sm:$0xff] %v8167_v4  ;;  %v8169_v17 = vpop.permute.xlu1 %3813  ;;  %4434 = vrot.lane.b32.xlu0 %v7974_v23, %s4936_s27  ;;  %v8173_v7 = vpop.f32.mrf.mxu1 }
 0x7b8   :  { %9711 = vst [vmem:[#allocation31_spill] sm:$0xff] %v8173_v7  ;;  %v8175_v41 = vpop.f32.mrf.mxu0 }
 0x7b9   :  { %9712 = vst [vmem:[#allocation37_spill] sm:$0xff] %v8175_v41  ;;  %v3816_v56 = vpop.permute.xlu0 %3815  ;;  %4432 = vrot.lane.b32.xlu1 %v7969_v49, %s4936_s27  ;;  %v8179_v2 = vpop.f32.mrf.mxu1 }
 0x7ba   :  { %9713 = vst [vmem:[#allocation28_spill] sm:$0xff] %v8179_v2  ;;  %v8181_v34 = vpop.f32.mrf.mxu0 }
 0x7bb   :  { %9714 = vst [vmem:[#allocation22_spill] sm:$0xff] %v8181_v34  ;;  %v8183_v19 = vpop.permute.xlu1 %3817  ;;  %4470 = vrot.lane.b32.xlu0 %v7982_v21, %s4937_s15  ;;  %v8187_v4 = vpop.f32.mrf.mxu1  ;;  %v3673_v21 = vsel %vm1515_vm5, %v8043_v0, %v8047_v12 }
 0x7bc   :  { %9715 = vst [vmem:[#allocation93_spill] sm:$0xff] %v8187_v4  ;;  %v8189_v23 = vpop.f32.mrf.mxu0 }
 0x7bd   :  { %9716 = vst [vmem:[#allocation34_spill] sm:$0xff] %v8189_v23  ;;  %v8191_v7 = vpop.permute.xlu0 %3851  ;;  %4468 = vrot.lane.b32.xlu1 %v7977_v37, %s4937_s15  ;;  %v8195_v41 = vpop.f32.mrf.mxu1 }
 0x7be   :  { %9717 = vst [vmem:[#allocation33_spill] sm:$0xff] %v8191_v7  ;;  %9718 = vst [vmem:[#allocation52_spill] sm:$0xff] %v8195_v41  ;;  %v4256_v49 = vpop.f32.mrf.mxu0  ;;  %v9719_v41 = vld [vmem:[#allocation77_spill] sm:$0xff]  ;;  %v9721_v7 = vld [vmem:[#allocation79_spill] sm:$0xff] }
 0x7bf   :  { %v8197_v2 = vpop.permute.xlu1 %3853  ;;  %4474 = vrot.lane.b32.xlu0 %v7984_v18, %s4937_s15  ;;  %v4337_v34 = vpop.f32.mrf.mxu1  ;;  %v3672_v49 = vsel %vm1515_vm5, %v8047_v12, %v8051_v53  ;;  %v3713_v18 = vsel %vm1588_vm6, %v8067_v33, %v8075_v15  ;;  %v3712_v12 = vsel %vm1588_vm6, %v8075_v15, %v8083_v20  ;;  %v3752_v15 = vsel %vm1661_vm7, %v8107_v14, %v8115_v10 }
 0x7c0   :  { %v4257_v4 = vpop.f32.mrf.mxu0  ;;  %v2938_v34 = vadd.f32 %v7620_v63, %v8033_v35  ;;  %v2977_v63 = vadd.f32 %v7618_v24, %v8033_v35  ;;  %v3716_v9 = vmul.f32 %v3713_v18, %v9721_v7  ;;  %v3793_v24 = vsel %vm1734_vm8, %v8131_v6, %v8137_v16  ;;  %v9724_v7 = vld [vmem:[#allocation86_spill] sm:$0xff] }
 0x7c1   :  { %v3856_v23 = vpop.permute.xlu0 %3855  ;;  %4472 = vrot.lane.b32.xlu1 %v7979_v32, %s4937_s15  ;;  %v4338_v37 = vpop.f32.mrf.mxu1  ;;  %v3676_v4 = vmul.f32 %v3673_v21, %v9719_v41  ;;  %v3753_v32 = vsel %vm1661_vm7, %v8099_v36, %v8107_v14  ;;  %v3832_v14 = vsel %vm1807_vm9, %v8169_v17, %v3816_v56 }
 0x7c2   :  { %v3644_v21 = vadd.f32 %v7884_v31, %v2938_v34  ;;  %v9720_v37 = vld [vmem:[#allocation78_spill] sm:$0xff]  ;;  %v3645_v31 = vadd.f32 %v7881_v50, %v2977_v63  ;;  %v9723_v34 = vld [vmem:[#allocation80_spill] sm:$0xff]  ;;  %v9725_v63 = vld [vmem:[#allocation87_spill] sm:$0xff] }
 0x7c3   :  { %v8218_v26 = vpop.permute.xlu1 %3857  ;;  %4510 = vrot.lane.b32.xlu0 %v8002_v11, %s4938_s16  ;;  %v3677_v41 = vmul.f32 %v3672_v49, %v9720_v37  ;;  %v3717_v18 = vmul.f32 %v3712_v12, %v9723_v34  ;;  %v3756_v37 = vmul.f32 %v3753_v32, %v9724_v7  ;;  %v3757_v12 = vmul.f32 %v3752_v15, %v9725_v63 }
 0x7c4   :  { %v3684_v49 = vadd.f32 %v3676_v4, %v3644_v21  ;;  %v9726_v21 = vld [vmem:[#allocation88_spill] sm:$0xff] }
 0x7c5   :  { %v8235_v11 = vpop.permute.xlu0 %3891  ;;  %4508 = vrot.lane.b32.xlu1 %v7997_v38, %s4938_s16  ;;  %v3792_v38 = vsel %vm1734_vm8, %v8137_v16, %v8145_v5  ;;  %v3685_v50 = vadd.f32 %v3677_v41, %v3645_v31  ;;  %v3796_v32 = vmul.f32 %v3793_v24, %v9726_v21  ;;  %v3872_v16 = vsel %vm1880_vm10, %v8197_v2, %v3856_v23  ;;  %v9727_v41 = vld [vmem:[#allocation89_spill] sm:$0xff]  ;;  %v9728_v31 = vld [vmem:[#allocation92_spill] sm:$0xff] }
 0x7c6   :  { %9722 = vst [vmem:[#allocation25_spill] sm:$0xff] %v8235_v11  ;;  %v3724_v4 = vadd.f32 %v3716_v9, %v3684_v49  ;;  %v3797_v9 = vmul.f32 %v3792_v38, %v9727_v41  ;;  %v3836_v15 = vmul.f32 %v3832_v14, %v9728_v31  ;;  %v9730_v38 = vld [vmem:[#allocation96_spill] sm:$0xff]  ;;  %v9731_v41 = vld [vmem:[#allocation97_spill] sm:$0xff] }
 0x7c7   :  { %v8250_v11 = vpop.permute.xlu1 %3893  ;;  %4514 = vrot.lane.b32.xlu0 %v8004_v1, %s4938_s16  ;;  %v3831_v1 = vsel %vm1807_vm9, %v3816_v56, %v8183_v19  ;;  %v3725_v34 = vadd.f32 %v3717_v18, %v3685_v50 }
 0x7c8   :  { %v3764_v5 = vadd.f32 %v3756_v37, %v3724_v4  ;;  %v9729_v37 = vld [vmem:[#allocation91_spill] sm:$0xff]  ;;  %v3876_v4 = vmul.f32 %v3872_v16, %v9730_v38 }
 0x7c9   :  { %v3896_v7 = vpop.permute.xlu0 %3895  ;;  %4512 = vrot.lane.b32.xlu1 %v7999_v28, %s4938_s16  ;;  %v3871_v28 = vsel %vm1880_vm10, %v3856_v23, %v8218_v26  ;;  %v3765_v24 = vadd.f32 %v3757_v12, %v3725_v34  ;;  %v3837_v50 = vmul.f32 %v3831_v1, %v9729_v37  ;;  %v9732_v1 = vld [vmem:[#allocation100_spill] sm:$0xff] }
 0x7ca   :  { %v3912_v56 = vsel %vm1953_vm11, %v8250_v11, %v3896_v7  ;;  %v3804_v18 = vadd.f32 %v3796_v32, %v3764_v5  ;;  %v3877_v21 = vmul.f32 %v3871_v28, %v9731_v41 }
 0x7cb   :  { %v8273_v49 = vpop.permute.xlu1 %3897  ;;  %4550 = vrot.lane.b32.xlu0 %v8012_v58, %s4939_s17  ;;  %v3805_v23 = vadd.f32 %v3797_v9, %v3765_v24  ;;  %v3916_v34 = vmul.f32 %v3912_v56, %v9591_v55 }
 0x7cc   :  { %v3911_v58 = vsel %vm1953_vm11, %v3896_v7, %v8273_v49  ;;  %v3844_v31 = vadd.f32 %v3836_v15, %v3804_v18 }
 0x7cd   :  { %v8285_v14 = vpop.permute.xlu0 %3931  ;;  %4548 = vrot.lane.b32.xlu1 %v8007_v44, %s4939_s17  ;;  %v3845_v12 = vadd.f32 %v3837_v50, %v3805_v23  ;;  %v3917_v16 = vmul.f32 %v3911_v58, %v9732_v1 }
 0x7ce   :  { %v3884_v32 = vadd.f32 %v3876_v4, %v3844_v31 }
 0x7cf   :  { %v8294_v5 = vpop.permute.xlu1 %3933  ;;  %4554 = vrot.lane.b32.xlu0 %v8014_v40, %s4939_s17  ;;  %v3885_v9 = vadd.f32 %v3877_v21, %v3845_v12  ;;  %v9733_v12 = vld [vmem:[#allocation107_spill] sm:$0xff] }
 0x7d0   :  { %v3924_v15 = vadd.f32 %v3916_v34, %v3884_v32 }
 0x7d1   :  { %v3936_v44 = vpop.permute.xlu0 %3935  ;;  %4552 = vrot.lane.b32.xlu1 %v8009_v27, %s4939_s17  ;;  %v3925_v31 = vadd.f32 %v3917_v16, %v3885_v9  ;;  %v9736_v9 = vld [vmem:[#allocation68_spill] sm:$0xff] }
 0x7d2   :  { %v3952_v7 = vsel %vm2026_vm12, %v8294_v5, %v3936_v44 }
 0x7d3   :  { %v3956_v28 = vmul.f32 %v3952_v7, %v9596_v29  ;;  %v8305_v56 = vpop.permute.xlu1 %3937  ;;  %4590 = vrot.lane.b32.xlu0 %v8023_v62, %s4933_s28  ;;  %v9766_v29 = vld [vmem:[#allocation110_spill] sm:$0xff] }
 0x7d4   :  { %v3951_v40 = vsel %vm2026_vm12, %v3936_v44, %v8305_v56 }
 0x7d5   :  { %v3964_v24 = vadd.f32 %v3956_v28, %v3924_v15  ;;  %v3957_v27 = vmul.f32 %v3951_v40, %v9598_v30  ;;  %v8313_v18 = vpop.permute.xlu0 %3659  ;;  %4588 = vrot.lane.b32.xlu1 %v8017_v8, %s4933_s28  ;;  %v9738_v28 = vld [vmem:[#allocation9_spill] sm:$0xff]  ;;  %v9739_v40 = vld [vmem:[#allocation76_spill] sm:$0xff] }
 0x7d7   :  { %v3977_v21 = vadd.f32 %v8025_v45, %v3964_v24  ;;  %v3965_v50 = vadd.f32 %v3957_v27, %v3925_v31  ;;  %v8318_v4 = vpop.permute.xlu1 %3661  ;;  %4594 = vrot.lane.b32.xlu0 %v8027_v52, %s4933_s28  ;;  %v9740_v24 = vld [vmem:[#allocation44_spill] sm:$0xff] }
 0x7d8   :  { %v3059_v27 = vadd.f32 %v9740_v24, %v8033_v35  ;;  %v9746_v24 = vld [vmem:[#allocation58_spill] sm:$0xff] }
 0x7d9   :  { %4677 = vst [vmem:[%s9096_s14 + $0x8] sm:$0xff] %v3977_v21  ;;  %v3978_v62 = vadd.f32 %v8025_v45, %v3965_v50  ;;  %v8326_v58 = vpop.permute.xlu0 %3663  ;;  %4592 = vrot.lane.b32.xlu1 %v8019_v46, %s4933_s28  ;;  %v9741_v50 = vld [vmem:[#allocation117_spill] sm:$0xff] }
 0x7db   :  { %4678 = vst [vmem:[%s9096_s14 + $0x10] sm:$0xff] %v3978_v62  ;;  %v8333_v8 = vpop.permute.xlu1 %3665  ;;  %4630 = vrot.lane.b32.xlu0 %v8039_v59, %s4940_s18 }
 0x7dd   :  { %v8337_v52 = vpop.permute.xlu0 %3699  ;;  %4628 = vrot.lane.b32.xlu1 %v8031_v42, %s4940_s18 }
 0x7df   :  { %v8341_v23 = vpop.permute.xlu1 %3701  ;;  %4634 = vrot.lane.b32.xlu0 %v8041_v3, %s4940_s18 }
 0x7e1   :  { %v8345_v46 = vpop.permute.xlu0 %3703  ;;  %4632 = vrot.lane.b32.xlu1 %v8035_v13, %s4940_s18  ;;  %v3674_v13 = vsel %vm1515_vm5, %v8333_v8, %v8043_v0 }
 0x7e2   :  { %v3675_v0 = vmul.f32 %v3674_v13, %v9733_v12  ;;  %v9747_v12 = vld [vmem:[#allocation53_spill] sm:$0xff] }
 0x7e3   :  { %v8349_v34 = vpop.permute.xlu1 %3705  ;;  %4358 = vrot.lane.b32.xlu0 %v8063_v39, %s4935_s8  ;;  %v3649_v30 = vadd.f32 %v9747_v12, %v3059_v27  ;;  %v3670_v27 = vsel %vm1515_vm5, %v8059_v57, %v8313_v18 }
 0x7e5   :  { %v8353_v59 = vpop.permute.xlu0 %3739  ;;  %4356 = vrot.lane.b32.xlu1 %v8055_v54, %s4935_s8  ;;  %v3714_v54 = vsel %vm1588_vm6, %v8349_v34, %v8067_v33 }
 0x7e7   :  { %v8357_v42 = vpop.permute.xlu1 %3741  ;;  %4362 = vrot.lane.b32.xlu0 %v8065_v43, %s4935_s8  ;;  %v2936_v43 = vadd.f32 %v7616_v60, %v8033_v35  ;;  %v3711_v60 = vsel %vm1588_vm6, %v8083_v20, %v8091_v47  ;;  %v3751_v20 = vsel %vm1661_vm7, %v8115_v10, %v8123_v22  ;;  %v9748_v10 = vld [vmem:[#allocation45_spill] sm:$0xff] }
 0x7e9   :  { %v8361_v3 = vpop.permute.xlu0 %3743  ;;  %4360 = vrot.lane.b32.xlu1 %v8057_v61, %s4935_s8  ;;  %v3671_v61 = vsel %vm1515_vm5, %v8051_v53, %v8059_v57  ;;  %v9735_v53 = vld [vmem:[#allocation112_spill] sm:$0xff]  ;;  %v3669_v57 = vsel %vm1515_vm5, %v8313_v18, %v8318_v4  ;;  %v9759_v18 = vld [vmem:[#allocation137_spill] sm:$0xff] }
 0x7ea   :  { %v3715_v44 = vmul.f32 %v3714_v54, %v9735_v53  ;;  %v3678_v31 = vmul.f32 %v3671_v61, %v9739_v40  ;;  %v9742_v54 = vld [vmem:[#allocation67_spill] sm:$0xff] }
 0x7eb   :  { %v8369_v39 = vpop.permute.xlu1 %3745  ;;  %4398 = vrot.lane.b32.xlu0 %v8079_v48, %s4931_s0  ;;  %v9734_v48 = vld [vmem:[#allocation51_spill] sm:$0xff] }
 0x7ec   :  { %v3754_v33 = vsel %vm1661_vm7, %v8369_v39, %v8099_v36  ;;  %v3643_v16 = vadd.f32 %v9734_v48, %v2936_v43  ;;  %v3018_v36 = vadd.f32 %v9738_v28, %v8033_v35  ;;  %v9743_v43 = vld [vmem:[#allocation54_spill] sm:$0xff]  ;;  %v9744_v61 = vld [vmem:[#allocation55_spill] sm:$0xff] }
 0x7ed   :  { %v8384_v32 = vpop.permute.xlu0 %3779  ;;  %4396 = vrot.lane.b32.xlu1 %v8071_v51, %s4931_s0  ;;  %v9737_v51 = vld [vmem:[#allocation43_spill] sm:$0xff]  ;;  %v3755_v62 = vmul.f32 %v3754_v33, %v9741_v50 }
 0x7ee   :  { %v2979_v15 = vadd.f32 %v9737_v51, %v8033_v35  ;;  %v3683_v21 = vadd.f32 %v3675_v0, %v3643_v16  ;;  %v9745_v51 = vld [vmem:[#allocation81_spill] sm:$0xff]  ;;  %v3647_v53 = vadd.f32 %v9746_v24, %v3018_v36  ;;  %v3061_v0 = vadd.f32 %v9748_v10, %v8033_v35  ;;  %v9749_v50 = vld [vmem:[#allocation71_spill] sm:$0xff] }
 0x7ef   :  { %v8398_v7 = vpop.permute.xlu1 %3781  ;;  %4402 = vrot.lane.b32.xlu0 %v9736_v9, %s4931_s0  ;;  %v3020_v9 = vadd.f32 %v9744_v61, %v8033_v35  ;;  %v3718_v28 = vmul.f32 %v3711_v60, %v9745_v51  ;;  %v9751_v61 = vld [vmem:[#allocation20_spill] sm:$0xff]  ;;  %v9752_v36 = vld [vmem:[#allocation63_spill] sm:$0xff] }
 0x7f0   :  { %v3646_v48 = vadd.f32 %v9743_v43, %v2979_v15  ;;  %v3723_v33 = vadd.f32 %v3715_v44, %v3683_v21  ;;  %v9750_v15 = vld [vmem:[#allocation85_spill] sm:$0xff]  ;;  %v3833_v60 = vsel %vm1807_vm9, %v9751_v61, %v8169_v17  ;;  %v9753_v21 = vld [vmem:[#allocation124_spill] sm:$0xff]  ;;  %v9755_v17 = vld [vmem:[#allocation70_spill] sm:$0xff] }
 0x7f1   :  { %v8414_v13 = vpop.permute.xlu0 %3783  ;;  %4400 = vrot.lane.b32.xlu1 %v9742_v54, %s4931_s0  ;;  %v3758_v43 = vmul.f32 %v3751_v20, %v9750_v15  ;;  %v3648_v44 = vadd.f32 %v9752_v36, %v3020_v9  ;;  %v3650_v24 = vadd.f32 %v9755_v17, %v3061_v0 }
 0x7f2   :  { %v3686_v54 = vadd.f32 %v3678_v31, %v3646_v48  ;;  %v3763_v31 = vadd.f32 %v3755_v62, %v3723_v33  ;;  %v9754_v48 = vld [vmem:[#allocation12_spill] sm:$0xff]  ;;  %v9757_v62 = vld [vmem:[#allocation94_spill] sm:$0xff] }
 0x7f3   :  { %v8426_v16 = vpop.permute.xlu1 %3785  ;;  %4438 = vrot.lane.b32.xlu0 %v9749_v50, %s4936_s27  ;;  %v3835_v33 = vmul.f32 %v3833_v60, %v9757_v62  ;;  %v9760_v60 = vld [vmem:[#allocation83_spill] sm:$0xff]  ;;  %v9762_v62 = vld [vmem:[#allocation105_spill] sm:$0xff] }
 0x7f4   :  { %v3794_v12 = vsel %vm1734_vm8, %v8426_v16, %v8131_v6  ;;  %v3726_v10 = vadd.f32 %v3718_v28, %v3686_v54  ;;  %v9756_v6 = vld [vmem:[#allocation33_spill] sm:$0xff]  ;;  %v3667_v28 = vsel %vm1515_vm5, %v8326_v58, %v8333_v8  ;;  %v9763_v8 = vld [vmem:[#allocation95_spill] sm:$0xff] }
 0x7f5   :  { %v3795_v20 = vmul.f32 %v3794_v12, %v9753_v21  ;;  %v8445_v50 = vpop.permute.xlu0 %3819  ;;  %4436 = vrot.lane.b32.xlu1 %v9754_v48, %s4936_s27  ;;  %v3873_v9 = vsel %vm1880_vm10, %v9756_v6, %v8197_v2  ;;  %v3668_v12 = vsel %vm1515_vm5, %v8318_v4, %v8326_v58  ;;  %v9758_v2 = vld [vmem:[#allocation74_spill] sm:$0xff]  ;;  %v3791_v48 = vsel %vm1734_vm8, %v9760_v60, %v9759_v18  ;;  %v9761_v4 = vld [vmem:[#allocation25_spill] sm:$0xff] }
 0x7f6   :  { %v8471_v36 = vadd.f32 %v3758_v43, %v3726_v10  ;;  %v3913_v17 = vsel %vm1953_vm11, %v9761_v4, %v8250_v11  ;;  %v3679_v58 = vmul.f32 %v3670_v27, %v9762_v62  ;;  %v3953_v43 = vsel %vm2026_vm12, %v8285_v14, %v8294_v5  ;;  %v9765_v60 = vld [vmem:[#allocation69_spill] sm:$0xff]  ;;  %v9767_v11 = vld [vmem:[#allocation108_spill] sm:$0xff] }
 0x7f7   :  { %v3803_v0 = vadd.f32 %v3795_v20, %v3763_v31  ;;  %v8467_v54 = vpop.permute.xlu1 %3821  ;;  %4442 = vrot.lane.b32.xlu0 %v9758_v2, %s4936_s27  ;;  %v3875_v31 = vmul.f32 %v3873_v9, %v9763_v8  ;;  %v9764_v20 = vld [vmem:[#allocation109_spill] sm:$0xff]  ;;  %v3681_v1 = vmul.f32 %v3668_v12, %v9766_v29  ;;  %v3682_v55 = vmul.f32 %v3667_v28, %v9767_v11  ;;  %v9768_v9 = vld [vmem:[#allocation90_spill] sm:$0xff]  ;;  %v9770_v11 = vld [vmem:[#allocation75_spill] sm:$0xff] }
 0x7f8   :  { %v3680_v10 = vmul.f32 %v3669_v57, %v9764_v20  ;;  %v3710_v27 = vsel %vm1588_vm6, %v8091_v47, %v8337_v52  ;;  %v3709_v5 = vsel %vm1588_vm6, %v8337_v52, %v8341_v23  ;;  %v3798_v57 = vmul.f32 %v3791_v48, %v9768_v9  ;;  %v9771_v47 = vld [vmem:[#allocation101_spill] sm:$0xff] }
 0x7f9   :  { %v3843_v2 = vadd.f32 %v3835_v33, %v3803_v0  ;;  %v8488_v21 = vpop.permute.xlu0 %3823  ;;  %4440 = vrot.lane.b32.xlu1 %v9765_v60, %s4936_s27  ;;  %v9769_v33 = vld [vmem:[#allocation98_spill] sm:$0xff]  ;;  %v3708_v12 = vsel %vm1588_vm6, %v8341_v23, %v8345_v46  ;;  %v3955_v29 = vmul.f32 %v3953_v43, %v9771_v47  ;;  %v3687_v20 = vadd.f32 %v3679_v58, %v3647_v53  ;;  %v9772_v23 = vld [vmem:[#allocation111_spill] sm:$0xff] }
 0x7fa   :  { %v3915_v0 = vmul.f32 %v3913_v17, %v9769_v33  ;;  %v3707_v52 = vsel %vm1588_vm6, %v8345_v46, %v8349_v34  ;;  %v3750_v48 = vsel %vm1661_vm7, %v8123_v22, %v8353_v59  ;;  %v3719_v17 = vmul.f32 %v3710_v27, %v9772_v23  ;;  %v9775_v33 = vld [vmem:[#allocation116_spill] sm:$0xff]  ;;  %v9776_v22 = vld [vmem:[#allocation113_spill] sm:$0xff]  ;;  %v9777_v27 = vld [vmem:[#allocation114_spill] sm:$0xff] }
 0x7fb   :  { %v3883_v28 = vadd.f32 %v3875_v31, %v3843_v2  ;;  %v8508_v60 = vpop.permute.xlu1 %3825  ;;  %4478 = vrot.lane.b32.xlu0 %v9770_v11, %s4937_s15  ;;  %v9773_v31 = vld [vmem:[#allocation115_spill] sm:$0xff]  ;;  %v3749_v43 = vsel %vm1661_vm7, %v8353_v59, %v8357_v42  ;;  %v9774_v11 = vld [vmem:[#allocation66_spill] sm:$0xff]  ;;  %v3688_v46 = vadd.f32 %v3680_v10, %v3648_v44  ;;  %v3689_v34 = vadd.f32 %v3681_v1, %v3649_v30 }
 0x7fc   :  { %v3720_v2 = vmul.f32 %v3709_v5, %v9773_v31  ;;  %v3690_v47 = vadd.f32 %v3682_v55, %v3650_v24  ;;  %v3721_v8 = vmul.f32 %v3708_v12, %v9775_v33  ;;  %v3722_v62 = vmul.f32 %v3707_v52, %v9776_v22 }
 0x7fd   :  { %v3923_v53 = vadd.f32 %v3915_v0, %v3883_v28  ;;  %v3860_v58 = vpop.permute.xlu0 %3859  ;;  %4476 = vrot.lane.b32.xlu1 %v9774_v11, %s4937_s15  ;;  %v3759_v23 = vmul.f32 %v3750_v48, %v9777_v27  ;;  %v3748_v5 = vsel %vm1661_vm7, %v8357_v42, %v8361_v3  ;;  %v9778_v28 = vld [vmem:[#allocation102_spill] sm:$0xff]  ;;  %v9779_v11 = vld [vmem:[#allocation121_spill] sm:$0xff]  ;;  %v3747_v55 = vsel %vm1661_vm7, %v8361_v3, %v8369_v39 }
 0x7fe   :  { %v3760_v44 = vmul.f32 %v3749_v43, %v9779_v11  ;;  %v3790_v30 = vsel %vm1734_vm8, %v9759_v18, %v8384_v32  ;;  %v3727_v1 = vadd.f32 %v3719_v17, %v3687_v20  ;;  %v3728_v42 = vadd.f32 %v3720_v2, %v3688_v46  ;;  %v9780_v39 = vld [vmem:[#allocation73_spill] sm:$0xff]  ;;  %v9781_v18 = vld [vmem:[#allocation122_spill] sm:$0xff]  ;;  %v9783_v17 = vld [vmem:[#allocation123_spill] sm:$0xff] }
 0x7ff   :  { %v3963_v59 = vadd.f32 %v3955_v29, %v3923_v53  ;;  %v3862_v0 = vpop.permute.xlu1 %3861  ;;  %4482 = vrot.lane.b32.xlu0 %v9778_v28, %s4937_s15  ;;  %v3789_v29 = vsel %vm1734_vm8, %v8384_v32, %v8398_v7  ;;  %v3788_v24 = vsel %vm1734_vm8, %v8398_v7, %v8414_v13  ;;  %v3729_v12 = vadd.f32 %v3721_v8, %v3689_v34  ;;  %v9782_v7 = vld [vmem:[#allocation118_spill] sm:$0xff]  ;;  %v9785_v8 = vld [vmem:[#allocation135_spill] sm:$0xff]  ;;  %v9787_v28 = vld [vmem:[#allocation125_spill] sm:$0xff] }
 0x800   :  { %v3761_v52 = vmul.f32 %v3748_v5, %v9781_v18  ;;  %v3787_v32 = vsel %vm1734_vm8, %v8414_v13, %v8426_v16  ;;  %v3830_v20 = vsel %vm1807_vm9, %v8183_v19, %v8445_v50  ;;  %v3762_v48 = vmul.f32 %v3747_v55, %v9782_v7  ;;  %v9784_v43 = vld [vmem:[#allocation126_spill] sm:$0xff]  ;;  %v9786_v5 = vld [vmem:[#allocation127_spill] sm:$0xff] }
 0x801   :  { %v3976_v10 = vadd.f32 %v8025_v45, %v3963_v59  ;;  %v3864_v3 = vpop.permute.xlu0 %3863  ;;  %4480 = vrot.lane.b32.xlu1 %v9780_v39, %s4937_s15  ;;  %v3799_v2 = vmul.f32 %v3790_v30, %v9783_v17  ;;  %v3800_v53 = vmul.f32 %v3789_v29, %v9784_v43  ;;  %v3829_v13 = vsel %vm1807_vm9, %v8445_v50, %v8467_v54  ;;  %v9788_v30 = vld [vmem:[#allocation129_spill] sm:$0xff] }
 0x802   :  { %v3730_v19 = vadd.f32 %v3722_v62, %v3690_v47  ;;  %v3767_v46 = vadd.f32 %v3759_v23, %v3727_v1  ;;  %v3768_v34 = vadd.f32 %v3760_v44, %v3728_v42  ;;  %v3801_v59 = vmul.f32 %v3788_v24, %v9786_v5  ;;  %v9789_v62 = vld [vmem:[#allocation103_spill] sm:$0xff]  ;;  %v9790_v44 = vld [vmem:[#allocation130_spill] sm:$0xff] }
 0x803   :  { %4676 = vst [vmem:[%s9096_s14] sm:$0xff] %v3976_v10  ;;  %v3866_v16 = vpop.permute.xlu1 %3865  ;;  %4518 = vrot.lane.b32.xlu0 %v9785_v8, %s4938_s16  ;;  %v3802_v55 = vmul.f32 %v3787_v32, %v9787_v28  ;;  %v3838_v29 = vmul.f32 %v3830_v20, %v9788_v30  ;;  %v3828_v10 = vsel %vm1807_vm9, %v8467_v54, %v8488_v21  ;;  %v9792_v8 = vld [vmem:[#allocation128_spill] sm:$0xff] }
 0x804   :  { %v3870_v50 = vsel %vm1880_vm10, %v8218_v26, %v3860_v58  ;;  %v3806_v47 = vadd.f32 %v3798_v57, %v8471_v36  ;;  %v3769_v23 = vadd.f32 %v3761_v52, %v3729_v12  ;;  %v3839_v1 = vmul.f32 %v3829_v13, %v9790_v44  ;;  %v9791_v26 = vld [vmem:[#allocation120_spill] sm:$0xff] }
 0x805   :  { %v3900_v39 = vpop.permute.xlu0 %3899  ;;  %4516 = vrot.lane.b32.xlu1 %v9789_v62, %s4938_s16  ;;  %v3770_v42 = vadd.f32 %v3762_v48, %v3730_v19  ;;  %v3807_v24 = vadd.f32 %v3799_v2, %v3767_v46  ;;  %v3808_v32 = vadd.f32 %v3800_v53, %v3768_v34  ;;  %v3827_v54 = vsel %vm1807_vm9, %v8488_v21, %v8508_v60  ;;  %v9793_v62 = vld [vmem:[#allocation16_spill] sm:$0xff]  ;;  %v9795_v19 = vld [vmem:[#allocation131_spill] sm:$0xff] }
 0x806   :  { %v3840_v5 = vmul.f32 %v3828_v10, %v9792_v8  ;;  %v3878_v28 = vmul.f32 %v3870_v50, %v9793_v62  ;;  %v3869_v36 = vsel %vm1880_vm10, %v3860_v58, %v3862_v0  ;;  %v3910_v57 = vsel %vm1953_vm11, %v8273_v49, %v3900_v39  ;;  %v9794_v53 = vld [vmem:[#allocation84_spill] sm:$0xff]  ;;  %v9796_v34 = vld [vmem:[#allocation27_spill] sm:$0xff] }
 0x807   :  { %v3902_v20 = vpop.permute.xlu1 %3901  ;;  %4522 = vrot.lane.b32.xlu0 %v9791_v26, %s4938_s16  ;;  %v3809_v12 = vadd.f32 %v3801_v59, %v3769_v23  ;;  %v3810_v52 = vadd.f32 %v3802_v55, %v3770_v42  ;;  %v3846_v48 = vadd.f32 %v3838_v29, %v3806_v47  ;;  %v3834_v21 = vsel %vm1807_vm9, %v8508_v60, %v9751_v61  ;;  %v9797_v60 = vld [vmem:[#allocation133_spill] sm:$0xff]  ;;  %v9798_v50 = vld [vmem:[#allocation136_spill] sm:$0xff]  ;;  %v9800_v42 = vld [vmem:[#allocation26_spill] sm:$0xff] }
 0x808   :  { %v3847_v13 = vadd.f32 %v3839_v1, %v3807_v24  ;;  %v3841_v46 = vmul.f32 %v3827_v54, %v9795_v19  ;;  %v3868_v58 = vsel %vm1880_vm10, %v3862_v0, %v3864_v3  ;;  %v3909_v49 = vsel %vm1953_vm11, %v3900_v39, %v3902_v20  ;;  %v9799_v0 = vld [vmem:[#allocation132_spill] sm:$0xff]  ;;  %v9830_v19 = vld [vmem:[#allocation57_spill] sm:$0xff] }
 0x809   :  { %v3904_v2 = vpop.permute.xlu0 %3903  ;;  %4520 = vrot.lane.b32.xlu1 %v9794_v53, %s4938_s16  ;;  %v3879_v59 = vmul.f32 %v3869_v36, %v9796_v34  ;;  %v3867_v55 = vsel %vm1880_vm10, %v3864_v3, %v3866_v16  ;;  %v3874_v61 = vsel %vm1880_vm10, %v3866_v16, %v9756_v6  ;;  %v3918_v29 = vmul.f32 %v3910_v57, %v9797_v60  ;;  %v9801_v3 = vld [vmem:[#allocation4_spill] sm:$0xff]  ;;  %v9804_v57 = vld [vmem:[#allocation19_spill] sm:$0xff] }
 0x80a   :  { %v3848_v47 = vadd.f32 %v3840_v5, %v3808_v32  ;;  %v3842_v23 = vmul.f32 %v3834_v21, %v9799_v0  ;;  %v3886_v1 = vadd.f32 %v3878_v28, %v3846_v48  ;;  %v3908_v39 = vsel %vm1953_vm11, %v3902_v20, %v3904_v2  ;;  %v9802_v5 = vld [vmem:[#allocation14_spill] sm:$0xff] }
 0x80b   :  { %v3906_v10 = vpop.permute.xlu1 %3905  ;;  %4558 = vrot.lane.b32.xlu0 %v9798_v50, %s4939_s17  ;;  %v3880_v24 = vmul.f32 %v3868_v58, %v9800_v42  ;;  %v3919_v54 = vmul.f32 %v3909_v49, %v9801_v3  ;;  %v3849_v32 = vadd.f32 %v3841_v46, %v3809_v12  ;;  %v9803_v28 = vld [vmem:[#allocation18_spill] sm:$0xff]  ;;  %v3882_v20 = vmul.f32 %v3874_v61, %v9804_v57  ;;  %v9806_v49 = vld [vmem:[#allocation5_spill] sm:$0xff]  ;;  %v9831_v3 = vld [vmem:[#allocation79_spill] sm:$0xff] }
 0x80c   :  { %v3907_v6 = vsel %vm1953_vm11, %v3904_v2, %v3906_v10  ;;  %v3914_v16 = vsel %vm1953_vm11, %v3906_v10, %v9761_v4  ;;  %v3881_v36 = vmul.f32 %v3867_v55, %v9803_v28  ;;  %v3887_v21 = vadd.f32 %v3879_v59, %v3847_v13  ;;  %v9805_v2 = vld [vmem:[#allocation32_spill] sm:$0xff]  ;;  %v9807_v10 = vld [vmem:[#allocation29_spill] sm:$0xff]  ;;  %v9809_v55 = vld [vmem:[#allocation30_spill] sm:$0xff] }
 0x80d   :  { %v3940_v26 = vpop.permute.xlu0 %3939  ;;  %4556 = vrot.lane.b32.xlu1 %v9802_v5, %s4939_s17  ;;  %v3926_v53 = vadd.f32 %v3918_v29, %v3886_v1  ;;  %v3920_v58 = vmul.f32 %v3908_v39, %v9805_v2  ;;  %v3850_v5 = vadd.f32 %v3842_v23, %v3810_v52  ;;  %v9808_v12 = vld [vmem:[#allocation21_spill] sm:$0xff]  ;;  %v3922_v28 = vmul.f32 %v3914_v16, %v9809_v55  ;;  %v9811_v39 = vld [vmem:[#allocation119_spill] sm:$0xff] }
 0x80e   :  { %v3950_v48 = vsel %vm2026_vm12, %v8305_v56, %v3940_v26  ;;  %v3921_v46 = vmul.f32 %v3907_v6, %v9808_v12  ;;  %v3888_v42 = vadd.f32 %v3880_v24, %v3848_v47  ;;  %v3927_v56 = vadd.f32 %v3919_v54, %v3887_v21  ;;  %v9810_v59 = vld [vmem:[#allocation17_spill] sm:$0xff] }
 0x80f   :  { %v3958_v50 = vmul.f32 %v3950_v48, %v9806_v49  ;;  %v3942_v4 = vpop.permute.xlu1 %3941  ;;  %4562 = vrot.lane.b32.xlu0 %v9807_v10, %s4939_s17  ;;  %v3889_v48 = vadd.f32 %v3881_v36, %v3849_v32  ;;  %v3890_v49 = vadd.f32 %v3882_v20, %v3850_v5  ;;  %v9812_v10 = vld [vmem:[#allocation82_spill] sm:$0xff]  ;;  %v9813_v24 = vld [vmem:[#allocation37_spill] sm:$0xff]  ;;  %v9814_v20 = vld [vmem:[#allocation8_spill] sm:$0xff] }
 0x810   :  { %v3949_v61 = vsel %vm2026_vm12, %v3940_v26, %v3942_v4  ;;  %v3928_v23 = vadd.f32 %v3920_v58, %v3888_v42 }
 0x811   :  { %v3966_v13 = vadd.f32 %v3958_v50, %v3926_v53  ;;  %v3959_v29 = vmul.f32 %v3949_v61, %v9810_v59  ;;  %v3944_v1 = vpop.permute.xlu0 %3943  ;;  %4560 = vrot.lane.b32.xlu1 %v9811_v39, %s4939_s17  ;;  %v3929_v54 = vadd.f32 %v3921_v46, %v3889_v48  ;;  %v3930_v21 = vadd.f32 %v3922_v28, %v3890_v49  ;;  %v9815_v50 = vld [vmem:[#allocation40_spill] sm:$0xff]  ;;  %v9816_v28 = vld [vmem:[#allocation11_spill] sm:$0xff]  ;;  %v9828_v59 = vld [vmem:[#allocation78_spill] sm:$0xff] }
 0x812   :  { %v3948_v52 = vsel %vm2026_vm12, %v3942_v4, %v3944_v1  ;;  %v9818_v39 = vld [vmem:[#allocation31_spill] sm:$0xff] }
 0x813   :  { %v3979_v6 = vadd.f32 %v8025_v45, %v3966_v13  ;;  %v3967_v16 = vadd.f32 %v3959_v29, %v3927_v56  ;;  %v3960_v26 = vmul.f32 %v3948_v52, %v9812_v10  ;;  %v3946_v47 = vpop.permute.xlu1 %3945  ;;  %4598 = vrot.lane.b32.xlu0 %v9813_v24, %s4933_s28  ;;  %v9817_v56 = vld [vmem:[#allocation28_spill] sm:$0xff]  ;;  %v9819_v48 = vld [vmem:[#allocation59_spill] sm:$0xff] }
 0x814   :  { %v3947_v53 = vsel %vm2026_vm12, %v3944_v1, %v3946_v47  ;;  %v3954_v32 = vsel %vm2026_vm12, %v3946_v47, %v8285_v14  ;;  %v3151_v52 = vadd.f32 %v9819_v48, %v8033_v35 }
 0x815   :  { %4679 = vst [vmem:[%s9096_s14 + $0x18] sm:$0xff] %v3979_v6  ;;  %v3980_v42 = vadd.f32 %v8025_v45, %v3967_v16  ;;  %v3968_v36 = vadd.f32 %v3960_v26, %v3928_v23  ;;  %v3961_v58 = vmul.f32 %v3947_v53, %v9814_v20  ;;  %v3962_v4 = vmul.f32 %v3954_v32, %v9815_v50  ;;  %v4351_v5 = vpop.permute.xlu0 %4350  ;;  %v9820_v6 = vld [vmem:[#allocation34_spill] sm:$0xff]  ;;  %v9821_v26 = vld [vmem:[#allocation65_spill] sm:$0xff]  ;;  %v9826_v20 = vld [vmem:[#allocation7_spill] sm:$0xff] }
 0x816   :  { %4596 = vrot.lane.b32.xlu1 %v9816_v28, %s4933_s28  ;;  %v4343_v47 = vadd.f32 %v9821_v26, %v3151_v52  ;;  %v3110_v10 = vadd.f32 %v9826_v20, %v8033_v35  ;;  %v9827_v50 = vld [vmem:[#allocation77_spill] sm:$0xff]  ;;  %v9832_v20 = vld [vmem:[#allocation80_spill] sm:$0xff] }
 0x817   :  { %4680 = vst [vmem:[%s9096_s14 + $0x20] sm:$0xff] %v3980_v42  ;;  %v3981_v14 = vadd.f32 %v8025_v45, %v3968_v36  ;;  %v3969_v49 = vadd.f32 %v3961_v58, %v3929_v54  ;;  %v3970_v46 = vadd.f32 %v3962_v4, %v3930_v21  ;;  %v8677_v61 = vpop.permute.xlu1 %4348  ;;  %4602 = vrot.lane.b32.xlu0 %v9817_v56, %s4933_s28  ;;  %v9822_v21 = vld [vmem:[#allocation22_spill] sm:$0xff]  ;;  %v9823_v42 = vld [vmem:[#allocation52_spill] sm:$0xff]  ;;  %v9824_v58 = vld [vmem:[#allocation93_spill] sm:$0xff] }
 0x819   :  { %4681 = vst [vmem:[%s9096_s14 + $0x28] sm:$0xff] %v3981_v14  ;;  %v3982_v13 = vadd.f32 %v8025_v45, %v3969_v49  ;;  %v3983_v29 = vadd.f32 %v8025_v45, %v3970_v46  ;;  %v8686_v1 = vpop.permute.xlu0 %4354 }
 0x81a   :  { %4600 = vrot.lane.b32.xlu1 %v9818_v39, %s4933_s28 }
 0x81b   :  { %4682 = vst [vmem:[%s9096_s14 + $0x30] sm:$0xff] %v3982_v13  ;;  %4683 = vst [vmem:[%s9096_s14 + $0x38] sm:$0xff] %v3983_v29  ;;  %v4353_v23 = vpop.permute.xlu1 %4352  ;;  %4638 = vrot.lane.b32.xlu0 %v9820_v6, %s4940_s18 }
 0x81c   :  { %v4368_v16 = vsel %vm1515_vm5, %v4353_v23, %v8686_v1 }
 0x81d   :  { %v4375_v24 = vmul.f32 %v4368_v16, %v9739_v40  ;;  %v4391_v54 = vpop.permute.xlu0 %4390 }
 0x81e   :  { %4636 = vrot.lane.b32.xlu1 %v9822_v21, %s4940_s18 }
 0x81f   :  { %v4383_v53 = vadd.f32 %v4375_v24, %v4343_v47  ;;  %v8707_v32 = vpop.permute.xlu1 %4388  ;;  %4642 = vrot.lane.b32.xlu0 %v9823_v42, %s4940_s18 }
 0x821   :  { %v8711_v36 = vpop.permute.xlu0 %4394 }
 0x822   :  { %4640 = vrot.lane.b32.xlu1 %v9824_v58, %s4940_s18 }
 0x823   :  { %v4393_v4 = vpop.permute.xlu1 %4392 }
 0x824   :  { %v4408_v40 = vsel %vm1588_vm6, %v4393_v4, %v8711_v36 }
 0x825   :  { %v4415_v28 = vmul.f32 %v4408_v40, %v9745_v51  ;;  %v4431_v14 = vpop.permute.xlu0 %4430 }
 0x827   :  { %v4423_v49 = vadd.f32 %v4415_v28, %v4383_v53  ;;  %v8719_v46 = vpop.permute.xlu1 %4428 }
 0x829   :  { %v8721_v56 = vpop.permute.xlu0 %4434 }
 0x82b   :  { %v4433_v13 = vpop.permute.xlu1 %4432 }
 0x82c   :  { %v4448_v29 = vsel %vm1661_vm7, %v4433_v13, %v8721_v56 }
 0x82d   :  { %v4455_v39 = vmul.f32 %v4448_v29, %v9750_v15  ;;  %v4471_v48 = vpop.permute.xlu0 %4470 }
 0x82f   :  { %v4463_v52 = vadd.f32 %v4455_v39, %v4423_v49  ;;  %v8727_v6 = vpop.permute.xlu1 %4468  ;;  %v4370_v49 = vsel %vm1515_vm5, %v8677_v61, %v4351_v5  ;;  %v4410_v39 = vsel %vm1588_vm6, %v8707_v32, %v4391_v54 }
 0x830   :  { %v4373_v12 = vmul.f32 %v4370_v49, %v9827_v50  ;;  %v4413_v57 = vmul.f32 %v4410_v39, %v9831_v3 }
 0x831   :  { %v8729_v16 = vpop.permute.xlu0 %4474 }
 0x833   :  { %v4473_v51 = vpop.permute.xlu1 %4472 }
 0x834   :  { %v4488_v26 = vsel %vm1734_vm8, %v4473_v51, %v8729_v16  ;;  %v4489_v49 = vsel %vm1734_vm8, %v4471_v48, %v4473_v51 }
 0x835   :  { %v4495_v47 = vmul.f32 %v4488_v26, %v9768_v9  ;;  %v8735_v24 = vpop.permute.xlu0 %4510  ;;  %v4369_v9 = vsel %vm1515_vm5, %v4351_v5, %v4353_v23  ;;  %v9825_v26 = vld [vmem:[#allocation47_spill] sm:$0xff]  ;;  %v4450_v5 = vsel %vm1661_vm7, %v8719_v46, %v4431_v14  ;;  %v4449_v23 = vsel %vm1661_vm7, %v4431_v14, %v4433_v13  ;;  %v9833_v14 = vld [vmem:[#allocation86_spill] sm:$0xff] }
 0x836   :  { %v4374_v2 = vmul.f32 %v4369_v9, %v9828_v59  ;;  %v4490_v59 = vsel %vm1734_vm8, %v8727_v6, %v4471_v48  ;;  %v4453_v13 = vmul.f32 %v4450_v5, %v9833_v14 }
 0x837   :  { %v8737_v21 = vadd.f32 %v4495_v47, %v4463_v52  ;;  %v8739_v53 = vpop.permute.xlu1 %4508  ;;  %v4409_v52 = vsel %vm1588_vm6, %v4391_v54, %v4393_v4  ;;  %v3149_v47 = vadd.f32 %v9825_v26, %v8033_v35  ;;  %v9829_v54 = vld [vmem:[#allocation62_spill] sm:$0xff]  ;;  %v4341_v26 = vadd.f32 %v9830_v19, %v3110_v10 }
 0x838   :  { %v4414_v34 = vmul.f32 %v4409_v52, %v9832_v20 }
 0x839   :  { %v8741_v15 = vpop.permute.xlu0 %4514  ;;  %v4342_v4 = vadd.f32 %v9829_v54, %v3149_v47  ;;  %v4381_v9 = vadd.f32 %v4373_v12, %v4341_v26  ;;  %v4454_v47 = vmul.f32 %v4449_v23, %v9725_v63  ;;  %v9834_v54 = vld [vmem:[#allocation88_spill] sm:$0xff]  ;;  %v9835_v12 = vld [vmem:[#allocation89_spill] sm:$0xff] }
 0x83a   :  { %v4493_v48 = vmul.f32 %v4490_v59, %v9834_v54  ;;  %v9836_v26 = vld [vmem:[#allocation92_spill] sm:$0xff] }
 0x83b   :  { %v4513_v42 = vpop.permute.xlu1 %4512  ;;  %v4382_v8 = vadd.f32 %v4374_v2, %v4342_v4  ;;  %v4421_v39 = vadd.f32 %v4413_v57, %v4381_v9  ;;  %v4494_v2 = vmul.f32 %v4489_v49, %v9835_v12 }
 0x83c   :  { %v4528_v3 = vsel %vm1807_vm9, %v4513_v42, %v8741_v15  ;;  %v4529_v10 = vsel %vm1807_vm9, %v8735_v24, %v4513_v42 }
 0x83d   :  { %v8743_v58 = vpop.permute.xlu0 %4550  ;;  %v4422_v52 = vadd.f32 %v4414_v34, %v4382_v8  ;;  %v4461_v23 = vadd.f32 %v4453_v13, %v4421_v39  ;;  %v4533_v20 = vmul.f32 %v4529_v10, %v9836_v26  ;;  %v4534_v57 = vmul.f32 %v4528_v3, %v9729_v37  ;;  %v9838_v10 = vld [vmem:[#allocation100_spill] sm:$0xff] }
 0x83f   :  { %v8745_v40 = vpop.permute.xlu1 %4548  ;;  %v4462_v4 = vadd.f32 %v4454_v47, %v4422_v52  ;;  %v4501_v59 = vadd.f32 %v4493_v48, %v4461_v23  ;;  %v9837_v47 = vld [vmem:[#allocation99_spill] sm:$0xff] }
 0x841   :  { %v8747_v28 = vpop.permute.xlu0 %4554  ;;  %v4502_v49 = vadd.f32 %v4494_v2, %v4462_v4  ;;  %v4541_v13 = vadd.f32 %v4533_v20, %v4501_v59  ;;  %v9841_v20 = vld [vmem:[#allocation48_spill] sm:$0xff] }
 0x843   :  { %v4553_v29 = vpop.permute.xlu1 %4552  ;;  %v4542_v37 = vadd.f32 %v4534_v57, %v4502_v49  ;;  %v3190_v57 = vadd.f32 %v9841_v20, %v8033_v35 }
 0x844   :  { %v4568_v63 = vsel %vm1880_vm10, %v4553_v29, %v8747_v28  ;;  %v4569_v5 = vsel %vm1880_vm10, %v8743_v58, %v4553_v29 }
 0x845   :  { %v8765_v55 = vpop.permute.xlu0 %4590  ;;  %v4573_v29 = vmul.f32 %v4569_v5, %v9730_v38  ;;  %v4574_v9 = vmul.f32 %v4568_v63, %v9731_v41  ;;  %v9840_v5 = vld [vmem:[#allocation106_spill] sm:$0xff] }
 0x847   :  { %v8776_v50 = vpop.permute.xlu1 %4588  ;;  %v4581_v54 = vadd.f32 %v4573_v29, %v4541_v13  ;;  %v4582_v12 = vadd.f32 %v4574_v9, %v4542_v37  ;;  %v9842_v29 = vld [vmem:[#allocation64_spill] sm:$0xff] }
 0x848   :  { %v4344_v9 = vadd.f32 %v9842_v29, %v3190_v57  ;;  %v9846_v29 = vld [vmem:[#allocation107_spill] sm:$0xff] }
 0x849   :  { %v8785_v19 = vpop.permute.xlu0 %4594 }
 0x84b   :  { %v4593_v51 = vpop.permute.xlu1 %4592 }
 0x84c   :  { %v4608_v34 = vsel %vm1953_vm11, %v4593_v51, %v8785_v19  ;;  %v4609_v42 = vsel %vm1953_vm11, %v8765_v55, %v4593_v51  ;;  %v9839_v51 = vld [vmem:[#allocation104_spill] sm:$0xff] }
 0x84d   :  { %v8803_v8 = vpop.permute.xlu0 %4630  ;;  %v4613_v3 = vmul.f32 %v4609_v42, %v9837_v47  ;;  %v4614_v39 = vmul.f32 %v4608_v34, %v9838_v10  ;;  %v9843_v47 = vld [vmem:[#allocation105_spill] sm:$0xff] }
 0x84f   :  { %v8813_v14 = vpop.permute.xlu1 %4628  ;;  %v4621_v38 = vadd.f32 %v4613_v3, %v4581_v54  ;;  %v4622_v2 = vadd.f32 %v4614_v39, %v4582_v12 }
 0x851   :  { %v8817_v52 = vpop.permute.xlu0 %4634 }
 0x853   :  { %v4633_v26 = vpop.permute.xlu1 %4632 }
 0x854   :  { %v4648_v48 = vsel %vm2026_vm12, %v4633_v26, %v8817_v52  ;;  %v4649_v41 = vsel %vm2026_vm12, %v8803_v8, %v4633_v26 }
 0x855   :  { %v4653_v63 = vmul.f32 %v4649_v41, %v9839_v51  ;;  %v4654_v23 = vmul.f32 %v4648_v48, %v9840_v5  ;;  %v8827_v4 = vpop.permute.xlu0 %4358  ;;  %v9844_v48 = vld [vmem:[#allocation111_spill] sm:$0xff] }
 0x857   :  { %v4661_v34 = vadd.f32 %v4653_v63, %v4621_v38  ;;  %v4662_v42 = vadd.f32 %v4654_v23, %v4622_v2  ;;  %v8831_v59 = vpop.permute.xlu1 %4356 }
 0x858   :  { %v4367_v49 = vsel %vm1515_vm5, %v8686_v1, %v8831_v59 }
 0x859   :  { %v4669_v13 = vadd.f32 %v4661_v34, %v8025_v45  ;;  %v4670_v37 = vadd.f32 %v4662_v42, %v8025_v45  ;;  %v4376_v3 = vmul.f32 %v4367_v49, %v9843_v47  ;;  %v4363_v10 = vpop.permute.xlu0 %4362  ;;  %v9845_v42 = vld [vmem:[#allocation10_spill] sm:$0xff]  ;;  %v9848_v47 = vld [vmem:[#allocation112_spill] sm:$0xff] }
 0x85a   :  { %v4371_v23 = vsel %vm1515_vm5, %v4363_v10, %v8677_v61  ;;  %v3108_v49 = vadd.f32 %v9845_v42, %v8033_v35 }
 0x85b   :  { %4685 = vst [vmem:[%s9096_s14 + $0x48] sm:$0xff] %v4669_v13  ;;  %4686 = vst [vmem:[%s9096_s14 + $0x50] sm:$0xff] %v4670_v37  ;;  %v4384_v39 = vadd.f32 %v4376_v3, %v4344_v9  ;;  %v4361_v54 = vpop.permute.xlu1 %4360  ;;  %v4372_v9 = vmul.f32 %v4371_v23, %v9846_v29  ;;  %v9850_v29 = vld [vmem:[#allocation124_spill] sm:$0xff] }
 0x85d   :  { %v8847_v1 = vpop.permute.xlu0 %4398 }
 0x85f   :  { %v4397_v12 = vpop.permute.xlu1 %4396 }
 0x860   :  { %v4407_v26 = vsel %vm1588_vm6, %v8711_v36, %v4397_v12 }
 0x861   :  { %v4416_v41 = vmul.f32 %v4407_v26, %v9844_v48  ;;  %v4403_v38 = vpop.permute.xlu0 %4402  ;;  %v9849_v26 = vld [vmem:[#allocation117_spill] sm:$0xff] }
 0x862   :  { %v4411_v34 = vsel %vm1588_vm6, %v4403_v38, %v8707_v32 }
 0x863   :  { %v4424_v2 = vadd.f32 %v4416_v41, %v4384_v39  ;;  %v4401_v51 = vpop.permute.xlu1 %4400  ;;  %v4412_v3 = vmul.f32 %v4411_v34, %v9848_v47 }
 0x865   :  { %v8853_v63 = vpop.permute.xlu0 %4438 }
 0x867   :  { %v8855_v5 = vpop.permute.xlu1 %4436 }
 0x868   :  { %v4447_v20 = vsel %vm1661_vm7, %v8721_v56, %v8855_v5 }
 0x869   :  { %v4456_v36 = vmul.f32 %v4447_v20, %v9777_v27  ;;  %v8865_v57 = vpop.permute.xlu0 %4442  ;;  %v9847_v27 = vld [vmem:[#allocation60_spill] sm:$0xff] }
 0x86a   :  { %v4451_v56 = vsel %vm1661_vm7, %v8865_v57, %v8719_v46  ;;  %v4340_v37 = vadd.f32 %v9847_v27, %v3108_v49 }
 0x86b   :  { %v4464_v13 = vadd.f32 %v4456_v36, %v4424_v2  ;;  %v8873_v61 = vpop.permute.xlu1 %4440  ;;  %v4452_v48 = vmul.f32 %v4451_v56, %v9849_v26  ;;  %v4530_v36 = vsel %vm1807_vm9, %v8739_v53, %v8735_v24  ;;  %v4650_v26 = vsel %vm2026_vm12, %v8813_v14, %v8803_v8 }
 0x86c   :  { %v4380_v32 = vadd.f32 %v4372_v9, %v4340_v37 }
 0x86d   :  { %v8881_v39 = vpop.permute.xlu0 %4478 }
 0x86e   :  { %v4420_v23 = vadd.f32 %v4412_v3, %v4380_v32 }
 0x86f   :  { %v8884_v41 = vpop.permute.xlu1 %4476 }
 0x870   :  { %v4487_v2 = vsel %vm1734_vm8, %v8729_v16, %v8884_v41  ;;  %v4460_v42 = vadd.f32 %v4452_v48, %v4420_v23  ;;  %v9851_v16 = vld [vmem:[#allocation94_spill] sm:$0xff] }
 0x871   :  { %v4496_v20 = vmul.f32 %v4487_v2, %v9783_v17  ;;  %v4483_v46 = vpop.permute.xlu0 %4482  ;;  %v4570_v17 = vsel %vm1880_vm10, %v8745_v40, %v8743_v58  ;;  %v4532_v27 = vmul.f32 %v4530_v36, %v9851_v16  ;;  %v9853_v48 = vld [vmem:[#allocation98_spill] sm:$0xff]  ;;  %v4364_v16 = vsel %vm1515_vm5, %v4361_v54, %v4363_v10 }
 0x872   :  { %v4491_v34 = vsel %vm1734_vm8, %v4483_v46, %v8727_v6  ;;  %v4610_v6 = vsel %vm1953_vm11, %v8776_v50, %v8765_v55  ;;  %v9854_v55 = vld [vmem:[#allocation101_spill] sm:$0xff] }
 0x873   :  { %v8898_v49 = vadd.f32 %v4496_v20, %v4464_v13  ;;  %v4492_v9 = vmul.f32 %v4491_v34, %v9850_v29  ;;  %v8901_v56 = vpop.permute.xlu1 %4480  ;;  %v9852_v13 = vld [vmem:[#allocation95_spill] sm:$0xff]  ;;  %v4612_v2 = vmul.f32 %v4610_v6, %v9853_v48  ;;  %v4652_v34 = vmul.f32 %v4650_v26, %v9854_v55  ;;  %v9861_v55 = vld [vmem:[#allocation108_spill] sm:$0xff] }
 0x874   :  { %v4572_v47 = vmul.f32 %v4570_v17, %v9852_v13  ;;  %v9855_v17 = vld [vmem:[#allocation50_spill] sm:$0xff]  ;;  %v9857_v13 = vld [vmem:[#allocation72_spill] sm:$0xff]  ;;  %v4404_v48 = vsel %vm1588_vm6, %v4401_v51, %v4403_v38 }
 0x875   :  { %v4500_v37 = vadd.f32 %v4492_v9, %v4460_v42  ;;  %v8908_v24 = vpop.permute.xlu0 %4518  ;;  %v3231_v8 = vadd.f32 %v9855_v17, %v8033_v35  ;;  %v9863_v17 = vld [vmem:[#allocation13_spill] sm:$0xff] }
 0x877   :  { %v4540_v3 = vadd.f32 %v4532_v27, %v4500_v37  ;;  %v4517_v32 = vpop.permute.xlu1 %4516 }
 0x878   :  { %v4527_v58 = vsel %vm1807_vm9, %v8741_v15, %v4517_v32  ;;  %v4366_v15 = vsel %vm1515_vm5, %v8831_v59, %v8827_v4  ;;  %v4406_v59 = vsel %vm1588_vm6, %v4397_v12, %v8847_v1  ;;  %v4446_v12 = vsel %vm1661_vm7, %v8855_v5, %v8853_v63 }
 0x879   :  { %v4580_v23 = vadd.f32 %v4572_v47, %v4540_v3  ;;  %v4535_v20 = vmul.f32 %v4527_v58, %v9788_v30  ;;  %v8924_v36 = vpop.permute.xlu0 %4522  ;;  %v4365_v30 = vsel %vm1515_vm5, %v8827_v4, %v4361_v54  ;;  %v4346_v47 = vadd.f32 %v9857_v13, %v3231_v8  ;;  %v9858_v3 = vld [vmem:[#allocation46_spill] sm:$0xff]  ;;  %v9859_v58 = vld [vmem:[#allocation109_spill] sm:$0xff] }
 0x87a   :  { %v3233_v26 = vadd.f32 %v9858_v3, %v8033_v35  ;;  %v4377_v10 = vmul.f32 %v4366_v15, %v9859_v58  ;;  %v4405_v4 = vsel %vm1588_vm6, %v8847_v1, %v4401_v51  ;;  %v4417_v51 = vmul.f32 %v4406_v59, %v9773_v31  ;;  %v9864_v59 = vld [vmem:[#allocation125_spill] sm:$0xff] }
 0x87b   :  { %v4620_v42 = vadd.f32 %v4612_v2, %v4580_v23  ;;  %v4543_v29 = vadd.f32 %v4535_v20, %v8737_v21  ;;  %v4521_v9 = vpop.permute.xlu1 %4520  ;;  %v9856_v21 = vld [vmem:[#allocation49_spill] sm:$0xff]  ;;  %v9860_v23 = vld [vmem:[#allocation110_spill] sm:$0xff]  ;;  %v4419_v5 = vmul.f32 %v4404_v48, %v9776_v22  ;;  %v4445_v31 = vsel %vm1661_vm7, %v8853_v63, %v8873_v61 }
 0x87c   :  { %v3192_v6 = vadd.f32 %v9856_v21, %v8033_v35  ;;  %v4378_v20 = vmul.f32 %v4365_v30, %v9860_v23  ;;  %v4379_v35 = vmul.f32 %v4364_v16, %v9861_v55  ;;  %v4347_v1 = vadd.f32 %v9863_v17, %v3233_v26 }
 0x87d   :  { %v4660_v27 = vadd.f32 %v4652_v34, %v4620_v42  ;;  %v4559_v37 = vpop.permute.xlu0 %4558  ;;  %v9862_v34 = vld [vmem:[#allocation134_spill] sm:$0xff]  ;;  %v4418_v16 = vmul.f32 %v4405_v4, %v9775_v33  ;;  %v4486_v33 = vsel %vm1734_vm8, %v8884_v41, %v8881_v39  ;;  %v4484_v22 = vsel %vm1734_vm8, %v8901_v56, %v4483_v46  ;;  %v9865_v4 = vld [vmem:[#allocation127_spill] sm:$0xff] }
 0x87e   :  { %v4345_v42 = vadd.f32 %v9862_v34, %v3192_v6  ;;  %v4386_v6 = vadd.f32 %v4378_v20, %v4346_v47  ;;  %v4387_v13 = vadd.f32 %v4379_v35, %v4347_v1  ;;  %v4458_v3 = vmul.f32 %v4445_v31, %v9781_v18  ;;  %v9866_v20 = vld [vmem:[#allocation128_spill] sm:$0xff]  ;;  %v9867_v35 = vld [vmem:[#allocation27_spill] sm:$0xff] }
 0x87f   :  { %v4668_v54 = vadd.f32 %v4660_v27, %v8025_v45  ;;  %v4557_v2 = vpop.permute.xlu1 %4556  ;;  %v4457_v27 = vmul.f32 %v4446_v12, %v9779_v11  ;;  %v4526_v11 = vsel %vm1807_vm9, %v4517_v32, %v8908_v24  ;;  %v4485_v41 = vsel %vm1734_vm8, %v8881_v39, %v8901_v56  ;;  %v9870_v31 = vld [vmem:[#allocation131_spill] sm:$0xff] }
 0x880   :  { %v4567_v38 = vsel %vm1880_vm10, %v8747_v28, %v4557_v2  ;;  %v4444_v28 = vsel %vm1661_vm7, %v8873_v61, %v8865_v57  ;;  %v4385_v30 = vadd.f32 %v4377_v10, %v4345_v42  ;;  %v4427_v47 = vadd.f32 %v4419_v5, %v4387_v13 }
 0x881   :  { %4684 = vst [vmem:[%s9096_s14 + $0x40] sm:$0xff] %v4668_v54  ;;  %v4575_v8 = vmul.f32 %v4567_v38, %v9793_v62  ;;  %v4563_v15 = vpop.permute.xlu0 %4562  ;;  %v4459_v63 = vmul.f32 %v4444_v28, %v9782_v7  ;;  %v4497_v46 = vmul.f32 %v4486_v33, %v9784_v43  ;;  %v4499_v58 = vmul.f32 %v4484_v22, %v9864_v59 }
 0x882   :  { %v4425_v57 = vadd.f32 %v4417_v51, %v4385_v30  ;;  %v4531_v18 = vsel %vm1807_vm9, %v8924_v36, %v8739_v53  ;;  %v4536_v32 = vmul.f32 %v4526_v11, %v9790_v44  ;;  %v4525_v10 = vsel %vm1807_vm9, %v8908_v24, %v4521_v9  ;;  %v9869_v51 = vld [vmem:[#allocation4_spill] sm:$0xff] }
 0x883   :  { %v4583_v21 = vadd.f32 %v4575_v8, %v4543_v29  ;;  %v4561_v62 = vpop.permute.xlu1 %4560  ;;  %v4426_v29 = vadd.f32 %v4418_v16, %v4386_v6  ;;  %v4566_v39 = vsel %vm1880_vm10, %v4557_v2, %v4559_v37  ;;  %v4467_v48 = vadd.f32 %v4459_v63, %v4427_v47  ;;  %v9875_v47 = vld [vmem:[#allocation5_spill] sm:$0xff] }
 0x884   :  { %v4465_v26 = vadd.f32 %v4457_v27, %v4425_v57  ;;  %v4498_v54 = vmul.f32 %v4485_v41, %v9865_v4  ;;  %v4539_v44 = vmul.f32 %v4531_v18, %v9799_v0  ;;  %v4524_v24 = vsel %vm1807_vm9, %v4521_v9, %v8924_v36  ;;  %v9868_v9 = vld [vmem:[#allocation19_spill] sm:$0xff]  ;;  %v9874_v57 = vld [vmem:[#allocation32_spill] sm:$0xff] }
 0x885   :  { %v4599_v61 = vpop.permute.xlu0 %4598  ;;  %v4466_v56 = vadd.f32 %v4458_v3, %v4426_v29  ;;  %v4571_v2 = vsel %vm1880_vm10, %v4563_v15, %v8745_v40  ;;  %v4537_v55 = vmul.f32 %v4525_v10, %v9866_v20  ;;  %v4576_v12 = vmul.f32 %v4566_v39, %v9867_v35  ;;  %v9880_v35 = vld [vmem:[#allocation8_spill] sm:$0xff] }
 0x886   :  { %v4505_v34 = vadd.f32 %v4497_v46, %v4465_v26  ;;  %v4507_v42 = vadd.f32 %v4499_v58, %v4467_v48  ;;  %v4544_v36 = vadd.f32 %v4536_v32, %v8898_v49  ;;  %v4579_v17 = vmul.f32 %v4571_v2, %v9868_v9  ;;  %v9871_v49 = vld [vmem:[#allocation26_spill] sm:$0xff]  ;;  %v9876_v26 = vld [vmem:[#allocation17_spill] sm:$0xff]  ;;  %v9878_v48 = vld [vmem:[#allocation40_spill] sm:$0xff] }
 0x887   :  { %v4564_v1 = vsel %vm1880_vm10, %v4561_v62, %v4563_v15  ;;  %v4506_v5 = vadd.f32 %v4498_v54, %v4466_v56  ;;  %v4538_v30 = vmul.f32 %v4524_v24, %v9870_v31 }
 0x888   :  { %v4597_v7 = vpop.permute.xlu1 %4596  ;;  %v4547_v28 = vadd.f32 %v4539_v44, %v4507_v42  ;;  %v4584_v6 = vadd.f32 %v4576_v12, %v4544_v36 }
 0x889   :  { %v4607_v43 = vsel %vm1953_vm11, %v8785_v19, %v4597_v7  ;;  %v4603_v23 = vpop.permute.xlu0 %4602  ;;  %v4606_v19 = vsel %vm1953_vm11, %v4597_v7, %v4599_v61  ;;  %v4546_v58 = vadd.f32 %v4538_v30, %v4506_v5  ;;  %v9877_v7 = vld [vmem:[#allocation21_spill] sm:$0xff] }
 0x88a   :  { %v4615_v53 = vmul.f32 %v4607_v43, %v9797_v60  ;;  %v4565_v60 = vsel %vm1880_vm10, %v4559_v37, %v4561_v62  ;;  %v4611_v40 = vsel %vm1953_vm11, %v4603_v23, %v8776_v50  ;;  %v4616_v8 = vmul.f32 %v4606_v19, %v9869_v51  ;;  %v9872_v50 = vld [vmem:[#allocation30_spill] sm:$0xff] }
 0x88b   :  { %v4577_v27 = vmul.f32 %v4565_v60, %v9871_v49  ;;  %v4619_v13 = vmul.f32 %v4611_v40, %v9872_v50  ;;  %v9873_v62 = vld [vmem:[#allocation18_spill] sm:$0xff] }
 0x88c   :  { %v4623_v38 = vadd.f32 %v4615_v53, %v4583_v21  ;;  %v4601_v0 = vpop.permute.xlu1 %4600  ;;  %v4545_v21 = vadd.f32 %v4537_v55, %v4505_v34  ;;  %v4578_v22 = vmul.f32 %v4564_v1, %v9873_v62  ;;  %v4624_v29 = vadd.f32 %v4616_v8, %v4584_v6 }
 0x88d   :  { %v4605_v37 = vsel %vm1953_vm11, %v4599_v61, %v4601_v0  ;;  %v4639_v16 = vpop.permute.xlu0 %4638  ;;  %v4604_v33 = vsel %vm1953_vm11, %v4601_v0, %v4603_v23  ;;  %v4587_v61 = vadd.f32 %v4579_v17, %v4547_v28 }
 0x88e   :  { %v4617_v3 = vmul.f32 %v4605_v37, %v9874_v57  ;;  %v4585_v18 = vadd.f32 %v4577_v27, %v4545_v21  ;;  %v4618_v32 = vmul.f32 %v4604_v33, %v9877_v7  ;;  %v4586_v54 = vadd.f32 %v4578_v22, %v4546_v58 }
 0x88f   :  { %v4627_v39 = vadd.f32 %v4619_v13, %v4587_v61 }
 0x890   :  { %v4637_v15 = vpop.permute.xlu1 %4636  ;;  %v4625_v53 = vadd.f32 %v4617_v3, %v4585_v18  ;;  %v4626_v55 = vadd.f32 %v4618_v32, %v4586_v54 }
 0x891   :  { %v4646_v63 = vsel %vm2026_vm12, %v4637_v15, %v4639_v16  ;;  %v4647_v11 = vsel %vm2026_vm12, %v8817_v52, %v4637_v15  ;;  %v4643_v59 = vpop.permute.xlu0 %4642 }
 0x892   :  { %v4655_v41 = vmul.f32 %v4647_v11, %v9875_v47  ;;  %v4656_v46 = vmul.f32 %v4646_v63, %v9876_v26  ;;  %v4651_v10 = vsel %vm2026_vm12, %v4643_v59, %v8813_v14  ;;  %v9879_v14 = vld [vmem:[#allocation82_spill] sm:$0xff] }
 0x893   :  { %v4659_v52 = vmul.f32 %v4651_v10, %v9878_v48 }
 0x894   :  { %v4663_v43 = vadd.f32 %v4655_v41, %v4623_v38  ;;  %v4664_v56 = vadd.f32 %v4656_v46, %v4624_v29  ;;  %v4641_v4 = vpop.permute.xlu1 %4640 }
 0x895   :  { %v4644_v23 = vsel %vm2026_vm12, %v4641_v4, %v4643_v59  ;;  %v4645_v44 = vsel %vm2026_vm12, %v4639_v16, %v4641_v4  ;;  %v4667_v19 = vadd.f32 %v4659_v52, %v4627_v39 }
 0x896   :  { %v4671_v24 = vadd.f32 %v4663_v43, %v8025_v45  ;;  %v4672_v2 = vadd.f32 %v4664_v56, %v8025_v45  ;;  %v4657_v20 = vmul.f32 %v4645_v44, %v9879_v14  ;;  %v4658_v12 = vmul.f32 %v4644_v23, %v9880_v35 }
 0x897   :  { %v4675_v25 = vadd.f32 %v4667_v19, %v8025_v45 }
 0x898   :  { %4687 = vst [vmem:[%s9096_s14 + $0x58] sm:$0xff] %v4671_v24  ;;  %4688 = vst [vmem:[%s9096_s14 + $0x60] sm:$0xff] %v4672_v2  ;;  %v4665_v60 = vadd.f32 %v4657_v20, %v4625_v53  ;;  %v4666_v38 = vadd.f32 %v4658_v12, %v4626_v55 }
 0x899   :  { %4691 = vst [vmem:[%s9096_s14 + $0x78] sm:$0xff] %v4675_v25 }
 0x89a   :  { %v4673_v0 = vadd.f32 %v4665_v60, %v8025_v45  ;;  %v4674_v34 = vadd.f32 %v4666_v38, %v8025_v45 }
 0x89c   :  { %4689 = vst [vmem:[%s9096_s14 + $0x68] sm:$0xff] %v4673_v0  ;;  %4690 = vst [vmem:[%s9096_s14 + $0x70] sm:$0xff] %v4674_v34 }

</bundles_post_ra>
